<compile_context>
chip_gen: v7x
topology: tpu7x:2x2x1
jax: 0.10.0
libtpu: 0.0.40
codegen_flags: <defaults>
</compile_context>

<pallas_src>
import functools

import jax
import jax.numpy as jnp
from jax.experimental import pallas as pl
from jax.experimental.pallas import tpu as pltpu

_EPS = 1e-5  # PyTorch nn.LayerNorm default eps.

# PyTorch concat order [x0..x7] as (h_parity, w_parity, t_parity):
#   x0:(0,0,0) x1:(1,0,0) x2:(0,1,0) x3:(0,0,1) x4:(1,1,0) x5:(0,1,1) x6:(1,0,1) x7:(1,1,1)
# The kernels produce features in "natural" order k = h*4 + w*2 + t; natural block k holds
# PyTorch block _TORCH_BLOCK[k].
_TORCH_BLOCK = (0, 3, 2, 5, 1, 6, 4, 7)

_MAX_TILE_ROWS = 2048  # mem-bound sweet spot; bytes budget is the binding constraint


def _round_up(x, m):
    return ((x + m - 1) // m) * m


@functools.lru_cache(maxsize=1)
def _vmem_budget_bytes():
    """Scoped-VMEM request: ~75% of physical VMEM (leave headroom for Mosaic scratch).

    v7x has only 64 MiB per TensorCore -> ~48 MiB; v5e/v6e have 128 MiB -> capped at 96 MiB.
    """
    try:
        cap = int(pltpu.get_tpu_info().vmem_capacity_bytes)
    except Exception:  # interpret mode / older jax: assume 128 MiB parts
        cap = 128 * 1024 * 1024
    return max(16 * 1024 * 1024, min(cap * 3 // 4, 96 * 1024 * 1024))


def _default_tile_byte_budget():
    # ~6 MiB input tiles on v7x, ~12 MiB on v5e/v6e.
    return max(2 * 1024 * 1024, _vmem_budget_bytes() // 8)


def _prepare_params(params, C, matmul_dtype=jnp.bfloat16):
    """Permute params to natural (h,w,t,c) feature order and fold the LN affine."""
    gamma = params["norm_weight"].astype(jnp.float32)          # (8C,)  torch order
    beta = params["norm_bias"].astype(jnp.float32)             # (8C,)
    w_t = params["reduction_weight"].T.astype(jnp.float32)     # (8C, Cout), torch rows
    cout = w_t.shape[1]

    # torch row index for each natural row
    idx = jnp.concatenate(
        [jnp.arange(C, dtype=jnp.int32) + tb * C for tb in _TORCH_BLOCK]
    )
    w_fold_f32 = gamma[idx][:, None] * w_t[idx, :]               # (8C, Cout), gamma folded
    w_fold = w_fold_f32.astype(matmul_dtype)                     # natural row order
    colsum = jnp.sum(w_fold_f32, axis=0).reshape(1, cout)        # (1, Cout), f32
    bias = (beta @ w_t).reshape(1, cout).astype(jnp.float32)     # (1, Cout), beta folded
    return w_fold, colsum, bias, cout


# ----------------------------------------------------------------------------- fused path
def _fused_kernel(x_ref, w_ref, cs_ref, b_ref, o_ref, *, rows, c2):
    """Gather 8 neighbours from VMEM, single-pass LN stats, one K=8C bf16 MXU matmul.

    x_ref : (bh, 2, wt, 2, T2, 2C)  raw input slab (parity dims un-gathered)
    w_ref : (8C, Cout)              gamma-folded weight, natural row order (bf16)
    cs_ref: (1, Cout)               column sums of the folded weight (f32)
    b_ref : (1, Cout)               beta @ W (f32)
    o_ref : (bh, wt*T2, Cout)       rows = bh * wt * T2
    """
    total = None
    ssq = None
    mm_pieces = []
    for hp in range(2):
        for wp in range(2):
            p = x_ref[:, hp, :, wp, :, :]                       # (bh, wt, T2, 2C)
            pf = p.astype(jnp.float32).reshape(rows, c2)        # free: T2 % 8 == 0
            s = jnp.sum(pf, axis=-1, keepdims=True)
            q = jnp.sum(pf * pf, axis=-1, keepdims=True)
            total = s if total is None else total + s
            ssq = q if ssq is None else ssq + q
            mm_pieces.append(pf.astype(w_ref.dtype))            # bf16 staging piece
    inv_n = 1.0 / (4 * c2)
    mean = total * inv_n
    var = ssq * inv_n - mean * mean                             # f32 sufficient statistics
    inv_std = jax.lax.rsqrt(var + _EPS)

    # Lane-concat to a single (rows, 8C) bf16 slab -> one full-depth MXU matmul.
    slab = jnp.concatenate(mm_pieces, axis=-1)
    acc = jnp.dot(slab, w_ref[...], preferred_element_type=jnp.float32)
    out = (acc - mean * cs_ref[...]) * inv_std + b_ref[...]
    o_ref[...] = out.reshape(o_ref.shape).astype(o_ref.dtype)


def _forward_fused(x, B, H2, W2, T2, C, w_fold, colsum, bias, cout, out_dtype,
                   tile_bytes):
    c2 = 2 * C
    itemsize = x.dtype.itemsize
    row_bytes = 8 * C * itemsize            # one merged output row's worth of input
    plane_rows = W2 * T2

    # Tile selection: prefer bh whole (W2, T2) planes; otherwise tile the W2 axis.
    if plane_rows <= _MAX_TILE_ROWS and plane_rows * row_bytes <= tile_bytes:
        wt = W2
        bh = 1
        # If B == 1, keep >= 2 h-tiles so both v7x TensorCores get work.
        bh_cap = H2 if (B > 1 or H2 < 2) else max(1, H2 // 2)
        for d in range(1, H2 + 1):
            if H2 % d or d > bh_cap:
                continue
            r = d * plane_rows
            if r <= _MAX_TILE_ROWS and r * row_bytes <= tile_bytes:
                bh = d
    else:
        bh = 1
        wt = 1
        for d in range(1, W2 + 1):
            if W2 % d:
                continue
            r = d * T2
            if r <= _MAX_TILE_ROWS and r * row_bytes <= tile_bytes:
                wt = d

    rows = bh * wt * T2
    n_h = H2 // bh
    n_w = W2 // wt
    n_rows_total = B * H2 * W2 * T2

    # Free reshape: (B, H*W*T, C) -> (B, H2, 2, W2, 2, T2, 2C); t-parity folds into lanes.
    x7 = x.reshape(B, H2, 2, W2, 2, T2, c2)

    kernel = functools.partial(_fused_kernel, rows=rows, c2=c2)
    out3d = pl.pallas_call(
        kernel,
        out_shape=jax.ShapeDtypeStruct((B * H2, W2 * T2, cout), out_dtype),
        grid=(B, n_h, n_w),
        in_specs=[
            pl.BlockSpec((None, bh, 2, wt, 2, T2, c2),
                         lambda b, hi, wi: (b, hi, 0, wi, 0, 0, 0)),
            pl.BlockSpec((8 * C, cout), lambda b, hi, wi: (0, 0)),
            pl.BlockSpec((1, cout), lambda b, hi, wi: (0, 0)),
            pl.BlockSpec((1, cout), lambda b, hi, wi: (0, 0)),
        ],
        # NOTE: for Cout < 128 this writeback is lane-masked (vst.msk); acceptable for the
        # small test shapes, full-lane for production channel counts.
        out_specs=pl.BlockSpec((bh, wt * T2, cout),
                               lambda b, hi, wi: (b * n_h + hi, wi, 0)),
        compiler_params=pltpu.CompilerParams(
            dimension_semantics=("parallel", "parallel", "parallel"),
            vmem_limit_bytes=_vmem_budget_bytes(),
        ),
        cost_estimate=pl.CostEstimate(
            flops=2 * n_rows_total * 8 * C * cout,
            transcendentals=n_rows_total,
            bytes_accessed=int(x.size) * itemsize
            + n_rows_total * cout * jnp.dtype(out_dtype).itemsize
            + int(w_fold.size) * w_fold.dtype.itemsize,
        ),
    )(x7, w_fold, colsum, bias)
    return out3d.reshape(B, H2 * W2 * T2, cout)


# -------------------------------------------------------------------------- fallback path
def _rowtile_kernel(x_ref, w_ref, cs_ref, b_ref, o_ref):
    """Single-pass LayerNorm(8C) + one bf16 matmul on a merged (tile_rows, 8C) slab."""
    x = x_ref[...].astype(jnp.float32)
    inv_n = 1.0 / x.shape[-1]
    mean = jnp.sum(x, axis=-1, keepdims=True) * inv_n
    var = jnp.sum(x * x, axis=-1, keepdims=True) * inv_n - mean * mean
    inv_std = jax.lax.rsqrt(var + _EPS)
    acc = jnp.dot(x.astype(w_ref.dtype), w_ref[...], preferred_element_type=jnp.float32)
    o_ref[...] = ((acc - mean * cs_ref[...]) * inv_std + b_ref[...]).astype(o_ref.dtype)


def _forward_rowtile(x, B, H2, W2, T2, C, w_fold, colsum, bias, cout, out_dtype,
                     tile_bytes):
    c8 = 8 * C
    itemsize = x.dtype.itemsize
    # Single HBM transpose builds the merged tensor in natural feature order (params are
    # already permuted to match), instead of 8 strided slices + concat.
    x8 = x.reshape(B, H2, 2, W2, 2, T2, 2, C)
    xm = jnp.transpose(x8, (0, 1, 3, 5, 2, 4, 6, 7)).reshape(B * H2 * W2 * T2, c8)

    n = xm.shape[0]
    tile = _MAX_TILE_ROWS
    while tile > 8 and tile * c8 * itemsize > tile_bytes:
        tile //= 2
    tile = min(tile, _round_up(n, 8))         # tile stays a multiple of 8
    grid0 = pl.cdiv(n, tile)                  # ragged last block: no full-array pad

    out = pl.pallas_call(
        _rowtile_kernel,
        out_shape=jax.ShapeDtypeStruct((n, cout), out_dtype),
        grid=(grid0,),
        in_specs=[
            pl.BlockSpec((tile, c8), lambda i: (i, 0)),
            pl.BlockSpec((c8, cout), lambda i: (0, 0)),
            pl.BlockSpec((1, cout), lambda i: (0, 0)),
            pl.BlockSpec((1, cout), lambda i: (0, 0)),
        ],
        out_specs=pl.BlockSpec((tile, cout), lambda i: (i, 0)),
        compiler_params=pltpu.CompilerParams(
            dimension_semantics=("parallel",),
            vmem_limit_bytes=_vmem_budget_bytes(),
        ),
        cost_estimate=pl.CostEstimate(
            flops=2 * n * c8 * cout,
            transcendentals=n,
            bytes_accessed=n * c8 * itemsize
            + n * cout * jnp.dtype(out_dtype).itemsize
            + int(w_fold.size) * w_fold.dtype.itemsize,
        ),
    )(xm, w_fold, colsum, bias)
    return out.reshape(B, n // B, cout)


# --------------------------------------------------------------------------------- public
def patch_merging_forward(x, H, W, T, params, *, reduce_factor=2,
                          matmul_dtype=jnp.bfloat16, out_dtype=None,
                          tile_byte_budget=None):
    """Forward pass matching PyTorch PatchMerging.

    x: (B, L, C) with L == H*W*T; H, W, T even.
    params: 'norm_weight' (8C,), 'norm_bias' (8C,), 'reduction_weight' (Cout, 8C).
    out_dtype: output dtype (default x.dtype; pass jnp.bfloat16 to halve output HBM bytes).
    returns: (B, L//8, Cout) with Cout = 8 // reduce_factor * C.
    """
    B, L, C = x.shape
    assert L == H * W * T, "input feature has wrong size"
    assert H % 2 == 0 and W % 2 == 0 and T % 2 == 0, f"x size ({H}*{W}*{T}) are not even."
    # TODO(synk): the PyTorch padding branch for odd H/W/T is unreachable given the
    # asserts above, so it is not implemented.
    H2, W2, T2 = H // 2, W // 2, T // 2
    out_dtype = x.dtype if out_dtype is None else out_dtype
    tile_bytes = _default_tile_byte_budget() if tile_byte_budget is None else tile_byte_budget

    w_fold, colsum, bias, cout = _prepare_params(params, C, matmul_dtype)
    assert cout == (8 // reduce_factor) * C

    # Fused path: T2 % 8 == 0 keeps the in-kernel flattens layout-free, and at least a
    # single (bh=1, wt=1) column of merged features must fit the tile byte budget.
    fused_ok = (T2 % 8 == 0) and (T2 * 8 * C * x.dtype.itemsize <= tile_bytes)
    if fused_ok:
        return _forward_fused(x, B, H2, W2, T2, C, w_fold, colsum, bias, cout,
                              out_dtype, tile_bytes)
    return _forward_rowtile(x, B, H2, W2, T2, C, w_fold, colsum, bias, cout,
                            out_dtype, tile_bytes)


# ------------------------------------------------------------------------------ reference
def _reference_forward(x, H, W, T, params):
    """Pure-JAX f32 reference following the PyTorch module exactly."""
    B, L, C = x.shape
    xv = x.reshape(B, H, W, T, C)
    parts = [
        xv[:, 0::2, 0::2, 0::2, :], xv[:, 1::2, 0::2, 0::2, :],
        xv[:, 0::2, 1::2, 0::2, :], xv[:, 0::2, 0::2, 1::2, :],
        xv[:, 1::2, 1::2, 0::2, :], xv[:, 0::2, 1::2, 1::2, :],
        xv[:, 1::2, 0::2, 1::2, :], xv[:, 1::2, 1::2, 1::2, :],
    ]
    xm = jnp.concatenate(parts, axis=-1).reshape(B, L // 8, 8 * C)
    mean = jnp.mean(xm, axis=-1, keepdims=True)
    var = jnp.mean((xm - mean) ** 2, axis=-1, keepdims=True)
    xn = (xm - mean) / jnp.sqrt(var + _EPS)
    xn = xn * params["norm_weight"] + params["norm_bias"]
    return xn @ params["reduction_weight"].T


def _make_inputs(key, B, C, H, W, T):
    k_x, k_nw, k_nb, k_rw = jax.random.split(key, 4)
    L = H * W * T
    c8 = 8 * C
    cout = 4 * C
    x = jax.random.normal(k_x, (B, L, C), dtype=jnp.float32)
    params = {
        "norm_weight": 1.0 + 0.1 * jax.random.normal(k_nw, (c8,), dtype=jnp.float32),
        "norm_bias": 0.1 * jax.random.normal(k_nb, (c8,), dtype=jnp.float32),
        "reduction_weight": 0.1 * jax.random.normal(k_rw, (cout, c8), dtype=jnp.float32),
    }
    return x, params


if __name__ == "__main__":
    key = jax.random.PRNGKey(0)
    k1, k2, k3 = jax.random.split(key, 3)

    # Test 1: fused path, whole-plane tiles. 8C = 128, Cout = 64, T/2 = 8.
    B, C, H, W, T = 2, 16, 16, 16, 16
    x, params = _make_inputs(k1, B, C, H, W, T)
    ref = _reference_forward(x, H, W, T, params)
    out = jax.block_until_ready(patch_merging_forward(x, H, W, T, params, reduce_factor=2))
    assert out.shape == (B, H * W * T // 8, 4 * C), out.shape
    assert bool(jnp.allclose(out, ref, atol=5e-2, rtol=5e-2)), "fused path mismatch"

    # Test 2: fused path with W/2 tiling (tiny tile budget forces wt < W/2).
    out_w = jax.block_until_ready(
        patch_merging_forward(x, H, W, T, params, tile_byte_budget=16 * 1024))
    assert bool(jnp.allclose(out_w, ref, atol=5e-2, rtol=5e-2)), "w-tiled fused mismatch"

    # Test 3: fallback path (T/2 not a multiple of 8), evenly-divided row tiles.
    B2, C2, H2d, W2d, T2d = 1, 4, 4, 4, 4
    x2, params2 = _make_inputs(k2, B2, C2, H2d, W2d, T2d)
    out2 = jax.block_until_ready(patch_merging_forward(x2, H2d, W2d, T2d, params2))
    ref2 = _reference_forward(x2, H2d, W2d, T2d, params2)
    assert out2.shape == (B2, H2d * W2d * T2d // 8, 4 * C2), out2.shape
    assert bool(jnp.allclose(out2, ref2, atol=5e-2, rtol=5e-2)), "fallback path mismatch"

    # Test 4: fallback with a ragged (partial) last row tile — no full-array pad.
    B3, C3, H3, W3, T3 = 1, 4, 4, 4, 6
    x3, params3 = _make_inputs(k3, B3, C3, H3, W3, T3)
    out3 = jax.block_until_ready(
        patch_merging_forward(x3, H3, W3, T3, params3, tile_byte_budget=1024))
    ref3 = _reference_forward(x3, H3, W3, T3, params3)
    assert out3.shape == (B3, H3 * W3 * T3 // 8, 4 * C3), out3.shape
    assert bool(jnp.allclose(out3, ref3, atol=5e-2, rtol=5e-2)), "ragged fallback mismatch"

    print("KERNEL_OK")
</pallas_src>

<mosaic_0001>
module attributes {stable_mosaic.version = 11 : i64} {
  func.func @_fused_kernel(%arg0: i32, %arg1: i32, %arg2: i32, %arg3: memref<1x8x2x8x2x8x32xf32, #tpu.memory_space<vmem>>, %arg4: memref<128x64xbf16, #tpu.memory_space<vmem>>, %arg5: memref<1x64xf32, #tpu.memory_space<vmem>>, %arg6: memref<1x64xf32, #tpu.memory_space<vmem>>, %arg7: memref<8x64x64xf32, #tpu.memory_space<vmem>>) attributes {dimension_semantics = [#tpu.dimension_semantics<parallel>, #tpu.dimension_semantics<parallel>, #tpu.dimension_semantics<parallel>], iteration_bounds = array<i64: 2, 1, 1>, scalar_prefetch = 0 : i64, scratch_operands = 0 : i64, tpu.core_type = #tpu.core_type<tc>, window_params = [{transform_indices = @transform_0, window_bounds = array<i64: 1, 8, 2, 8, 2, 8, 32>}, {pipeline_mode = #tpu.pipeline_mode<synchronous>, transform_indices = @transform_1, window_bounds = array<i64: 128, 64>}, {pipeline_mode = #tpu.pipeline_mode<synchronous>, transform_indices = @transform_2, window_bounds = array<i64: 1, 64>}, {pipeline_mode = #tpu.pipeline_mode<synchronous>, transform_indices = @transform_3, window_bounds = array<i64: 1, 64>}, {transform_indices = @transform_4, window_bounds = array<i64: 8, 64, 64>}]} {
    %c0 = arith.constant 0 : index
    %c0_0 = arith.constant 0 : index
    %c0_1 = arith.constant 0 : index
    %c0_2 = arith.constant 0 : index
    %c0_3 = arith.constant 0 : index
    %c0_4 = arith.constant 0 : index
    %c0_5 = arith.constant 0 : index
    %0 = vector.load %arg3[%c0, %c0_0, %c0_1, %c0_2, %c0_3, %c0_4, %c0_5] : memref<1x8x2x8x2x8x32xf32, #tpu.memory_space<vmem>>, vector<1x8x1x8x1x8x32xf32>
    %1 = vector.shape_cast %0 : vector<1x8x1x8x1x8x32xf32> to vector<8x8x8x32xf32>
    %2 = vector.shape_cast %1 : vector<8x8x8x32xf32> to vector<512x32xf32>
    %cst = arith.constant dense<0.000000e+00> : vector<512xf32>
    %3 = vector.multi_reduction <add>, %2, %cst [1] : vector<512x32xf32> to vector<512xf32>
    %4 = vector.shape_cast %3 : vector<512xf32> to vector<512x1xf32>
    %5 = arith.mulf %2, %2 : vector<512x32xf32>
    %cst_6 = arith.constant dense<0.000000e+00> : vector<512xf32>
    %6 = vector.multi_reduction <add>, %5, %cst_6 [1] : vector<512x32xf32> to vector<512xf32>
    %7 = vector.shape_cast %6 : vector<512xf32> to vector<512x1xf32>
    %8 = arith.truncf %2 : vector<512x32xf32> to vector<512x32xbf16>
    %c0_7 = arith.constant 0 : index
    %c0_8 = arith.constant 0 : index
    %c0_9 = arith.constant 0 : index
    %c0_10 = arith.constant 0 : index
    %c1 = arith.constant 1 : index
    %c0_11 = arith.constant 0 : index
    %c0_12 = arith.constant 0 : index
    %9 = vector.load %arg3[%c0_7, %c0_8, %c0_9, %c0_10, %c1, %c0_11, %c0_12] : memref<1x8x2x8x2x8x32xf32, #tpu.memory_space<vmem>>, vector<1x8x1x8x1x8x32xf32>
    %10 = vector.shape_cast %9 : vector<1x8x1x8x1x8x32xf32> to vector<8x8x8x32xf32>
    %11 = vector.shape_cast %10 : vector<8x8x8x32xf32> to vector<512x32xf32>
    %cst_13 = arith.constant dense<0.000000e+00> : vector<512xf32>
    %12 = vector.multi_reduction <add>, %11, %cst_13 [1] : vector<512x32xf32> to vector<512xf32>
    %13 = vector.shape_cast %12 : vector<512xf32> to vector<512x1xf32>
    %14 = arith.mulf %11, %11 : vector<512x32xf32>
    %cst_14 = arith.constant dense<0.000000e+00> : vector<512xf32>
    %15 = vector.multi_reduction <add>, %14, %cst_14 [1] : vector<512x32xf32> to vector<512xf32>
    %16 = vector.shape_cast %15 : vector<512xf32> to vector<512x1xf32>
    %17 = arith.addf %4, %13 : vector<512x1xf32>
    %18 = arith.addf %7, %16 : vector<512x1xf32>
    %19 = arith.truncf %11 : vector<512x32xf32> to vector<512x32xbf16>
    %c0_15 = arith.constant 0 : index
    %c0_16 = arith.constant 0 : index
    %c1_17 = arith.constant 1 : index
    %c0_18 = arith.constant 0 : index
    %c0_19 = arith.constant 0 : index
    %c0_20 = arith.constant 0 : index
    %c0_21 = arith.constant 0 : index
    %20 = vector.load %arg3[%c0_15, %c0_16, %c1_17, %c0_18, %c0_19, %c0_20, %c0_21] : memref<1x8x2x8x2x8x32xf32, #tpu.memory_space<vmem>>, vector<1x8x1x8x1x8x32xf32>
    %21 = vector.shape_cast %20 : vector<1x8x1x8x1x8x32xf32> to vector<8x8x8x32xf32>
    %22 = vector.shape_cast %21 : vector<8x8x8x32xf32> to vector<512x32xf32>
    %cst_22 = arith.constant dense<0.000000e+00> : vector<512xf32>
    %23 = vector.multi_reduction <add>, %22, %cst_22 [1] : vector<512x32xf32> to vector<512xf32>
    %24 = vector.shape_cast %23 : vector<512xf32> to vector<512x1xf32>
    %25 = arith.mulf %22, %22 : vector<512x32xf32>
    %cst_23 = arith.constant dense<0.000000e+00> : vector<512xf32>
    %26 = vector.multi_reduction <add>, %25, %cst_23 [1] : vector<512x32xf32> to vector<512xf32>
    %27 = vector.shape_cast %26 : vector<512xf32> to vector<512x1xf32>
    %28 = arith.addf %17, %24 : vector<512x1xf32>
    %29 = arith.addf %18, %27 : vector<512x1xf32>
    %30 = arith.truncf %22 : vector<512x32xf32> to vector<512x32xbf16>
    %c0_24 = arith.constant 0 : index
    %c0_25 = arith.constant 0 : index
    %c1_26 = arith.constant 1 : index
    %c0_27 = arith.constant 0 : index
    %c1_28 = arith.constant 1 : index
    %c0_29 = arith.constant 0 : index
    %c0_30 = arith.constant 0 : index
    %31 = vector.load %arg3[%c0_24, %c0_25, %c1_26, %c0_27, %c1_28, %c0_29, %c0_30] : memref<1x8x2x8x2x8x32xf32, #tpu.memory_space<vmem>>, vector<1x8x1x8x1x8x32xf32>
    %32 = vector.shape_cast %31 : vector<1x8x1x8x1x8x32xf32> to vector<8x8x8x32xf32>
    %33 = vector.shape_cast %32 : vector<8x8x8x32xf32> to vector<512x32xf32>
    %cst_31 = arith.constant dense<0.000000e+00> : vector<512xf32>
    %34 = vector.multi_reduction <add>, %33, %cst_31 [1] : vector<512x32xf32> to vector<512xf32>
    %35 = vector.shape_cast %34 : vector<512xf32> to vector<512x1xf32>
    %36 = arith.mulf %33, %33 : vector<512x32xf32>
    %cst_32 = arith.constant dense<0.000000e+00> : vector<512xf32>
    %37 = vector.multi_reduction <add>, %36, %cst_32 [1] : vector<512x32xf32> to vector<512xf32>
    %38 = vector.shape_cast %37 : vector<512xf32> to vector<512x1xf32>
    %39 = arith.addf %28, %35 : vector<512x1xf32>
    %40 = arith.addf %29, %38 : vector<512x1xf32>
    %41 = arith.truncf %33 : vector<512x32xf32> to vector<512x32xbf16>
    %cst_33 = arith.constant 7.812500e-03 : f32
    %42 = vector.broadcast %cst_33 : f32 to vector<512x1xf32>
    %43 = arith.mulf %39, %42 : vector<512x1xf32>
    %cst_34 = arith.constant 7.812500e-03 : f32
    %44 = vector.broadcast %cst_34 : f32 to vector<512x1xf32>
    %45 = arith.mulf %40, %44 : vector<512x1xf32>
    %46 = arith.mulf %43, %43 : vector<512x1xf32>
    %47 = arith.subf %45, %46 : vector<512x1xf32>
    %cst_35 = arith.constant 9.99999974E-6 : f32
    %48 = vector.broadcast %cst_35 : f32 to vector<512x1xf32>
    %49 = arith.addf %47, %48 : vector<512x1xf32>
    %50 = math.rsqrt %49 : vector<512x1xf32>
    %51 = tpu.concatenate %8, %19, %30, %41 in 1 : vector<512x32xbf16>, vector<512x32xbf16>, vector<512x32xbf16>, vector<512x32xbf16> -> vector<512x128xbf16>
    %c0_36 = arith.constant 0 : index
    %c0_37 = arith.constant 0 : index
    %52 = vector.load %arg4[%c0_36, %c0_37] : memref<128x64xbf16, #tpu.memory_space<vmem>>, vector<128x64xbf16>
    %cst_38 = arith.constant dense<0.000000e+00> : vector<512x64xf32>
    %53 = tpu.matmul %51, %52, %cst_38 {dimension_numbers = #tpu.dot_dimension_numbers<[1], [0], [0], [1], [0, 0, 1, 1], [], []>} : vector<512x128xbf16>, vector<128x64xbf16>, vector<512x64xf32> -> vector<512x64xf32>
    %c0_39 = arith.constant 0 : index
    %c0_40 = arith.constant 0 : index
    %54 = vector.load %arg5[%c0_39, %c0_40] : memref<1x64xf32, #tpu.memory_space<vmem>>, vector<1x64xf32>
    %55 = vector.broadcast %43 : vector<512x1xf32> to vector<512x64xf32>
    %56 = vector.broadcast %54 : vector<1x64xf32> to vector<512x64xf32>
    %57 = arith.mulf %55, %56 : vector<512x64xf32>
    %58 = arith.subf %53, %57 : vector<512x64xf32>
    %59 = vector.broadcast %50 : vector<512x1xf32> to vector<512x64xf32>
    %60 = arith.mulf %58, %59 : vector<512x64xf32>
    %c0_41 = arith.constant 0 : index
    %c0_42 = arith.constant 0 : index
    %61 = vector.load %arg6[%c0_41, %c0_42] : memref<1x64xf32, #tpu.memory_space<vmem>>, vector<1x64xf32>
    %62 = vector.broadcast %61 : vector<1x64xf32> to vector<512x64xf32>
    %63 = arith.addf %60, %62 : vector<512x64xf32>
    %64 = vector.shape_cast %63 : vector<512x64xf32> to vector<8x64x64xf32>
    %c0_43 = arith.constant 0 : index
    %c0_44 = arith.constant 0 : index
    %c0_45 = arith.constant 0 : index
    %65 = vector.load %arg7[%c0_43, %c0_44, %c0_45] : memref<8x64x64xf32, #tpu.memory_space<vmem>>, vector<8x64x64xf32>
    tpu.vector_store %arg7[%c0_43, %c0_44, %c0_45], %64 {strides = array<i32>} : memref<8x64x64xf32, #tpu.memory_space<vmem>>, vector<8x64x64xf32>,
    return
  }
  func.func @transform_0(%arg0: i32, %arg1: i32, %arg2: i32) -> (i32, i32, i32, i32, i32, i32, i32) {
    %c0_i32 = arith.constant 0 : i32
    %c0_i32_0 = arith.constant 0 : i32
    %c0_i32_1 = arith.constant 0 : i32
    %c0_i32_2 = arith.constant 0 : i32
    %c0_i32_3 = arith.constant 0 : i32
    return %arg0, %arg1, %c0_i32, %arg2, %c0_i32_0, %c0_i32_1, %c0_i32_2 : i32, i32, i32, i32, i32, i32, i32
  }
  func.func @transform_1(%arg0: i32, %arg1: i32, %arg2: i32) -> (i32, i32) {
    %c0_i32 = arith.constant 0 : i32
    %c0_i32_0 = arith.constant 0 : i32
    %c0_i32_1 = arith.constant 0 : i32
    return %c0_i32, %c0_i32_0 : i32, i32
  }
  func.func @transform_2(%arg0: i32, %arg1: i32, %arg2: i32) -> (i32, i32) {
    %c0_i32 = arith.constant 0 : i32
    %c0_i32_0 = arith.constant 0 : i32
    %c0_i32_1 = arith.constant 0 : i32
    return %c0_i32, %c0_i32_0 : i32, i32
  }
  func.func @transform_3(%arg0: i32, %arg1: i32, %arg2: i32) -> (i32, i32) {
    %c0_i32 = arith.constant 0 : i32
    %c0_i32_0 = arith.constant 0 : i32
    %c0_i32_1 = arith.constant 0 : i32
    return %c0_i32, %c0_i32_0 : i32, i32
  }
  func.func @transform_4(%arg0: i32, %arg1: i32, %arg2: i32) -> (i32, i32, i32) {
    %c1_i32 = arith.constant 1 : i32
    %0 = arith.muli %arg0, %c1_i32 : i32
    %1 = arith.addi %0, %arg1 : i32
    %c0_i32 = arith.constant 0 : i32
    %c0_i32_0 = arith.constant 0 : i32
    return %1, %arg2, %c0_i32 : i32, i32, i32
  }
}

</mosaic_0001>

<bundles_post_ra>
// kernel: tpu_custom_call.1
= control target key start
LH: loop header
LB: loop body
LE: loop exit
PB: predicated region body
PF: predicated region fallthrough
CT: control target
= control target key end

     0   :  { %9 = vsyncpa [#allocation3], 0  ;;  %s11119_s0 = inlined_call_operand.hbm [shape: f32[2,8,2,8,2,8,32], index: 0, kind: input, shape index: {}]   ;;  %s11120_s1 = inlined_call_operand.hbm [shape: bf16[128,64], index: 1, kind: input, shape index: {}]   ;;  %s11121_s2 = inlined_call_operand.hbm [shape: f32[1,64], index: 2, kind: input, shape index: {}]   ;;  %s11122_s3 = inlined_call_operand.hbm [shape: f32[1,64], index: 3, kind: input, shape index: {}]   ;;  %s11123_s4 = inlined_call_operand.hbm [shape: f32[16,64,64], index: 4, kind: output, shape index: {}]  }
   0x1   :  { %11 = vsyncpa [#allocation3 + $0x1], 0 }
   0x2   :  { %12 = vsyncpa [#allocation6], 0 }
   0x3   :  { %13 = vsyncpa [#allocation9], 0 }
   0x4   :  { %14 = vsyncpa [#allocation4], 0 }
   0x5   :  { %16 = vsyncpa [#allocation4 + $0x1], 0  ;;  %s5679_s15 = smov 0   ;;  %s5681_s16 = smov 0  }
   0x6   :  { %s5683_s17 = smov 0   ;;  %s5685_s18 = smov 0  }
   0x7   :  { %s5687_s19 = smov 0   ;;  %s5689_s20 = smov 0  }
   0x8 LB: > { %s4616_s21 = sadd.s32 4294967295, %s5638_s20   ;;  %s4617_s22 = sadd.s32 4294967294, %s5638_s20   ;;  %s5638_s20 = sphi %s5689_s20, %s22_s20   ;;  %s5634_s19 = sphi %s5687_s19, %s12695_s19   ;;  %s5630_s18 = sphi %s5685_s18, %s12694_s18   ;;  %s5626_s17 = sphi %s5683_s17, %s12693_s17   ;;  %s5622_s16 = sphi %s5681_s16, %s12692_s16   ;;  %s5618_s15 = sphi %s5679_s15, %s12691_s15  }
   0x9   : > { %p65_p0 = scmp.ne.s32.totalorder %s5622_s16, %s5618_s15  ;;  %p5713_p1 = scmp.eq.s32.totalorder %s4616_s21, 0 }
   0xa   : > { %p5717_p2 = scmp.eq.s32.totalorder %s4616_s21, 1  ;;  %p162_p3 = scmp.eq.s32.totalorder %s4617_s22, 1 }
   0xb   : > { %s11283_s23 = scalar_select %p5713_p1, 1, 0 }
   0xc   : > { %s11284_s24 = scalar_select %p5717_p2, 1, 0 }
   0xd   : > { %p5723_p4 = por %p5713_p1, %p65_p0  ;;  %p4618_p5 = scmp.ge.s32.totalorder %s5638_s20, 1 }
   0xe   : > { %p5728_p6 = por %p162_p3, %p65_p0  ;;  %p169_p7 = scmp.lt.s32.totalorder %s5638_s20, 3 }
   0xf   : > { %s11285_s25 = scalar_select %p5723_p4, 1, 0 }
  0x10   : > { %s11286_s26 = scalar_select %p5728_p6, 1, 0 }
  0x11   : > { %p5733_p8 = pnand %p4618_p5, %p169_p7  ;;  %s5640_s28 = smov [#allocation5]  }
  0x12   : > { %11287 = sst [smem:[#allocation15_spill]] %s11286_s26  ;;  %s181_s29 = sshll.u32 %s5640_s28, 4  ;;  %s5737_s29 = int_to_ptr.vmem [resolvable:$true] %s181_s29 }
  0x13   : > { %s11288_s27 = scalar_select %p5733_p8, 1, 0 }
  0x14   : > { %p4995_p9 = pneg %p5733_p8  ;;  %s5641_s5 = smov [#allocation7]  }
  0x15   : > { %s195_s6 = sshll.u32 %s5641_s5, 4  ;;  %s5642_s7 = smov [#allocation8]   ;;  %s5748_s6 = int_to_ptr.vmem [resolvable:$true] %s195_s6 }
  0x16   : > { %p5744_p11 = pnand %p4995_p9, %p5713_p1  ;;  %s5750_s8 = sshll.u32 %s5642_s7, 4  ;;  %s207_s8 = int_to_ptr.vmem [resolvable:$true] %s5750_s8 }
  0x17   : > { %s5434_s11 = scalar_lea.hbm %s11120_s1, 1024 }
  0x18   : > { %p5435_p12 = scmp.ne.s32.totalorder %s11120_s1, %s5434_s11  ;;  %p5760_p13 = pneg %p5744_p11 }
  0x19   : > { %p5441_p5 = scmp.lt.u32.totalorder %s5434_s11, %s11120_s1 }
  0x1a   : > { %p5437_p0 = pnand %p5760_p13, %p5435_p12 }
  0x1c   : > { %p5438_p3 = pneg %p5437_p0 }
  0x1e   : > { %p5443_p7 = pnand %p5441_p5, %p5438_p3 }
  0x20   : > { %5446 = shalt.err (!%p5443_p7)
}
  0x21   : > { %s5447_s28 = scalar_lea.vmem %s5737_s29, 1024  ;;  %p5455_p1 = scmp.lt.s32.totalorder %s5737_s29, %s5737_s29 }
  0x22   : > { %p5448_p9 = scmp.ne.s32.totalorder %s5737_s29, %s5447_s28  ;;  %p5456_p4 = scmp.lt.s32.totalorder %s5447_s28, %s5447_s28 }
  0x24   : > { %p5450_p10 = pnand %p5448_p9, %p5760_p13  ;;  %p5457_p12 = por %p5456_p4, %p5455_p1 }
  0x26   : > { %p5451_p6 = pneg %p5450_p10 }
  0x28   : > { %p5458_p0 = pnand %p5457_p12, %p5451_p6 }
  0x2a   : > { %5461 = shalt.err (!%p5458_p0)
}
  0x2b   : > { %s5643_s5 = smov 64   ;;  %s5644_s7 = smov 4  }
  0x2c   : > { %4998 = dma.hbm_to_vmem [thread:$0]  (!%p5744_p11), %s11120_s1, 1024, %s5737_s29, [#allocation6], %s5643_s5, %s5643_s5, %s5644_s7  }
  0x2d   : > { %s5462_s13 = scalar_lea.hbm %s11121_s2, 16 }
  0x2e   : > { %p5463_p1 = scmp.ne.s32.totalorder %s11121_s2, %s5462_s13  ;;  %p5469_p10 = scmp.lt.u32.totalorder %s5462_s13, %s11121_s2 }
  0x30   : > { %p5465_p4 = pnand %p5463_p1, %p5760_p13 }
  0x32   : > { %p5466_p6 = pneg %p5465_p4 }
  0x34   : > { %p5471_p3 = pnand %p5469_p10, %p5466_p6 }
  0x36   : > { %5474 = shalt.err (!%p5471_p3)
}
  0x37   : > { %s5475_s29 = scalar_lea.vmem %s5748_s6, 16  ;;  %s5482_s5 = scalar_lea.vmem %s5748_s6, 32 }
  0x38   : > { %p5476_p5 = scmp.ne.s32.totalorder %s5748_s6, %s5475_s29  ;;  %p5483_p12 = scmp.lt.s32.totalorder %s5748_s6, %s5748_s6 }
  0x39   : > { %p5484_p0 = scmp.lt.s32.totalorder %s5482_s5, %s5475_s29 }
  0x3a   : > { %p5478_p7 = pnand %p5476_p5, %p5760_p13 }
  0x3b   : > { %p5485_p1 = por %p5484_p0, %p5483_p12 }
  0x3c   : > { %p5479_p9 = pneg %p5478_p7 }
  0x3e   : > { %p5486_p4 = pnand %p5485_p1, %p5479_p9 }
  0x40   : > { %5489 = shalt.err (!%p5486_p4)
}
  0x41   : > { %5001 = dma.hbm_to_vmem [thread:$0]  (!%p5744_p11), %s11121_s2, 16, %s5748_s6, [#allocation6]  }
  0x42   : > { %s5490_s11 = scalar_lea.hbm %s11122_s3, 16 }
  0x43   : > { %p5491_p6 = scmp.ne.s32.totalorder %s11122_s3, %s5490_s11  ;;  %p5497_p5 = scmp.lt.u32.totalorder %s5490_s11, %s11122_s3 }
  0x45   : > { %p5493_p10 = pnand %p5491_p6, %p5760_p13 }
  0x47   : > { %p5494_p3 = pneg %p5493_p10 }
  0x49   : > { %p5499_p7 = pnand %p5497_p5, %p5494_p3 }
  0x4b   : > { %5502 = shalt.err (!%p5499_p7)
}
  0x4c   : > { %s5503_s28 = scalar_lea.vmem %s207_s8, 16  ;;  %s5510_s6 = scalar_lea.vmem %s207_s8, 32 }
  0x4d   : > { %p5504_p9 = scmp.ne.s32.totalorder %s207_s8, %s5503_s28  ;;  %p5511_p1 = scmp.lt.s32.totalorder %s207_s8, %s207_s8 }
  0x4e   : > { %p5512_p4 = scmp.lt.s32.totalorder %s5510_s6, %s5503_s28 }
  0x4f   : > { %p5506_p12 = pnand %p5504_p9, %p5760_p13 }
  0x50   : > { %p5513_p8 = por %p5512_p4, %p5511_p1 }
  0x51   : > { %p5507_p0 = pneg %p5506_p12 }
  0x53   : > { %p5514_p2 = pnand %p5513_p8, %p5507_p0 }
  0x55   : > { %5517 = shalt.err (!%p5514_p2)
}
  0x56   : > { %5004 = dma.hbm_to_vmem [thread:$0]  (!%p5744_p11), %s11122_s3, 16, %s207_s8, [#allocation9]  }
  0x57   : > { %s52_s14 = sadd.s32 1, %s5626_s17  ;;  %s41_s26 = sadd.s32 1, %s5634_s19 }
  0x58   : > { %p59_p2 = scmp.ne.s32.totalorder %s5626_s17, %s5622_s16  ;;  %p43_p8 = scmp.ge.s32.totalorder %s41_s26, 2 }
  0x59   : > { %p60_p13 = scmp.eq.s32.totalorder %s5638_s20, 0  ;;  %p11291_p6 = scmp.ne.s32.totalorder %s11284_s24, 0 }
  0x5a   : > { %p5016_p3 = scmp.lt.s32.totalorder %s5638_s20, 2  ;;  %s12697_s26 = smov (%p43_p8, %s41_s26), 0 }
  0x5b   : > { %p5831_p10 = por %p11291_p6, %p59_p2  ;;  %p61_p5 = por %p60_p13, %p59_p2 }
  0x5c   : > { %s217_s7 = sand.u32 1, %s5626_s17   ;;  %s45_s9 = ssub.s32 %s5634_s19, %s12697_s26 }
  0x5d   : > { %p50_p7 = scmp.eq.s32.totalorder %s45_s9, 0  ;;  %s4623_s8 = sshll.u32 %s217_s7, 11 }
  0x5e   : > { %s4840_s10 = sshll.u32 %s5634_s19, 15  ;;  %s221_s21 = scalar_lea.vmem [#allocation2], %s4623_s8 }
  0x5f   : > { %s5843_s11 = scalar_select %p50_p7, %s5626_s17, %s52_s14  }
  0x60   : > { %s5848_s24 = scalar_lea.hbm %s11119_s0, %s4840_s10  ;;  %s234_s22 = sshll.u32 %s221_s21, 4  ;;  %s5850_s22 = int_to_ptr.vmem [resolvable:$true] %s234_s22 }
  0x61   : > { %p5854_p11 = pnand %p5016_p3, %p61_p5  ;;  %s5858_s6 = scalar_lea.sflag [#allocation3], %s217_s7 }
  0x62   : > { %s5518_s29 = scalar_lea.hbm %s5848_s24, 32768  ;;  %s5523_s9 = scalar_lea.hbm %s11119_s0, 65536 }
  0x63   : > { %p5519_p9 = scmp.ne.s32.totalorder %s5848_s24, %s5518_s29  ;;  %p5520_p12 = pneg %p5854_p11 }
  0x64   : > { %p5524_p4 = scmp.lt.u32.totalorder %s5848_s24, %s11119_s0  ;;  %p5525_p2 = scmp.lt.u32.totalorder %s5523_s9, %s5518_s29 }
  0x65   : > { %p5521_p0 = pnand %p5520_p12, %p5519_p9  ;;  %p5527_p13 = scmp.lt.u32.totalorder %s5518_s29, %s5848_s24 }
  0x66   : > { %p5526_p8 = por %p5525_p2, %p5524_p4 }
  0x67   : > { %p5522_p1 = pneg %p5521_p0 }
  0x68   : > { %p5528_p6 = por %p5527_p13, %p5526_p8 }
  0x6a   : > { %p5529_p3 = pnand %p5528_p6, %p5522_p1 }
  0x6c   : > { %5532 = shalt.err (!%p5529_p3)
}
  0x6d   : > { %s5533_s7 = scalar_lea.vmem %s5850_s22, 32768  ;;  %s5645_s12 = smov [#allocation2]  }
  0x6e   : > { %p5534_p5 = scmp.ne.s32.totalorder %s5850_s22, %s5533_s7  ;;  %s5538_s13 = sshll.u32 %s5645_s12, 4  ;;  %s5539_s13 = int_to_ptr.vmem [resolvable:$false] %s5538_s13 }
  0x6f   : > { %s5540_s21 = scalar_lea.vmem %s5539_s13, 65536  ;;  %p5541_p0 = scmp.lt.s32.totalorder %s5850_s22, %s5539_s13 }
  0x70   : > { %p5536_p7 = pnand %p5534_p5, %p5520_p12  ;;  %p5542_p4 = scmp.lt.s32.totalorder %s5540_s21, %s5533_s7 }
  0x72   : > { %p5537_p9 = pneg %p5536_p7  ;;  %p5543_p2 = por %p5542_p4, %p5541_p0 }
  0x74   : > { %p5544_p8 = pnand %p5543_p2, %p5537_p9 }
  0x76   : > { %5547 = shalt.err (!%p5544_p8)
}
  0x77   : > { %s5646_s29 = smov 128   ;;  %s5647_s5 = smov 8  }
  0x78   : > { %5008 = dma.hbm_to_vmem [thread:$0]  (!%p5854_p11), %s5848_s24, 32768, %s5850_s22, %s5858_s6, %s5646_s29, %s5646_s29, %s5647_s5  }
  0x79   : > { %p11294_p12 = scmp.ne.s32.totalorder %s11288_s27, 0 }
  0x7b   : > { %246 = sbr.rel (%p11294_p12) target bundleno = 1615 (0x64f), region = 36 }
  0x82   : > { %s5889_s14 = sand.u32 1, %s5622_s16   ;;  %p11295_p1 = scmp.ne.s32.totalorder %s11285_s25, 0 }
  0x83   : > { %s4627_s9 = sshll.u32 %s5889_s14, 11  ;;  %s249_s8 = scalar_lea.sflag [#allocation3], %s5889_s14 }
  0x84   : > { %s5893_s10 = scalar_lea.vmem [#allocation2], %s4627_s9 }
  0x85   : > { %5601 = dma.done.wait (%p11295_p1), %s249_s8, 32768  }
  0x86   : > { %5603 = vsyncadd (%p11295_p1), %s249_s8, 4294934528  ;;  %p11296_p11 = scmp.ne.s32.totalorder %s11283_s23, 0 }
  0x88   : > { %5605 = dma.done.wait (%p11296_p11), [#allocation6], 1040  }
  0x89   : > { %5607 = vsyncadd (%p11296_p11), [#allocation6], 4294966256 }
  0x8a   : > { %5609 = dma.done.wait (%p11296_p11), [#allocation9], 16  }
  0x8b   : > { %5611 = vsyncadd (%p11296_p11), [#allocation9], 4294967280  ;;  %vm359_vm0 = vcmask 261120   ;;  %v5908_v0 = vld [vmem:[%s5893_s10 + $0x20] sm:$0xff]  ;;  %v5914_v2 = vld [vmem:[%s5893_s10 + $0x30] sm:$0xff]  ;;  %s5648_s23 = smov 32  }
  0x8c   : > { %11297 = vst [vmem:[#allocation16_spill] sm:$0xff] %v5908_v0  ;;  %v5911_v1 = vld [vmem:[%s5893_s10] sm:$0xff]  ;;  %11299 = vst [vmem:[#allocation18_spill] sm:$0xff] %v5914_v2  ;;  %v366_v3 = vsel %vm359_vm0, %v5908_v0, 0.0  ;;  %v5923_v6 = vld [vmem:[%s5893_s10 + $0x10] sm:$0xff]  ;;  %v369_v12 = vsel %vm359_vm0, %v5914_v2, 0.0 }
  0x8d   : > { %11298 = vst [vmem:[#allocation17_spill] sm:$0xff] %v5911_v1  ;;  %v360_v4 = vsel %vm359_vm0, %v5911_v1, 0.0  ;;  %11300 = vst [vmem:[#allocation19_spill] sm:$0xff] %v5923_v6  ;;  %v5926_v7 = vld [vmem:[%s5893_s10 + $0x50] sm:$0xff]  ;;  %367 = vadd.xlane.f32.xlu1 %v366_v3  ;;  %v5931_v9 = vld [vmem:[%s5893_s10 + $0x40] sm:$0xff]  ;;  %v363_v13 = vsel %vm359_vm0, %v5923_v6, 0.0 }
  0x8e   : > { %11301 = vst [vmem:[#allocation20_spill] sm:$0xff] %v5926_v7  ;;  %361 = vadd.xlane.f32.xlu0 %v360_v4  ;;  %11302 = vst [vmem:[#allocation21_spill] sm:$0xff] %v5931_v9  ;;  %v5934_v10 = vld [vmem:[%s5893_s10 + $0x70] sm:$0xff]  ;;  %v5937_v11 = vld [vmem:[%s5893_s10 + $0x60] sm:$0xff]  ;;  %v375_v30 = vsel %vm359_vm0, %v5926_v7, 0.0  ;;  %v372_v31 = vsel %vm359_vm0, %v5931_v9, 0.0 }
  0x8f   : > { %11303 = vst [vmem:[#allocation22_spill] sm:$0xff] %v5934_v10  ;;  %11304 = vst [vmem:[#allocation23_spill] sm:$0xff] %v5937_v11  ;;  %v5948_v16 = vld [vmem:[%s5893_s10 + $0x110] sm:$0xff]  ;;  %v5951_v17 = vld [vmem:[%s5893_s10 + $0x100] sm:$0xff]  ;;  %v381_v48 = vsel %vm359_vm0, %v5934_v10, 0.0  ;;  %v378_v49 = vsel %vm359_vm0, %v5937_v11, 0.0 }
  0x90   : > { %11305 = vst [vmem:[#allocation24_spill] sm:$0xff] %v5948_v16  ;;  %11306 = vst [vmem:[#allocation25_spill] sm:$0xff] %v5951_v17  ;;  %v5956_v19 = vld [vmem:[%s5893_s10 + $0x130] sm:$0xff]  ;;  %v5959_v20 = vld [vmem:[%s5893_s10 + $0x120] sm:$0xff]  ;;  %s5649_s25 = smov 64   ;;  %s5650_s27 = smov 96  }
  0x91   : > { %11307 = vst [vmem:[#allocation26_spill] sm:$0xff] %v5956_v19  ;;  %11308 = vst [vmem:[#allocation27_spill] sm:$0xff] %v5959_v20  ;;  %v5962_v21 = vld [vmem:[%s5893_s10 + $0x150] sm:$0xff]  ;;  %v5967_v23 = vld [vmem:[%s5893_s10 + $0x140] sm:$0xff]  ;;  %370 = vadd.xlane.f32.xlu1 %v369_v12  ;;  %v387_v12 = vsel %vm359_vm0, %v5948_v16, 0.0  ;;  %v393_v54 = vsel %vm359_vm0, %v5956_v19, 0.0 }
  0x92   : > { %11309 = vst [vmem:[#allocation28_spill] sm:$0xff] %v5962_v21  ;;  %11310 = vst [vmem:[#allocation29_spill] sm:$0xff] %v5967_v23  ;;  %v5970_v24 = vld [vmem:[%s5893_s10 + $0x170] sm:$0xff]  ;;  %v5973_v25 = vld [vmem:[%s5893_s10 + $0x160] sm:$0xff]  ;;  %364 = vadd.xlane.f32.xlu0 %v363_v13  ;;  %v384_v13 = vsel %vm359_vm0, %v5951_v17, 0.0  ;;  %v390_v50 = vsel %vm359_vm0, %v5959_v20, 0.0 }
  0x93   : > { %11311 = vst [vmem:[#allocation30_spill] sm:$0xff] %v5970_v24  ;;  %11312 = vst [vmem:[#allocation31_spill] sm:$0xff] %v5973_v25  ;;  %v5980_v28 = vld [vmem:[%s5893_s10 + $0x210] sm:$0xff]  ;;  %v5983_v29 = vld [vmem:[%s5893_s10 + $0x200] sm:$0xff]  ;;  %v399_v44 = vsel %vm359_vm0, %v5962_v21, 0.0  ;;  %v396_v41 = vsel %vm359_vm0, %v5967_v23, 0.0 }
  0x94   : > { %11313 = vst [vmem:[#allocation32_spill] sm:$0xff] %v5980_v28  ;;  %11314 = vst [vmem:[#allocation33_spill] sm:$0xff] %v5983_v29  ;;  %v5992_v33 = vld [vmem:[%s5893_s10 + $0x230] sm:$0xff]  ;;  %v5995_v34 = vld [vmem:[%s5893_s10 + $0x220] sm:$0xff]  ;;  %vm3627_vm1 = vcmask 523264   ;;  %vm3692_vm2 = vcmask 785408  }
  0x95   : > { %11315 = vst [vmem:[#allocation34_spill] sm:$0xff] %v5992_v33  ;;  %11316 = vst [vmem:[#allocation35_spill] sm:$0xff] %v5995_v34  ;;  %v5998_v35 = vld [vmem:[%s5893_s10 + $0x250] sm:$0xff]  ;;  %v6003_v37 = vld [vmem:[%s5893_s10 + $0x240] sm:$0xff]  ;;  %376 = vadd.xlane.f32.xlu1 %v375_v30  ;;  %s4631_s24 = sshll.u32 %s5889_s14, 9  ;;  %s4842_s28 = sshll.u32 %s5630_s18, 13 }
  0x96   : > { %11317 = vst [vmem:[#allocation36_spill] sm:$0xff] %v5998_v35  ;;  %11318 = vst [vmem:[#allocation37_spill] sm:$0xff] %v6003_v37  ;;  %v6006_v38 = vld [vmem:[%s5893_s10 + $0x270] sm:$0xff]  ;;  %v6009_v39 = vld [vmem:[%s5893_s10 + $0x260] sm:$0xff]  ;;  %373 = vadd.xlane.f32.xlu0 %v372_v31  ;;  %s10296_s22 = scalar_lea.vmem [#allocation10], %s4631_s24  ;;  %s11061_s12 = scalar_lea.hbm %s11123_s4, %s4842_s28 }
  0x97   : > { %11319 = vst [vmem:[#allocation38_spill] sm:$0xff] %v6006_v38  ;;  %11320 = vst [vmem:[#allocation39_spill] sm:$0xff] %v6009_v39  ;;  %v6016_v42 = vld [vmem:[%s5893_s10 + $0x310] sm:$0xff]  ;;  %v6019_v43 = vld [vmem:[%s5893_s10 + $0x300] sm:$0xff]  ;;  %s4494_s6 = sshll.u32 %s10296_s22, 4  ;;  %s4477_s13 = scalar_lea.sflag [#allocation4], %s5889_s14  ;;  %s11063_s6 = int_to_ptr.vmem [resolvable:$true] %s4494_s6 }
  0x98   : > { %11321 = vst [vmem:[#allocation40_spill] sm:$0xff] %v6016_v42  ;;  %11322 = vst [vmem:[#allocation41_spill] sm:$0xff] %v6019_v43  ;;  %v6024_v45 = vld [vmem:[%s5893_s10 + $0x330] sm:$0xff]  ;;  %v6027_v46 = vld [vmem:[%s5893_s10 + $0x320] sm:$0xff]  ;;  %s5548_s21 = scalar_lea.vmem %s11063_s6, 8192  ;;  %s5651_s29 = smov [#allocation10]  }
  0x99   : > { %11323 = vst [vmem:[#allocation42_spill] sm:$0xff] %v6024_v45  ;;  %11324 = vst [vmem:[#allocation43_spill] sm:$0xff] %v6027_v46  ;;  %v6030_v47 = vld [vmem:[%s5893_s10 + $0x350] sm:$0xff]  ;;  %v6039_v51 = vld [vmem:[%s5893_s10 + $0x340] sm:$0xff]  ;;  %382 = vadd.xlane.f32.xlu1 %v381_v48  ;;  %p5549_p13 = scmp.ne.s32.totalorder %s11063_s6, %s5548_s21  ;;  %s5552_s5 = sshll.u32 %s5651_s29, 4  ;;  %s5553_s5 = int_to_ptr.vmem [resolvable:$false] %s5552_s5 }
  0x9a   : > { %11325 = vst [vmem:[#allocation44_spill] sm:$0xff] %v6030_v47  ;;  %11326 = vst [vmem:[#allocation45_spill] sm:$0xff] %v6039_v51  ;;  %v6042_v52 = vld [vmem:[%s5893_s10 + $0x370] sm:$0xff]  ;;  %v6045_v53 = vld [vmem:[%s5893_s10 + $0x360] sm:$0xff]  ;;  %379 = vadd.xlane.f32.xlu0 %v378_v49  ;;  %s5554_s9 = scalar_lea.vmem %s5553_s5, 16384  ;;  %p5555_p5 = scmp.lt.s32.totalorder %s11063_s6, %s5553_s5 }
  0x9b   : > { %11327 = vst [vmem:[#allocation46_spill] sm:$0xff] %v6042_v52  ;;  %11328 = vst [vmem:[#allocation47_spill] sm:$0xff] %v6045_v53  ;;  %v6052_v56 = vld [vmem:[%s5893_s10 + $0x410] sm:$0xff]  ;;  %v6055_v57 = vld [vmem:[%s5893_s10 + $0x400] sm:$0xff]  ;;  %p5550_p6 = pnand %p5549_p13, %p5831_p10  ;;  %p5556_p7 = scmp.lt.s32.totalorder %s5554_s9, %s5548_s21 }
  0x9c   : > { %11329 = vst [vmem:[#allocation48_spill] sm:$0xff] %v6052_v56  ;;  %11330 = vst [vmem:[#allocation49_spill] sm:$0xff] %v6055_v57  ;;  %v6060_v59 = vld [vmem:[%s5893_s10 + $0x430] sm:$0xff]  ;;  %v6063_v60 = vld [vmem:[%s5893_s10 + $0x420] sm:$0xff] }
  0x9d   : > { %11331 = vst [vmem:[#allocation50_spill] sm:$0xff] %v6060_v59  ;;  %11332 = vst [vmem:[#allocation51_spill] sm:$0xff] %v6063_v60  ;;  %v6066_v61 = vld [vmem:[%s5893_s10 + $0x450] sm:$0xff]  ;;  %v6071_v63 = vld [vmem:[%s5893_s10 + $0x440] sm:$0xff]  ;;  %388 = vadd.xlane.f32.xlu1 %v387_v12  ;;  %v405_v12 = vsel %vm359_vm0, %v5970_v24, 0.0  ;;  %p5551_p3 = pneg %p5550_p6  ;;  %p5557_p9 = por %p5556_p7, %p5555_p5 }
  0x9e   : > { %11333 = vst [vmem:[#allocation52_spill] sm:$0xff] %v6066_v61  ;;  %11334 = vst [vmem:[#allocation53_spill] sm:$0xff] %v6071_v63  ;;  %v6074_v3 = vld [vmem:[%s5893_s10 + $0x470] sm:$0xff]  ;;  %v6077_v4 = vld [vmem:[%s5893_s10 + $0x460] sm:$0xff]  ;;  %385 = vadd.xlane.f32.xlu0 %v384_v13  ;;  %v402_v13 = vsel %vm359_vm0, %v5973_v25, 0.0 }
  0x9f   : > { %11335 = vst [vmem:[#allocation54_spill] sm:$0xff] %v6074_v3  ;;  %11336 = vst [vmem:[#allocation55_spill] sm:$0xff] %v6077_v4  ;;  %v6088_v48 = vld [vmem:[%s5893_s10 + $0x510] sm:$0xff]  ;;  %v6091_v49 = vld [vmem:[%s5893_s10 + $0x500] sm:$0xff]  ;;  %p5558_p0 = pnand %p5557_p9, %p5551_p3 }
  0xa0   : > { %11337 = vst [vmem:[#allocation56_spill] sm:$0xff] %v6088_v48  ;;  %11338 = vst [vmem:[#allocation57_spill] sm:$0xff] %v6091_v49  ;;  %v6160_v40 = vld [vmem:[%s5893_s10 + $0x530] sm:$0xff]  ;;  %v6173_v36 = vld [vmem:[%s5893_s10 + $0x540] sm:$0xff] }
  0xa1   : > { %394 = vadd.xlane.f32.xlu1 %v393_v54  ;;  %v411_v54 = vsel %vm359_vm0, %v5980_v28, 0.0  ;;  %v6180_v32 = vld [vmem:[%s5893_s10 + $0x570] sm:$0xff]  ;;  %v6183_v27 = vld [vmem:[%s5893_s10 + $0x560] sm:$0xff] }
  0xa2   : > { %391 = vadd.xlane.f32.xlu0 %v390_v50  ;;  %v408_v50 = vsel %vm359_vm0, %v5983_v29, 0.0  ;;  %v6190_v26 = vld [vmem:[%s5893_s10 + $0x610] sm:$0xff]  ;;  %v6193_v22 = vld [vmem:[%s5893_s10 + $0x600] sm:$0xff] }
  0xa3   : > { %v6200_v18 = vld [vmem:[%s5893_s10 + $0x630] sm:$0xff]  ;;  %v6203_v55 = vld [vmem:[%s5893_s10 + $0x620] sm:$0xff] }
  0xa4   : > { %v6210_v15 = vld [vmem:[%s5893_s10 + $0x650] sm:$0xff]  ;;  %v6213_v31 = vld [vmem:[%s5893_s10 + $0x640] sm:$0xff] }
  0xa5   : > { %400 = vadd.xlane.f32.xlu1 %v399_v44  ;;  %v417_v44 = vsel %vm359_vm0, %v5992_v33, 0.0  ;;  %v6220_v14 = vld [vmem:[%s5893_s10 + $0x670] sm:$0xff]  ;;  %v6223_v30 = vld [vmem:[%s5893_s10 + $0x660] sm:$0xff] }
  0xa6   : > { %397 = vadd.xlane.f32.xlu0 %v396_v41  ;;  %v414_v41 = vsel %vm359_vm0, %v5995_v34, 0.0  ;;  %11339 = vst [vmem:[#allocation58_spill] sm:$0xff] %v6220_v14  ;;  %11340 = vst [vmem:[#allocation59_spill] sm:$0xff] %v6223_v30  ;;  %v6230_v5 = vld [vmem:[%s5893_s10 + $0x710] sm:$0xff]  ;;  %v6233_v62 = vld [vmem:[%s5893_s10 + $0x700] sm:$0xff] }
  0xa7   : > { %11341 = vst [vmem:[#allocation60_spill] sm:$0xff] %v6230_v5  ;;  %11342 = vst [vmem:[#allocation61_spill] sm:$0xff] %v6233_v62  ;;  %v6240_v8 = vld [vmem:[%s5893_s10 + $0x730] sm:$0xff]  ;;  %v6243_v58 = vld [vmem:[%s5893_s10 + $0x720] sm:$0xff] }
  0xa8   : > { %11343 = vst [vmem:[#allocation62_spill] sm:$0xff] %v6240_v8  ;;  %11344 = vst [vmem:[#allocation63_spill] sm:$0xff] %v6243_v58 }
  0xa9   : > { %406 = vadd.xlane.f32.xlu1 %v405_v12  ;;  %v423_v12 = vsel %vm359_vm0, %v5998_v35, 0.0 }
  0xaa   : > { %403 = vadd.xlane.f32.xlu0 %v402_v13  ;;  %v420_v13 = vsel %vm359_vm0, %v6003_v37, 0.0 }
  0xad   : > { %412 = vadd.xlane.f32.xlu1 %v411_v54  ;;  %v429_v54 = vsel %vm359_vm0, %v6006_v38, 0.0 }
  0xae   : > { %409 = vadd.xlane.f32.xlu0 %v408_v50  ;;  %v426_v50 = vsel %vm359_vm0, %v6009_v39, 0.0 }
  0xb1   : > { %418 = vadd.xlane.f32.xlu1 %v417_v44  ;;  %v435_v44 = vsel %vm359_vm0, %v6016_v42, 0.0 }
  0xb2   : > { %415 = vadd.xlane.f32.xlu0 %v414_v41  ;;  %v432_v41 = vsel %vm359_vm0, %v6019_v43, 0.0 }
  0xb5   : > { %424 = vadd.xlane.f32.xlu1 %v423_v12  ;;  %v441_v12 = vsel %vm359_vm0, %v6024_v45, 0.0 }
  0xb6   : > { %421 = vadd.xlane.f32.xlu0 %v420_v13  ;;  %v438_v13 = vsel %vm359_vm0, %v6027_v46, 0.0 }
  0xb9   : > { %430 = vadd.xlane.f32.xlu1 %v429_v54  ;;  %v447_v54 = vsel %vm359_vm0, %v6030_v47, 0.0 }
  0xba   : > { %427 = vadd.xlane.f32.xlu0 %v426_v50  ;;  %v444_v50 = vsel %vm359_vm0, %v6039_v51, 0.0 }
  0xbd   : > { %436 = vadd.xlane.f32.xlu1 %v435_v44  ;;  %v453_v44 = vsel %vm359_vm0, %v6042_v52, 0.0 }
  0xbe   : > { %433 = vadd.xlane.f32.xlu0 %v432_v41  ;;  %v450_v41 = vsel %vm359_vm0, %v6045_v53, 0.0 }
  0xc1   : > { %442 = vadd.xlane.f32.xlu1 %v441_v12  ;;  %v459_v12 = vsel %vm359_vm0, %v6052_v56, 0.0 }
  0xc2   : > { %439 = vadd.xlane.f32.xlu0 %v438_v13  ;;  %v456_v13 = vsel %vm359_vm0, %v6055_v57, 0.0 }
  0xc5   : > { %448 = vadd.xlane.f32.xlu1 %v447_v54  ;;  %v465_v54 = vsel %vm359_vm0, %v6060_v59, 0.0 }
  0xc6   : > { %445 = vadd.xlane.f32.xlu0 %v444_v50  ;;  %v462_v50 = vsel %vm359_vm0, %v6063_v60, 0.0 }
  0xc9   : > { %454 = vadd.xlane.f32.xlu1 %v453_v44  ;;  %v471_v44 = vsel %vm359_vm0, %v6066_v61, 0.0 }
  0xca   : > { %451 = vadd.xlane.f32.xlu0 %v450_v41  ;;  %v468_v41 = vsel %vm359_vm0, %v6071_v63, 0.0 }
  0xcd   : > { %460 = vadd.xlane.f32.xlu1 %v459_v12  ;;  %v477_v12 = vsel %vm359_vm0, %v6074_v3, 0.0 }
  0xce   : > { %457 = vadd.xlane.f32.xlu0 %v456_v13  ;;  %v474_v13 = vsel %vm359_vm0, %v6077_v4, 0.0 }
  0xd1   : > { %466 = vadd.xlane.f32.xlu1 %v465_v54  ;;  %v483_v54 = vsel %vm359_vm0, %v6088_v48, 0.0 }
  0xd2   : > { %463 = vadd.xlane.f32.xlu0 %v462_v50  ;;  %v480_v50 = vsel %vm359_vm0, %v6091_v49, 0.0 }
  0xd5   : > { %472 = vadd.xlane.f32.xlu1 %v471_v44  ;;  %v6163_v44 = vld [vmem:[%s5893_s10 + $0x520] sm:$0xff] }
  0xd6   : > { %469 = vadd.xlane.f32.xlu0 %v468_v41  ;;  %v489_v41 = vsel %vm359_vm0, %v6160_v40, 0.0 }
  0xd9   : > { %478 = vadd.xlane.f32.xlu1 %v477_v12  ;;  %v486_v12 = vsel %vm359_vm0, %v6163_v44, 0.0 }
  0xda   : > { %475 = vadd.xlane.f32.xlu0 %v474_v13  ;;  %v6170_v13 = vld [vmem:[%s5893_s10 + $0x550] sm:$0xff] }
  0xdd   : > { %484 = vadd.xlane.f32.xlu1 %v483_v54  ;;  %v495_v54 = vsel %vm359_vm0, %v6170_v13, 0.0 }
  0xde   : > { %481 = vadd.xlane.f32.xlu0 %v480_v50  ;;  %v492_v50 = vsel %vm359_vm0, %v6173_v36, 0.0 }
  0xe1   : > { %490 = vadd.xlane.f32.xlu1 %v489_v41  ;;  %v501_v41 = vsel %vm359_vm0, %v6180_v32, 0.0 }
  0xe2   : > { %487 = vadd.xlane.f32.xlu0 %v486_v12  ;;  %v498_v12 = vsel %vm359_vm0, %v6183_v27, 0.0 }
  0xe5   : > { %496 = vadd.xlane.f32.xlu1 %v495_v54  ;;  %v507_v54 = vsel %vm359_vm0, %v6190_v26, 0.0 }
  0xe6   : > { %493 = vadd.xlane.f32.xlu0 %v492_v50  ;;  %v504_v50 = vsel %vm359_vm0, %v6193_v22, 0.0 }
  0xe9   : > { %502 = vadd.xlane.f32.xlu1 %v501_v41  ;;  %v513_v41 = vsel %vm359_vm0, %v6200_v18, 0.0 }
  0xea   : > { %499 = vadd.xlane.f32.xlu0 %v498_v12  ;;  %v510_v12 = vsel %vm359_vm0, %v6203_v55, 0.0 }
  0xed   : > { %508 = vadd.xlane.f32.xlu1 %v507_v54  ;;  %v519_v54 = vsel %vm359_vm0, %v6210_v15, 0.0 }
  0xee   : > { %505 = vadd.xlane.f32.xlu0 %v504_v50  ;;  %v516_v50 = vsel %vm359_vm0, %v6213_v31, 0.0 }
  0xf1   : > { %514 = vadd.xlane.f32.xlu1 %v513_v41  ;;  %v525_v41 = vsel %vm359_vm0, %v6220_v14, 0.0  ;;  %v6253_v14 = vld [vmem:[%s5893_s10 + $0x740] sm:$0xff] }
  0xf2   : > { %511 = vadd.xlane.f32.xlu0 %v510_v12  ;;  %v522_v12 = vsel %vm359_vm0, %v6223_v30, 0.0  ;;  %v537_v30 = vsel %vm359_vm0, %v6240_v8, 0.0  ;;  %11346 = vst [vmem:[#allocation65_spill] sm:$0xff] %v6253_v14 }
  0xf5   : > { %520 = vadd.xlane.f32.xlu1 %v519_v54  ;;  %v531_v54 = vsel %vm359_vm0, %v6230_v5, 0.0  ;;  %v540_v5 = vsel %vm359_vm0, %v6253_v14, 0.0 }
  0xf6   : > { %517 = vadd.xlane.f32.xlu0 %v516_v50  ;;  %v528_v50 = vsel %vm359_vm0, %v6233_v62, 0.0 }
  0xf9   : > { %526 = vadd.xlane.f32.xlu1 %v525_v41  ;;  %v534_v41 = vsel %vm359_vm0, %v6243_v58, 0.0 }
  0xfa   : > { %523 = vadd.xlane.f32.xlu0 %v522_v12  ;;  %v6250_v12 = vld [vmem:[%s5893_s10 + $0x750] sm:$0xff] }
  0xfb   : > { %11345 = vst [vmem:[#allocation64_spill] sm:$0xff] %v6250_v12  ;;  %v543_v62 = vsel %vm359_vm0, %v6250_v12, 0.0 }
  0xfd   : > { %532 = vadd.xlane.f32.xlu1 %v531_v54  ;;  %v6260_v54 = vld [vmem:[%s5893_s10 + $0x770] sm:$0xff] }
  0xfe   : > { %529 = vadd.xlane.f32.xlu0 %v528_v50  ;;  %v6263_v50 = vld [vmem:[%s5893_s10 + $0x760] sm:$0xff]  ;;  %v549_v58 = vsel %vm359_vm0, %v6260_v54, 0.0 }
  0xff   : > { %11347 = vst [vmem:[#allocation66_spill] sm:$0xff] %v6263_v50  ;;  %v546_v8 = vsel %vm359_vm0, %v6263_v50, 0.0 }
 0x101   : > { %538 = vadd.xlane.f32.xlu1 %v537_v30  ;;  %v553_v30 = vmul.f32 %v5923_v6, %v5923_v6 }
 0x102   : > { %535 = vadd.xlane.f32.xlu0 %v534_v41  ;;  %v552_v41 = vmul.f32 %v5911_v1, %v5911_v1  ;;  %v11402_v1 = vld [vmem:[#allocation62_spill] sm:$0xff] }
 0x103   : > { %v619_v14 = vsel %vm359_vm0, %v553_v30, 0.0 }
 0x104   : > { %v616_v12 = vsel %vm359_vm0, %v552_v41, 0.0 }
 0x105   : > { %544 = vadd.xlane.f32.xlu1 %v543_v62  ;;  %v554_v62 = vmul.f32 %v5908_v0, %v5908_v0  ;;  %v11394_v0 = vld [vmem:[#allocation58_spill] sm:$0xff] }
 0x106   : > { %541 = vadd.xlane.f32.xlu0 %v540_v5  ;;  %v555_v5 = vmul.f32 %v5914_v2, %v5914_v2 }
 0x107   : > { %v622_v6 = vsel %vm359_vm0, %v554_v62, 0.0 }
 0x108   : > { %v625_v50 = vsel %vm359_vm0, %v555_v5, 0.0 }
 0x109   : > { %550 = vadd.xlane.f32.xlu1 %v549_v58  ;;  %v557_v58 = vmul.f32 %v5926_v7, %v5926_v7 }
 0x10a   : > { %547 = vadd.xlane.f32.xlu0 %v546_v8  ;;  %v556_v8 = vmul.f32 %v5931_v9, %v5931_v9 }
 0x10b   : > { %v631_v30 = vsel %vm359_vm0, %v557_v58, 0.0 }
 0x10c   : > { %v628_v41 = vsel %vm359_vm0, %v556_v8, 0.0 }
 0x10d   : > { %620 = vadd.xlane.f32.xlu1 %v619_v14  ;;  %v559_v14 = vmul.f32 %v5934_v10, %v5934_v10 }
 0x10e   : > { %617 = vadd.xlane.f32.xlu0 %v616_v12  ;;  %v558_v12 = vmul.f32 %v5937_v11, %v5937_v11 }
 0x10f   : > { %v637_v5 = vsel %vm359_vm0, %v559_v14, 0.0  ;;  %v562_v14 = vmul.f32 %v5959_v20, %v5959_v20 }
 0x110   : > { %v634_v62 = vsel %vm359_vm0, %v558_v12, 0.0 }
 0x111   : > { %626 = vadd.xlane.f32.xlu1 %v625_v50  ;;  %v561_v50 = vmul.f32 %v5948_v16, %v5948_v16 }
 0x112   : > { %623 = vadd.xlane.f32.xlu0 %v622_v6  ;;  %v560_v6 = vmul.f32 %v5951_v17, %v5951_v17  ;;  %v646_v17 = vsel %vm359_vm0, %v562_v14, 0.0  ;;  %v566_v14 = vmul.f32 %v5973_v25, %v5973_v25 }
 0x113   : > { %v643_v11 = vsel %vm359_vm0, %v561_v50, 0.0  ;;  %v565_v50 = vmul.f32 %v5962_v21, %v5962_v21 }
 0x115   : > { %632 = vadd.xlane.f32.xlu1 %v631_v30  ;;  %v640_v30 = vsel %vm359_vm0, %v560_v6, 0.0  ;;  %v564_v6 = vmul.f32 %v5967_v23, %v5967_v23  ;;  %v658_v23 = vsel %vm359_vm0, %v566_v14, 0.0  ;;  %v570_v14 = vmul.f32 %v5995_v34, %v5995_v34 }
 0x116   : > { %629 = vadd.xlane.f32.xlu0 %v628_v41  ;;  %v563_v41 = vmul.f32 %v5956_v19, %v5956_v19 }
 0x117   : > { %v652_v20 = vsel %vm359_vm0, %v564_v6, 0.0  ;;  %v568_v6 = vmul.f32 %v5983_v29, %v5983_v29  ;;  %v670_v29 = vsel %vm359_vm0, %v570_v14, 0.0  ;;  %v574_v14 = vmul.f32 %v6009_v39, %v6009_v39 }
 0x119   : > { %638 = vadd.xlane.f32.xlu1 %v637_v5  ;;  %v664_v25 = vsel %vm359_vm0, %v568_v6, 0.0  ;;  %v572_v6 = vmul.f32 %v6003_v37, %v6003_v37  ;;  %v682_v37 = vsel %vm359_vm0, %v574_v14, 0.0  ;;  %v578_v14 = vmul.f32 %v6027_v46, %v6027_v46 }
 0x11a   : > { %635 = vadd.xlane.f32.xlu0 %v634_v62  ;;  %v6297_v58 = vpop.xlane.xlu1 %367  ;;  %v649_v62 = vsel %vm359_vm0, %v563_v41, 0.0  ;;  %v567_v41 = vmul.f32 %v5970_v24, %v5970_v24 }
 0x11b   : > { %11348 = vst [vmem:[#allocation67_spill] sm:$0xff] %v6297_v58  ;;  %v6299_v8 = vpop.xlane.xlu0 %361  ;;  %v676_v34 = vsel %vm359_vm0, %v572_v6, 0.0  ;;  %v576_v6 = vmul.f32 %v6019_v43, %v6019_v43  ;;  %v694_v43 = vsel %vm359_vm0, %v578_v14, 0.0  ;;  %v582_v14 = vmul.f32 %v6045_v53, %v6045_v53  ;;  %v6952_v58 = vld [vmem:[%s5893_s10 + $0x678] sm:$0xff] }
 0x11c   : > { %11349 = vst [vmem:[#allocation68_spill] sm:$0xff] %v6299_v8  ;;  %11468 = vst [vmem:[#allocation169_spill] sm:$0xff] %v6952_v58  ;;  %v6966_v8 = vld [vmem:[%s5893_s10 + $0x718] sm:$0xff] }
 0x11d   : > { %644 = vadd.xlane.f32.xlu1 %v643_v11  ;;  %v688_v39 = vsel %vm359_vm0, %v576_v6, 0.0  ;;  %v580_v6 = vmul.f32 %v6039_v51, %v6039_v51  ;;  %v706_v51 = vsel %vm359_vm0, %v582_v14, 0.0  ;;  %v586_v14 = vmul.f32 %v6063_v60, %v6063_v60  ;;  %v11398_v60 = vld [vmem:[#allocation60_spill] sm:$0xff]  ;;  %11472 = vst [vmem:[#allocation173_spill] sm:$0xff] %v6966_v8 }
 0x11e   : > { %641 = vadd.xlane.f32.xlu0 %v640_v30  ;;  %v6307_v12 = vpop.xlane.xlu1 %370  ;;  %v655_v30 = vsel %vm359_vm0, %v565_v50, 0.0  ;;  %v569_v50 = vmul.f32 %v5980_v28, %v5980_v28 }
 0x11f   : > { %11350 = vst [vmem:[#allocation69_spill] sm:$0xff] %v6307_v12  ;;  %v6309_v5 = vpop.xlane.xlu0 %364  ;;  %v700_v46 = vsel %vm359_vm0, %v580_v6, 0.0  ;;  %v584_v6 = vmul.f32 %v6055_v57, %v6055_v57  ;;  %v718_v10 = vsel %vm359_vm0, %v586_v14, 0.0  ;;  %v590_v14 = vmul.f32 %v6077_v4, %v6077_v4  ;;  %v6955_v12 = vld [vmem:[%s5893_s10 + $0x668] sm:$0xff] }
 0x120   : > { %11351 = vst [vmem:[#allocation70_spill] sm:$0xff] %v6309_v5  ;;  %11469 = vst [vmem:[#allocation170_spill] sm:$0xff] %v6955_v12  ;;  %v6969_v5 = vld [vmem:[%s5893_s10 + $0x708] sm:$0xff] }
 0x121   : > { %650 = vadd.xlane.f32.xlu1 %v649_v62  ;;  %v712_v53 = vsel %vm359_vm0, %v584_v6, 0.0  ;;  %v588_v6 = vmul.f32 %v6071_v63, %v6071_v63  ;;  %v730_v63 = vsel %vm359_vm0, %v590_v14, 0.0  ;;  %v594_v14 = vmul.f32 %v6163_v44, %v6163_v44  ;;  %11473 = vst [vmem:[#allocation174_spill] sm:$0xff] %v6969_v5 }
 0x122   : > { %647 = vadd.xlane.f32.xlu0 %v646_v17  ;;  %v6317_v19 = vpop.xlane.xlu1 %376  ;;  %v661_v17 = vsel %vm359_vm0, %v567_v41, 0.0  ;;  %v571_v41 = vmul.f32 %v5992_v33, %v5992_v33 }
 0x123   : > { %11352 = vst [vmem:[#allocation71_spill] sm:$0xff] %v6317_v19  ;;  %v6319_v11 = vpop.xlane.xlu0 %373  ;;  %v724_v7 = vsel %vm359_vm0, %v588_v6, 0.0  ;;  %v592_v6 = vmul.f32 %v6091_v49, %v6091_v49  ;;  %v742_v49 = vsel %vm359_vm0, %v594_v14, 0.0  ;;  %v598_v14 = vmul.f32 %v6183_v27, %v6183_v27  ;;  %v6941_v19 = vld [vmem:[%s5893_s10 + $0x648] sm:$0xff] }
 0x124   : > { %11353 = vst [vmem:[#allocation72_spill] sm:$0xff] %v6319_v11  ;;  %v6938_v11 = vld [vmem:[%s5893_s10 + $0x658] sm:$0xff]  ;;  %11465 = vst [vmem:[#allocation166_spill] sm:$0xff] %v6941_v19 }
 0x125   : > { %656 = vadd.xlane.f32.xlu1 %v655_v30  ;;  %v736_v4 = vsel %vm359_vm0, %v592_v6, 0.0  ;;  %v596_v6 = vmul.f32 %v6173_v36, %v6173_v36 }
 0x126   : > { %653 = vadd.xlane.f32.xlu0 %v652_v20  ;;  %v6327_v21 = vpop.xlane.xlu1 %382  ;;  %v667_v20 = vsel %vm359_vm0, %v569_v50, 0.0  ;;  %v573_v50 = vmul.f32 %v5998_v35, %v5998_v35 }
 0x127   : > { %11354 = vst [vmem:[#allocation73_spill] sm:$0xff] %v6327_v21  ;;  %v6329_v62 = vpop.xlane.xlu0 %379  ;;  %v6927_v21 = vld [vmem:[%s5893_s10 + $0x628] sm:$0xff] }
 0x128   : > { %11355 = vst [vmem:[#allocation74_spill] sm:$0xff] %v6329_v62  ;;  %v6924_v62 = vld [vmem:[%s5893_s10 + $0x638] sm:$0xff] }
 0x129   : > { %662 = vadd.xlane.f32.xlu1 %v661_v17 }
 0x12a   : > { %659 = vadd.xlane.f32.xlu0 %v658_v23  ;;  %v6337_v24 = vpop.xlane.xlu1 %388  ;;  %v673_v23 = vsel %vm359_vm0, %v571_v41, 0.0  ;;  %v575_v41 = vmul.f32 %v6006_v38, %v6006_v38 }
 0x12b   : > { %11356 = vst [vmem:[#allocation75_spill] sm:$0xff] %v6337_v24  ;;  %v6339_v30 = vpop.xlane.xlu0 %385  ;;  %v6913_v24 = vld [vmem:[%s5893_s10 + $0x608] sm:$0xff] }
 0x12c   : > { %11357 = vst [vmem:[#allocation76_spill] sm:$0xff] %v6339_v30  ;;  %v6910_v30 = vld [vmem:[%s5893_s10 + $0x618] sm:$0xff] }
 0x12d   : > { %668 = vadd.xlane.f32.xlu1 %v667_v20 }
 0x12e   : > { %665 = vadd.xlane.f32.xlu0 %v664_v25  ;;  %v6347_v28 = vpop.xlane.xlu1 %394  ;;  %v679_v25 = vsel %vm359_vm0, %v573_v50, 0.0  ;;  %v577_v50 = vmul.f32 %v6016_v42, %v6016_v42 }
 0x12f   : > { %11358 = vst [vmem:[#allocation77_spill] sm:$0xff] %v6347_v28  ;;  %v6349_v17 = vpop.xlane.xlu0 %391  ;;  %v6899_v28 = vld [vmem:[%s5893_s10 + $0x568] sm:$0xff] }
 0x130   : > { %11359 = vst [vmem:[#allocation78_spill] sm:$0xff] %v6349_v17  ;;  %v6896_v17 = vld [vmem:[%s5893_s10 + $0x578] sm:$0xff] }
 0x131   : > { %674 = vadd.xlane.f32.xlu1 %v673_v23 }
 0x132   : > { %671 = vadd.xlane.f32.xlu0 %v670_v29  ;;  %v6357_v33 = vpop.xlane.xlu1 %400  ;;  %v685_v29 = vsel %vm359_vm0, %v575_v41, 0.0  ;;  %v579_v41 = vmul.f32 %v6024_v45, %v6024_v45 }
 0x133   : > { %11360 = vst [vmem:[#allocation79_spill] sm:$0xff] %v6357_v33  ;;  %v6359_v20 = vpop.xlane.xlu0 %397  ;;  %v6885_v33 = vld [vmem:[%s5893_s10 + $0x548] sm:$0xff] }
 0x134   : > { %11361 = vst [vmem:[#allocation80_spill] sm:$0xff] %v6359_v20  ;;  %v6882_v20 = vld [vmem:[%s5893_s10 + $0x558] sm:$0xff] }
 0x135   : > { %680 = vadd.xlane.f32.xlu1 %v679_v25 }
 0x136   : > { %677 = vadd.xlane.f32.xlu0 %v676_v34  ;;  %v6367_v35 = vpop.xlane.xlu1 %406  ;;  %v691_v34 = vsel %vm359_vm0, %v577_v50, 0.0  ;;  %v581_v50 = vmul.f32 %v6030_v47, %v6030_v47 }
 0x137   : > { %11362 = vst [vmem:[#allocation81_spill] sm:$0xff] %v6367_v35  ;;  %v6369_v23 = vpop.xlane.xlu0 %403  ;;  %v6871_v35 = vld [vmem:[%s5893_s10 + $0x528] sm:$0xff] }
 0x138   : > { %11363 = vst [vmem:[#allocation82_spill] sm:$0xff] %v6369_v23  ;;  %v6868_v23 = vld [vmem:[%s5893_s10 + $0x538] sm:$0xff] }
 0x139   : > { %686 = vadd.xlane.f32.xlu1 %v685_v29 }
 0x13a   : > { %683 = vadd.xlane.f32.xlu0 %v682_v37  ;;  %v6377_v38 = vpop.xlane.xlu1 %412  ;;  %v697_v37 = vsel %vm359_vm0, %v579_v41, 0.0  ;;  %v583_v41 = vmul.f32 %v6042_v52, %v6042_v52 }
 0x13b   : > { %11364 = vst [vmem:[#allocation83_spill] sm:$0xff] %v6377_v38  ;;  %v6379_v25 = vpop.xlane.xlu0 %409  ;;  %v6857_v38 = vld [vmem:[%s5893_s10 + $0x508] sm:$0xff] }
 0x13c   : > { %11365 = vst [vmem:[#allocation84_spill] sm:$0xff] %v6379_v25  ;;  %v6854_v25 = vld [vmem:[%s5893_s10 + $0x518] sm:$0xff] }
 0x13d   : > { %692 = vadd.xlane.f32.xlu1 %v691_v34 }
 0x13e   : > { %689 = vadd.xlane.f32.xlu0 %v688_v39  ;;  %v6387_v42 = vpop.xlane.xlu1 %418  ;;  %v703_v39 = vsel %vm359_vm0, %v581_v50, 0.0  ;;  %v585_v50 = vmul.f32 %v6052_v56, %v6052_v56  ;;  %v11406_v56 = vld [vmem:[#allocation64_spill] sm:$0xff] }
 0x13f   : > { %11366 = vst [vmem:[#allocation85_spill] sm:$0xff] %v6387_v42  ;;  %v6389_v29 = vpop.xlane.xlu0 %415  ;;  %v6843_v42 = vld [vmem:[%s5893_s10 + $0x468] sm:$0xff] }
 0x140   : > { %11367 = vst [vmem:[#allocation86_spill] sm:$0xff] %v6389_v29  ;;  %v6840_v29 = vld [vmem:[%s5893_s10 + $0x478] sm:$0xff] }
 0x141   : > { %698 = vadd.xlane.f32.xlu1 %v697_v37 }
 0x142   : > { %695 = vadd.xlane.f32.xlu0 %v694_v43  ;;  %v6397_v45 = vpop.xlane.xlu1 %424  ;;  %v709_v43 = vsel %vm359_vm0, %v583_v41, 0.0  ;;  %v587_v41 = vmul.f32 %v6060_v59, %v6060_v59 }
 0x143   : > { %11368 = vst [vmem:[#allocation87_spill] sm:$0xff] %v6397_v45  ;;  %v6399_v34 = vpop.xlane.xlu0 %421  ;;  %v6829_v45 = vld [vmem:[%s5893_s10 + $0x448] sm:$0xff] }
 0x144   : > { %11369 = vst [vmem:[#allocation88_spill] sm:$0xff] %v6399_v34  ;;  %v6826_v34 = vld [vmem:[%s5893_s10 + $0x458] sm:$0xff] }
 0x145   : > { %704 = vadd.xlane.f32.xlu1 %v703_v39 }
 0x146   : > { %701 = vadd.xlane.f32.xlu0 %v700_v46  ;;  %v6407_v47 = vpop.xlane.xlu1 %430  ;;  %v715_v46 = vsel %vm359_vm0, %v585_v50, 0.0  ;;  %v589_v50 = vmul.f32 %v6066_v61, %v6066_v61 }
 0x147   : > { %11370 = vst [vmem:[#allocation89_spill] sm:$0xff] %v6407_v47  ;;  %v6409_v37 = vpop.xlane.xlu0 %427  ;;  %v6815_v47 = vld [vmem:[%s5893_s10 + $0x428] sm:$0xff] }
 0x148   : > { %11371 = vst [vmem:[#allocation90_spill] sm:$0xff] %v6409_v37  ;;  %v6812_v37 = vld [vmem:[%s5893_s10 + $0x438] sm:$0xff] }
 0x149   : > { %710 = vadd.xlane.f32.xlu1 %v709_v43 }
 0x14a   : > { %707 = vadd.xlane.f32.xlu0 %v706_v51  ;;  %v6417_v52 = vpop.xlane.xlu1 %436  ;;  %v721_v51 = vsel %vm359_vm0, %v587_v41, 0.0  ;;  %v591_v41 = vmul.f32 %v6074_v3, %v6074_v3 }
 0x14b   : > { %11372 = vst [vmem:[#allocation91_spill] sm:$0xff] %v6417_v52  ;;  %v6419_v39 = vpop.xlane.xlu0 %433  ;;  %v6801_v52 = vld [vmem:[%s5893_s10 + $0x408] sm:$0xff] }
 0x14c   : > { %11373 = vst [vmem:[#allocation92_spill] sm:$0xff] %v6419_v39  ;;  %v6798_v39 = vld [vmem:[%s5893_s10 + $0x418] sm:$0xff] }
 0x14d   : > { %716 = vadd.xlane.f32.xlu1 %v715_v46 }
 0x14e   : > { %713 = vadd.xlane.f32.xlu0 %v712_v53  ;;  %v6427_v16 = vpop.xlane.xlu1 %442  ;;  %v727_v53 = vsel %vm359_vm0, %v589_v50, 0.0  ;;  %v593_v50 = vmul.f32 %v6088_v48, %v6088_v48 }
 0x14f   : > { %11374 = vst [vmem:[#allocation93_spill] sm:$0xff] %v6427_v16  ;;  %v6429_v43 = vpop.xlane.xlu0 %439  ;;  %v6787_v16 = vld [vmem:[%s5893_s10 + $0x368] sm:$0xff] }
 0x150   : > { %11375 = vst [vmem:[#allocation94_spill] sm:$0xff] %v6429_v43  ;;  %v6784_v43 = vld [vmem:[%s5893_s10 + $0x378] sm:$0xff] }
 0x151   : > { %722 = vadd.xlane.f32.xlu1 %v721_v51 }
 0x152   : > { %719 = vadd.xlane.f32.xlu0 %v718_v10  ;;  %v6437_v9 = vpop.xlane.xlu1 %448  ;;  %v733_v10 = vsel %vm359_vm0, %v591_v41, 0.0  ;;  %v595_v41 = vmul.f32 %v6160_v40, %v6160_v40 }
 0x153   : > { %11376 = vst [vmem:[#allocation95_spill] sm:$0xff] %v6437_v9  ;;  %v6439_v46 = vpop.xlane.xlu0 %445  ;;  %v6773_v9 = vld [vmem:[%s5893_s10 + $0x348] sm:$0xff] }
 0x154   : > { %11377 = vst [vmem:[#allocation96_spill] sm:$0xff] %v6439_v46  ;;  %v6770_v46 = vld [vmem:[%s5893_s10 + $0x358] sm:$0xff] }
 0x155   : > { %728 = vadd.xlane.f32.xlu1 %v727_v53 }
 0x156   : > { %725 = vadd.xlane.f32.xlu0 %v724_v7  ;;  %v6447_v61 = vpop.xlane.xlu1 %454  ;;  %v739_v7 = vsel %vm359_vm0, %v593_v50, 0.0  ;;  %v597_v50 = vmul.f32 %v6170_v13, %v6170_v13 }
 0x157   : > { %11378 = vst [vmem:[#allocation97_spill] sm:$0xff] %v6447_v61  ;;  %v6449_v51 = vpop.xlane.xlu0 %451  ;;  %v6759_v61 = vld [vmem:[%s5893_s10 + $0x328] sm:$0xff] }
 0x158   : > { %11379 = vst [vmem:[#allocation98_spill] sm:$0xff] %v6449_v51  ;;  %v6756_v51 = vld [vmem:[%s5893_s10 + $0x338] sm:$0xff] }
 0x159   : > { %734 = vadd.xlane.f32.xlu1 %v733_v10 }
 0x15a   : > { %731 = vadd.xlane.f32.xlu0 %v730_v63  ;;  %v6457_v3 = vpop.xlane.xlu1 %460  ;;  %v745_v63 = vsel %vm359_vm0, %v595_v41, 0.0  ;;  %v599_v41 = vmul.f32 %v6180_v32, %v6180_v32 }
 0x15b   : > { %11380 = vst [vmem:[#allocation99_spill] sm:$0xff] %v6457_v3  ;;  %v6459_v53 = vpop.xlane.xlu0 %457  ;;  %v6745_v3 = vld [vmem:[%s5893_s10 + $0x308] sm:$0xff] }
 0x15c   : > { %11381 = vst [vmem:[#allocation100_spill] sm:$0xff] %v6459_v53  ;;  %v6742_v53 = vld [vmem:[%s5893_s10 + $0x318] sm:$0xff] }
 0x15d   : > { %740 = vadd.xlane.f32.xlu1 %v739_v7  ;;  %v748_v7 = vsel %vm359_vm0, %v596_v6, 0.0  ;;  %v600_v6 = vmul.f32 %v6193_v22, %v6193_v22 }
 0x15e   : > { %737 = vadd.xlane.f32.xlu0 %v736_v4  ;;  %v6467_v48 = vpop.xlane.xlu1 %466  ;;  %v751_v4 = vsel %vm359_vm0, %v597_v50, 0.0  ;;  %v601_v50 = vmul.f32 %v6190_v26, %v6190_v26 }
 0x15f   : > { %11382 = vst [vmem:[#allocation101_spill] sm:$0xff] %v6467_v48  ;;  %v6469_v10 = vpop.xlane.xlu0 %463  ;;  %v6731_v48 = vld [vmem:[%s5893_s10 + $0x268] sm:$0xff] }
 0x160   : > { %11383 = vst [vmem:[#allocation102_spill] sm:$0xff] %v6469_v10  ;;  %v6728_v10 = vld [vmem:[%s5893_s10 + $0x278] sm:$0xff] }
 0x161   : > { %746 = vadd.xlane.f32.xlu1 %v745_v63  ;;  %v754_v63 = vsel %vm359_vm0, %v598_v14, 0.0  ;;  %v602_v14 = vmul.f32 %v6203_v55, %v6203_v55 }
 0x162   : > { %743 = vadd.xlane.f32.xlu0 %v742_v49  ;;  %v6477_v40 = vpop.xlane.xlu1 %472  ;;  %v757_v49 = vsel %vm359_vm0, %v599_v41, 0.0  ;;  %v603_v41 = vmul.f32 %v6200_v18, %v6200_v18 }
 0x163   : > { %11384 = vst [vmem:[#allocation103_spill] sm:$0xff] %v6477_v40  ;;  %v6479_v44 = vpop.xlane.xlu0 %469  ;;  %v6717_v40 = vld [vmem:[%s5893_s10 + $0x248] sm:$0xff] }
 0x164   : > { %11385 = vst [vmem:[#allocation104_spill] sm:$0xff] %v6479_v44  ;;  %v6714_v44 = vld [vmem:[%s5893_s10 + $0x258] sm:$0xff] }
 0x165   : > { %752 = vadd.xlane.f32.xlu1 %v751_v4  ;;  %v763_v4 = vsel %vm359_vm0, %v601_v50, 0.0  ;;  %v605_v50 = vmul.f32 %v6210_v15, %v6210_v15 }
 0x166   : > { %749 = vadd.xlane.f32.xlu0 %v748_v7  ;;  %v6487_v13 = vpop.xlane.xlu1 %478  ;;  %v760_v7 = vsel %vm359_vm0, %v600_v6, 0.0  ;;  %v604_v6 = vmul.f32 %v6213_v31, %v6213_v31 }
 0x167   : > { %11386 = vst [vmem:[#allocation105_spill] sm:$0xff] %v6487_v13  ;;  %v6489_v36 = vpop.xlane.xlu0 %475  ;;  %v6703_v13 = vld [vmem:[%s5893_s10 + $0x228] sm:$0xff] }
 0x168   : > { %11387 = vst [vmem:[#allocation106_spill] sm:$0xff] %v6489_v36  ;;  %v6700_v36 = vld [vmem:[%s5893_s10 + $0x238] sm:$0xff] }
 0x169   : > { %758 = vadd.xlane.f32.xlu1 %v757_v49  ;;  %v769_v49 = vsel %vm359_vm0, %v603_v41, 0.0  ;;  %v607_v41 = vmul.f32 %v11394_v0, %v11394_v0 }
 0x16a   : > { %755 = vadd.xlane.f32.xlu0 %v754_v63  ;;  %v6497_v32 = vpop.xlane.xlu1 %484  ;;  %v766_v63 = vsel %vm359_vm0, %v602_v14, 0.0  ;;  %v11395_v14 = vld [vmem:[#allocation59_spill] sm:$0xff] }
 0x16b   : > { %11388 = vst [vmem:[#allocation107_spill] sm:$0xff] %v6497_v32  ;;  %v6499_v27 = vpop.xlane.xlu0 %481  ;;  %v606_v2 = vmul.f32 %v11395_v14, %v11395_v14  ;;  %v6689_v32 = vld [vmem:[%s5893_s10 + $0x208] sm:$0xff] }
 0x16c   : > { %11389 = vst [vmem:[#allocation108_spill] sm:$0xff] %v6499_v27  ;;  %v6686_v27 = vld [vmem:[%s5893_s10 + $0x218] sm:$0xff] }
 0x16d   : > { %764 = vadd.xlane.f32.xlu1 %v763_v4  ;;  %v775_v4 = vsel %vm359_vm0, %v605_v50, 0.0  ;;  %v609_v50 = vmul.f32 %v11398_v60, %v11398_v60 }
 0x16e   : > { %761 = vadd.xlane.f32.xlu0 %v760_v7  ;;  %v6507_v26 = vpop.xlane.xlu1 %490  ;;  %v772_v7 = vsel %vm359_vm0, %v604_v6, 0.0  ;;  %v11399_v6 = vld [vmem:[#allocation61_spill] sm:$0xff] }
 0x16f   : > { %11390 = vst [vmem:[#allocation109_spill] sm:$0xff] %v6507_v26  ;;  %v6509_v22 = vpop.xlane.xlu0 %487  ;;  %v608_v59 = vmul.f32 %v11399_v6, %v11399_v6  ;;  %v6675_v26 = vld [vmem:[%s5893_s10 + $0x168] sm:$0xff] }
 0x170   : > { %11391 = vst [vmem:[#allocation110_spill] sm:$0xff] %v6509_v22  ;;  %v6672_v22 = vld [vmem:[%s5893_s10 + $0x178] sm:$0xff] }
 0x171   : > { %770 = vadd.xlane.f32.xlu1 %v769_v49  ;;  %v781_v49 = vsel %vm359_vm0, %v607_v41, 0.0  ;;  %v784_v14 = vsel %vm359_vm0, %v608_v59, 0.0  ;;  %v611_v41 = vmul.f32 %v11402_v1, %v11402_v1  ;;  %v11407_v59 = vld [vmem:[#allocation65_spill] sm:$0xff] }
 0x172   : > { %767 = vadd.xlane.f32.xlu0 %v766_v63  ;;  %v6517_v18 = vpop.xlane.xlu1 %496  ;;  %v778_v63 = vsel %vm359_vm0, %v606_v2, 0.0  ;;  %v11403_v2 = vld [vmem:[#allocation63_spill] sm:$0xff]  ;;  %v612_v1 = vmul.f32 %v11407_v59, %v11407_v59 }
 0x173   : > { %11392 = vst [vmem:[#allocation111_spill] sm:$0xff] %v6517_v18  ;;  %v6519_v55 = vpop.xlane.xlu0 %493  ;;  %v610_v57 = vmul.f32 %v11403_v2, %v11403_v2  ;;  %v6661_v18 = vld [vmem:[%s5893_s10 + $0x148] sm:$0xff] }
 0x174   : > { %11393 = vst [vmem:[#allocation112_spill] sm:$0xff] %v6519_v55  ;;  %v6658_v55 = vld [vmem:[%s5893_s10 + $0x158] sm:$0xff] }
 0x175   : > { %776 = vadd.xlane.f32.xlu1 %v775_v4  ;;  %v790_v6 = vsel %vm359_vm0, %v610_v57, 0.0  ;;  %v615_v57 = vmul.f32 %v6260_v54, %v6260_v54 }
 0x176   : > { %773 = vadd.xlane.f32.xlu0 %v772_v7  ;;  %v6527_v15 = vpop.xlane.xlu1 %502  ;;  %v787_v7 = vsel %vm359_vm0, %v609_v50, 0.0  ;;  %v613_v50 = vmul.f32 %v11406_v56, %v11406_v56 }
 0x177   : > { %11396 = vst [vmem:[#allocation58_spill] sm:$0xff] %v6527_v15  ;;  %v6529_v31 = vpop.xlane.xlu0 %499  ;;  %v805_v59 = vsel %vm359_vm0, %v615_v57, 0.0  ;;  %v6588_v57 = vld [vmem:[%s5893_s10 + $0x38] sm:$0xff]  ;;  %v6647_v15 = vld [vmem:[%s5893_s10 + $0x128] sm:$0xff] }
 0x178   : > { %11397 = vst [vmem:[#allocation59_spill] sm:$0xff] %v6529_v31  ;;  %v799_v2 = vsel %vm359_vm0, %v613_v50, 0.0  ;;  %v6644_v31 = vld [vmem:[%s5893_s10 + $0x138] sm:$0xff] }
 0x179   : > { %782 = vadd.xlane.f32.xlu1 %v781_v49 }
 0x17a   : > { %779 = vadd.xlane.f32.xlu0 %v778_v63  ;;  %v6537_v0 = vpop.xlane.xlu1 %508  ;;  %v793_v63 = vsel %vm359_vm0, %v611_v41, 0.0  ;;  %v796_v41 = vsel %vm359_vm0, %v612_v1, 0.0  ;;  %v6577_v1 = vld [vmem:[%s5893_s10 + $0x8] sm:$0xff] }
 0x17b   : > { %11400 = vst [vmem:[#allocation60_spill] sm:$0xff] %v6537_v0  ;;  %v6539_v4 = vpop.xlane.xlu0 %505  ;;  %v6633_v0 = vld [vmem:[%s5893_s10 + $0x108] sm:$0xff] }
 0x17c   : > { %11401 = vst [vmem:[#allocation61_spill] sm:$0xff] %v6539_v4  ;;  %v6630_v4 = vld [vmem:[%s5893_s10 + $0x118] sm:$0xff] }
 0x17d   : > { %788 = vadd.xlane.f32.xlu1 %v787_v7 }
 0x17e   : > { %785 = vadd.xlane.f32.xlu0 %v784_v14  ;;  %v6547_v60 = vpop.xlane.xlu1 %514 }
 0x17f   : > { %11404 = vst [vmem:[#allocation62_spill] sm:$0xff] %v6547_v60  ;;  %v6549_v49 = vpop.xlane.xlu0 %511  ;;  %v6619_v60 = vld [vmem:[%s5893_s10 + $0x68] sm:$0xff] }
 0x180   : > { %11405 = vst [vmem:[#allocation63_spill] sm:$0xff] %v6549_v49  ;;  %v11410_v49 = vld [vmem:[#allocation66_spill] sm:$0xff] }
 0x181   : > { %794 = vadd.xlane.f32.xlu1 %v793_v63  ;;  %v614_v56 = vmul.f32 %v11410_v49, %v11410_v49 }
 0x182   : > { %791 = vadd.xlane.f32.xlu0 %v790_v6  ;;  %v6557_v7 = vpop.xlane.xlu1 %520 }
 0x183   : > { %11408 = vst [vmem:[#allocation64_spill] sm:$0xff] %v6557_v7  ;;  %v6559_v14 = vpop.xlane.xlu0 %517  ;;  %v802_v50 = vsel %vm359_vm0, %v614_v56, 0.0  ;;  %v6591_v56 = vld [vmem:[%s5893_s10 + $0x28] sm:$0xff]  ;;  %v6616_v7 = vld [vmem:[%s5893_s10 + $0x78] sm:$0xff] }
 0x184   : > { %11409 = vst [vmem:[#allocation65_spill] sm:$0xff] %v6559_v14  ;;  %v6574_v14 = vld [vmem:[%s5893_s10 + $0x18] sm:$0xff] }
 0x185   : > { %800 = vadd.xlane.f32.xlu1 %v799_v2  ;;  %v908_v2 = vsel %vm359_vm0, %v6574_v14, 0.0 }
 0x186   : > { %797 = vadd.xlane.f32.xlu0 %v796_v41  ;;  %v6567_v63 = vpop.xlane.xlu1 %526  ;;  %v905_v41 = vsel %vm359_vm0, %v6577_v1, 0.0 }
 0x187   : > { %11411 = vst [vmem:[#allocation66_spill] sm:$0xff] %v6567_v63  ;;  %v6569_v6 = vpop.xlane.xlu0 %523  ;;  %v6605_v63 = vld [vmem:[%s5893_s10 + $0x48] sm:$0xff] }
 0x188   : > { %11412 = vst [vmem:[#allocation113_spill] sm:$0xff] %v6569_v6  ;;  %v6602_v6 = vld [vmem:[%s5893_s10 + $0x58] sm:$0xff] }
 0x189   : > { %806 = vadd.xlane.f32.xlu1 %v805_v59 }
 0x18a   : > { %803 = vadd.xlane.f32.xlu0 %v802_v50  ;;  %v6579_v54 = vpop.xlane.xlu1 %532 }
 0x18b   : > { %11413 = vst [vmem:[#allocation114_spill] sm:$0xff] %v6579_v54  ;;  %v6581_v49 = vpop.xlane.xlu0 %529  ;;  %v911_v54 = vsel %vm359_vm0, %v6591_v56, 0.0 }
 0x18c   : > { %11414 = vst [vmem:[#allocation115_spill] sm:$0xff] %v6581_v49  ;;  %v914_v49 = vsel %vm359_vm0, %v6588_v57, 0.0 }
 0x18d   : > { %909 = vadd.xlane.f32.xlu1 %v908_v2 }
 0x18e   : > { %906 = vadd.xlane.f32.xlu0 %v905_v41  ;;  %v6593_v59 = vpop.xlane.xlu1 %538 }
 0x18f   : > { %11415 = vst [vmem:[#allocation116_spill] sm:$0xff] %v6593_v59  ;;  %v6595_v50 = vpop.xlane.xlu0 %535  ;;  %v917_v59 = vsel %vm359_vm0, %v6605_v63, 0.0 }
 0x190   : > { %11416 = vst [vmem:[#allocation117_spill] sm:$0xff] %v6595_v50  ;;  %v920_v50 = vsel %vm359_vm0, %v6602_v6, 0.0 }
 0x191   : > { %915 = vadd.xlane.f32.xlu1 %v914_v49 }
 0x192   : > { %912 = vadd.xlane.f32.xlu0 %v911_v54  ;;  %v6607_v2 = vpop.xlane.xlu1 %544 }
 0x193   : > { %11417 = vst [vmem:[#allocation118_spill] sm:$0xff] %v6607_v2  ;;  %v6609_v41 = vpop.xlane.xlu0 %541  ;;  %v923_v2 = vsel %vm359_vm0, %v6619_v60, 0.0 }
 0x194   : > { %11418 = vst [vmem:[#allocation119_spill] sm:$0xff] %v6609_v41  ;;  %v926_v41 = vsel %vm359_vm0, %v6616_v7, 0.0 }
 0x195   : > { %921 = vadd.xlane.f32.xlu1 %v920_v50 }
 0x196   : > { %918 = vadd.xlane.f32.xlu0 %v917_v59  ;;  %v6621_v49 = vpop.xlane.xlu1 %550 }
 0x197   : > { %11419 = vst [vmem:[#allocation120_spill] sm:$0xff] %v6621_v49  ;;  %v6623_v54 = vpop.xlane.xlu0 %547  ;;  %v929_v49 = vsel %vm359_vm0, %v6633_v0, 0.0 }
 0x198   : > { %11420 = vst [vmem:[#allocation121_spill] sm:$0xff] %v6623_v54  ;;  %v932_v54 = vsel %vm359_vm0, %v6630_v4, 0.0 }
 0x199   : > { %927 = vadd.xlane.f32.xlu1 %v926_v41 }
 0x19a   : > { %924 = vadd.xlane.f32.xlu0 %v923_v2  ;;  %v6635_v50 = vpop.xlane.xlu1 %620 }
 0x19b   : > { %11421 = vst [vmem:[#allocation122_spill] sm:$0xff] %v6635_v50  ;;  %v6637_v59 = vpop.xlane.xlu0 %617  ;;  %v935_v50 = vsel %vm359_vm0, %v6647_v15, 0.0 }
 0x19c   : > { %11422 = vst [vmem:[#allocation123_spill] sm:$0xff] %v6637_v59  ;;  %v938_v59 = vsel %vm359_vm0, %v6644_v31, 0.0 }
 0x19d   : > { %933 = vadd.xlane.f32.xlu1 %v932_v54 }
 0x19e   : > { %930 = vadd.xlane.f32.xlu0 %v929_v49  ;;  %v6649_v41 = vpop.xlane.xlu1 %626 }
 0x19f   : > { %11423 = vst [vmem:[#allocation124_spill] sm:$0xff] %v6649_v41  ;;  %v6651_v2 = vpop.xlane.xlu0 %623  ;;  %v941_v41 = vsel %vm359_vm0, %v6661_v18, 0.0 }
 0x1a0   : > { %11424 = vst [vmem:[#allocation125_spill] sm:$0xff] %v6651_v2  ;;  %v944_v2 = vsel %vm359_vm0, %v6658_v55, 0.0 }
 0x1a1   : > { %939 = vadd.xlane.f32.xlu1 %v938_v59 }
 0x1a2   : > { %936 = vadd.xlane.f32.xlu0 %v935_v50  ;;  %v6663_v54 = vpop.xlane.xlu1 %632 }
 0x1a3   : > { %11425 = vst [vmem:[#allocation126_spill] sm:$0xff] %v6663_v54  ;;  %v6665_v49 = vpop.xlane.xlu0 %629  ;;  %v947_v54 = vsel %vm359_vm0, %v6675_v26, 0.0 }
 0x1a4   : > { %11426 = vst [vmem:[#allocation127_spill] sm:$0xff] %v6665_v49  ;;  %v950_v49 = vsel %vm359_vm0, %v6672_v22, 0.0 }
 0x1a5   : > { %945 = vadd.xlane.f32.xlu1 %v944_v2 }
 0x1a6   : > { %942 = vadd.xlane.f32.xlu0 %v941_v41  ;;  %v6677_v59 = vpop.xlane.xlu1 %638 }
 0x1a7   : > { %11427 = vst [vmem:[#allocation128_spill] sm:$0xff] %v6677_v59  ;;  %v6679_v50 = vpop.xlane.xlu0 %635  ;;  %v953_v59 = vsel %vm359_vm0, %v6689_v32, 0.0 }
 0x1a8   : > { %11428 = vst [vmem:[#allocation129_spill] sm:$0xff] %v6679_v50  ;;  %v956_v50 = vsel %vm359_vm0, %v6686_v27, 0.0 }
 0x1a9   : > { %951 = vadd.xlane.f32.xlu1 %v950_v49 }
 0x1aa   : > { %948 = vadd.xlane.f32.xlu0 %v947_v54  ;;  %v6691_v2 = vpop.xlane.xlu1 %644 }
 0x1ab   : > { %11429 = vst [vmem:[#allocation130_spill] sm:$0xff] %v6691_v2  ;;  %v6693_v41 = vpop.xlane.xlu0 %641  ;;  %v959_v2 = vsel %vm359_vm0, %v6703_v13, 0.0 }
 0x1ac   : > { %11430 = vst [vmem:[#allocation131_spill] sm:$0xff] %v6693_v41  ;;  %v962_v41 = vsel %vm359_vm0, %v6700_v36, 0.0 }
 0x1ad   : > { %957 = vadd.xlane.f32.xlu1 %v956_v50 }
 0x1ae   : > { %954 = vadd.xlane.f32.xlu0 %v953_v59  ;;  %v6705_v49 = vpop.xlane.xlu1 %650 }
 0x1af   : > { %11431 = vst [vmem:[#allocation132_spill] sm:$0xff] %v6705_v49  ;;  %v6707_v54 = vpop.xlane.xlu0 %647  ;;  %v965_v49 = vsel %vm359_vm0, %v6717_v40, 0.0 }
 0x1b0   : > { %11432 = vst [vmem:[#allocation133_spill] sm:$0xff] %v6707_v54  ;;  %v968_v54 = vsel %vm359_vm0, %v6714_v44, 0.0 }
 0x1b1   : > { %963 = vadd.xlane.f32.xlu1 %v962_v41 }
 0x1b2   : > { %960 = vadd.xlane.f32.xlu0 %v959_v2  ;;  %v6719_v50 = vpop.xlane.xlu1 %656 }
 0x1b3   : > { %11433 = vst [vmem:[#allocation134_spill] sm:$0xff] %v6719_v50  ;;  %v6721_v59 = vpop.xlane.xlu0 %653  ;;  %v971_v50 = vsel %vm359_vm0, %v6731_v48, 0.0 }
 0x1b4   : > { %11434 = vst [vmem:[#allocation135_spill] sm:$0xff] %v6721_v59  ;;  %v974_v59 = vsel %vm359_vm0, %v6728_v10, 0.0 }
 0x1b5   : > { %969 = vadd.xlane.f32.xlu1 %v968_v54 }
 0x1b6   : > { %966 = vadd.xlane.f32.xlu0 %v965_v49  ;;  %v6733_v41 = vpop.xlane.xlu1 %662 }
 0x1b7   : > { %11435 = vst [vmem:[#allocation136_spill] sm:$0xff] %v6733_v41  ;;  %v6735_v2 = vpop.xlane.xlu0 %659  ;;  %v977_v41 = vsel %vm359_vm0, %v6745_v3, 0.0 }
 0x1b8   : > { %11436 = vst [vmem:[#allocation137_spill] sm:$0xff] %v6735_v2  ;;  %v980_v2 = vsel %vm359_vm0, %v6742_v53, 0.0 }
 0x1b9   : > { %975 = vadd.xlane.f32.xlu1 %v974_v59 }
 0x1ba   : > { %972 = vadd.xlane.f32.xlu0 %v971_v50  ;;  %v6747_v54 = vpop.xlane.xlu1 %668 }
 0x1bb   : > { %11437 = vst [vmem:[#allocation138_spill] sm:$0xff] %v6747_v54  ;;  %v6749_v49 = vpop.xlane.xlu0 %665  ;;  %v983_v54 = vsel %vm359_vm0, %v6759_v61, 0.0 }
 0x1bc   : > { %11438 = vst [vmem:[#allocation139_spill] sm:$0xff] %v6749_v49  ;;  %v986_v49 = vsel %vm359_vm0, %v6756_v51, 0.0 }
 0x1bd   : > { %981 = vadd.xlane.f32.xlu1 %v980_v2 }
 0x1be   : > { %978 = vadd.xlane.f32.xlu0 %v977_v41  ;;  %v6761_v59 = vpop.xlane.xlu1 %674 }
 0x1bf   : > { %11439 = vst [vmem:[#allocation140_spill] sm:$0xff] %v6761_v59  ;;  %v6763_v50 = vpop.xlane.xlu0 %671  ;;  %v989_v59 = vsel %vm359_vm0, %v6773_v9, 0.0 }
 0x1c0   : > { %11440 = vst [vmem:[#allocation141_spill] sm:$0xff] %v6763_v50  ;;  %v992_v50 = vsel %vm359_vm0, %v6770_v46, 0.0 }
 0x1c1   : > { %987 = vadd.xlane.f32.xlu1 %v986_v49 }
 0x1c2   : > { %984 = vadd.xlane.f32.xlu0 %v983_v54  ;;  %v6775_v2 = vpop.xlane.xlu1 %680 }
 0x1c3   : > { %11441 = vst [vmem:[#allocation142_spill] sm:$0xff] %v6775_v2  ;;  %v6777_v41 = vpop.xlane.xlu0 %677  ;;  %v995_v2 = vsel %vm359_vm0, %v6787_v16, 0.0 }
 0x1c4   : > { %11442 = vst [vmem:[#allocation143_spill] sm:$0xff] %v6777_v41  ;;  %v998_v41 = vsel %vm359_vm0, %v6784_v43, 0.0 }
 0x1c5   : > { %993 = vadd.xlane.f32.xlu1 %v992_v50 }
 0x1c6   : > { %990 = vadd.xlane.f32.xlu0 %v989_v59  ;;  %v6789_v49 = vpop.xlane.xlu1 %686 }
 0x1c7   : > { %11443 = vst [vmem:[#allocation144_spill] sm:$0xff] %v6789_v49  ;;  %v6791_v54 = vpop.xlane.xlu0 %683  ;;  %v1001_v49 = vsel %vm359_vm0, %v6801_v52, 0.0 }
 0x1c8   : > { %11444 = vst [vmem:[#allocation145_spill] sm:$0xff] %v6791_v54  ;;  %v1004_v54 = vsel %vm359_vm0, %v6798_v39, 0.0 }
 0x1c9   : > { %999 = vadd.xlane.f32.xlu1 %v998_v41 }
 0x1ca   : > { %996 = vadd.xlane.f32.xlu0 %v995_v2  ;;  %v6803_v50 = vpop.xlane.xlu1 %692 }
 0x1cb   : > { %11445 = vst [vmem:[#allocation146_spill] sm:$0xff] %v6803_v50  ;;  %v6805_v59 = vpop.xlane.xlu0 %689  ;;  %v1010_v50 = vsel %vm359_vm0, %v6812_v37, 0.0 }
 0x1cc   : > { %11446 = vst [vmem:[#allocation147_spill] sm:$0xff] %v6805_v59  ;;  %v1007_v59 = vsel %vm359_vm0, %v6815_v47, 0.0 }
 0x1cd   : > { %1005 = vadd.xlane.f32.xlu1 %v1004_v54 }
 0x1ce   : > { %1002 = vadd.xlane.f32.xlu0 %v1001_v49  ;;  %v6817_v41 = vpop.xlane.xlu1 %698 }
 0x1cf   : > { %11447 = vst [vmem:[#allocation148_spill] sm:$0xff] %v6817_v41  ;;  %v6819_v2 = vpop.xlane.xlu0 %695  ;;  %v1013_v41 = vsel %vm359_vm0, %v6829_v45, 0.0 }
 0x1d0   : > { %11448 = vst [vmem:[#allocation149_spill] sm:$0xff] %v6819_v2  ;;  %v1016_v2 = vsel %vm359_vm0, %v6826_v34, 0.0 }
 0x1d1   : > { %1011 = vadd.xlane.f32.xlu1 %v1010_v50 }
 0x1d2   : > { %1008 = vadd.xlane.f32.xlu0 %v1007_v59  ;;  %v6831_v54 = vpop.xlane.xlu1 %704 }
 0x1d3   : > { %11449 = vst [vmem:[#allocation150_spill] sm:$0xff] %v6831_v54  ;;  %v6833_v49 = vpop.xlane.xlu0 %701  ;;  %v1019_v54 = vsel %vm359_vm0, %v6843_v42, 0.0 }
 0x1d4   : > { %11450 = vst [vmem:[#allocation151_spill] sm:$0xff] %v6833_v49  ;;  %v1022_v49 = vsel %vm359_vm0, %v6840_v29, 0.0 }
 0x1d5   : > { %1017 = vadd.xlane.f32.xlu1 %v1016_v2 }
 0x1d6   : > { %1014 = vadd.xlane.f32.xlu0 %v1013_v41  ;;  %v6845_v50 = vpop.xlane.xlu1 %710 }
 0x1d7   : > { %11451 = vst [vmem:[#allocation152_spill] sm:$0xff] %v6845_v50  ;;  %v6847_v59 = vpop.xlane.xlu0 %707  ;;  %v1025_v50 = vsel %vm359_vm0, %v6857_v38, 0.0 }
 0x1d8   : > { %11452 = vst [vmem:[#allocation153_spill] sm:$0xff] %v6847_v59  ;;  %v1028_v59 = vsel %vm359_vm0, %v6854_v25, 0.0 }
 0x1d9   : > { %1023 = vadd.xlane.f32.xlu1 %v1022_v49 }
 0x1da   : > { %1020 = vadd.xlane.f32.xlu0 %v1019_v54  ;;  %v6859_v2 = vpop.xlane.xlu1 %716 }
 0x1db   : > { %11453 = vst [vmem:[#allocation154_spill] sm:$0xff] %v6859_v2  ;;  %v6861_v41 = vpop.xlane.xlu0 %713  ;;  %v1031_v2 = vsel %vm359_vm0, %v6871_v35, 0.0 }
 0x1dc   : > { %11454 = vst [vmem:[#allocation155_spill] sm:$0xff] %v6861_v41  ;;  %v1034_v41 = vsel %vm359_vm0, %v6868_v23, 0.0 }
 0x1dd   : > { %1029 = vadd.xlane.f32.xlu1 %v1028_v59 }
 0x1de   : > { %1026 = vadd.xlane.f32.xlu0 %v1025_v50  ;;  %v6873_v49 = vpop.xlane.xlu1 %722 }
 0x1df   : > { %11455 = vst [vmem:[#allocation156_spill] sm:$0xff] %v6873_v49  ;;  %v6875_v54 = vpop.xlane.xlu0 %719  ;;  %v1037_v49 = vsel %vm359_vm0, %v6885_v33, 0.0 }
 0x1e0   : > { %11456 = vst [vmem:[#allocation157_spill] sm:$0xff] %v6875_v54  ;;  %v1040_v54 = vsel %vm359_vm0, %v6882_v20, 0.0 }
 0x1e1   : > { %1035 = vadd.xlane.f32.xlu1 %v1034_v41 }
 0x1e2   : > { %1032 = vadd.xlane.f32.xlu0 %v1031_v2  ;;  %v6887_v59 = vpop.xlane.xlu1 %728 }
 0x1e3   : > { %11457 = vst [vmem:[#allocation158_spill] sm:$0xff] %v6887_v59  ;;  %v6889_v50 = vpop.xlane.xlu0 %725  ;;  %v1043_v59 = vsel %vm359_vm0, %v6899_v28, 0.0 }
 0x1e4   : > { %11458 = vst [vmem:[#allocation159_spill] sm:$0xff] %v6889_v50  ;;  %v1046_v50 = vsel %vm359_vm0, %v6896_v17, 0.0 }
 0x1e5   : > { %1041 = vadd.xlane.f32.xlu1 %v1040_v54 }
 0x1e6   : > { %1038 = vadd.xlane.f32.xlu0 %v1037_v49  ;;  %v6901_v41 = vpop.xlane.xlu1 %734 }
 0x1e7   : > { %11459 = vst [vmem:[#allocation160_spill] sm:$0xff] %v6901_v41  ;;  %v6903_v2 = vpop.xlane.xlu0 %731  ;;  %v1049_v41 = vsel %vm359_vm0, %v6913_v24, 0.0 }
 0x1e8   : > { %11460 = vst [vmem:[#allocation161_spill] sm:$0xff] %v6903_v2  ;;  %v1052_v2 = vsel %vm359_vm0, %v6910_v30, 0.0 }
 0x1e9   : > { %1047 = vadd.xlane.f32.xlu1 %v1046_v50 }
 0x1ea   : > { %1044 = vadd.xlane.f32.xlu0 %v1043_v59  ;;  %v6915_v54 = vpop.xlane.xlu1 %740 }
 0x1eb   : > { %11461 = vst [vmem:[#allocation162_spill] sm:$0xff] %v6915_v54  ;;  %v6917_v49 = vpop.xlane.xlu0 %737  ;;  %v1055_v54 = vsel %vm359_vm0, %v6927_v21, 0.0 }
 0x1ec   : > { %11462 = vst [vmem:[#allocation163_spill] sm:$0xff] %v6917_v49  ;;  %v1058_v49 = vsel %vm359_vm0, %v6924_v62, 0.0 }
 0x1ed   : > { %1053 = vadd.xlane.f32.xlu1 %v1052_v2 }
 0x1ee   : > { %1050 = vadd.xlane.f32.xlu0 %v1049_v41  ;;  %v6929_v50 = vpop.xlane.xlu1 %746 }
 0x1ef   : > { %11463 = vst [vmem:[#allocation164_spill] sm:$0xff] %v6929_v50  ;;  %v6931_v59 = vpop.xlane.xlu0 %743  ;;  %v1061_v50 = vsel %vm359_vm0, %v6941_v19, 0.0 }
 0x1f0   : > { %11464 = vst [vmem:[#allocation165_spill] sm:$0xff] %v6931_v59  ;;  %v1064_v59 = vsel %vm359_vm0, %v6938_v11, 0.0 }
 0x1f1   : > { %1059 = vadd.xlane.f32.xlu1 %v1058_v49 }
 0x1f2   : > { %1056 = vadd.xlane.f32.xlu0 %v1055_v54  ;;  %v6943_v2 = vpop.xlane.xlu1 %752 }
 0x1f3   : > { %11466 = vst [vmem:[#allocation167_spill] sm:$0xff] %v6943_v2  ;;  %v6945_v41 = vpop.xlane.xlu0 %749  ;;  %v1067_v2 = vsel %vm359_vm0, %v6955_v12, 0.0  ;;  %v6983_v12 = vld [vmem:[%s5893_s10 + $0x728] sm:$0xff] }
 0x1f4   : > { %11467 = vst [vmem:[#allocation168_spill] sm:$0xff] %v6945_v41  ;;  %v1070_v41 = vsel %vm359_vm0, %v6952_v58, 0.0  ;;  %v6980_v58 = vld [vmem:[%s5893_s10 + $0x738] sm:$0xff]  ;;  %11477 = vst [vmem:[#allocation178_spill] sm:$0xff] %v6983_v12 }
 0x1f5   : > { %1065 = vadd.xlane.f32.xlu1 %v1064_v59  ;;  %11476 = vst [vmem:[#allocation177_spill] sm:$0xff] %v6980_v58 }
 0x1f6   : > { %1062 = vadd.xlane.f32.xlu0 %v1061_v50  ;;  %v6957_v49 = vpop.xlane.xlu1 %758 }
 0x1f7   : > { %11470 = vst [vmem:[#allocation171_spill] sm:$0xff] %v6957_v49  ;;  %v6959_v54 = vpop.xlane.xlu0 %755  ;;  %v1073_v49 = vsel %vm359_vm0, %v6969_v5, 0.0  ;;  %v6997_v5 = vld [vmem:[%s5893_s10 + $0x748] sm:$0xff] }
 0x1f8   : > { %11471 = vst [vmem:[#allocation172_spill] sm:$0xff] %v6959_v54  ;;  %v1076_v54 = vsel %vm359_vm0, %v6966_v8, 0.0  ;;  %v6994_v8 = vld [vmem:[%s5893_s10 + $0x758] sm:$0xff]  ;;  %11480 = vst [vmem:[#allocation181_spill] sm:$0xff] %v6997_v5 }
 0x1f9   : > { %1071 = vadd.xlane.f32.xlu1 %v1070_v41 }
 0x1fa   : > { %1068 = vadd.xlane.f32.xlu0 %v1067_v2  ;;  %v6971_v59 = vpop.xlane.xlu1 %764 }
 0x1fb   : > { %11474 = vst [vmem:[#allocation175_spill] sm:$0xff] %v6971_v59  ;;  %v6973_v50 = vpop.xlane.xlu0 %761  ;;  %v1079_v59 = vsel %vm359_vm0, %v6983_v12, 0.0 }
 0x1fc   : > { %11475 = vst [vmem:[#allocation176_spill] sm:$0xff] %v6973_v50  ;;  %v1082_v50 = vsel %vm359_vm0, %v6980_v58, 0.0  ;;  %v7011_v58 = vld [vmem:[%s5893_s10 + $0x768] sm:$0xff] }
 0x1fd   : > { %1077 = vadd.xlane.f32.xlu1 %v1076_v54  ;;  %11484 = vst [vmem:[#allocation185_spill] sm:$0xff] %v7011_v58 }
 0x1fe   : > { %1074 = vadd.xlane.f32.xlu0 %v1073_v49  ;;  %v6985_v41 = vpop.xlane.xlu1 %770  ;;  %v1088_v49 = vsel %vm359_vm0, %v6994_v8, 0.0 }
 0x1ff   : > { %11478 = vst [vmem:[#allocation179_spill] sm:$0xff] %v6985_v41  ;;  %v6987_v2 = vpop.xlane.xlu0 %767  ;;  %v7008_v41 = vld [vmem:[%s5893_s10 + $0x778] sm:$0xff] }
 0x200   : > { %11479 = vst [vmem:[#allocation180_spill] sm:$0xff] %v6987_v2  ;;  %v1085_v2 = vsel %vm359_vm0, %v6997_v5, 0.0  ;;  %11483 = vst [vmem:[#allocation184_spill] sm:$0xff] %v7008_v41  ;;  %v1097_v5 = vmul.f32 %v6577_v1, %v6577_v1 }
 0x201   : > { %1083 = vadd.xlane.f32.xlu1 %v1082_v50 }
 0x202   : > { %1080 = vadd.xlane.f32.xlu0 %v1079_v59  ;;  %v6999_v19 = vpop.xlane.xlu1 %776  ;;  %v1094_v59 = vsel %vm359_vm0, %v7008_v41, 0.0  ;;  %v1100_v41 = vmul.f32 %v6588_v57, %v6588_v57 }
 0x203   : > { %11481 = vst [vmem:[#allocation182_spill] sm:$0xff] %v6999_v19  ;;  %v7001_v54 = vpop.xlane.xlu0 %773  ;;  %v1098_v19 = vmul.f32 %v6574_v14, %v6574_v14 }
 0x204   : > { %11482 = vst [vmem:[#allocation183_spill] sm:$0xff] %v7001_v54  ;;  %v1091_v54 = vsel %vm359_vm0, %v7011_v58, 0.0  ;;  %v1099_v58 = vmul.f32 %v6591_v56, %v6591_v56 }
 0x205   : > { %1089 = vadd.xlane.f32.xlu1 %v1088_v49 }
 0x206   : > { %1086 = vadd.xlane.f32.xlu0 %v1085_v2  ;;  %v7013_v12 = vpop.xlane.xlu1 %782 }
 0x207   : > { %11485 = vst [vmem:[#allocation186_spill] sm:$0xff] %v7013_v12  ;;  %v7015_v50 = vpop.xlane.xlu0 %779  ;;  %v1161_v12 = vsel %vm359_vm0, %v1097_v5, 0.0  ;;  %v1101_v5 = vmul.f32 %v6605_v63, %v6605_v63 }
 0x208   : > { %11486 = vst [vmem:[#allocation187_spill] sm:$0xff] %v7015_v50  ;;  %v1164_v50 = vsel %vm359_vm0, %v1098_v19, 0.0  ;;  %v1102_v19 = vmul.f32 %v6602_v6, %v6602_v6 }
 0x209   : > { %1095 = vadd.xlane.f32.xlu1 %v1094_v59  ;;  %v1167_v59 = vsel %vm359_vm0, %v1099_v58, 0.0  ;;  %v1103_v58 = vmul.f32 %v6619_v60, %v6619_v60 }
 0x20a   : > { %1092 = vadd.xlane.f32.xlu0 %v1091_v54  ;;  %v7025_v49 = vpop.xlane.xlu1 %788  ;;  %v1170_v54 = vsel %vm359_vm0, %v1100_v41, 0.0  ;;  %v1104_v41 = vmul.f32 %v6616_v7, %v6616_v7 }
 0x20b   : > { %11487 = vst [vmem:[#allocation188_spill] sm:$0xff] %v7025_v49  ;;  %v7027_v2 = vpop.xlane.xlu0 %785  ;;  %v11535_v49 = vld [vmem:[#allocation184_spill] sm:$0xff] }
 0x20c   : > { %11488 = vst [vmem:[#allocation189_spill] sm:$0xff] %v7027_v2 }
 0x20d   : > { %1165 = vadd.xlane.f32.xlu1 %v1164_v50  ;;  %v1173_v50 = vsel %vm359_vm0, %v1101_v5, 0.0  ;;  %v1105_v5 = vmul.f32 %v6633_v0, %v6633_v0 }
 0x20e   : > { %1162 = vadd.xlane.f32.xlu0 %v1161_v12  ;;  %v7035_v14 = vpop.xlane.xlu1 %794  ;;  %v1176_v12 = vsel %vm359_vm0, %v1102_v19, 0.0  ;;  %v1106_v19 = vmul.f32 %v6630_v4, %v6630_v4 }
 0x20f   : > { %11489 = vst [vmem:[#allocation190_spill] sm:$0xff] %v7035_v14  ;;  %v7037_v1 = vpop.xlane.xlu0 %791  ;;  %v11528_v14 = vld [vmem:[#allocation177_spill] sm:$0xff] }
 0x210   : > { %11490 = vst [vmem:[#allocation191_spill] sm:$0xff] %v7037_v1 }
 0x211   : > { %1171 = vadd.xlane.f32.xlu1 %v1170_v54  ;;  %v1182_v54 = vsel %vm359_vm0, %v1104_v41, 0.0  ;;  %v1108_v41 = vmul.f32 %v6644_v31, %v6644_v31 }
 0x212   : > { %1168 = vadd.xlane.f32.xlu0 %v1167_v59  ;;  %v7045_v57 = vpop.xlane.xlu1 %800  ;;  %v1179_v59 = vsel %vm359_vm0, %v1103_v58, 0.0  ;;  %v1107_v58 = vmul.f32 %v6647_v15, %v6647_v15 }
 0x213   : > { %11491 = vst [vmem:[#allocation192_spill] sm:$0xff] %v7045_v57  ;;  %v7047_v56 = vpop.xlane.xlu0 %797  ;;  %v11524_v57 = vld [vmem:[#allocation173_spill] sm:$0xff] }
 0x214   : > { %11492 = vst [vmem:[#allocation193_spill] sm:$0xff] %v7047_v56 }
 0x215   : > { %1177 = vadd.xlane.f32.xlu1 %v1176_v12  ;;  %v1188_v12 = vsel %vm359_vm0, %v1106_v19, 0.0  ;;  %v1110_v19 = vmul.f32 %v6658_v55, %v6658_v55 }
 0x216   : > { %1174 = vadd.xlane.f32.xlu0 %v1173_v50  ;;  %v7055_v6 = vpop.xlane.xlu1 %806  ;;  %v1185_v50 = vsel %vm359_vm0, %v1105_v5, 0.0  ;;  %v1109_v5 = vmul.f32 %v6661_v18, %v6661_v18 }
 0x217   : > { %11493 = vst [vmem:[#allocation194_spill] sm:$0xff] %v7055_v6  ;;  %v7057_v63 = vpop.xlane.xlu0 %803  ;;  %v11520_v6 = vld [vmem:[#allocation169_spill] sm:$0xff] }
 0x218   : > { %11494 = vst [vmem:[#allocation195_spill] sm:$0xff] %v7057_v63 }
 0x219   : > { %1183 = vadd.xlane.f32.xlu1 %v1182_v54  ;;  %v1194_v54 = vsel %vm359_vm0, %v1108_v41, 0.0  ;;  %v1112_v41 = vmul.f32 %v6672_v22, %v6672_v22 }
 0x21a   : > { %1180 = vadd.xlane.f32.xlu0 %v1179_v59  ;;  %v7065_v7 = vpop.xlane.xlu1 %909  ;;  %v1191_v59 = vsel %vm359_vm0, %v1107_v58, 0.0  ;;  %v1111_v58 = vmul.f32 %v6675_v26, %v6675_v26 }
 0x21b   : > { %v7067_v60 = vpop.xlane.xlu0 %906 }
 0x21d   : > { %1189 = vadd.xlane.f32.xlu1 %v1188_v12  ;;  %v1200_v12 = vsel %vm359_vm0, %v1110_v19, 0.0  ;;  %v1114_v19 = vmul.f32 %v6686_v27, %v6686_v27 }
 0x21e   : > { %1186 = vadd.xlane.f32.xlu0 %v1185_v50  ;;  %v7075_v4 = vpop.xlane.xlu1 %915  ;;  %v1197_v50 = vsel %vm359_vm0, %v1109_v5, 0.0  ;;  %v1113_v5 = vmul.f32 %v6689_v32, %v6689_v32 }
 0x21f   : > { %v7077_v0 = vpop.xlane.xlu0 %912 }
 0x221   : > { %1195 = vadd.xlane.f32.xlu1 %v1194_v54  ;;  %v1206_v54 = vsel %vm359_vm0, %v1112_v41, 0.0  ;;  %v1116_v41 = vmul.f32 %v6700_v36, %v6700_v36 }
 0x222   : > { %1192 = vadd.xlane.f32.xlu0 %v1191_v59  ;;  %v7085_v31 = vpop.xlane.xlu1 %921  ;;  %v1203_v59 = vsel %vm359_vm0, %v1111_v58, 0.0  ;;  %v1115_v58 = vmul.f32 %v6703_v13, %v6703_v13 }
 0x223   : > { %v7087_v15 = vpop.xlane.xlu0 %918 }
 0x225   : > { %1201 = vadd.xlane.f32.xlu1 %v1200_v12  ;;  %v1212_v12 = vsel %vm359_vm0, %v1114_v19, 0.0  ;;  %v1118_v19 = vmul.f32 %v6714_v44, %v6714_v44 }
 0x226   : > { %1198 = vadd.xlane.f32.xlu0 %v1197_v50  ;;  %v7095_v55 = vpop.xlane.xlu1 %927  ;;  %v1209_v50 = vsel %vm359_vm0, %v1113_v5, 0.0  ;;  %v1117_v5 = vmul.f32 %v6717_v40, %v6717_v40 }
 0x227   : > { %v7097_v18 = vpop.xlane.xlu0 %924 }
 0x229   : > { %1207 = vadd.xlane.f32.xlu1 %v1206_v54  ;;  %v1218_v54 = vsel %vm359_vm0, %v1116_v41, 0.0  ;;  %v1120_v41 = vmul.f32 %v6728_v10, %v6728_v10 }
 0x22a   : > { %1204 = vadd.xlane.f32.xlu0 %v1203_v59  ;;  %v7105_v22 = vpop.xlane.xlu1 %933  ;;  %v1215_v59 = vsel %vm359_vm0, %v1115_v58, 0.0  ;;  %v1119_v58 = vmul.f32 %v6731_v48, %v6731_v48 }
 0x22b   : > { %v7107_v26 = vpop.xlane.xlu0 %930 }
 0x22d   : > { %1213 = vadd.xlane.f32.xlu1 %v1212_v12  ;;  %v1224_v12 = vsel %vm359_vm0, %v1118_v19, 0.0  ;;  %v1122_v19 = vmul.f32 %v6742_v53, %v6742_v53 }
 0x22e   : > { %1210 = vadd.xlane.f32.xlu0 %v1209_v50  ;;  %v7115_v27 = vpop.xlane.xlu1 %939  ;;  %v1221_v50 = vsel %vm359_vm0, %v1117_v5, 0.0  ;;  %v1121_v5 = vmul.f32 %v6745_v3, %v6745_v3 }
 0x22f   : > { %v7117_v32 = vpop.xlane.xlu0 %936 }
 0x231   : > { %1219 = vadd.xlane.f32.xlu1 %v1218_v54  ;;  %v1230_v54 = vsel %vm359_vm0, %v1120_v41, 0.0  ;;  %v1124_v41 = vmul.f32 %v6756_v51, %v6756_v51 }
 0x232   : > { %1216 = vadd.xlane.f32.xlu0 %v1215_v59  ;;  %v7125_v36 = vpop.xlane.xlu1 %945  ;;  %v1227_v59 = vsel %vm359_vm0, %v1119_v58, 0.0  ;;  %v1123_v58 = vmul.f32 %v6759_v61, %v6759_v61 }
 0x233   : > { %v7127_v13 = vpop.xlane.xlu0 %942 }
 0x235   : > { %1225 = vadd.xlane.f32.xlu1 %v1224_v12  ;;  %v1236_v12 = vsel %vm359_vm0, %v1122_v19, 0.0  ;;  %v1126_v19 = vmul.f32 %v6770_v46, %v6770_v46 }
 0x236   : > { %1222 = vadd.xlane.f32.xlu0 %v1221_v50  ;;  %v7135_v44 = vpop.xlane.xlu1 %951  ;;  %v1233_v50 = vsel %vm359_vm0, %v1121_v5, 0.0  ;;  %v1125_v5 = vmul.f32 %v6773_v9, %v6773_v9 }
 0x237   : > { %v7137_v40 = vpop.xlane.xlu0 %948 }
 0x239   : > { %1231 = vadd.xlane.f32.xlu1 %v1230_v54  ;;  %v1242_v54 = vsel %vm359_vm0, %v1124_v41, 0.0  ;;  %v1128_v41 = vmul.f32 %v6784_v43, %v6784_v43 }
 0x23a   : > { %1228 = vadd.xlane.f32.xlu0 %v1227_v59  ;;  %v7145_v10 = vpop.xlane.xlu1 %957  ;;  %v1239_v59 = vsel %vm359_vm0, %v1123_v58, 0.0  ;;  %v1127_v58 = vmul.f32 %v6787_v16, %v6787_v16 }
 0x23b   : > { %v7147_v48 = vpop.xlane.xlu0 %954 }
 0x23d   : > { %1237 = vadd.xlane.f32.xlu1 %v1236_v12  ;;  %v1248_v12 = vsel %vm359_vm0, %v1126_v19, 0.0  ;;  %v1130_v19 = vmul.f32 %v6798_v39, %v6798_v39 }
 0x23e   : > { %1234 = vadd.xlane.f32.xlu0 %v1233_v50  ;;  %v7155_v53 = vpop.xlane.xlu1 %963  ;;  %v1245_v50 = vsel %vm359_vm0, %v1125_v5, 0.0  ;;  %v1129_v5 = vmul.f32 %v6801_v52, %v6801_v52 }
 0x23f   : > { %v7157_v3 = vpop.xlane.xlu0 %960 }
 0x241   : > { %1243 = vadd.xlane.f32.xlu1 %v1242_v54  ;;  %v1254_v54 = vsel %vm359_vm0, %v1128_v41, 0.0  ;;  %v1132_v41 = vmul.f32 %v6812_v37, %v6812_v37 }
 0x242   : > { %1240 = vadd.xlane.f32.xlu0 %v1239_v59  ;;  %v7165_v51 = vpop.xlane.xlu1 %969  ;;  %v1251_v59 = vsel %vm359_vm0, %v1127_v58, 0.0  ;;  %v1131_v58 = vmul.f32 %v6815_v47, %v6815_v47 }
 0x243   : > { %v7167_v61 = vpop.xlane.xlu0 %966 }
 0x245   : > { %1249 = vadd.xlane.f32.xlu1 %v1248_v12  ;;  %v1260_v12 = vsel %vm359_vm0, %v1130_v19, 0.0  ;;  %v1134_v19 = vmul.f32 %v6826_v34, %v6826_v34 }
 0x246   : > { %1246 = vadd.xlane.f32.xlu0 %v1245_v50  ;;  %v7175_v46 = vpop.xlane.xlu1 %975  ;;  %v1257_v50 = vsel %vm359_vm0, %v1129_v5, 0.0  ;;  %v1133_v5 = vmul.f32 %v6829_v45, %v6829_v45 }
 0x247   : > { %11495 = vst [vmem:[#allocation196_spill] sm:$0xff] %v7175_v46  ;;  %v7177_v9 = vpop.xlane.xlu0 %972  ;;  %v7583_v46 = vld [vmem:[%s5893_s10 + $0x4a0] sm:$0xff] }
 0x248   : > { %11496 = vst [vmem:[#allocation197_spill] sm:$0xff] %v7177_v9  ;;  %v7580_v9 = vld [vmem:[%s5893_s10 + $0x4b0] sm:$0xff]  ;;  %11577 = vst [vmem:[#allocation258_spill] sm:$0xff] %v7583_v46 }
 0x249   : > { %1255 = vadd.xlane.f32.xlu1 %v1254_v54  ;;  %v1266_v54 = vsel %vm359_vm0, %v1132_v41, 0.0  ;;  %v1136_v41 = vmul.f32 %v6840_v29, %v6840_v29  ;;  %11576 = vst [vmem:[#allocation257_spill] sm:$0xff] %v7580_v9 }
 0x24a   : > { %1252 = vadd.xlane.f32.xlu0 %v1251_v59  ;;  %v7185_v43 = vpop.xlane.xlu1 %981  ;;  %v1263_v59 = vsel %vm359_vm0, %v1131_v58, 0.0  ;;  %v1135_v58 = vmul.f32 %v6843_v42, %v6843_v42 }
 0x24b   : > { %11497 = vst [vmem:[#allocation198_spill] sm:$0xff] %v7185_v43  ;;  %v7187_v16 = vpop.xlane.xlu0 %978  ;;  %v7569_v43 = vld [vmem:[%s5893_s10 + $0x480] sm:$0xff] }
 0x24c   : > { %11498 = vst [vmem:[#allocation199_spill] sm:$0xff] %v7187_v16  ;;  %v7566_v16 = vld [vmem:[%s5893_s10 + $0x490] sm:$0xff]  ;;  %11573 = vst [vmem:[#allocation254_spill] sm:$0xff] %v7569_v43 }
 0x24d   : > { %1261 = vadd.xlane.f32.xlu1 %v1260_v12  ;;  %v1272_v12 = vsel %vm359_vm0, %v1134_v19, 0.0  ;;  %v1138_v19 = vmul.f32 %v6854_v25, %v6854_v25  ;;  %11572 = vst [vmem:[#allocation253_spill] sm:$0xff] %v7566_v16 }
 0x24e   : > { %1258 = vadd.xlane.f32.xlu0 %v1257_v50  ;;  %v7195_v39 = vpop.xlane.xlu1 %987  ;;  %v1269_v50 = vsel %vm359_vm0, %v1133_v5, 0.0  ;;  %v1137_v5 = vmul.f32 %v6857_v38, %v6857_v38 }
 0x24f   : > { %11499 = vst [vmem:[#allocation200_spill] sm:$0xff] %v7195_v39  ;;  %v7197_v52 = vpop.xlane.xlu0 %984  ;;  %v7555_v39 = vld [vmem:[%s5893_s10 + $0x3e0] sm:$0xff] }
 0x250   : > { %11500 = vst [vmem:[#allocation201_spill] sm:$0xff] %v7197_v52  ;;  %v7552_v52 = vld [vmem:[%s5893_s10 + $0x3f0] sm:$0xff]  ;;  %11569 = vst [vmem:[#allocation250_spill] sm:$0xff] %v7555_v39 }
 0x251   : > { %1267 = vadd.xlane.f32.xlu1 %v1266_v54  ;;  %v1278_v54 = vsel %vm359_vm0, %v1136_v41, 0.0  ;;  %v1140_v41 = vmul.f32 %v6868_v23, %v6868_v23 }
 0x252   : > { %1264 = vadd.xlane.f32.xlu0 %v1263_v59  ;;  %v7205_v37 = vpop.xlane.xlu1 %993  ;;  %v1275_v59 = vsel %vm359_vm0, %v1135_v58, 0.0  ;;  %v1139_v58 = vmul.f32 %v6871_v35, %v6871_v35 }
 0x253   : > { %11501 = vst [vmem:[#allocation202_spill] sm:$0xff] %v7205_v37  ;;  %v7207_v47 = vpop.xlane.xlu0 %990  ;;  %v7541_v37 = vld [vmem:[%s5893_s10 + $0x3c0] sm:$0xff] }
 0x254   : > { %11502 = vst [vmem:[#allocation203_spill] sm:$0xff] %v7207_v47  ;;  %v7538_v47 = vld [vmem:[%s5893_s10 + $0x3d0] sm:$0xff] }
 0x255   : > { %1273 = vadd.xlane.f32.xlu1 %v1272_v12  ;;  %v1284_v12 = vsel %vm359_vm0, %v1138_v19, 0.0  ;;  %v1142_v19 = vmul.f32 %v6882_v20, %v6882_v20 }
 0x256   : > { %1270 = vadd.xlane.f32.xlu0 %v1269_v50  ;;  %v7215_v34 = vpop.xlane.xlu1 %999  ;;  %v1281_v50 = vsel %vm359_vm0, %v1137_v5, 0.0  ;;  %v1141_v5 = vmul.f32 %v6885_v33, %v6885_v33 }
 0x257   : > { %11503 = vst [vmem:[#allocation204_spill] sm:$0xff] %v7215_v34  ;;  %v7217_v45 = vpop.xlane.xlu0 %996  ;;  %v7527_v34 = vld [vmem:[%s5893_s10 + $0x3a0] sm:$0xff] }
 0x258   : > { %11504 = vst [vmem:[#allocation205_spill] sm:$0xff] %v7217_v45  ;;  %v7524_v45 = vld [vmem:[%s5893_s10 + $0x3b0] sm:$0xff] }
 0x259   : > { %1279 = vadd.xlane.f32.xlu1 %v1278_v54  ;;  %v1290_v54 = vsel %vm359_vm0, %v1140_v41, 0.0  ;;  %v1144_v41 = vmul.f32 %v6896_v17, %v6896_v17 }
 0x25a   : > { %1276 = vadd.xlane.f32.xlu0 %v1275_v59  ;;  %v7225_v29 = vpop.xlane.xlu1 %1005  ;;  %v1287_v59 = vsel %vm359_vm0, %v1139_v58, 0.0  ;;  %v1143_v58 = vmul.f32 %v6899_v28, %v6899_v28 }
 0x25b   : > { %11505 = vst [vmem:[#allocation206_spill] sm:$0xff] %v7225_v29  ;;  %v7227_v42 = vpop.xlane.xlu0 %1002  ;;  %v7513_v29 = vld [vmem:[%s5893_s10 + $0x380] sm:$0xff] }
 0x25c   : > { %11506 = vst [vmem:[#allocation207_spill] sm:$0xff] %v7227_v42  ;;  %v7510_v42 = vld [vmem:[%s5893_s10 + $0x390] sm:$0xff] }
 0x25d   : > { %1285 = vadd.xlane.f32.xlu1 %v1284_v12  ;;  %v1296_v12 = vsel %vm359_vm0, %v1142_v19, 0.0  ;;  %v1146_v19 = vmul.f32 %v6910_v30, %v6910_v30 }
 0x25e   : > { %1282 = vadd.xlane.f32.xlu0 %v1281_v50  ;;  %v7235_v25 = vpop.xlane.xlu1 %1011  ;;  %v1293_v50 = vsel %vm359_vm0, %v1141_v5, 0.0  ;;  %v1145_v5 = vmul.f32 %v6913_v24, %v6913_v24 }
 0x25f   : > { %11507 = vst [vmem:[#allocation208_spill] sm:$0xff] %v7235_v25  ;;  %v7237_v38 = vpop.xlane.xlu0 %1008  ;;  %v7499_v25 = vld [vmem:[%s5893_s10 + $0x2e0] sm:$0xff] }
 0x260   : > { %11508 = vst [vmem:[#allocation209_spill] sm:$0xff] %v7237_v38  ;;  %v7496_v38 = vld [vmem:[%s5893_s10 + $0x2f0] sm:$0xff] }
 0x261   : > { %1291 = vadd.xlane.f32.xlu1 %v1290_v54  ;;  %v1302_v54 = vsel %vm359_vm0, %v1144_v41, 0.0  ;;  %v1148_v41 = vmul.f32 %v6924_v62, %v6924_v62 }
 0x262   : > { %1288 = vadd.xlane.f32.xlu0 %v1287_v59  ;;  %v7245_v23 = vpop.xlane.xlu1 %1017  ;;  %v1299_v59 = vsel %vm359_vm0, %v1143_v58, 0.0  ;;  %v1147_v58 = vmul.f32 %v6927_v21, %v6927_v21 }
 0x263   : > { %11509 = vst [vmem:[#allocation210_spill] sm:$0xff] %v7245_v23  ;;  %v7247_v35 = vpop.xlane.xlu0 %1014  ;;  %v7485_v23 = vld [vmem:[%s5893_s10 + $0x2c0] sm:$0xff] }
 0x264   : > { %11510 = vst [vmem:[#allocation211_spill] sm:$0xff] %v7247_v35  ;;  %v7482_v35 = vld [vmem:[%s5893_s10 + $0x2d0] sm:$0xff] }
 0x265   : > { %1297 = vadd.xlane.f32.xlu1 %v1296_v12  ;;  %v1308_v12 = vsel %vm359_vm0, %v1146_v19, 0.0  ;;  %v1150_v19 = vmul.f32 %v6938_v11, %v6938_v11 }
 0x266   : > { %1294 = vadd.xlane.f32.xlu0 %v1293_v50  ;;  %v7255_v20 = vpop.xlane.xlu1 %1023  ;;  %v1305_v50 = vsel %vm359_vm0, %v1145_v5, 0.0  ;;  %v11517_v5 = vld [vmem:[#allocation166_spill] sm:$0xff] }
 0x267   : > { %11511 = vst [vmem:[#allocation212_spill] sm:$0xff] %v7255_v20  ;;  %v7257_v33 = vpop.xlane.xlu0 %1020  ;;  %v1149_v63 = vmul.f32 %v11517_v5, %v11517_v5  ;;  %v7471_v20 = vld [vmem:[%s5893_s10 + $0x2a0] sm:$0xff] }
 0x268   : > { %11512 = vst [vmem:[#allocation213_spill] sm:$0xff] %v7257_v33  ;;  %v7468_v33 = vld [vmem:[%s5893_s10 + $0x2b0] sm:$0xff] }
 0x269   : > { %1303 = vadd.xlane.f32.xlu1 %v1302_v54  ;;  %v1314_v54 = vsel %vm359_vm0, %v1148_v41, 0.0  ;;  %v1152_v41 = vmul.f32 %v11520_v6, %v11520_v6 }
 0x26a   : > { %1300 = vadd.xlane.f32.xlu0 %v1299_v59  ;;  %v7265_v17 = vpop.xlane.xlu1 %1029  ;;  %v1311_v59 = vsel %vm359_vm0, %v1147_v58, 0.0  ;;  %v11521_v58 = vld [vmem:[#allocation170_spill] sm:$0xff] }
 0x26b   : > { %11513 = vst [vmem:[#allocation214_spill] sm:$0xff] %v7265_v17  ;;  %v7267_v28 = vpop.xlane.xlu0 %1026  ;;  %v1151_v56 = vmul.f32 %v11521_v58, %v11521_v58  ;;  %v7457_v17 = vld [vmem:[%s5893_s10 + $0x280] sm:$0xff] }
 0x26c   : > { %11514 = vst [vmem:[#allocation215_spill] sm:$0xff] %v7267_v28  ;;  %v7454_v28 = vld [vmem:[%s5893_s10 + $0x290] sm:$0xff] }
 0x26d   : > { %1309 = vadd.xlane.f32.xlu1 %v1308_v12  ;;  %v1320_v12 = vsel %vm359_vm0, %v1150_v19, 0.0  ;;  %v1323_v5 = vsel %vm359_vm0, %v1151_v56, 0.0  ;;  %v1154_v19 = vmul.f32 %v11524_v57, %v11524_v57  ;;  %v11529_v56 = vld [vmem:[#allocation178_spill] sm:$0xff] }
 0x26e   : > { %1306 = vadd.xlane.f32.xlu0 %v1305_v50  ;;  %v7275_v30 = vpop.xlane.xlu1 %1035  ;;  %v1317_v50 = vsel %vm359_vm0, %v1149_v63, 0.0  ;;  %v11525_v63 = vld [vmem:[#allocation174_spill] sm:$0xff]  ;;  %v1155_v2 = vmul.f32 %v11529_v56, %v11529_v56 }
 0x26f   : > { %11515 = vst [vmem:[#allocation216_spill] sm:$0xff] %v7275_v30  ;;  %v7277_v24 = vpop.xlane.xlu0 %1032  ;;  %v1153_v1 = vmul.f32 %v11525_v63, %v11525_v63  ;;  %v7443_v30 = vld [vmem:[%s5893_s10 + $0x1e0] sm:$0xff] }
 0x270   : > { %11516 = vst [vmem:[#allocation217_spill] sm:$0xff] %v7277_v24  ;;  %v1335_v63 = vsel %vm359_vm0, %v1155_v2, 0.0  ;;  %v1160_v2 = vmul.f32 %v11535_v49, %v11535_v49  ;;  %v7440_v24 = vld [vmem:[%s5893_s10 + $0x1f0] sm:$0xff] }
 0x271   : > { %1315 = vadd.xlane.f32.xlu1 %v1314_v54  ;;  %v1329_v58 = vsel %vm359_vm0, %v1153_v1, 0.0  ;;  %v11532_v1 = vld [vmem:[#allocation181_spill] sm:$0xff] }
 0x272   : > { %1312 = vadd.xlane.f32.xlu0 %v1311_v59  ;;  %v7285_v62 = vpop.xlane.xlu1 %1041  ;;  %v1326_v59 = vsel %vm359_vm0, %v1152_v41, 0.0  ;;  %v1156_v41 = vmul.f32 %v11528_v14, %v11528_v14  ;;  %v1157_v14 = vmul.f32 %v11532_v1, %v11532_v1  ;;  %v1350_v1 = vsel %vm359_vm0, %v1160_v2, 0.0  ;;  %v7356_v2 = vld [vmem:[%s5893_s10 + $0xb0] sm:$0xff] }
 0x273   : > { %11518 = vst [vmem:[#allocation166_spill] sm:$0xff] %v7285_v62  ;;  %v7287_v21 = vpop.xlane.xlu0 %1038  ;;  %v7429_v62 = vld [vmem:[%s5893_s10 + $0x1c0] sm:$0xff] }
 0x274   : > { %11519 = vst [vmem:[#allocation218_spill] sm:$0xff] %v7287_v21  ;;  %v7426_v21 = vld [vmem:[%s5893_s10 + $0x1d0] sm:$0xff] }
 0x275   : > { %1321 = vadd.xlane.f32.xlu1 %v1320_v12 }
 0x276   : > { %1318 = vadd.xlane.f32.xlu0 %v1317_v50  ;;  %v7295_v11 = vpop.xlane.xlu1 %1047  ;;  %v1332_v50 = vsel %vm359_vm0, %v1154_v19, 0.0  ;;  %v1158_v19 = vmul.f32 %v6994_v8, %v6994_v8 }
 0x277   : > { %11522 = vst [vmem:[#allocation169_spill] sm:$0xff] %v7295_v11  ;;  %v7297_v54 = vpop.xlane.xlu0 %1044  ;;  %v7415_v11 = vld [vmem:[%s5893_s10 + $0x1a0] sm:$0xff] }
 0x278   : > { %11523 = vst [vmem:[#allocation170_spill] sm:$0xff] %v7297_v54  ;;  %v1344_v56 = vsel %vm359_vm0, %v1158_v19, 0.0  ;;  %v7412_v54 = vld [vmem:[%s5893_s10 + $0x1b0] sm:$0xff] }
 0x279   : > { %1327 = vadd.xlane.f32.xlu1 %v1326_v59 }
 0x27a   : > { %1324 = vadd.xlane.f32.xlu0 %v1323_v5  ;;  %v7305_v6 = vpop.xlane.xlu1 %1053  ;;  %v1338_v5 = vsel %vm359_vm0, %v1156_v41, 0.0  ;;  %v1341_v41 = vsel %vm359_vm0, %v1157_v14, 0.0  ;;  %v7345_v14 = vld [vmem:[%s5893_s10 + $0x80] sm:$0xff] }
 0x27b   : > { %11526 = vst [vmem:[#allocation173_spill] sm:$0xff] %v7305_v6  ;;  %v7307_v12 = vpop.xlane.xlu0 %1050  ;;  %v7401_v6 = vld [vmem:[%s5893_s10 + $0x180] sm:$0xff] }
 0x27c   : > { %11527 = vst [vmem:[#allocation174_spill] sm:$0xff] %v7307_v12  ;;  %v7398_v12 = vld [vmem:[%s5893_s10 + $0x190] sm:$0xff] }
 0x27d   : > { %1333 = vadd.xlane.f32.xlu1 %v1332_v50 }
 0x27e   : > { %1330 = vadd.xlane.f32.xlu0 %v1329_v58  ;;  %v7315_v57 = vpop.xlane.xlu1 %1059 }
 0x27f   : > { %11530 = vst [vmem:[#allocation177_spill] sm:$0xff] %v7315_v57  ;;  %v7317_v59 = vpop.xlane.xlu0 %1056  ;;  %v7387_v57 = vld [vmem:[%s5893_s10 + $0xe0] sm:$0xff] }
 0x280   : > { %11531 = vst [vmem:[#allocation178_spill] sm:$0xff] %v7317_v59  ;;  %v11536_v59 = vld [vmem:[#allocation185_spill] sm:$0xff] }
 0x281   : > { %1339 = vadd.xlane.f32.xlu1 %v1338_v5  ;;  %v1159_v8 = vmul.f32 %v11536_v59, %v11536_v59 }
 0x282   : > { %1336 = vadd.xlane.f32.xlu0 %v1335_v63  ;;  %v7325_v50 = vpop.xlane.xlu1 %1065 }
 0x283   : > { %11533 = vst [vmem:[#allocation181_spill] sm:$0xff] %v7325_v50  ;;  %v7327_v58 = vpop.xlane.xlu0 %1062  ;;  %v1347_v19 = vsel %vm359_vm0, %v1159_v8, 0.0  ;;  %v7359_v8 = vld [vmem:[%s5893_s10 + $0xa0] sm:$0xff]  ;;  %v7384_v50 = vld [vmem:[%s5893_s10 + $0xf0] sm:$0xff] }
 0x284   : > { %11534 = vst [vmem:[#allocation219_spill] sm:$0xff] %v7327_v58  ;;  %v7342_v58 = vld [vmem:[%s5893_s10 + $0x90] sm:$0xff] }
 0x285   : > { %1345 = vadd.xlane.f32.xlu1 %v1344_v56  ;;  %v1581_v56 = vsel %vm359_vm0, %v7342_v58, 0.0 }
 0x286   : > { %1342 = vadd.xlane.f32.xlu0 %v1341_v41  ;;  %v7335_v5 = vpop.xlane.xlu1 %1071  ;;  %v1578_v41 = vsel %vm359_vm0, %v7345_v14, 0.0 }
 0x287   : > { %11537 = vst [vmem:[#allocation184_spill] sm:$0xff] %v7335_v5  ;;  %v7337_v63 = vpop.xlane.xlu0 %1068  ;;  %v7373_v5 = vld [vmem:[%s5893_s10 + $0xc0] sm:$0xff] }
 0x288   : > { %11538 = vst [vmem:[#allocation185_spill] sm:$0xff] %v7337_v63  ;;  %v7370_v63 = vld [vmem:[%s5893_s10 + $0xd0] sm:$0xff] }
 0x289   : > { %1351 = vadd.xlane.f32.xlu1 %v1350_v1 }
 0x28a   : > { %1348 = vadd.xlane.f32.xlu0 %v1347_v19  ;;  %v7347_v49 = vpop.xlane.xlu1 %1077 }
 0x28b   : > { %11539 = vst [vmem:[#allocation220_spill] sm:$0xff] %v7347_v49  ;;  %v7349_v59 = vpop.xlane.xlu0 %1074  ;;  %v1584_v49 = vsel %vm359_vm0, %v7359_v8, 0.0 }
 0x28c   : > { %11540 = vst [vmem:[#allocation221_spill] sm:$0xff] %v7349_v59  ;;  %v1587_v59 = vsel %vm359_vm0, %v7356_v2, 0.0 }
 0x28d   : > { %1582 = vadd.xlane.f32.xlu1 %v1581_v56 }
 0x28e   : > { %1579 = vadd.xlane.f32.xlu0 %v1578_v41  ;;  %v7361_v1 = vpop.xlane.xlu1 %1083 }
 0x28f   : > { %11541 = vst [vmem:[#allocation222_spill] sm:$0xff] %v7361_v1  ;;  %v7363_v19 = vpop.xlane.xlu0 %1080  ;;  %v1590_v1 = vsel %vm359_vm0, %v7373_v5, 0.0 }
 0x290   : > { %11542 = vst [vmem:[#allocation223_spill] sm:$0xff] %v7363_v19  ;;  %v1593_v19 = vsel %vm359_vm0, %v7370_v63, 0.0 }
 0x291   : > { %1588 = vadd.xlane.f32.xlu1 %v1587_v59 }
 0x292   : > { %1585 = vadd.xlane.f32.xlu0 %v1584_v49  ;;  %v7375_v56 = vpop.xlane.xlu1 %1089 }
 0x293   : > { %11543 = vst [vmem:[#allocation224_spill] sm:$0xff] %v7375_v56  ;;  %v7377_v41 = vpop.xlane.xlu0 %1086  ;;  %v1596_v56 = vsel %vm359_vm0, %v7387_v57, 0.0 }
 0x294   : > { %11544 = vst [vmem:[#allocation225_spill] sm:$0xff] %v7377_v41  ;;  %v1599_v41 = vsel %vm359_vm0, %v7384_v50, 0.0 }
 0x295   : > { %1594 = vadd.xlane.f32.xlu1 %v1593_v19 }
 0x296   : > { %1591 = vadd.xlane.f32.xlu0 %v1590_v1  ;;  %v7389_v59 = vpop.xlane.xlu1 %1095 }
 0x297   : > { %11545 = vst [vmem:[#allocation226_spill] sm:$0xff] %v7389_v59  ;;  %v7391_v49 = vpop.xlane.xlu0 %1092  ;;  %v1602_v59 = vsel %vm359_vm0, %v7401_v6, 0.0 }
 0x298   : > { %11546 = vst [vmem:[#allocation227_spill] sm:$0xff] %v7391_v49  ;;  %v1605_v49 = vsel %vm359_vm0, %v7398_v12, 0.0 }
 0x299   : > { %1600 = vadd.xlane.f32.xlu1 %v1599_v41 }
 0x29a   : > { %1597 = vadd.xlane.f32.xlu0 %v1596_v56  ;;  %v7403_v19 = vpop.xlane.xlu1 %1165 }
 0x29b   : > { %11547 = vst [vmem:[#allocation228_spill] sm:$0xff] %v7403_v19  ;;  %v7405_v1 = vpop.xlane.xlu0 %1162  ;;  %v1608_v19 = vsel %vm359_vm0, %v7415_v11, 0.0 }
 0x29c   : > { %11548 = vst [vmem:[#allocation229_spill] sm:$0xff] %v7405_v1  ;;  %v1611_v1 = vsel %vm359_vm0, %v7412_v54, 0.0 }
 0x29d   : > { %1606 = vadd.xlane.f32.xlu1 %v1605_v49 }
 0x29e   : > { %1603 = vadd.xlane.f32.xlu0 %v1602_v59  ;;  %v7417_v41 = vpop.xlane.xlu1 %1171 }
 0x29f   : > { %11549 = vst [vmem:[#allocation230_spill] sm:$0xff] %v7417_v41  ;;  %v7419_v56 = vpop.xlane.xlu0 %1168  ;;  %v1614_v41 = vsel %vm359_vm0, %v7429_v62, 0.0 }
 0x2a0   : > { %11550 = vst [vmem:[#allocation231_spill] sm:$0xff] %v7419_v56  ;;  %v1617_v56 = vsel %vm359_vm0, %v7426_v21, 0.0 }
 0x2a1   : > { %1612 = vadd.xlane.f32.xlu1 %v1611_v1 }
 0x2a2   : > { %1609 = vadd.xlane.f32.xlu0 %v1608_v19  ;;  %v7431_v49 = vpop.xlane.xlu1 %1177 }
 0x2a3   : > { %11551 = vst [vmem:[#allocation232_spill] sm:$0xff] %v7431_v49  ;;  %v7433_v59 = vpop.xlane.xlu0 %1174  ;;  %v1620_v49 = vsel %vm359_vm0, %v7443_v30, 0.0 }
 0x2a4   : > { %11552 = vst [vmem:[#allocation233_spill] sm:$0xff] %v7433_v59  ;;  %v1623_v59 = vsel %vm359_vm0, %v7440_v24, 0.0 }
 0x2a5   : > { %1618 = vadd.xlane.f32.xlu1 %v1617_v56 }
 0x2a6   : > { %1615 = vadd.xlane.f32.xlu0 %v1614_v41  ;;  %v7445_v1 = vpop.xlane.xlu1 %1183 }
 0x2a7   : > { %11553 = vst [vmem:[#allocation234_spill] sm:$0xff] %v7445_v1  ;;  %v7447_v19 = vpop.xlane.xlu0 %1180  ;;  %v1626_v1 = vsel %vm359_vm0, %v7457_v17, 0.0 }
 0x2a8   : > { %11554 = vst [vmem:[#allocation235_spill] sm:$0xff] %v7447_v19  ;;  %v1629_v19 = vsel %vm359_vm0, %v7454_v28, 0.0 }
 0x2a9   : > { %1624 = vadd.xlane.f32.xlu1 %v1623_v59 }
 0x2aa   : > { %1621 = vadd.xlane.f32.xlu0 %v1620_v49  ;;  %v7459_v56 = vpop.xlane.xlu1 %1189 }
 0x2ab   : > { %11555 = vst [vmem:[#allocation236_spill] sm:$0xff] %v7459_v56  ;;  %v7461_v41 = vpop.xlane.xlu0 %1186  ;;  %v1632_v56 = vsel %vm359_vm0, %v7471_v20, 0.0 }
 0x2ac   : > { %11556 = vst [vmem:[#allocation237_spill] sm:$0xff] %v7461_v41  ;;  %v1635_v41 = vsel %vm359_vm0, %v7468_v33, 0.0 }
 0x2ad   : > { %1630 = vadd.xlane.f32.xlu1 %v1629_v19 }
 0x2ae   : > { %1627 = vadd.xlane.f32.xlu0 %v1626_v1  ;;  %v7473_v59 = vpop.xlane.xlu1 %1195 }
 0x2af   : > { %11557 = vst [vmem:[#allocation238_spill] sm:$0xff] %v7473_v59  ;;  %v7475_v49 = vpop.xlane.xlu0 %1192  ;;  %v1638_v59 = vsel %vm359_vm0, %v7485_v23, 0.0 }
 0x2b0   : > { %11558 = vst [vmem:[#allocation239_spill] sm:$0xff] %v7475_v49  ;;  %v1641_v49 = vsel %vm359_vm0, %v7482_v35, 0.0 }
 0x2b1   : > { %1636 = vadd.xlane.f32.xlu1 %v1635_v41 }
 0x2b2   : > { %1633 = vadd.xlane.f32.xlu0 %v1632_v56  ;;  %v7487_v19 = vpop.xlane.xlu1 %1201 }
 0x2b3   : > { %11559 = vst [vmem:[#allocation240_spill] sm:$0xff] %v7487_v19  ;;  %v7489_v1 = vpop.xlane.xlu0 %1198  ;;  %v1644_v19 = vsel %vm359_vm0, %v7499_v25, 0.0 }
 0x2b4   : > { %11560 = vst [vmem:[#allocation241_spill] sm:$0xff] %v7489_v1  ;;  %v1647_v1 = vsel %vm359_vm0, %v7496_v38, 0.0 }
 0x2b5   : > { %1642 = vadd.xlane.f32.xlu1 %v1641_v49 }
 0x2b6   : > { %1639 = vadd.xlane.f32.xlu0 %v1638_v59  ;;  %v7501_v41 = vpop.xlane.xlu1 %1207 }
 0x2b7   : > { %11561 = vst [vmem:[#allocation242_spill] sm:$0xff] %v7501_v41  ;;  %v7503_v56 = vpop.xlane.xlu0 %1204  ;;  %v1650_v41 = vsel %vm359_vm0, %v7513_v29, 0.0 }
 0x2b8   : > { %11562 = vst [vmem:[#allocation243_spill] sm:$0xff] %v7503_v56  ;;  %v1653_v56 = vsel %vm359_vm0, %v7510_v42, 0.0 }
 0x2b9   : > { %1648 = vadd.xlane.f32.xlu1 %v1647_v1 }
 0x2ba   : > { %1645 = vadd.xlane.f32.xlu0 %v1644_v19  ;;  %v7515_v49 = vpop.xlane.xlu1 %1213 }
 0x2bb   : > { %11563 = vst [vmem:[#allocation244_spill] sm:$0xff] %v7515_v49  ;;  %v7517_v59 = vpop.xlane.xlu0 %1210  ;;  %v1656_v49 = vsel %vm359_vm0, %v7527_v34, 0.0 }
 0x2bc   : > { %11564 = vst [vmem:[#allocation245_spill] sm:$0xff] %v7517_v59  ;;  %v1659_v59 = vsel %vm359_vm0, %v7524_v45, 0.0 }
 0x2bd   : > { %1654 = vadd.xlane.f32.xlu1 %v1653_v56 }
 0x2be   : > { %1651 = vadd.xlane.f32.xlu0 %v1650_v41  ;;  %v7529_v1 = vpop.xlane.xlu1 %1219 }
 0x2bf   : > { %11565 = vst [vmem:[#allocation246_spill] sm:$0xff] %v7529_v1  ;;  %v7531_v19 = vpop.xlane.xlu0 %1216  ;;  %v1662_v1 = vsel %vm359_vm0, %v7541_v37, 0.0 }
 0x2c0   : > { %11566 = vst [vmem:[#allocation247_spill] sm:$0xff] %v7531_v19  ;;  %v1665_v19 = vsel %vm359_vm0, %v7538_v47, 0.0 }
 0x2c1   : > { %1660 = vadd.xlane.f32.xlu1 %v1659_v59 }
 0x2c2   : > { %1657 = vadd.xlane.f32.xlu0 %v1656_v49  ;;  %v7543_v56 = vpop.xlane.xlu1 %1225 }
 0x2c3   : > { %11567 = vst [vmem:[#allocation248_spill] sm:$0xff] %v7543_v56  ;;  %v7545_v41 = vpop.xlane.xlu0 %1222  ;;  %v1668_v56 = vsel %vm359_vm0, %v7555_v39, 0.0 }
 0x2c4   : > { %11568 = vst [vmem:[#allocation249_spill] sm:$0xff] %v7545_v41  ;;  %v1671_v41 = vsel %vm359_vm0, %v7552_v52, 0.0 }
 0x2c5   : > { %1666 = vadd.xlane.f32.xlu1 %v1665_v19 }
 0x2c6   : > { %1663 = vadd.xlane.f32.xlu0 %v1662_v1  ;;  %v7557_v59 = vpop.xlane.xlu1 %1231 }
 0x2c7   : > { %11570 = vst [vmem:[#allocation251_spill] sm:$0xff] %v7557_v59  ;;  %v7559_v49 = vpop.xlane.xlu0 %1228  ;;  %v1674_v59 = vsel %vm359_vm0, %v7569_v43, 0.0  ;;  %v7597_v43 = vld [vmem:[%s5893_s10 + $0x4c0] sm:$0xff] }
 0x2c8   : > { %11571 = vst [vmem:[#allocation252_spill] sm:$0xff] %v7559_v49  ;;  %v1677_v49 = vsel %vm359_vm0, %v7566_v16, 0.0  ;;  %v7594_v16 = vld [vmem:[%s5893_s10 + $0x4d0] sm:$0xff]  ;;  %11581 = vst [vmem:[#allocation262_spill] sm:$0xff] %v7597_v43 }
 0x2c9   : > { %1672 = vadd.xlane.f32.xlu1 %v1671_v41  ;;  %11580 = vst [vmem:[#allocation261_spill] sm:$0xff] %v7594_v16 }
 0x2ca   : > { %1669 = vadd.xlane.f32.xlu0 %v1668_v56  ;;  %v7571_v19 = vpop.xlane.xlu1 %1237 }
 0x2cb   : > { %11574 = vst [vmem:[#allocation255_spill] sm:$0xff] %v7571_v19  ;;  %v7573_v1 = vpop.xlane.xlu0 %1234  ;;  %v1683_v19 = vsel %vm359_vm0, %v7580_v9, 0.0  ;;  %v7608_v9 = vld [vmem:[%s5893_s10 + $0x4f0] sm:$0xff] }
 0x2cc   : > { %11575 = vst [vmem:[#allocation256_spill] sm:$0xff] %v7573_v1  ;;  %v1680_v1 = vsel %vm359_vm0, %v7583_v46, 0.0  ;;  %11584 = vst [vmem:[#allocation265_spill] sm:$0xff] %v7608_v9  ;;  %v7611_v46 = vld [vmem:[%s5893_s10 + $0x4e0] sm:$0xff] }
 0x2cd   : > { %1678 = vadd.xlane.f32.xlu1 %v1677_v49  ;;  %11585 = vst [vmem:[#allocation266_spill] sm:$0xff] %v7611_v46 }
 0x2ce   : > { %1675 = vadd.xlane.f32.xlu0 %v1674_v59  ;;  %v7585_v41 = vpop.xlane.xlu1 %1243 }
 0x2cf   : > { %11578 = vst [vmem:[#allocation259_spill] sm:$0xff] %v7585_v41  ;;  %v7587_v56 = vpop.xlane.xlu0 %1240  ;;  %v1686_v41 = vsel %vm359_vm0, %v7597_v43, 0.0  ;;  %v7625_v43 = vld [vmem:[%s5893_s10 + $0x580] sm:$0xff] }
 0x2d0   : > { %11579 = vst [vmem:[#allocation260_spill] sm:$0xff] %v7587_v56  ;;  %v1689_v56 = vsel %vm359_vm0, %v7594_v16, 0.0  ;;  %v7622_v16 = vld [vmem:[%s5893_s10 + $0x590] sm:$0xff]  ;;  %11589 = vst [vmem:[#allocation270_spill] sm:$0xff] %v7625_v43 }
 0x2d1   : > { %1684 = vadd.xlane.f32.xlu1 %v1683_v19  ;;  %11588 = vst [vmem:[#allocation269_spill] sm:$0xff] %v7622_v16 }
 0x2d2   : > { %1681 = vadd.xlane.f32.xlu0 %v1680_v1  ;;  %v7599_v49 = vpop.xlane.xlu1 %1249 }
 0x2d3   : > { %11582 = vst [vmem:[#allocation263_spill] sm:$0xff] %v7599_v49  ;;  %v7601_v59 = vpop.xlane.xlu0 %1246  ;;  %v1692_v49 = vsel %vm359_vm0, %v7611_v46, 0.0  ;;  %v7639_v46 = vld [vmem:[%s5893_s10 + $0x5a0] sm:$0xff] }
 0x2d4   : > { %11583 = vst [vmem:[#allocation264_spill] sm:$0xff] %v7601_v59  ;;  %v1695_v59 = vsel %vm359_vm0, %v7608_v9, 0.0  ;;  %v7636_v9 = vld [vmem:[%s5893_s10 + $0x5b0] sm:$0xff]  ;;  %11593 = vst [vmem:[#allocation274_spill] sm:$0xff] %v7639_v46 }
 0x2d5   : > { %1690 = vadd.xlane.f32.xlu1 %v1689_v56  ;;  %11592 = vst [vmem:[#allocation273_spill] sm:$0xff] %v7636_v9 }
 0x2d6   : > { %1687 = vadd.xlane.f32.xlu0 %v1686_v41  ;;  %v7613_v19 = vpop.xlane.xlu1 %1255 }
 0x2d7   : > { %11586 = vst [vmem:[#allocation267_spill] sm:$0xff] %v7613_v19  ;;  %v7615_v1 = vpop.xlane.xlu0 %1252  ;;  %v1698_v19 = vsel %vm359_vm0, %v7625_v43, 0.0  ;;  %v7653_v43 = vld [vmem:[%s5893_s10 + $0x5c0] sm:$0xff] }
 0x2d8   : > { %11587 = vst [vmem:[#allocation268_spill] sm:$0xff] %v7615_v1  ;;  %v1701_v1 = vsel %vm359_vm0, %v7622_v16, 0.0  ;;  %v7650_v16 = vld [vmem:[%s5893_s10 + $0x5d0] sm:$0xff]  ;;  %11597 = vst [vmem:[#allocation278_spill] sm:$0xff] %v7653_v43 }
 0x2d9   : > { %1696 = vadd.xlane.f32.xlu1 %v1695_v59  ;;  %11596 = vst [vmem:[#allocation277_spill] sm:$0xff] %v7650_v16 }
 0x2da   : > { %1693 = vadd.xlane.f32.xlu0 %v1692_v49  ;;  %v7627_v56 = vpop.xlane.xlu1 %1261 }
 0x2db   : > { %11590 = vst [vmem:[#allocation271_spill] sm:$0xff] %v7627_v56  ;;  %v7629_v41 = vpop.xlane.xlu0 %1258  ;;  %v1704_v56 = vsel %vm359_vm0, %v7639_v46, 0.0  ;;  %v7667_v46 = vld [vmem:[%s5893_s10 + $0x5e0] sm:$0xff] }
 0x2dc   : > { %11591 = vst [vmem:[#allocation272_spill] sm:$0xff] %v7629_v41  ;;  %v1707_v41 = vsel %vm359_vm0, %v7636_v9, 0.0  ;;  %v7664_v9 = vld [vmem:[%s5893_s10 + $0x5f0] sm:$0xff]  ;;  %11601 = vst [vmem:[#allocation282_spill] sm:$0xff] %v7667_v46 }
 0x2dd   : > { %1702 = vadd.xlane.f32.xlu1 %v1701_v1  ;;  %11600 = vst [vmem:[#allocation281_spill] sm:$0xff] %v7664_v9 }
 0x2de   : > { %1699 = vadd.xlane.f32.xlu0 %v1698_v19  ;;  %v7641_v59 = vpop.xlane.xlu1 %1267 }
 0x2df   : > { %11594 = vst [vmem:[#allocation275_spill] sm:$0xff] %v7641_v59  ;;  %v7643_v49 = vpop.xlane.xlu0 %1264  ;;  %v1710_v59 = vsel %vm359_vm0, %v7653_v43, 0.0  ;;  %v7681_v43 = vld [vmem:[%s5893_s10 + $0x680] sm:$0xff] }
 0x2e0   : > { %11595 = vst [vmem:[#allocation276_spill] sm:$0xff] %v7643_v49  ;;  %v1713_v49 = vsel %vm359_vm0, %v7650_v16, 0.0  ;;  %v7678_v16 = vld [vmem:[%s5893_s10 + $0x690] sm:$0xff]  ;;  %11605 = vst [vmem:[#allocation286_spill] sm:$0xff] %v7681_v43 }
 0x2e1   : > { %1708 = vadd.xlane.f32.xlu1 %v1707_v41  ;;  %11604 = vst [vmem:[#allocation285_spill] sm:$0xff] %v7678_v16 }
 0x2e2   : > { %1705 = vadd.xlane.f32.xlu0 %v1704_v56  ;;  %v7655_v1 = vpop.xlane.xlu1 %1273 }
 0x2e3   : > { %11598 = vst [vmem:[#allocation279_spill] sm:$0xff] %v7655_v1  ;;  %v7657_v19 = vpop.xlane.xlu0 %1270  ;;  %v1716_v1 = vsel %vm359_vm0, %v7667_v46, 0.0  ;;  %v7695_v46 = vld [vmem:[%s5893_s10 + $0x6a0] sm:$0xff] }
 0x2e4   : > { %11599 = vst [vmem:[#allocation280_spill] sm:$0xff] %v7657_v19  ;;  %v1719_v19 = vsel %vm359_vm0, %v7664_v9, 0.0  ;;  %v7692_v9 = vld [vmem:[%s5893_s10 + $0x6b0] sm:$0xff]  ;;  %11609 = vst [vmem:[#allocation290_spill] sm:$0xff] %v7695_v46 }
 0x2e5   : > { %1714 = vadd.xlane.f32.xlu1 %v1713_v49  ;;  %11608 = vst [vmem:[#allocation289_spill] sm:$0xff] %v7692_v9 }
 0x2e6   : > { %1711 = vadd.xlane.f32.xlu0 %v1710_v59  ;;  %v7669_v41 = vpop.xlane.xlu1 %1279 }
 0x2e7   : > { %11602 = vst [vmem:[#allocation283_spill] sm:$0xff] %v7669_v41  ;;  %v7671_v56 = vpop.xlane.xlu0 %1276  ;;  %v1722_v41 = vsel %vm359_vm0, %v7681_v43, 0.0  ;;  %v7709_v43 = vld [vmem:[%s5893_s10 + $0x6c0] sm:$0xff] }
 0x2e8   : > { %11603 = vst [vmem:[#allocation284_spill] sm:$0xff] %v7671_v56  ;;  %v1725_v56 = vsel %vm359_vm0, %v7678_v16, 0.0  ;;  %v7706_v16 = vld [vmem:[%s5893_s10 + $0x6d0] sm:$0xff]  ;;  %11613 = vst [vmem:[#allocation294_spill] sm:$0xff] %v7709_v43 }
 0x2e9   : > { %1720 = vadd.xlane.f32.xlu1 %v1719_v19  ;;  %11612 = vst [vmem:[#allocation293_spill] sm:$0xff] %v7706_v16 }
 0x2ea   : > { %1717 = vadd.xlane.f32.xlu0 %v1716_v1  ;;  %v7683_v49 = vpop.xlane.xlu1 %1285 }
 0x2eb   : > { %11606 = vst [vmem:[#allocation287_spill] sm:$0xff] %v7683_v49  ;;  %v7685_v59 = vpop.xlane.xlu0 %1282  ;;  %v1728_v49 = vsel %vm359_vm0, %v7695_v46, 0.0  ;;  %v7723_v46 = vld [vmem:[%s5893_s10 + $0x6e0] sm:$0xff] }
 0x2ec   : > { %11607 = vst [vmem:[#allocation288_spill] sm:$0xff] %v7685_v59  ;;  %v1731_v59 = vsel %vm359_vm0, %v7692_v9, 0.0  ;;  %v7720_v9 = vld [vmem:[%s5893_s10 + $0x6f0] sm:$0xff]  ;;  %11617 = vst [vmem:[#allocation298_spill] sm:$0xff] %v7723_v46 }
 0x2ed   : > { %1726 = vadd.xlane.f32.xlu1 %v1725_v56  ;;  %11616 = vst [vmem:[#allocation297_spill] sm:$0xff] %v7720_v9 }
 0x2ee   : > { %1723 = vadd.xlane.f32.xlu0 %v1722_v41  ;;  %v7697_v19 = vpop.xlane.xlu1 %1291 }
 0x2ef   : > { %11610 = vst [vmem:[#allocation291_spill] sm:$0xff] %v7697_v19  ;;  %v7699_v1 = vpop.xlane.xlu0 %1288  ;;  %v1734_v19 = vsel %vm359_vm0, %v7709_v43, 0.0  ;;  %v7737_v43 = vld [vmem:[%s5893_s10 + $0x780] sm:$0xff] }
 0x2f0   : > { %11611 = vst [vmem:[#allocation292_spill] sm:$0xff] %v7699_v1  ;;  %v1737_v1 = vsel %vm359_vm0, %v7706_v16, 0.0  ;;  %v7734_v16 = vld [vmem:[%s5893_s10 + $0x790] sm:$0xff]  ;;  %11621 = vst [vmem:[#allocation302_spill] sm:$0xff] %v7737_v43 }
 0x2f1   : > { %1732 = vadd.xlane.f32.xlu1 %v1731_v59  ;;  %11620 = vst [vmem:[#allocation301_spill] sm:$0xff] %v7734_v16 }
 0x2f2   : > { %1729 = vadd.xlane.f32.xlu0 %v1728_v49  ;;  %v7711_v56 = vpop.xlane.xlu1 %1297 }
 0x2f3   : > { %11614 = vst [vmem:[#allocation295_spill] sm:$0xff] %v7711_v56  ;;  %v7713_v41 = vpop.xlane.xlu0 %1294  ;;  %v1740_v56 = vsel %vm359_vm0, %v7723_v46, 0.0  ;;  %v7751_v46 = vld [vmem:[%s5893_s10 + $0x7a0] sm:$0xff] }
 0x2f4   : > { %11615 = vst [vmem:[#allocation296_spill] sm:$0xff] %v7713_v41  ;;  %v1743_v41 = vsel %vm359_vm0, %v7720_v9, 0.0  ;;  %v7748_v9 = vld [vmem:[%s5893_s10 + $0x7b0] sm:$0xff]  ;;  %11625 = vst [vmem:[#allocation306_spill] sm:$0xff] %v7751_v46 }
 0x2f5   : > { %1738 = vadd.xlane.f32.xlu1 %v1737_v1  ;;  %11624 = vst [vmem:[#allocation305_spill] sm:$0xff] %v7748_v9 }
 0x2f6   : > { %1735 = vadd.xlane.f32.xlu0 %v1734_v19  ;;  %v7725_v59 = vpop.xlane.xlu1 %1303 }
 0x2f7   : > { %11618 = vst [vmem:[#allocation299_spill] sm:$0xff] %v7725_v59  ;;  %v7727_v49 = vpop.xlane.xlu0 %1300  ;;  %v1746_v59 = vsel %vm359_vm0, %v7737_v43, 0.0  ;;  %v7765_v43 = vld [vmem:[%s5893_s10 + $0x7c0] sm:$0xff] }
 0x2f8   : > { %11619 = vst [vmem:[#allocation300_spill] sm:$0xff] %v7727_v49  ;;  %v1749_v49 = vsel %vm359_vm0, %v7734_v16, 0.0  ;;  %v7762_v16 = vld [vmem:[%s5893_s10 + $0x7d0] sm:$0xff]  ;;  %11628 = vst [vmem:[#allocation309_spill] sm:$0xff] %v7765_v43 }
 0x2f9   : > { %1744 = vadd.xlane.f32.xlu1 %v1743_v41 }
 0x2fa   : > { %1741 = vadd.xlane.f32.xlu0 %v1740_v56  ;;  %v7739_v1 = vpop.xlane.xlu1 %1309 }
 0x2fb   : > { %11622 = vst [vmem:[#allocation303_spill] sm:$0xff] %v7739_v1  ;;  %v7741_v19 = vpop.xlane.xlu0 %1306  ;;  %v1752_v1 = vsel %vm359_vm0, %v7751_v46, 0.0 }
 0x2fc   : > { %11623 = vst [vmem:[#allocation304_spill] sm:$0xff] %v7741_v19  ;;  %v1755_v19 = vsel %vm359_vm0, %v7748_v9, 0.0  ;;  %v7779_v9 = vld [vmem:[%s5893_s10 + $0x7e0] sm:$0xff] }
 0x2fd   : > { %1750 = vadd.xlane.f32.xlu1 %v1749_v49  ;;  %11632 = vst [vmem:[#allocation313_spill] sm:$0xff] %v7779_v9 }
 0x2fe   : > { %1747 = vadd.xlane.f32.xlu0 %v1746_v59  ;;  %v7753_v41 = vpop.xlane.xlu1 %1315  ;;  %v1761_v59 = vsel %vm359_vm0, %v7762_v16, 0.0 }
 0x2ff   : > { %11626 = vst [vmem:[#allocation307_spill] sm:$0xff] %v7753_v41  ;;  %v7755_v56 = vpop.xlane.xlu0 %1312  ;;  %v7776_v41 = vld [vmem:[%s5893_s10 + $0x7f0] sm:$0xff] }
 0x300   : > { %11627 = vst [vmem:[#allocation308_spill] sm:$0xff] %v7755_v56  ;;  %v1758_v56 = vsel %vm359_vm0, %v7765_v43, 0.0  ;;  %11631 = vst [vmem:[#allocation312_spill] sm:$0xff] %v7776_v41  ;;  %v1770_v43 = vmul.f32 %v7345_v14, %v7345_v14 }
 0x301   : > { %1756 = vadd.xlane.f32.xlu1 %v1755_v19 }
 0x302   : > { %1753 = vadd.xlane.f32.xlu0 %v1752_v1  ;;  %v7767_v39 = vpop.xlane.xlu1 %1321  ;;  %v1767_v1 = vsel %vm359_vm0, %v7776_v41, 0.0  ;;  %v1773_v41 = vmul.f32 %v7356_v2, %v7356_v2 }
 0x303   : > { %11629 = vst [vmem:[#allocation310_spill] sm:$0xff] %v7767_v39  ;;  %v7769_v49 = vpop.xlane.xlu0 %1318  ;;  %v1771_v39 = vmul.f32 %v7342_v58, %v7342_v58 }
 0x304   : > { %11630 = vst [vmem:[#allocation311_spill] sm:$0xff] %v7769_v49  ;;  %v1764_v49 = vsel %vm359_vm0, %v7779_v9, 0.0  ;;  %v1772_v9 = vmul.f32 %v7359_v8, %v7359_v8 }
 0x305   : > { %1762 = vadd.xlane.f32.xlu1 %v1761_v59 }
 0x306   : > { %1759 = vadd.xlane.f32.xlu0 %v1758_v56  ;;  %v7781_v46 = vpop.xlane.xlu1 %1327 }
 0x307   : > { %11633 = vst [vmem:[#allocation314_spill] sm:$0xff] %v7781_v46  ;;  %v7783_v19 = vpop.xlane.xlu0 %1324  ;;  %v1834_v46 = vsel %vm359_vm0, %v1770_v43, 0.0  ;;  %v1774_v43 = vmul.f32 %v7373_v5, %v7373_v5 }
 0x308   : > { %11634 = vst [vmem:[#allocation315_spill] sm:$0xff] %v7783_v19  ;;  %v1837_v19 = vsel %vm359_vm0, %v1771_v39, 0.0  ;;  %v1775_v39 = vmul.f32 %v7370_v63, %v7370_v63 }
 0x309   : > { %1768 = vadd.xlane.f32.xlu1 %v1767_v1  ;;  %v1840_v1 = vsel %vm359_vm0, %v1772_v9, 0.0  ;;  %v1776_v9 = vmul.f32 %v7387_v57, %v7387_v57  ;;  %v11644_v57 = vld [vmem:[#allocation68_spill] sm:$0xff] }
 0x30a   : > { %1765 = vadd.xlane.f32.xlu0 %v1764_v49  ;;  %v7793_v59 = vpop.xlane.xlu1 %1333  ;;  %v1843_v49 = vsel %vm359_vm0, %v1773_v41, 0.0  ;;  %v1777_v41 = vmul.f32 %v7384_v50, %v7384_v50  ;;  %v11643_v50 = vld [vmem:[#allocation70_spill] sm:$0xff] }
 0x30b   : > { %11635 = vst [vmem:[#allocation316_spill] sm:$0xff] %v7793_v59  ;;  %v7795_v56 = vpop.xlane.xlu0 %1330  ;;  %v8683_v59 = vld [vmem:[%s5893_s10 + $0x788] sm:$0xff] }
 0x30c   : > { %11636 = vst [vmem:[#allocation317_spill] sm:$0xff] %v7795_v56 }
 0x30d   : > { %1838 = vadd.xlane.f32.xlu1 %v1837_v19  ;;  %v1846_v19 = vsel %vm359_vm0, %v1774_v43, 0.0  ;;  %v1778_v43 = vmul.f32 %v7401_v6, %v7401_v6  ;;  %v1780_v6 = vmul.f32 %v7415_v11, %v7415_v11  ;;  %v1783_v11 = vmul.f32 %v7426_v21, %v7426_v21 }
 0x30e   : > { %1835 = vadd.xlane.f32.xlu0 %v1834_v46  ;;  %v7803_v58 = vpop.xlane.xlu1 %1339  ;;  %v1849_v46 = vsel %vm359_vm0, %v1775_v39, 0.0  ;;  %v1779_v39 = vmul.f32 %v7398_v12, %v7398_v12  ;;  %v1781_v12 = vmul.f32 %v7412_v54, %v7412_v54 }
 0x30f   : > { %11637 = vst [vmem:[#allocation318_spill] sm:$0xff] %v7803_v58  ;;  %v7805_v14 = vpop.xlane.xlu0 %1336  ;;  %v1864_v54 = vsel %vm359_vm0, %v1780_v6, 0.0  ;;  %v1873_v6 = vsel %vm359_vm0, %v1783_v11, 0.0  ;;  %v1786_v11 = vmul.f32 %v7457_v17, %v7457_v17  ;;  %v1789_v17 = vmul.f32 %v7468_v33, %v7468_v33  ;;  %v8669_v58 = vld [vmem:[%s5893_s10 + $0x6e8] sm:$0xff] }
 0x310   : > { %11638 = vst [vmem:[#allocation319_spill] sm:$0xff] %v7805_v14  ;;  %v8666_v14 = vld [vmem:[%s5893_s10 + $0x6f8] sm:$0xff] }
 0x311   : > { %1844 = vadd.xlane.f32.xlu1 %v1843_v49  ;;  %v1855_v49 = vsel %vm359_vm0, %v1777_v41, 0.0  ;;  %v1861_v41 = vsel %vm359_vm0, %v1779_v39, 0.0 }
 0x312   : > { %1841 = vadd.xlane.f32.xlu0 %v1840_v1  ;;  %v7813_v2 = vpop.xlane.xlu1 %1345  ;;  %v1852_v1 = vsel %vm359_vm0, %v1776_v9, 0.0  ;;  %v1858_v9 = vsel %vm359_vm0, %v1778_v43, 0.0 }
 0x313   : > { %11639 = vst [vmem:[#allocation320_spill] sm:$0xff] %v7813_v2  ;;  %v7815_v8 = vpop.xlane.xlu0 %1342  ;;  %v8655_v2 = vld [vmem:[%s5893_s10 + $0x6c8] sm:$0xff] }
 0x314   : > { %11640 = vst [vmem:[#allocation321_spill] sm:$0xff] %v7815_v8  ;;  %v1354_v8 = vadd.f32 %v7065_v7, %v11643_v50  ;;  %v11647_v50 = vld [vmem:[#allocation69_spill] sm:$0xff] }
 0x315   : > { %1850 = vadd.xlane.f32.xlu1 %v1849_v46  ;;  %v1353_v46 = vadd.f32 %v7067_v60, %v11644_v57  ;;  %v1356_v60 = vadd.f32 %v7075_v4, %v11647_v50  ;;  %v1867_v57 = vsel %vm359_vm0, %v1781_v12, 0.0  ;;  %v1784_v50 = vmul.f32 %v7443_v30, %v7443_v30 }
 0x316   : > { %1847 = vadd.xlane.f32.xlu0 %v1846_v19  ;;  %v7823_v63 = vpop.xlane.xlu1 %1351  ;;  %v1787_v30 = vmul.f32 %v7454_v28, %v7454_v28  ;;  %v1882_v28 = vsel %vm359_vm0, %v1786_v11, 0.0 }
 0x317   : > { %11641 = vst [vmem:[#allocation322_spill] sm:$0xff] %v7823_v63  ;;  %v7825_v5 = vpop.xlane.xlu0 %1348 }
 0x318   : > { %11642 = vst [vmem:[#allocation323_spill] sm:$0xff] %v7825_v5 }
 0x319   : > { %1856 = vadd.xlane.f32.xlu1 %v1855_v49  ;;  %v11648_v49 = vld [vmem:[#allocation67_spill] sm:$0xff] }
 0x31a   : > { %1853 = vadd.xlane.f32.xlu0 %v1852_v1  ;;  %v1583_v19 = vpop.xlane.xlu1 %1582  ;;  %v1355_v1 = vadd.f32 %v7077_v0, %v11648_v49  ;;  %v11655_v49 = vld [vmem:[#allocation73_spill] sm:$0xff] }
 0x31b   : > { %v1580_v5 = vpop.xlane.xlu0 %1579  ;;  %v7843_v63 = vadd.f32 %v1583_v19, %v1354_v8  ;;  %v1782_v8 = vmul.f32 %v7429_v62, %v7429_v62  ;;  %v11652_v19 = vld [vmem:[#allocation72_spill] sm:$0xff]  ;;  %v1785_v62 = vmul.f32 %v7440_v24, %v7440_v24  ;;  %v1876_v24 = vsel %vm359_vm0, %v1784_v50, 0.0  ;;  %v11664_v50 = vld [vmem:[#allocation78_spill] sm:$0xff] }
 0x31c   : > { %v7845_v7 = vadd.f32 %v1580_v5, %v1353_v46  ;;  %v11651_v46 = vld [vmem:[#allocation71_spill] sm:$0xff] }
 0x31d   : > { %11645 = vst [vmem:[#allocation70_spill] sm:$0xff] %v7843_v63  ;;  %1862 = vadd.xlane.f32.xlu1 %v1861_v41  ;;  %v1358_v0 = vadd.f32 %v7085_v31, %v11651_v46  ;;  %v1357_v41 = vadd.f32 %v7087_v15, %v11652_v19  ;;  %v1870_v21 = vsel %vm359_vm0, %v1782_v8, 0.0  ;;  %v1360_v15 = vadd.f32 %v7095_v55, %v11655_v49  ;;  %v11659_v46 = vld [vmem:[#allocation75_spill] sm:$0xff] }
 0x31e   : > { %11646 = vst [vmem:[#allocation68_spill] sm:$0xff] %v7845_v7  ;;  %1859 = vadd.xlane.f32.xlu0 %v1858_v9  ;;  %v1589_v39 = vpop.xlane.xlu1 %1588  ;;  %v1363_v49 = vadd.f32 %v7117_v32, %v11664_v50  ;;  %v11675_v50 = vld [vmem:[#allocation83_spill] sm:$0xff] }
 0x31f   : > { %v1586_v43 = vpop.xlane.xlu0 %1585  ;;  %v7857_v5 = vadd.f32 %v1589_v39, %v1356_v60 }
 0x320   : > { %v7859_v4 = vadd.f32 %v1586_v43, %v1355_v1  ;;  %v11656_v1 = vld [vmem:[#allocation74_spill] sm:$0xff] }
 0x321   : > { %11649 = vst [vmem:[#allocation69_spill] sm:$0xff] %v7857_v5  ;;  %1868 = vadd.xlane.f32.xlu1 %v1867_v57  ;;  %v1359_v39 = vadd.f32 %v7097_v18, %v11656_v1  ;;  %v1362_v18 = vadd.f32 %v7105_v22, %v11659_v46  ;;  %v8585_v5 = vld [vmem:[%s5893_s10 + $0x5a8] sm:$0xff] }
 0x322   : > { %11650 = vst [vmem:[#allocation67_spill] sm:$0xff] %v7859_v4  ;;  %1865 = vadd.xlane.f32.xlu0 %v1864_v54  ;;  %v1595_v9 = vpop.xlane.xlu1 %1594  ;;  %v1879_v54 = vsel %vm359_vm0, %v1785_v62, 0.0  ;;  %v11663_v62 = vld [vmem:[#allocation77_spill] sm:$0xff]  ;;  %v8582_v4 = vld [vmem:[%s5893_s10 + $0x5b8] sm:$0xff]  ;;  %v2377_v63 = vsel %vm359_vm0, %v8585_v5, 0.0 }
 0x323   : > { %v1592_v12 = vpop.xlane.xlu0 %1591  ;;  %v7871_v60 = vadd.f32 %v1595_v9, %v1358_v0  ;;  %v11660_v0 = vld [vmem:[#allocation76_spill] sm:$0xff]  ;;  %v2380_v7 = vsel %vm359_vm0, %v8582_v4, 0.0 }
 0x324   : > { %v7873_v31 = vadd.f32 %v1592_v12, %v1357_v41  ;;  %v1361_v19 = vadd.f32 %v7107_v26, %v11660_v0  ;;  %v1885_v12 = vsel %vm359_vm0, %v1787_v30, 0.0  ;;  %v1364_v26 = vadd.f32 %v7115_v27, %v11663_v62 }
 0x325   : > { %11653 = vst [vmem:[#allocation71_spill] sm:$0xff] %v7871_v60  ;;  %1874 = vadd.xlane.f32.xlu1 %v1873_v6  ;;  %v1788_v6 = vmul.f32 %v7471_v20, %v7471_v20  ;;  %v1791_v20 = vmul.f32 %v7482_v35, %v7482_v35  ;;  %v1792_v0 = vmul.f32 %v7499_v25, %v7499_v25 }
 0x326   : > { %11654 = vst [vmem:[#allocation72_spill] sm:$0xff] %v7873_v31  ;;  %1871 = vadd.xlane.f32.xlu0 %v1870_v21  ;;  %v1601_v43 = vpop.xlane.xlu1 %1600  ;;  %v1795_v25 = vmul.f32 %v7510_v42, %v7510_v42  ;;  %v1794_v62 = vmul.f32 %v7513_v29, %v7513_v29  ;;  %v1797_v29 = vmul.f32 %v7524_v45, %v7524_v45 }
 0x327   : > { %v1598_v57 = vpop.xlane.xlu0 %1597  ;;  %v7885_v8 = vadd.f32 %v1601_v43, %v1360_v15  ;;  %v1888_v33 = vsel %vm359_vm0, %v1788_v6, 0.0  ;;  %v1790_v43 = vmul.f32 %v7485_v23, %v7485_v23  ;;  %v1793_v23 = vmul.f32 %v7496_v38, %v7496_v38 }
 0x328   : > { %v7887_v55 = vadd.f32 %v1598_v57, %v1359_v39  ;;  %v1891_v39 = vsel %vm359_vm0, %v1789_v17, 0.0  ;;  %v1900_v38 = vsel %vm359_vm0, %v1792_v0, 0.0  ;;  %v1906_v42 = vsel %vm359_vm0, %v1794_v62, 0.0  ;;  %v11684_v0 = vld [vmem:[#allocation88_spill] sm:$0xff]  ;;  %v11690_v62 = vld [vmem:[#allocation90_spill] sm:$0xff] }
 0x329   : > { %11657 = vst [vmem:[#allocation73_spill] sm:$0xff] %v7885_v8  ;;  %1880 = vadd.xlane.f32.xlu1 %v1879_v54  ;;  %v11667_v54 = vld [vmem:[#allocation79_spill] sm:$0xff]  ;;  %v1894_v35 = vsel %vm359_vm0, %v1790_v43, 0.0  ;;  %v1903_v6 = vsel %vm359_vm0, %v1793_v23, 0.0  ;;  %v8571_v8 = vld [vmem:[%s5893_s10 + $0x588] sm:$0xff] }
 0x32a   : > { %11658 = vst [vmem:[#allocation74_spill] sm:$0xff] %v7887_v55  ;;  %1877 = vadd.xlane.f32.xlu0 %v1876_v24  ;;  %v1607_v41 = vpop.xlane.xlu1 %1606  ;;  %v1366_v32 = vadd.f32 %v7125_v36, %v11667_v54  ;;  %v11668_v24 = vld [vmem:[#allocation80_spill] sm:$0xff]  ;;  %v11679_v54 = vld [vmem:[#allocation85_spill] sm:$0xff]  ;;  %v11683_v23 = vld [vmem:[#allocation87_spill] sm:$0xff]  ;;  %v2371_v60 = vsel %vm359_vm0, %v8571_v8, 0.0 }
 0x32b   : > { %v1604_v9 = vpop.xlane.xlu0 %1603  ;;  %v7899_v21 = vadd.f32 %v1607_v41, %v1362_v18  ;;  %v1365_v30 = vadd.f32 %v7127_v13, %v11668_v24  ;;  %v1897_v18 = vsel %vm359_vm0, %v1791_v20, 0.0  ;;  %v11671_v41 = vld [vmem:[#allocation81_spill] sm:$0xff]  ;;  %v1796_v20 = vmul.f32 %v7527_v34, %v7527_v34  ;;  %v8568_v55 = vld [vmem:[%s5893_s10 + $0x598] sm:$0xff] }
 0x32c   : > { %v7901_v22 = vadd.f32 %v1604_v9, %v1361_v19  ;;  %v1368_v13 = vadd.f32 %v7135_v44, %v11671_v41  ;;  %v11672_v9 = vld [vmem:[#allocation82_spill] sm:$0xff]  ;;  %v1799_v34 = vmul.f32 %v7538_v47, %v7538_v47  ;;  %v1373_v41 = vadd.f32 %v7167_v61, %v11684_v0  ;;  %v11689_v61 = vld [vmem:[#allocation196_spill] sm:$0xff] }
 0x32d   : > { %11661 = vst [vmem:[#allocation75_spill] sm:$0xff] %v7899_v21  ;;  %1886 = vadd.xlane.f32.xlu1 %v1885_v12  ;;  %v1367_v12 = vadd.f32 %v7137_v40, %v11672_v9  ;;  %v1370_v40 = vadd.f32 %v7145_v10, %v11675_v50  ;;  %v1912_v45 = vsel %vm359_vm0, %v1796_v20, 0.0  ;;  %v11691_v50 = vld [vmem:[#allocation197_spill] sm:$0xff]  ;;  %v2374_v31 = vsel %vm359_vm0, %v8568_v55, 0.0 }
 0x32e   : > { %11662 = vst [vmem:[#allocation76_spill] sm:$0xff] %v7901_v22  ;;  %1883 = vadd.xlane.f32.xlu0 %v1882_v28  ;;  %v1613_v15 = vpop.xlane.xlu1 %1612 }
 0x32f   : > { %v1610_v1 = vpop.xlane.xlu0 %1609  ;;  %v7913_v57 = vadd.f32 %v1613_v15, %v1364_v26 }
 0x330   : > { %v7915_v27 = vadd.f32 %v1610_v1, %v1363_v49  ;;  %v11676_v49 = vld [vmem:[#allocation84_spill] sm:$0xff] }
 0x331   : > { %11665 = vst [vmem:[#allocation77_spill] sm:$0xff] %v7913_v57  ;;  %1892 = vadd.xlane.f32.xlu1 %v1891_v39  ;;  %v1369_v15 = vadd.f32 %v7147_v48, %v11676_v49  ;;  %v1372_v48 = vadd.f32 %v7155_v53, %v11679_v54  ;;  %v8557_v57 = vld [vmem:[%s5893_s10 + $0x4e8] sm:$0xff] }
 0x332   : > { %11666 = vst [vmem:[#allocation78_spill] sm:$0xff] %v7915_v27  ;;  %1889 = vadd.xlane.f32.xlu0 %v1888_v33  ;;  %v1619_v11 = vpop.xlane.xlu1 %1618  ;;  %v1909_v33 = vsel %vm359_vm0, %v1795_v25, 0.0  ;;  %v2365_v21 = vsel %vm359_vm0, %v8557_v57, 0.0 }
 0x333   : > { %v1616_v46 = vpop.xlane.xlu0 %1615  ;;  %v7927_v19 = vadd.f32 %v1619_v11, %v1366_v32  ;;  %v11680_v32 = vld [vmem:[#allocation86_spill] sm:$0xff] }
 0x334   : > { %v7929_v36 = vadd.f32 %v1616_v46, %v1365_v30  ;;  %v1371_v24 = vadd.f32 %v7157_v3, %v11680_v32  ;;  %v1915_v46 = vsel %vm359_vm0, %v1797_v29, 0.0  ;;  %v1374_v3 = vadd.f32 %v7165_v51, %v11683_v23  ;;  %v11697_v32 = vld [vmem:[#allocation198_spill] sm:$0xff] }
 0x335   : > { %11669 = vst [vmem:[#allocation79_spill] sm:$0xff] %v7927_v19  ;;  %1898 = vadd.xlane.f32.xlu1 %v1897_v18  ;;  %v1798_v18 = vmul.f32 %v7541_v37, %v7541_v37  ;;  %v1801_v37 = vmul.f32 %v7552_v52, %v7552_v52 }
 0x336   : > { %11670 = vst [vmem:[#allocation80_spill] sm:$0xff] %v7929_v36  ;;  %1895 = vadd.xlane.f32.xlu0 %v1894_v35  ;;  %v1625_v28 = vpop.xlane.xlu1 %1624 }
 0x337   : > { %v1622_v17 = vpop.xlane.xlu0 %1621  ;;  %v7941_v26 = vadd.f32 %v1625_v28, %v1368_v13  ;;  %v1918_v47 = vsel %vm359_vm0, %v1798_v18, 0.0  ;;  %v11685_v28 = vld [vmem:[#allocation250_spill] sm:$0xff] }
 0x338   : > { %v7943_v44 = vadd.f32 %v1622_v17, %v1367_v12  ;;  %v1921_v12 = vsel %vm359_vm0, %v1799_v34, 0.0  ;;  %v1800_v17 = vmul.f32 %v11685_v28, %v11685_v28 }
 0x339   : > { %11673 = vst [vmem:[#allocation81_spill] sm:$0xff] %v7941_v26  ;;  %1904 = vadd.xlane.f32.xlu1 %v1903_v6 }
 0x33a   : > { %11674 = vst [vmem:[#allocation82_spill] sm:$0xff] %v7943_v44  ;;  %1901 = vadd.xlane.f32.xlu0 %v1900_v38  ;;  %v1631_v1 = vpop.xlane.xlu1 %1630  ;;  %v11688_v38 = vld [vmem:[#allocation89_spill] sm:$0xff]  ;;  %v1924_v52 = vsel %vm359_vm0, %v1800_v17, 0.0  ;;  %v11706_v17 = vld [vmem:[#allocation94_spill] sm:$0xff] }
 0x33b   : > { %v1628_v39 = vpop.xlane.xlu0 %1627  ;;  %v7955_v43 = vadd.f32 %v1631_v1, %v1370_v40  ;;  %v1376_v25 = vadd.f32 %v11689_v61, %v11688_v38  ;;  %v1375_v40 = vadd.f32 %v11691_v50, %v11690_v62  ;;  %v1927_v1 = vsel %vm359_vm0, %v1801_v37, 0.0  ;;  %v11705_v37 = vld [vmem:[#allocation200_spill] sm:$0xff]  ;;  %v11707_v38 = vld [vmem:[#allocation201_spill] sm:$0xff] }
 0x33c   : > { %v7957_v10 = vadd.f32 %v1628_v39, %v1369_v15  ;;  %v11692_v39 = vld [vmem:[#allocation253_spill] sm:$0xff]  ;;  %v1379_v61 = vadd.f32 %v11707_v38, %v11706_v17  ;;  %v11722_v17 = vld [vmem:[#allocation98_spill] sm:$0xff] }
 0x33d   : > { %11677 = vst [vmem:[#allocation83_spill] sm:$0xff] %v7955_v43  ;;  %1910 = vadd.xlane.f32.xlu1 %v1909_v33  ;;  %v1803_v33 = vmul.f32 %v11692_v39, %v11692_v39  ;;  %v11723_v38 = vld [vmem:[#allocation205_spill] sm:$0xff] }
 0x33e   : > { %11678 = vst [vmem:[#allocation84_spill] sm:$0xff] %v7957_v10  ;;  %1907 = vadd.xlane.f32.xlu0 %v1906_v42  ;;  %v1637_v30 = vpop.xlane.xlu1 %1636  ;;  %v11693_v42 = vld [vmem:[#allocation254_spill] sm:$0xff] }
 0x33f   : > { %v1634_v11 = vpop.xlane.xlu0 %1633  ;;  %v7969_v35 = vadd.f32 %v1637_v30, %v1372_v48  ;;  %v1802_v29 = vmul.f32 %v11693_v42, %v11693_v42  ;;  %v11696_v48 = vld [vmem:[#allocation91_spill] sm:$0xff]  ;;  %v11698_v30 = vld [vmem:[#allocation92_spill] sm:$0xff]  ;;  %v1933_v18 = vsel %vm359_vm0, %v1803_v33, 0.0 }
 0x340   : > { %v7971_v53 = vadd.f32 %v1634_v11, %v1371_v24  ;;  %v1378_v24 = vadd.f32 %v11697_v32, %v11696_v48  ;;  %v11699_v11 = vld [vmem:[#allocation199_spill] sm:$0xff]  ;;  %v11714_v32 = vld [vmem:[#allocation96_spill] sm:$0xff] }
 0x341   : > { %11681 = vst [vmem:[#allocation85_spill] sm:$0xff] %v7969_v35  ;;  %1916 = vadd.xlane.f32.xlu1 %v1915_v46  ;;  %v1377_v46 = vadd.f32 %v11699_v11, %v11698_v30  ;;  %v1930_v23 = vsel %vm359_vm0, %v1802_v29, 0.0  ;;  %v11712_v42 = vld [vmem:[#allocation95_spill] sm:$0xff]  ;;  %v11713_v29 = vld [vmem:[#allocation202_spill] sm:$0xff] }
 0x342   : > { %11682 = vst [vmem:[#allocation86_spill] sm:$0xff] %v7971_v53  ;;  %1913 = vadd.xlane.f32.xlu0 %v1912_v45  ;;  %v1643_v13 = vpop.xlane.xlu1 %1642  ;;  %v1382_v48 = vadd.f32 %v11713_v29, %v11712_v42 }
 0x343   : > { %v1640_v9 = vpop.xlane.xlu0 %1639  ;;  %v7983_v6 = vadd.f32 %v1643_v13, %v1374_v3  ;;  %v11700_v3 = vld [vmem:[#allocation257_spill] sm:$0xff] }
 0x344   : > { %v7985_v51 = vadd.f32 %v1640_v9, %v1373_v41  ;;  %v1805_v0 = vmul.f32 %v11700_v3, %v11700_v3  ;;  %v11701_v41 = vld [vmem:[#allocation258_spill] sm:$0xff] }
 0x345   : > { %11686 = vst [vmem:[#allocation87_spill] sm:$0xff] %v7983_v6  ;;  %1922 = vadd.xlane.f32.xlu1 %v1921_v12  ;;  %v1804_v13 = vmul.f32 %v11701_v41, %v11701_v41  ;;  %v11717_v3 = vld [vmem:[#allocation266_spill] sm:$0xff] }
 0x346   : > { %11687 = vst [vmem:[#allocation88_spill] sm:$0xff] %v7985_v51  ;;  %1919 = vadd.xlane.f32.xlu0 %v1918_v47  ;;  %v1649_v49 = vpop.xlane.xlu1 %1648  ;;  %v11704_v47 = vld [vmem:[#allocation93_spill] sm:$0xff]  ;;  %v1939_v50 = vsel %vm359_vm0, %v1805_v0, 0.0  ;;  %v1808_v0 = vmul.f32 %v11717_v3, %v11717_v3 }
 0x347   : > { %v1646_v15 = vpop.xlane.xlu0 %1645  ;;  %v7997_v20 = vadd.f32 %v1649_v49, %v1376_v25  ;;  %v1380_v28 = vadd.f32 %v11705_v37, %v11704_v47  ;;  %v11708_v49 = vld [vmem:[#allocation261_spill] sm:$0xff]  ;;  %v11721_v37 = vld [vmem:[#allocation204_spill] sm:$0xff] }
 0x348   : > { %v7999_v54 = vadd.f32 %v1646_v15, %v1375_v40  ;;  %v1936_v40 = vsel %vm359_vm0, %v1804_v13, 0.0  ;;  %v1807_v15 = vmul.f32 %v11708_v49, %v11708_v49  ;;  %v11720_v47 = vld [vmem:[#allocation97_spill] sm:$0xff] }
 0x349   : > { %11694 = vst [vmem:[#allocation250_spill] sm:$0xff] %v7997_v20  ;;  %1928 = vadd.xlane.f32.xlu1 %v1927_v1  ;;  %v11709_v1 = vld [vmem:[#allocation262_spill] sm:$0xff]  ;;  %v11724_v49 = vld [vmem:[#allocation269_spill] sm:$0xff] }
 0x34a   : > { %11695 = vst [vmem:[#allocation89_spill] sm:$0xff] %v7999_v54  ;;  %1925 = vadd.xlane.f32.xlu0 %v1924_v52  ;;  %v1655_v45 = vpop.xlane.xlu1 %1654  ;;  %v1806_v52 = vmul.f32 %v11709_v1, %v11709_v1  ;;  %v11725_v1 = vld [vmem:[#allocation270_spill] sm:$0xff]  ;;  %v11732_v3 = vld [vmem:[#allocation273_spill] sm:$0xff] }
 0x34b   : > { %v1652_v34 = vpop.xlane.xlu0 %1651  ;;  %v8011_v9 = vadd.f32 %v1655_v45, %v1378_v24  ;;  %v11715_v24 = vld [vmem:[#allocation203_spill] sm:$0xff]  ;;  %v1945_v45 = vsel %vm359_vm0, %v1807_v15, 0.0  ;;  %v1811_v15 = vmul.f32 %v11724_v49, %v11724_v49 }
 0x34c   : > { %v8013_v12 = vadd.f32 %v1652_v34, %v1377_v46  ;;  %v1381_v30 = vadd.f32 %v11715_v24, %v11714_v32  ;;  %v1942_v34 = vsel %vm359_vm0, %v1806_v52, 0.0  ;;  %v1810_v52 = vmul.f32 %v11725_v1, %v11725_v1  ;;  %v11729_v32 = vld [vmem:[#allocation206_spill] sm:$0xff] }
 0x34d   : > { %11702 = vst [vmem:[#allocation196_spill] sm:$0xff] %v8011_v9  ;;  %1934 = vadd.xlane.f32.xlu1 %v1933_v18  ;;  %v11716_v18 = vld [vmem:[#allocation265_spill] sm:$0xff] }
 0x34e   : > { %11703 = vst [vmem:[#allocation90_spill] sm:$0xff] %v8013_v12  ;;  %1931 = vadd.xlane.f32.xlu0 %v1930_v23  ;;  %v1661_v25 = vpop.xlane.xlu1 %1660  ;;  %v1809_v23 = vmul.f32 %v11716_v18, %v11716_v18  ;;  %v1957_v18 = vsel %vm359_vm0, %v1811_v15, 0.0 }
 0x34f   : > { %v1658_v62 = vpop.xlane.xlu0 %1657  ;;  %v8025_v39 = vadd.f32 %v1661_v25, %v1380_v28  ;;  %v1384_v28 = vadd.f32 %v11721_v37, %v11720_v47  ;;  %v11733_v47 = vld [vmem:[#allocation274_spill] sm:$0xff] }
 0x350   : > { %v8027_v33 = vadd.f32 %v1658_v62, %v1379_v61  ;;  %v1383_v61 = vadd.f32 %v11723_v38, %v11722_v17  ;;  %v1812_v37 = vmul.f32 %v11733_v47, %v11733_v47  ;;  %v11736_v38 = vld [vmem:[#allocation101_spill] sm:$0xff] }
 0x351   : > { %11710 = vst [vmem:[#allocation197_spill] sm:$0xff] %v8025_v39  ;;  %1940 = vadd.xlane.f32.xlu1 %v1939_v50  ;;  %v1951_v50 = vsel %vm359_vm0, %v1809_v23, 0.0  ;;  %v1954_v23 = vsel %vm359_vm0, %v1810_v52, 0.0 }
 0x352   : > { %11711 = vst [vmem:[#allocation253_spill] sm:$0xff] %v8027_v33  ;;  %1937 = vadd.xlane.f32.xlu0 %v1936_v40  ;;  %v1667_v11 = vpop.xlane.xlu1 %1666  ;;  %v1948_v40 = vsel %vm359_vm0, %v1808_v0, 0.0  ;;  %v1813_v0 = vmul.f32 %v11732_v3, %v11732_v3  ;;  %v1960_v52 = vsel %vm359_vm0, %v1812_v37, 0.0  ;;  %v11747_v3 = vld [vmem:[#allocation211_spill] sm:$0xff] }
 0x353   : > { %v1664_v46 = vpop.xlane.xlu0 %1663  ;;  %v8039_v41 = vadd.f32 %v1667_v11, %v1382_v48  ;;  %v11728_v48 = vld [vmem:[#allocation99_spill] sm:$0xff] }
 0x354   : > { %v8041_v13 = vadd.f32 %v1664_v46, %v1381_v30  ;;  %v1386_v24 = vadd.f32 %v11729_v32, %v11728_v48  ;;  %v11730_v30 = vld [vmem:[#allocation100_spill] sm:$0xff]  ;;  %v11731_v11 = vld [vmem:[#allocation207_spill] sm:$0xff]  ;;  %v1963_v1 = vsel %vm359_vm0, %v1813_v0, 0.0  ;;  %v11740_v48 = vld [vmem:[#allocation277_spill] sm:$0xff] }
 0x355   : > { %11718 = vst [vmem:[#allocation254_spill] sm:$0xff] %v8039_v41  ;;  %1946 = vadd.xlane.f32.xlu1 %v1945_v45  ;;  %v1385_v46 = vadd.f32 %v11731_v11, %v11730_v30  ;;  %v1815_v32 = vmul.f32 %v11740_v48, %v11740_v48  ;;  %v11752_v48 = vld [vmem:[#allocation105_spill] sm:$0xff] }
 0x356   : > { %11719 = vst [vmem:[#allocation91_spill] sm:$0xff] %v8041_v13  ;;  %1943 = vadd.xlane.f32.xlu0 %v1942_v34  ;;  %v1673_v25 = vpop.xlane.xlu1 %1672 }
 0x357   : > { %v1670_v62 = vpop.xlane.xlu0 %1669  ;;  %v8053_v42 = vadd.f32 %v1673_v25, %v1384_v28 }
 0x358   : > { %v8055_v29 = vadd.f32 %v1670_v62, %v1383_v61  ;;  %v11737_v61 = vld [vmem:[#allocation208_spill] sm:$0xff]  ;;  %v11738_v62 = vld [vmem:[#allocation102_spill] sm:$0xff] }
 0x359   : > { %11726 = vst [vmem:[#allocation198_spill] sm:$0xff] %v8053_v42  ;;  %1952 = vadd.xlane.f32.xlu1 %v1951_v50  ;;  %v1388_v25 = vadd.f32 %v11737_v61, %v11736_v38  ;;  %v11739_v50 = vld [vmem:[#allocation209_spill] sm:$0xff]  ;;  %v1969_v38 = vsel %vm359_vm0, %v1815_v32, 0.0 }
 0x35a   : > { %11727 = vst [vmem:[#allocation92_spill] sm:$0xff] %v8055_v29  ;;  %1949 = vadd.xlane.f32.xlu0 %v1948_v40  ;;  %v1679_v45 = vpop.xlane.xlu1 %1678  ;;  %v1387_v40 = vadd.f32 %v11739_v50, %v11738_v62  ;;  %v11748_v62 = vld [vmem:[#allocation281_spill] sm:$0xff]  ;;  %v11749_v50 = vld [vmem:[#allocation282_spill] sm:$0xff] }
 0x35b   : > { %v1676_v34 = vpop.xlane.xlu0 %1675  ;;  %v8067_v28 = vadd.f32 %v1679_v45, %v1386_v24  ;;  %v11741_v24 = vld [vmem:[#allocation278_spill] sm:$0xff]  ;;  %v11744_v45 = vld [vmem:[#allocation103_spill] sm:$0xff] }
 0x35c   : > { %v8069_v17 = vadd.f32 %v1676_v34, %v1385_v46  ;;  %v1814_v30 = vmul.f32 %v11741_v24, %v11741_v24  ;;  %v11745_v34 = vld [vmem:[#allocation210_spill] sm:$0xff]  ;;  %v11753_v24 = vld [vmem:[#allocation212_spill] sm:$0xff] }
 0x35d   : > { %11734 = vst [vmem:[#allocation199_spill] sm:$0xff] %v8067_v28  ;;  %1958 = vadd.xlane.f32.xlu1 %v1957_v18  ;;  %v1390_v18 = vadd.f32 %v11745_v34, %v11744_v45  ;;  %v11755_v45 = vld [vmem:[#allocation213_spill] sm:$0xff] }
 0x35e   : > { %11735 = vst [vmem:[#allocation257_spill] sm:$0xff] %v8069_v17  ;;  %1955 = vadd.xlane.f32.xlu0 %v1954_v23  ;;  %v1685_v49 = vpop.xlane.xlu1 %1684  ;;  %v11746_v23 = vld [vmem:[#allocation104_spill] sm:$0xff]  ;;  %v1966_v61 = vsel %vm359_vm0, %v1814_v30, 0.0 }
 0x35f   : > { %v1682_v15 = vpop.xlane.xlu0 %1681  ;;  %v8081_v11 = vadd.f32 %v1685_v49, %v1388_v25  ;;  %v1389_v47 = vadd.f32 %v11747_v3, %v11746_v23  ;;  %v1817_v25 = vmul.f32 %v11748_v62, %v11748_v62  ;;  %v11756_v62 = vld [vmem:[#allocation285_spill] sm:$0xff] }
 0x360   : > { %v8083_v46 = vadd.f32 %v1682_v15, %v1387_v40  ;;  %v1816_v40 = vmul.f32 %v11749_v50, %v11749_v50 }
 0x361   : > { %11742 = vst [vmem:[#allocation258_spill] sm:$0xff] %v8081_v11  ;;  %1964 = vadd.xlane.f32.xlu1 %v1963_v1  ;;  %v1392_v1 = vadd.f32 %v11753_v24, %v11752_v48  ;;  %v1975_v23 = vsel %vm359_vm0, %v1817_v25, 0.0  ;;  %v11760_v48 = vld [vmem:[#allocation107_spill] sm:$0xff]  ;;  %v11761_v24 = vld [vmem:[#allocation214_spill] sm:$0xff] }
 0x362   : > { %11743 = vst [vmem:[#allocation93_spill] sm:$0xff] %v8083_v46  ;;  %1961 = vadd.xlane.f32.xlu0 %v1960_v52  ;;  %v1691_v0 = vpop.xlane.xlu1 %1690  ;;  %v11754_v52 = vld [vmem:[#allocation106_spill] sm:$0xff]  ;;  %v1972_v3 = vsel %vm359_vm0, %v1816_v40, 0.0 }
 0x363   : > { %v1688_v37 = vpop.xlane.xlu0 %1687  ;;  %v8095_v49 = vadd.f32 %v1691_v0, %v1390_v18  ;;  %v1391_v34 = vadd.f32 %v11755_v45, %v11754_v52  ;;  %v1819_v18 = vmul.f32 %v11756_v62, %v11756_v62  ;;  %v11757_v0 = vld [vmem:[#allocation286_spill] sm:$0xff]  ;;  %v11763_v52 = vld [vmem:[#allocation215_spill] sm:$0xff] }
 0x364   : > { %v8097_v15 = vadd.f32 %v1688_v37, %v1389_v47  ;;  %v1818_v47 = vmul.f32 %v11757_v0, %v11757_v0 }
 0x365   : > { %11750 = vst [vmem:[#allocation200_spill] sm:$0xff] %v8095_v49  ;;  %1970 = vadd.xlane.f32.xlu1 %v1969_v38  ;;  %v1394_v38 = vadd.f32 %v11761_v24, %v11760_v48  ;;  %v11764_v49 = vld [vmem:[#allocation289_spill] sm:$0xff]  ;;  %v11769_v24 = vld [vmem:[#allocation216_spill] sm:$0xff] }
 0x366   : > { %11751 = vst [vmem:[#allocation94_spill] sm:$0xff] %v8097_v15  ;;  %1967 = vadd.xlane.f32.xlu0 %v1966_v61  ;;  %v1697_v32 = vpop.xlane.xlu1 %1696  ;;  %v11762_v61 = vld [vmem:[#allocation108_spill] sm:$0xff]  ;;  %v1981_v15 = vsel %vm359_vm0, %v1819_v18, 0.0  ;;  %v1978_v62 = vsel %vm359_vm0, %v1818_v47, 0.0  ;;  %v11768_v48 = vld [vmem:[#allocation109_spill] sm:$0xff] }
 0x367   : > { %v1694_v30 = vpop.xlane.xlu0 %1693  ;;  %v8109_v37 = vadd.f32 %v1697_v32, %v1392_v1  ;;  %v1393_v45 = vadd.f32 %v11763_v52, %v11762_v61  ;;  %v1821_v1 = vmul.f32 %v11764_v49, %v11764_v49  ;;  %v11765_v32 = vld [vmem:[#allocation290_spill] sm:$0xff]  ;;  %v11771_v61 = vld [vmem:[#allocation217_spill] sm:$0xff] }
 0x368   : > { %v8111_v50 = vadd.f32 %v1694_v30, %v1391_v34  ;;  %v1820_v34 = vmul.f32 %v11765_v32, %v11765_v32 }
 0x369   : > { %11758 = vst [vmem:[#allocation201_spill] sm:$0xff] %v8109_v37  ;;  %1976 = vadd.xlane.f32.xlu1 %v1975_v23  ;;  %v1396_v23 = vadd.f32 %v11769_v24, %v11768_v48  ;;  %v11772_v37 = vld [vmem:[#allocation293_spill] sm:$0xff]  ;;  %v11776_v48 = vld [vmem:[#allocation111_spill] sm:$0xff]  ;;  %v11777_v24 = vld [vmem:[#allocation166_spill] sm:$0xff] }
 0x36a   : > { %11759 = vst [vmem:[#allocation261_spill] sm:$0xff] %v8111_v50  ;;  %1973 = vadd.xlane.f32.xlu0 %v1972_v3  ;;  %v1703_v25 = vpop.xlane.xlu1 %1702  ;;  %v11770_v3 = vld [vmem:[#allocation110_spill] sm:$0xff]  ;;  %v1987_v50 = vsel %vm359_vm0, %v1821_v1, 0.0  ;;  %v1984_v49 = vsel %vm359_vm0, %v1820_v34, 0.0 }
 0x36b   : > { %v1700_v40 = vpop.xlane.xlu0 %1699  ;;  %v8123_v30 = vadd.f32 %v1703_v25, %v1394_v38  ;;  %v1395_v52 = vadd.f32 %v11771_v61, %v11770_v3  ;;  %v1823_v38 = vmul.f32 %v11772_v37, %v11772_v37  ;;  %v11773_v25 = vld [vmem:[#allocation294_spill] sm:$0xff] }
 0x36c   : > { %v8125_v0 = vadd.f32 %v1700_v40, %v1393_v45  ;;  %v1822_v45 = vmul.f32 %v11773_v25, %v11773_v25  ;;  %v11779_v3 = vld [vmem:[#allocation218_spill] sm:$0xff] }
 0x36d   : > { %11766 = vst [vmem:[#allocation262_spill] sm:$0xff] %v8123_v30  ;;  %1982 = vadd.xlane.f32.xlu1 %v1981_v15  ;;  %v1398_v15 = vadd.f32 %v11777_v24, %v11776_v48  ;;  %v11780_v30 = vld [vmem:[#allocation297_spill] sm:$0xff]  ;;  %v11784_v48 = vld [vmem:[#allocation58_spill] sm:$0xff] }
 0x36e   : > { %11767 = vst [vmem:[#allocation95_spill] sm:$0xff] %v8125_v0  ;;  %1979 = vadd.xlane.f32.xlu0 %v1978_v62  ;;  %v1709_v18 = vpop.xlane.xlu1 %1708  ;;  %v11778_v62 = vld [vmem:[#allocation112_spill] sm:$0xff]  ;;  %v1993_v0 = vsel %vm359_vm0, %v1823_v38, 0.0  ;;  %v1990_v37 = vsel %vm359_vm0, %v1822_v45, 0.0  ;;  %v11785_v24 = vld [vmem:[#allocation169_spill] sm:$0xff] }
 0x36f   : > { %v1706_v47 = vpop.xlane.xlu0 %1705  ;;  %v8137_v40 = vadd.f32 %v1709_v18, %v1396_v23  ;;  %v1397_v61 = vadd.f32 %v11779_v3, %v11778_v62  ;;  %v1825_v23 = vmul.f32 %v11780_v30, %v11780_v30  ;;  %v11781_v18 = vld [vmem:[#allocation298_spill] sm:$0xff] }
 0x370   : > { %v8139_v32 = vadd.f32 %v1706_v47, %v1395_v52  ;;  %v1824_v52 = vmul.f32 %v11781_v18, %v11781_v18  ;;  %v11787_v62 = vld [vmem:[#allocation170_spill] sm:$0xff] }
 0x371   : > { %11774 = vst [vmem:[#allocation202_spill] sm:$0xff] %v8137_v40  ;;  %1988 = vadd.xlane.f32.xlu1 %v1987_v50  ;;  %v1400_v50 = vadd.f32 %v11785_v24, %v11784_v48  ;;  %v11788_v40 = vld [vmem:[#allocation301_spill] sm:$0xff]  ;;  %v11792_v48 = vld [vmem:[#allocation60_spill] sm:$0xff] }
 0x372   : > { %11775 = vst [vmem:[#allocation96_spill] sm:$0xff] %v8139_v32  ;;  %1985 = vadd.xlane.f32.xlu0 %v1984_v49  ;;  %v1715_v1 = vpop.xlane.xlu1 %1714  ;;  %v11786_v49 = vld [vmem:[#allocation59_spill] sm:$0xff]  ;;  %v1999_v32 = vsel %vm359_vm0, %v1825_v23, 0.0  ;;  %v1996_v30 = vsel %vm359_vm0, %v1824_v52, 0.0  ;;  %v11793_v24 = vld [vmem:[#allocation173_spill] sm:$0xff] }
 0x373   : > { %v1712_v34 = vpop.xlane.xlu0 %1711  ;;  %v8151_v47 = vadd.f32 %v1715_v1, %v1398_v15  ;;  %v1399_v3 = vadd.f32 %v11787_v62, %v11786_v49  ;;  %v1827_v15 = vmul.f32 %v11788_v40, %v11788_v40  ;;  %v11789_v1 = vld [vmem:[#allocation302_spill] sm:$0xff] }
 0x374   : > { %v8153_v25 = vadd.f32 %v1712_v34, %v1397_v61  ;;  %v1826_v61 = vmul.f32 %v11789_v1, %v11789_v1  ;;  %v11795_v49 = vld [vmem:[#allocation174_spill] sm:$0xff] }
 0x375   : > { %11782 = vst [vmem:[#allocation203_spill] sm:$0xff] %v8151_v47  ;;  %1994 = vadd.xlane.f32.xlu1 %v1993_v0  ;;  %v1402_v0 = vadd.f32 %v11793_v24, %v11792_v48  ;;  %v11796_v47 = vld [vmem:[#allocation305_spill] sm:$0xff]  ;;  %v11800_v48 = vld [vmem:[#allocation62_spill] sm:$0xff] }
 0x376   : > { %11783 = vst [vmem:[#allocation265_spill] sm:$0xff] %v8153_v25  ;;  %1991 = vadd.xlane.f32.xlu0 %v1990_v37  ;;  %v1721_v38 = vpop.xlane.xlu1 %1720  ;;  %v11794_v37 = vld [vmem:[#allocation61_spill] sm:$0xff]  ;;  %v2005_v25 = vsel %vm359_vm0, %v1827_v15, 0.0  ;;  %v2002_v40 = vsel %vm359_vm0, %v1826_v61, 0.0 }
 0x377   : > { %v1718_v45 = vpop.xlane.xlu0 %1717  ;;  %v8165_v34 = vadd.f32 %v1721_v38, %v1400_v50  ;;  %v1401_v62 = vadd.f32 %v11795_v49, %v11794_v37  ;;  %v1829_v50 = vmul.f32 %v11796_v47, %v11796_v47  ;;  %v11797_v38 = vld [vmem:[#allocation306_spill] sm:$0xff]  ;;  %v11801_v24 = vld [vmem:[#allocation177_spill] sm:$0xff] }
 0x378   : > { %v8167_v18 = vadd.f32 %v1718_v45, %v1399_v3  ;;  %v1828_v3 = vmul.f32 %v11797_v38, %v11797_v38  ;;  %v11803_v37 = vld [vmem:[#allocation178_spill] sm:$0xff] }
 0x379   : > { %11790 = vst [vmem:[#allocation266_spill] sm:$0xff] %v8165_v34  ;;  %2000 = vadd.xlane.f32.xlu1 %v1999_v32  ;;  %v1404_v32 = vadd.f32 %v11801_v24, %v11800_v48  ;;  %v11807_v48 = vld [vmem:[#allocation64_spill] sm:$0xff]  ;;  %v11808_v24 = vld [vmem:[#allocation181_spill] sm:$0xff] }
 0x37a   : > { %11791 = vst [vmem:[#allocation97_spill] sm:$0xff] %v8167_v18  ;;  %1997 = vadd.xlane.f32.xlu0 %v1996_v30  ;;  %v1727_v23 = vpop.xlane.xlu1 %1726  ;;  %v11802_v30 = vld [vmem:[#allocation63_spill] sm:$0xff]  ;;  %v2011_v18 = vsel %vm359_vm0, %v1829_v50, 0.0  ;;  %v2008_v47 = vsel %vm359_vm0, %v1828_v3, 0.0 }
 0x37b   : > { %v1724_v52 = vpop.xlane.xlu0 %1723  ;;  %v8179_v45 = vadd.f32 %v1727_v23, %v1402_v0  ;;  %v1403_v49 = vadd.f32 %v11803_v37, %v11802_v30  ;;  %v1831_v0 = vmul.f32 %v7762_v16, %v7762_v16  ;;  %v11804_v23 = vld [vmem:[#allocation309_spill] sm:$0xff]  ;;  %v11810_v30 = vld [vmem:[#allocation219_spill] sm:$0xff] }
 0x37c   : > { %v8181_v1 = vadd.f32 %v1724_v52, %v1401_v62  ;;  %v1830_v62 = vmul.f32 %v11804_v23, %v11804_v23  ;;  %v11811_v23 = vld [vmem:[#allocation312_spill] sm:$0xff] }
 0x37d   : > { %11798 = vst [vmem:[#allocation204_spill] sm:$0xff] %v8179_v45  ;;  %2006 = vadd.xlane.f32.xlu1 %v2005_v25  ;;  %v1406_v25 = vadd.f32 %v11808_v24, %v11807_v48 }
 0x37e   : > { %11799 = vst [vmem:[#allocation98_spill] sm:$0xff] %v8181_v1  ;;  %2003 = vadd.xlane.f32.xlu0 %v2002_v40  ;;  %v1733_v15 = vpop.xlane.xlu1 %1732  ;;  %v11809_v40 = vld [vmem:[#allocation65_spill] sm:$0xff]  ;;  %v2017_v1 = vsel %vm359_vm0, %v1831_v0, 0.0  ;;  %v2014_v16 = vsel %vm359_vm0, %v1830_v62, 0.0 }
 0x37f   : > { %v1730_v61 = vpop.xlane.xlu0 %1729  ;;  %v8193_v52 = vadd.f32 %v1733_v15, %v1404_v32  ;;  %v1405_v37 = vadd.f32 %v11810_v30, %v11809_v40  ;;  %v1833_v32 = vmul.f32 %v11811_v23, %v11811_v23  ;;  %v11817_v40 = vld [vmem:[#allocation113_spill] sm:$0xff] }
 0x380   : > { %v8195_v38 = vadd.f32 %v1730_v61, %v1403_v49  ;;  %v11812_v49 = vld [vmem:[#allocation313_spill] sm:$0xff] }
 0x381   : > { %11805 = vst [vmem:[#allocation205_spill] sm:$0xff] %v8193_v52  ;;  %2012 = vadd.xlane.f32.xlu1 %v2011_v18  ;;  %v1832_v15 = vmul.f32 %v11812_v49, %v11812_v49  ;;  %v11815_v18 = vld [vmem:[#allocation66_spill] sm:$0xff]  ;;  %v11818_v30 = vld [vmem:[#allocation185_spill] sm:$0xff]  ;;  %v2023_v52 = vsel %vm359_vm0, %v1833_v32, 0.0 }
 0x382   : > { %11806 = vst [vmem:[#allocation269_spill] sm:$0xff] %v8195_v38  ;;  %2009 = vadd.xlane.f32.xlu0 %v2008_v47  ;;  %v1739_v50 = vpop.xlane.xlu1 %1738  ;;  %v11816_v47 = vld [vmem:[#allocation184_spill] sm:$0xff]  ;;  %v1407_v0 = vadd.f32 %v11818_v30, %v11817_v40  ;;  %v11821_v49 = vld [vmem:[#allocation114_spill] sm:$0xff] }
 0x383   : > { %v1736_v3 = vpop.xlane.xlu0 %1735  ;;  %v8207_v61 = vadd.f32 %v1739_v50, %v1406_v25  ;;  %v1408_v24 = vadd.f32 %v11816_v47, %v11815_v18  ;;  %v2020_v23 = vsel %vm359_vm0, %v1832_v15, 0.0  ;;  %v8222_v50 = vld [vmem:[%s5893_s10 + $0x98] sm:$0xff]  ;;  %v11822_v18 = vld [vmem:[#allocation220_spill] sm:$0xff]  ;;  %v11824_v47 = vld [vmem:[#allocation221_spill] sm:$0xff]  ;;  %11950 = vst [vmem:[#allocation184_spill] sm:$0xff] %v8683_v59 }
 0x384   : > { %v8209_v48 = vadd.f32 %v1736_v3, %v1405_v37  ;;  %v8225_v3 = vld [vmem:[%s5893_s10 + $0x88] sm:$0xff]  ;;  %v2254_v15 = vsel %vm359_vm0, %v8222_v50, 0.0 }
 0x385   : > { %11813 = vst [vmem:[#allocation270_spill] sm:$0xff] %v8207_v61  ;;  %2018 = vadd.xlane.f32.xlu1 %v2017_v1  ;;  %v1410_v1 = vadd.f32 %v11822_v18, %v11821_v49  ;;  %v8243_v49 = vld [vmem:[%s5893_s10 + $0xa8] sm:$0xff] }
 0x386   : > { %11814 = vst [vmem:[#allocation99_spill] sm:$0xff] %v8209_v48  ;;  %2015 = vadd.xlane.f32.xlu0 %v2014_v16  ;;  %v1745_v62 = vpop.xlane.xlu1 %1744  ;;  %v11823_v16 = vld [vmem:[#allocation115_spill] sm:$0xff] }
 0x387   : > { %v1742_v38 = vpop.xlane.xlu0 %1741  ;;  %v8217_v25 = vadd.f32 %v1745_v62, %v1408_v24  ;;  %v1409_v40 = vadd.f32 %v11824_v47, %v11823_v16  ;;  %v8240_v62 = vld [vmem:[%s5893_s10 + $0xb8] sm:$0xff]  ;;  %v11829_v16 = vld [vmem:[#allocation117_spill] sm:$0xff] }
 0x388   : > { %v8219_v37 = vadd.f32 %v1742_v38, %v1407_v0  ;;  %v2251_v38 = vsel %vm359_vm0, %v8225_v3, 0.0  ;;  %v11830_v47 = vld [vmem:[#allocation223_spill] sm:$0xff] }
 0x389   : > { %11819 = vst [vmem:[#allocation206_spill] sm:$0xff] %v8217_v25  ;;  %2024 = vadd.xlane.f32.xlu1 %v2023_v52  ;;  %v11827_v52 = vld [vmem:[#allocation116_spill] sm:$0xff] }
 0x38a   : > { %11820 = vst [vmem:[#allocation100_spill] sm:$0xff] %v8219_v37  ;;  %2021 = vadd.xlane.f32.xlu0 %v2020_v23  ;;  %v1751_v32 = vpop.xlane.xlu1 %1750  ;;  %v11828_v23 = vld [vmem:[#allocation222_spill] sm:$0xff]  ;;  %v1411_v37 = vadd.f32 %v11830_v47, %v11829_v16  ;;  %v11835_v47 = vld [vmem:[#allocation119_spill] sm:$0xff] }
 0x38b   : > { %v1748_v30 = vpop.xlane.xlu0 %1747  ;;  %v8235_v24 = vadd.f32 %v1751_v32, %v1410_v1  ;;  %v1412_v18 = vadd.f32 %v11828_v23, %v11827_v52  ;;  %v2260_v1 = vsel %vm359_vm0, %v8240_v62, 0.0  ;;  %v8258_v52 = vld [vmem:[%s5893_s10 + $0xd8] sm:$0xff]  ;;  %v8261_v23 = vld [vmem:[%s5893_s10 + $0xc8] sm:$0xff] }
 0x38c   : > { %v8237_v0 = vadd.f32 %v1748_v30, %v1409_v40  ;;  %v2257_v40 = vsel %vm359_vm0, %v8243_v49, 0.0 }
 0x38d   : > { %11825 = vst [vmem:[#allocation207_spill] sm:$0xff] %v8235_v24  ;;  %2255 = vadd.xlane.f32.xlu1 %v2254_v15  ;;  %v11833_v15 = vld [vmem:[#allocation118_spill] sm:$0xff] }
 0x38e   : > { %11826 = vst [vmem:[#allocation273_spill] sm:$0xff] %v8237_v0  ;;  %2252 = vadd.xlane.f32.xlu0 %v2251_v38  ;;  %v1757_v25 = vpop.xlane.xlu1 %1756  ;;  %v11834_v38 = vld [vmem:[#allocation224_spill] sm:$0xff]  ;;  %v11836_v0 = vld [vmem:[#allocation225_spill] sm:$0xff] }
 0x38f   : > { %v1754_v48 = vpop.xlane.xlu0 %1753  ;;  %v8253_v32 = vadd.f32 %v1757_v25, %v1412_v18  ;;  %v1414_v16 = vadd.f32 %v11834_v38, %v11833_v15  ;;  %v1413_v24 = vadd.f32 %v11836_v0, %v11835_v47  ;;  %v2266_v25 = vsel %vm359_vm0, %v8258_v52, 0.0  ;;  %v8276_v15 = vld [vmem:[%s5893_s10 + $0xf8] sm:$0xff]  ;;  %v8279_v38 = vld [vmem:[%s5893_s10 + $0xe8] sm:$0xff] }
 0x390   : > { %v8255_v30 = vadd.f32 %v1754_v48, %v1411_v37  ;;  %v2263_v48 = vsel %vm359_vm0, %v8261_v23, 0.0  ;;  %v11839_v0 = vld [vmem:[#allocation120_spill] sm:$0xff]  ;;  %v11841_v47 = vld [vmem:[#allocation121_spill] sm:$0xff] }
 0x391   : > { %11831 = vst [vmem:[#allocation274_spill] sm:$0xff] %v8253_v32  ;;  %2261 = vadd.xlane.f32.xlu1 %v2260_v1  ;;  %v11840_v1 = vld [vmem:[#allocation226_spill] sm:$0xff] }
 0x392   : > { %11832 = vst [vmem:[#allocation101_spill] sm:$0xff] %v8255_v30  ;;  %2258 = vadd.xlane.f32.xlu0 %v2257_v40  ;;  %v1763_v61 = vpop.xlane.xlu1 %1762  ;;  %v1416_v40 = vadd.f32 %v11840_v1, %v11839_v0  ;;  %v11842_v30 = vld [vmem:[#allocation227_spill] sm:$0xff]  ;;  %v8297_v1 = vld [vmem:[%s5893_s10 + $0x188] sm:$0xff] }
 0x393   : > { %v1760_v45 = vpop.xlane.xlu0 %1759  ;;  %v8271_v37 = vadd.f32 %v1763_v61, %v1414_v16  ;;  %v1415_v34 = vadd.f32 %v11842_v30, %v11841_v47  ;;  %v2272_v61 = vsel %vm359_vm0, %v8276_v15, 0.0  ;;  %v8294_v0 = vld [vmem:[%s5893_s10 + $0x198] sm:$0xff] }
 0x394   : > { %v8273_v18 = vadd.f32 %v1760_v45, %v1413_v24  ;;  %v2269_v45 = vsel %vm359_vm0, %v8279_v38, 0.0  ;;  %v11845_v30 = vld [vmem:[#allocation122_spill] sm:$0xff]  ;;  %v11847_v47 = vld [vmem:[#allocation123_spill] sm:$0xff] }
 0x395   : > { %11837 = vst [vmem:[#allocation208_spill] sm:$0xff] %v8271_v37  ;;  %2267 = vadd.xlane.f32.xlu1 %v2266_v25  ;;  %v11846_v25 = vld [vmem:[#allocation228_spill] sm:$0xff]  ;;  %v11848_v37 = vld [vmem:[#allocation229_spill] sm:$0xff] }
 0x396   : > { %11838 = vst [vmem:[#allocation102_spill] sm:$0xff] %v8273_v18  ;;  %2264 = vadd.xlane.f32.xlu0 %v2263_v48  ;;  %v1769_v32 = vpop.xlane.xlu1 %1768  ;;  %v1418_v48 = vadd.f32 %v11846_v25, %v11845_v30  ;;  %v1417_v18 = vadd.f32 %v11848_v37, %v11847_v47  ;;  %v8312_v30 = vld [vmem:[%s5893_s10 + $0x1b8] sm:$0xff]  ;;  %v8315_v25 = vld [vmem:[%s5893_s10 + $0x1a8] sm:$0xff] }
 0x397   : > { %v1766_v29 = vpop.xlane.xlu0 %1765  ;;  %v8289_v24 = vadd.f32 %v1769_v32, %v1416_v40  ;;  %v2278_v32 = vsel %vm359_vm0, %v8294_v0, 0.0  ;;  %v11851_v37 = vld [vmem:[#allocation124_spill] sm:$0xff]  ;;  %v11853_v47 = vld [vmem:[#allocation125_spill] sm:$0xff] }
 0x398   : > { %v8291_v16 = vadd.f32 %v1766_v29, %v1415_v34  ;;  %v2275_v29 = vsel %vm359_vm0, %v8297_v1, 0.0 }
 0x399   : > { %11843 = vst [vmem:[#allocation209_spill] sm:$0xff] %v8289_v24  ;;  %2273 = vadd.xlane.f32.xlu1 %v2272_v61  ;;  %v11852_v61 = vld [vmem:[#allocation230_spill] sm:$0xff] }
 0x39a   : > { %11844 = vst [vmem:[#allocation277_spill] sm:$0xff] %v8291_v16  ;;  %2270 = vadd.xlane.f32.xlu0 %v2269_v45  ;;  %v1839_v42 = vpop.xlane.xlu1 %1838  ;;  %v1420_v45 = vadd.f32 %v11852_v61, %v11851_v37  ;;  %v11854_v16 = vld [vmem:[#allocation231_spill] sm:$0xff]  ;;  %v8333_v61 = vld [vmem:[%s5893_s10 + $0x1c8] sm:$0xff] }
 0x39b   : > { %v1836_v13 = vpop.xlane.xlu0 %1835  ;;  %v8307_v34 = vadd.f32 %v1839_v42, %v1418_v48  ;;  %v1419_v24 = vadd.f32 %v11854_v16, %v11853_v47  ;;  %v2284_v42 = vsel %vm359_vm0, %v8312_v30, 0.0  ;;  %v8330_v37 = vld [vmem:[%s5893_s10 + $0x1d8] sm:$0xff] }
 0x39c   : > { %v8309_v40 = vadd.f32 %v1836_v13, %v1417_v18  ;;  %v2281_v13 = vsel %vm359_vm0, %v8315_v25, 0.0  ;;  %v11857_v16 = vld [vmem:[#allocation126_spill] sm:$0xff]  ;;  %v11859_v47 = vld [vmem:[#allocation127_spill] sm:$0xff] }
 0x39d   : > { %11849 = vst [vmem:[#allocation278_spill] sm:$0xff] %v8307_v34  ;;  %2279 = vadd.xlane.f32.xlu1 %v2278_v32  ;;  %v11858_v32 = vld [vmem:[#allocation232_spill] sm:$0xff] }
 0x39e   : > { %11850 = vst [vmem:[#allocation103_spill] sm:$0xff] %v8309_v40  ;;  %2276 = vadd.xlane.f32.xlu0 %v2275_v29  ;;  %v1845_v41 = vpop.xlane.xlu1 %1844  ;;  %v1422_v29 = vadd.f32 %v11858_v32, %v11857_v16  ;;  %v11860_v40 = vld [vmem:[#allocation233_spill] sm:$0xff]  ;;  %v8348_v16 = vld [vmem:[%s5893_s10 + $0x1f8] sm:$0xff] }
 0x39f   : > { %v1842_v33 = vpop.xlane.xlu0 %1841  ;;  %v8325_v18 = vadd.f32 %v1845_v41, %v1420_v45  ;;  %v1421_v34 = vadd.f32 %v11860_v40, %v11859_v47  ;;  %v2290_v41 = vsel %vm359_vm0, %v8330_v37, 0.0  ;;  %v8351_v32 = vld [vmem:[%s5893_s10 + $0x1e8] sm:$0xff] }
 0x3a0   : > { %v8327_v48 = vadd.f32 %v1842_v33, %v1419_v24  ;;  %v2287_v33 = vsel %vm359_vm0, %v8333_v61, 0.0  ;;  %v11863_v40 = vld [vmem:[#allocation128_spill] sm:$0xff]  ;;  %v11865_v47 = vld [vmem:[#allocation129_spill] sm:$0xff] }
 0x3a1   : > { %11855 = vst [vmem:[#allocation210_spill] sm:$0xff] %v8325_v18  ;;  %2285 = vadd.xlane.f32.xlu1 %v2284_v42  ;;  %v11864_v42 = vld [vmem:[#allocation234_spill] sm:$0xff] }
 0x3a2   : > { %11856 = vst [vmem:[#allocation104_spill] sm:$0xff] %v8327_v48  ;;  %2282 = vadd.xlane.f32.xlu0 %v2281_v13  ;;  %v1851_v39 = vpop.xlane.xlu1 %1850  ;;  %v1424_v13 = vadd.f32 %v11864_v42, %v11863_v40  ;;  %v11866_v48 = vld [vmem:[#allocation235_spill] sm:$0xff]  ;;  %v8369_v42 = vld [vmem:[%s5893_s10 + $0x288] sm:$0xff] }
 0x3a3   : > { %v1848_v12 = vpop.xlane.xlu0 %1847  ;;  %v8343_v24 = vadd.f32 %v1851_v39, %v1422_v29  ;;  %v1423_v18 = vadd.f32 %v11866_v48, %v11865_v47  ;;  %v2296_v39 = vsel %vm359_vm0, %v8348_v16, 0.0  ;;  %v8366_v40 = vld [vmem:[%s5893_s10 + $0x298] sm:$0xff] }
 0x3a4   : > { %v8345_v45 = vadd.f32 %v1848_v12, %v1421_v34  ;;  %v2293_v12 = vsel %vm359_vm0, %v8351_v32, 0.0  ;;  %v11869_v48 = vld [vmem:[#allocation130_spill] sm:$0xff]  ;;  %v11871_v47 = vld [vmem:[#allocation131_spill] sm:$0xff] }
 0x3a5   : > { %11861 = vst [vmem:[#allocation211_spill] sm:$0xff] %v8343_v24  ;;  %2291 = vadd.xlane.f32.xlu1 %v2290_v41  ;;  %v11870_v41 = vld [vmem:[#allocation236_spill] sm:$0xff] }
 0x3a6   : > { %11862 = vst [vmem:[#allocation281_spill] sm:$0xff] %v8345_v45  ;;  %2288 = vadd.xlane.f32.xlu0 %v2287_v33  ;;  %v1857_v9 = vpop.xlane.xlu1 %1856  ;;  %v1426_v33 = vadd.f32 %v11870_v41, %v11869_v48  ;;  %v11872_v45 = vld [vmem:[#allocation237_spill] sm:$0xff]  ;;  %v8384_v48 = vld [vmem:[%s5893_s10 + $0x2b8] sm:$0xff] }
 0x3a7   : > { %v1854_v54 = vpop.xlane.xlu0 %1853  ;;  %v8361_v34 = vadd.f32 %v1857_v9, %v1424_v13  ;;  %v1425_v24 = vadd.f32 %v11872_v45, %v11871_v47  ;;  %v2302_v9 = vsel %vm359_vm0, %v8366_v40, 0.0  ;;  %v8387_v41 = vld [vmem:[%s5893_s10 + $0x2a8] sm:$0xff] }
 0x3a8   : > { %v8363_v29 = vadd.f32 %v1854_v54, %v1423_v18  ;;  %v2299_v54 = vsel %vm359_vm0, %v8369_v42, 0.0  ;;  %v11875_v45 = vld [vmem:[#allocation132_spill] sm:$0xff]  ;;  %v11877_v47 = vld [vmem:[#allocation133_spill] sm:$0xff] }
 0x3a9   : > { %11867 = vst [vmem:[#allocation282_spill] sm:$0xff] %v8361_v34  ;;  %2297 = vadd.xlane.f32.xlu1 %v2296_v39  ;;  %v11876_v39 = vld [vmem:[#allocation238_spill] sm:$0xff] }
 0x3aa   : > { %11868 = vst [vmem:[#allocation105_spill] sm:$0xff] %v8363_v29  ;;  %2294 = vadd.xlane.f32.xlu0 %v2293_v12  ;;  %v1863_v28 = vpop.xlane.xlu1 %1862  ;;  %v1428_v12 = vadd.f32 %v11876_v39, %v11875_v45  ;;  %v11878_v29 = vld [vmem:[#allocation239_spill] sm:$0xff]  ;;  %v8405_v39 = vld [vmem:[%s5893_s10 + $0x2c8] sm:$0xff] }
 0x3ab   : > { %v1860_v11 = vpop.xlane.xlu0 %1859  ;;  %v8379_v18 = vadd.f32 %v1863_v28, %v1426_v33  ;;  %v1427_v34 = vadd.f32 %v11878_v29, %v11877_v47  ;;  %v2308_v28 = vsel %vm359_vm0, %v8384_v48, 0.0  ;;  %v8402_v45 = vld [vmem:[%s5893_s10 + $0x2d8] sm:$0xff] }
 0x3ac   : > { %v8381_v13 = vadd.f32 %v1860_v11, %v1425_v24  ;;  %v2305_v11 = vsel %vm359_vm0, %v8387_v41, 0.0  ;;  %v11881_v29 = vld [vmem:[#allocation134_spill] sm:$0xff]  ;;  %v11883_v47 = vld [vmem:[#allocation135_spill] sm:$0xff] }
 0x3ad   : > { %11873 = vst [vmem:[#allocation212_spill] sm:$0xff] %v8379_v18  ;;  %2303 = vadd.xlane.f32.xlu1 %v2302_v9  ;;  %v11882_v9 = vld [vmem:[#allocation240_spill] sm:$0xff] }
 0x3ae   : > { %11874 = vst [vmem:[#allocation106_spill] sm:$0xff] %v8381_v13  ;;  %2300 = vadd.xlane.f32.xlu0 %v2299_v54  ;;  %v1869_v46 = vpop.xlane.xlu1 %1868  ;;  %v1430_v54 = vadd.f32 %v11882_v9, %v11881_v29  ;;  %v11884_v13 = vld [vmem:[#allocation241_spill] sm:$0xff]  ;;  %v8420_v29 = vld [vmem:[%s5893_s10 + $0x2f8] sm:$0xff] }
 0x3af   : > { %v1866_v17 = vpop.xlane.xlu0 %1865  ;;  %v8397_v24 = vadd.f32 %v1869_v46, %v1428_v12  ;;  %v1429_v18 = vadd.f32 %v11884_v13, %v11883_v47  ;;  %v2314_v46 = vsel %vm359_vm0, %v8402_v45, 0.0  ;;  %v8423_v9 = vld [vmem:[%s5893_s10 + $0x2e8] sm:$0xff] }
 0x3b0   : > { %v8399_v33 = vadd.f32 %v1866_v17, %v1427_v34  ;;  %v2311_v17 = vsel %vm359_vm0, %v8405_v39, 0.0  ;;  %v11887_v13 = vld [vmem:[#allocation136_spill] sm:$0xff]  ;;  %v11889_v47 = vld [vmem:[#allocation137_spill] sm:$0xff] }
 0x3b1   : > { %11879 = vst [vmem:[#allocation213_spill] sm:$0xff] %v8397_v24  ;;  %2309 = vadd.xlane.f32.xlu1 %v2308_v28  ;;  %v11888_v28 = vld [vmem:[#allocation242_spill] sm:$0xff] }
 0x3b2   : > { %11880 = vst [vmem:[#allocation285_spill] sm:$0xff] %v8399_v33  ;;  %2306 = vadd.xlane.f32.xlu0 %v2305_v11  ;;  %v1875_v20 = vpop.xlane.xlu1 %1874  ;;  %v1432_v11 = vadd.f32 %v11888_v28, %v11887_v13  ;;  %v11890_v33 = vld [vmem:[#allocation243_spill] sm:$0xff]  ;;  %v8441_v28 = vld [vmem:[%s5893_s10 + $0x388] sm:$0xff] }
 0x3b3   : > { %v1872_v51 = vpop.xlane.xlu0 %1871  ;;  %v8415_v34 = vadd.f32 %v1875_v20, %v1430_v54  ;;  %v1431_v24 = vadd.f32 %v11890_v33, %v11889_v47  ;;  %v2320_v20 = vsel %vm359_vm0, %v8420_v29, 0.0  ;;  %v8438_v13 = vld [vmem:[%s5893_s10 + $0x398] sm:$0xff] }
 0x3b4   : > { %v8417_v12 = vadd.f32 %v1872_v51, %v1429_v18  ;;  %v2317_v51 = vsel %vm359_vm0, %v8423_v9, 0.0  ;;  %v11893_v33 = vld [vmem:[#allocation138_spill] sm:$0xff]  ;;  %v11895_v47 = vld [vmem:[#allocation139_spill] sm:$0xff] }
 0x3b5   : > { %11885 = vst [vmem:[#allocation286_spill] sm:$0xff] %v8415_v34  ;;  %2315 = vadd.xlane.f32.xlu1 %v2314_v46  ;;  %v11894_v46 = vld [vmem:[#allocation244_spill] sm:$0xff] }
 0x3b6   : > { %11886 = vst [vmem:[#allocation107_spill] sm:$0xff] %v8417_v12  ;;  %2312 = vadd.xlane.f32.xlu0 %v2311_v17  ;;  %v1881_v6 = vpop.xlane.xlu1 %1880  ;;  %v1434_v17 = vadd.f32 %v11894_v46, %v11893_v33  ;;  %v11896_v12 = vld [vmem:[#allocation245_spill] sm:$0xff]  ;;  %v8456_v33 = vld [vmem:[%s5893_s10 + $0x3b8] sm:$0xff] }
 0x3b7   : > { %v1878_v53 = vpop.xlane.xlu0 %1877  ;;  %v8433_v18 = vadd.f32 %v1881_v6, %v1432_v11  ;;  %v1433_v34 = vadd.f32 %v11896_v12, %v11895_v47  ;;  %v2326_v6 = vsel %vm359_vm0, %v8438_v13, 0.0  ;;  %11899 = vst [vmem:[#allocation290_spill] sm:$0xff] %v8456_v33  ;;  %v8459_v46 = vld [vmem:[%s5893_s10 + $0x3a8] sm:$0xff] }
 0x3b8   : > { %v8435_v54 = vadd.f32 %v1878_v53, %v1431_v24  ;;  %v2323_v53 = vsel %vm359_vm0, %v8441_v28, 0.0  ;;  %11900 = vst [vmem:[#allocation109_spill] sm:$0xff] %v8459_v46  ;;  %v11901_v12 = vld [vmem:[#allocation140_spill] sm:$0xff]  ;;  %v11903_v47 = vld [vmem:[#allocation141_spill] sm:$0xff] }
 0x3b9   : > { %11891 = vst [vmem:[#allocation214_spill] sm:$0xff] %v8433_v18  ;;  %2321 = vadd.xlane.f32.xlu1 %v2320_v20  ;;  %v11902_v20 = vld [vmem:[#allocation246_spill] sm:$0xff] }
 0x3ba   : > { %11892 = vst [vmem:[#allocation108_spill] sm:$0xff] %v8435_v54  ;;  %2318 = vadd.xlane.f32.xlu0 %v2317_v51  ;;  %v1887_v35 = vpop.xlane.xlu1 %1886  ;;  %v1436_v51 = vadd.f32 %v11902_v20, %v11901_v12  ;;  %v11904_v54 = vld [vmem:[#allocation247_spill] sm:$0xff]  ;;  %v8477_v20 = vld [vmem:[%s5893_s10 + $0x3c8] sm:$0xff] }
 0x3bb   : > { %v1884_v10 = vpop.xlane.xlu0 %1883  ;;  %v8451_v24 = vadd.f32 %v1887_v35, %v1434_v17  ;;  %v1435_v18 = vadd.f32 %v11904_v54, %v11903_v47  ;;  %v2332_v35 = vsel %vm359_vm0, %v8456_v33, 0.0  ;;  %v8474_v12 = vld [vmem:[%s5893_s10 + $0x3d8] sm:$0xff]  ;;  %11908 = vst [vmem:[#allocation293_spill] sm:$0xff] %v8477_v20 }
 0x3bc   : > { %v8453_v11 = vadd.f32 %v1884_v10, %v1433_v34  ;;  %v2329_v10 = vsel %vm359_vm0, %v8459_v46, 0.0  ;;  %11907 = vst [vmem:[#allocation217_spill] sm:$0xff] %v8474_v12  ;;  %v11909_v54 = vld [vmem:[#allocation142_spill] sm:$0xff]  ;;  %v11911_v47 = vld [vmem:[#allocation143_spill] sm:$0xff] }
 0x3bd   : > { %11897 = vst [vmem:[#allocation215_spill] sm:$0xff] %v8451_v24  ;;  %2327 = vadd.xlane.f32.xlu1 %v2326_v6  ;;  %v11910_v6 = vld [vmem:[#allocation248_spill] sm:$0xff]  ;;  %v5227_v46 = vld [vmem:[%s5893_s10 + $0x490] sm:$0xff] }
 0x3be   : > { %11898 = vst [vmem:[#allocation289_spill] sm:$0xff] %v8453_v11  ;;  %2324 = vadd.xlane.f32.xlu0 %v2323_v53  ;;  %v1893_v43 = vpop.xlane.xlu1 %1892  ;;  %v1438_v53 = vadd.f32 %v11910_v6, %v11909_v54  ;;  %v11912_v11 = vld [vmem:[#allocation249_spill] sm:$0xff]  ;;  %v8492_v54 = vld [vmem:[%s5893_s10 + $0x3f8] sm:$0xff] }
 0x3bf   : > { %v1890_v44 = vpop.xlane.xlu0 %1889  ;;  %v8469_v34 = vadd.f32 %v1893_v43, %v1436_v51  ;;  %v1437_v24 = vadd.f32 %v11912_v11, %v11911_v47  ;;  %v2338_v43 = vsel %vm359_vm0, %v8474_v12, 0.0  ;;  %11915 = vst [vmem:[#allocation166_spill] sm:$0xff] %v8492_v54  ;;  %v8495_v6 = vld [vmem:[%s5893_s10 + $0x3e8] sm:$0xff] }
 0x3c0   : > { %v8471_v17 = vadd.f32 %v1890_v44, %v1435_v18  ;;  %v2335_v44 = vsel %vm359_vm0, %v8477_v20, 0.0  ;;  %11916 = vst [vmem:[#allocation112_spill] sm:$0xff] %v8495_v6  ;;  %v11917_v11 = vld [vmem:[#allocation144_spill] sm:$0xff]  ;;  %v11919_v47 = vld [vmem:[#allocation145_spill] sm:$0xff] }
 0x3c1   : > { %11905 = vst [vmem:[#allocation216_spill] sm:$0xff] %v8469_v34  ;;  %2333 = vadd.xlane.f32.xlu1 %v2332_v35  ;;  %v11918_v35 = vld [vmem:[#allocation251_spill] sm:$0xff] }
 0x3c2   : > { %11906 = vst [vmem:[#allocation110_spill] sm:$0xff] %v8471_v17  ;;  %2330 = vadd.xlane.f32.xlu0 %v2329_v10  ;;  %v1899_v26 = vpop.xlane.xlu1 %1898  ;;  %v1440_v10 = vadd.f32 %v11918_v35, %v11917_v11  ;;  %v11920_v17 = vld [vmem:[#allocation252_spill] sm:$0xff]  ;;  %v8510_v11 = vld [vmem:[%s5893_s10 + $0x498] sm:$0xff] }
 0x3c3   : > { %v1896_v36 = vpop.xlane.xlu0 %1895  ;;  %v8487_v18 = vadd.f32 %v1899_v26, %v1438_v53  ;;  %v1439_v34 = vadd.f32 %v11920_v17, %v11919_v47  ;;  %v2341_v26 = vsel %vm359_vm0, %v8495_v6, 0.0  ;;  %v8513_v35 = vld [vmem:[%s5893_s10 + $0x488] sm:$0xff]  ;;  %v11923_v17 = vld [vmem:[#allocation147_spill] sm:$0xff] }
 0x3c4   : > { %v8489_v51 = vadd.f32 %v1896_v36, %v1437_v24  ;;  %v2344_v36 = vsel %vm359_vm0, %v8492_v54, 0.0 }
 0x3c5   : > { %11913 = vst [vmem:[#allocation294_spill] sm:$0xff] %v8487_v18  ;;  %2339 = vadd.xlane.f32.xlu1 %v2338_v43  ;;  %v11924_v43 = vld [vmem:[#allocation256_spill] sm:$0xff]  ;;  %v8554_v18 = vld [vmem:[%s5893_s10 + $0x4f8] sm:$0xff] }
 0x3c6   : > { %11914 = vst [vmem:[#allocation111_spill] sm:$0xff] %v8489_v51  ;;  %2336 = vadd.xlane.f32.xlu0 %v2335_v44  ;;  %v1905_v19 = vpop.xlane.xlu1 %1904  ;;  %v1441_v44 = vadd.f32 %v11924_v43, %v11923_v17  ;;  %v2368_v22 = vsel %vm359_vm0, %v8554_v18, 0.0 }
 0x3c7   : > { %v1902_v27 = vpop.xlane.xlu0 %1901  ;;  %v8505_v24 = vadd.f32 %v1905_v19, %v1440_v10  ;;  %v2350_v19 = vsel %vm359_vm0, %v8510_v11, 0.0  ;;  %v8526_v10 = vld [vmem:[%s5893_s10 + $0x4b8] sm:$0xff] }
 0x3c8   : > { %v8507_v53 = vadd.f32 %v1902_v27, %v1439_v34  ;;  %v2347_v27 = vsel %vm359_vm0, %v8513_v35, 0.0  ;;  %v2356_v17 = vsel %vm359_vm0, %v8526_v10, 0.0 }
 0x3c9   : > { %11921 = vst [vmem:[#allocation218_spill] sm:$0xff] %v8505_v24  ;;  %2345 = vadd.xlane.f32.xlu1 %v2344_v36 }
 0x3ca   : > { %11922 = vst [vmem:[#allocation297_spill] sm:$0xff] %v8507_v53  ;;  %2342 = vadd.xlane.f32.xlu0 %v2341_v26  ;;  %v8517_v47 = vpop.xlane.xlu1 %1910  ;;  %v8529_v53 = vld [vmem:[%s5893_s10 + $0x4a8] sm:$0xff] }
 0x3cb   : > { %11925 = vst [vmem:[#allocation298_spill] sm:$0xff] %v8517_v47  ;;  %v1908_v51 = vpop.xlane.xlu0 %1907  ;;  %v2353_v43 = vsel %vm359_vm0, %v8529_v53, 0.0  ;;  %v8652_v47 = vld [vmem:[%s5893_s10 + $0x6d8] sm:$0xff] }
 0x3cc   : > { %v8523_v34 = vadd.f32 %v1908_v51, %v1441_v44  ;;  %v8540_v51 = vld [vmem:[%s5893_s10 + $0x4d8] sm:$0xff]  ;;  %v8543_v44 = vld [vmem:[%s5893_s10 + $0x4c8] sm:$0xff] }
 0x3cd   : > { %2351 = vadd.xlane.f32.xlu1 %v2350_v19  ;;  %v2359_v24 = vsel %vm359_vm0, %v8543_v44, 0.0 }
 0x3ce   : > { %11926 = vst [vmem:[#allocation58_spill] sm:$0xff] %v8523_v34  ;;  %2348 = vadd.xlane.f32.xlu0 %v2347_v27  ;;  %v8531_v36 = vpop.xlane.xlu1 %1916  ;;  %v2362_v34 = vsel %vm359_vm0, %v8540_v51, 0.0 }
 0x3cf   : > { %11927 = vst [vmem:[#allocation169_spill] sm:$0xff] %v8531_v36  ;;  %v8533_v26 = vpop.xlane.xlu0 %1913  ;;  %v8641_v36 = vld [vmem:[%s5893_s10 + $0x6a8] sm:$0xff] }
 0x3d0   : > { %11928 = vst [vmem:[#allocation59_spill] sm:$0xff] %v8533_v26  ;;  %v8638_v26 = vld [vmem:[%s5893_s10 + $0x6b8] sm:$0xff] }
 0x3d1   : > { %2357 = vadd.xlane.f32.xlu1 %v2356_v17 }
 0x3d2   : > { %2354 = vadd.xlane.f32.xlu0 %v2353_v43  ;;  %v8545_v19 = vpop.xlane.xlu1 %1922 }
 0x3d3   : > { %11929 = vst [vmem:[#allocation170_spill] sm:$0xff] %v8545_v19  ;;  %v8547_v27 = vpop.xlane.xlu0 %1919  ;;  %v8627_v19 = vld [vmem:[%s5893_s10 + $0x688] sm:$0xff] }
 0x3d4   : > { %11930 = vst [vmem:[#allocation301_spill] sm:$0xff] %v8547_v27  ;;  %v8624_v27 = vld [vmem:[%s5893_s10 + $0x698] sm:$0xff] }
 0x3d5   : > { %2363 = vadd.xlane.f32.xlu1 %v2362_v34 }
 0x3d6   : > { %2360 = vadd.xlane.f32.xlu0 %v2359_v24  ;;  %v8559_v17 = vpop.xlane.xlu1 %1928 }
 0x3d7   : > { %11931 = vst [vmem:[#allocation302_spill] sm:$0xff] %v8559_v17  ;;  %v8561_v43 = vpop.xlane.xlu0 %1925  ;;  %v8613_v17 = vld [vmem:[%s5893_s10 + $0x5e8] sm:$0xff] }
 0x3d8   : > { %11932 = vst [vmem:[#allocation60_spill] sm:$0xff] %v8561_v43  ;;  %v8610_v43 = vld [vmem:[%s5893_s10 + $0x5f8] sm:$0xff] }
 0x3d9   : > { %2369 = vadd.xlane.f32.xlu1 %v2368_v22 }
 0x3da   : > { %2366 = vadd.xlane.f32.xlu0 %v2365_v21  ;;  %v8573_v34 = vpop.xlane.xlu1 %1934 }
 0x3db   : > { %11933 = vst [vmem:[#allocation173_spill] sm:$0xff] %v8573_v34  ;;  %v8575_v24 = vpop.xlane.xlu0 %1931  ;;  %v8599_v34 = vld [vmem:[%s5893_s10 + $0x5c8] sm:$0xff] }
 0x3dc   : > { %11934 = vst [vmem:[#allocation61_spill] sm:$0xff] %v8575_v24  ;;  %v8596_v24 = vld [vmem:[%s5893_s10 + $0x5d8] sm:$0xff] }
 0x3dd   : > { %2375 = vadd.xlane.f32.xlu1 %v2374_v31 }
 0x3de   : > { %2372 = vadd.xlane.f32.xlu0 %v2371_v60  ;;  %v8587_v22 = vpop.xlane.xlu1 %1940 }
 0x3df   : > { %11935 = vst [vmem:[#allocation174_spill] sm:$0xff] %v8587_v22  ;;  %v8589_v21 = vpop.xlane.xlu0 %1937  ;;  %v2383_v22 = vsel %vm359_vm0, %v8599_v34, 0.0 }
 0x3e0   : > { %11936 = vst [vmem:[#allocation305_spill] sm:$0xff] %v8589_v21  ;;  %v2386_v21 = vsel %vm359_vm0, %v8596_v24, 0.0 }
 0x3e1   : > { %2381 = vadd.xlane.f32.xlu1 %v2380_v7 }
 0x3e2   : > { %2378 = vadd.xlane.f32.xlu0 %v2377_v63  ;;  %v8601_v31 = vpop.xlane.xlu1 %1946 }
 0x3e3   : > { %11937 = vst [vmem:[#allocation306_spill] sm:$0xff] %v8601_v31  ;;  %v8603_v60 = vpop.xlane.xlu0 %1943  ;;  %v2389_v31 = vsel %vm359_vm0, %v8613_v17, 0.0 }
 0x3e4   : > { %11938 = vst [vmem:[#allocation62_spill] sm:$0xff] %v8603_v60  ;;  %v2392_v60 = vsel %vm359_vm0, %v8610_v43, 0.0 }
 0x3e5   : > { %2387 = vadd.xlane.f32.xlu1 %v2386_v21 }
 0x3e6   : > { %2384 = vadd.xlane.f32.xlu0 %v2383_v22  ;;  %v8615_v7 = vpop.xlane.xlu1 %1952 }
 0x3e7   : > { %11939 = vst [vmem:[#allocation177_spill] sm:$0xff] %v8615_v7  ;;  %v8617_v63 = vpop.xlane.xlu0 %1949  ;;  %v2395_v7 = vsel %vm359_vm0, %v8627_v19, 0.0 }
 0x3e8   : > { %11940 = vst [vmem:[#allocation63_spill] sm:$0xff] %v8617_v63  ;;  %v2398_v63 = vsel %vm359_vm0, %v8624_v27, 0.0 }
 0x3e9   : > { %2393 = vadd.xlane.f32.xlu1 %v2392_v60 }
 0x3ea   : > { %2390 = vadd.xlane.f32.xlu0 %v2389_v31  ;;  %v8629_v21 = vpop.xlane.xlu1 %1958 }
 0x3eb   : > { %11941 = vst [vmem:[#allocation178_spill] sm:$0xff] %v8629_v21  ;;  %v8631_v22 = vpop.xlane.xlu0 %1955  ;;  %v2401_v21 = vsel %vm359_vm0, %v8641_v36, 0.0 }
 0x3ec   : > { %11942 = vst [vmem:[#allocation309_spill] sm:$0xff] %v8631_v22  ;;  %v2404_v22 = vsel %vm359_vm0, %v8638_v26, 0.0 }
 0x3ed   : > { %2399 = vadd.xlane.f32.xlu1 %v2398_v63 }
 0x3ee   : > { %2396 = vadd.xlane.f32.xlu0 %v2395_v7  ;;  %v8643_v60 = vpop.xlane.xlu1 %1964 }
 0x3ef   : > { %11943 = vst [vmem:[#allocation64_spill] sm:$0xff] %v8643_v60  ;;  %v8645_v31 = vpop.xlane.xlu0 %1961  ;;  %v2407_v60 = vsel %vm359_vm0, %v8655_v2, 0.0 }
 0x3f0   : > { %11944 = vst [vmem:[#allocation181_spill] sm:$0xff] %v8645_v31  ;;  %v2410_v31 = vsel %vm359_vm0, %v8652_v47, 0.0 }
 0x3f1   : > { %2405 = vadd.xlane.f32.xlu1 %v2404_v22  ;;  %v2416_v22 = vsel %vm359_vm0, %v8666_v14, 0.0 }
 0x3f2   : > { %2402 = vadd.xlane.f32.xlu0 %v2401_v21  ;;  %v8657_v63 = vpop.xlane.xlu1 %1970 }
 0x3f3   : > { %11945 = vst [vmem:[#allocation65_spill] sm:$0xff] %v8657_v63  ;;  %v8659_v7 = vpop.xlane.xlu0 %1967  ;;  %v8680_v63 = vld [vmem:[%s5893_s10 + $0x798] sm:$0xff] }
 0x3f4   : > { %11946 = vst [vmem:[#allocation219_spill] sm:$0xff] %v8659_v7  ;;  %v2413_v7 = vsel %vm359_vm0, %v8669_v58, 0.0  ;;  %11949 = vst [vmem:[#allocation66_spill] sm:$0xff] %v8680_v63 }
 0x3f5   : > { %2411 = vadd.xlane.f32.xlu1 %v2410_v31 }
 0x3f6   : > { %2408 = vadd.xlane.f32.xlu0 %v2407_v60  ;;  %v8671_v56 = vpop.xlane.xlu1 %1976  ;;  %v2422_v60 = vsel %vm359_vm0, %v8680_v63, 0.0  ;;  %v5228_v63 = vld [vmem:[%s5893_s10 + $0x480] sm:$0xff] }
 0x3f7   : > { %11947 = vst [vmem:[#allocation312_spill] sm:$0xff] %v8671_v56  ;;  %v8673_v21 = vpop.xlane.xlu0 %1973  ;;  %v8694_v56 = vld [vmem:[%s5893_s10 + $0x7a8] sm:$0xff] }
 0x3f8   : > { %11948 = vst [vmem:[#allocation313_spill] sm:$0xff] %v8673_v21  ;;  %v2419_v21 = vsel %vm359_vm0, %v8683_v59, 0.0  ;;  %11953 = vst [vmem:[#allocation114_spill] sm:$0xff] %v8694_v56  ;;  %v5232_v59 = vld [vmem:[%s5893_s10 + $0x4a0] sm:$0xff] }
 0x3f9   : > { %2417 = vadd.xlane.f32.xlu1 %v2416_v22 }
 0x3fa   : > { %2414 = vadd.xlane.f32.xlu0 %v2413_v7  ;;  %v8685_v54 = vpop.xlane.xlu1 %1982  ;;  %v2425_v7 = vsel %vm359_vm0, %v8694_v56, 0.0  ;;  %v5083_v56 = vld [vmem:[#allocation5 + $0x10] sm:$0xff]  }
 0x3fb   : > { %11951 = vst [vmem:[#allocation113_spill] sm:$0xff] %v8685_v54  ;;  %v8687_v31 = vpop.xlane.xlu0 %1979  ;;  %v5081_v54 = vld [vmem:[#allocation5] sm:$0xff]  }
 0x3fc   : > { %11952 = vst [vmem:[#allocation185_spill] sm:$0xff] %v8687_v31  ;;  %4963 = vmatprep.subr.bf16.mxu1 %v5081_v54  ;;  %4883 = vmatprep.subr.bf16.mxu0 %v5081_v54 }
 0x3fd   : > { %2423 = vadd.xlane.f32.xlu1 %v2422_v60  ;;  %4971 = vmatpush3.bf16.msra.mxu1 %v5081_v54 }
 0x3fe   : > { %2420 = vadd.xlane.f32.xlu0 %v2419_v21  ;;  %v8696_v6 = vpop.xlane.xlu1 %1988  ;;  %4884 = vmatpush3.bf16.msra.mxu0 %v5081_v54  ;;  %v5219_v54 = vld [vmem:[%s5893_s10 + $0x38] sm:$0xff] }
 0x3ff   : > { %11954 = vst [vmem:[#allocation220_spill] sm:$0xff] %v8696_v6  ;;  %v8698_v12 = vpop.xlane.xlu0 %1985 }
 0x400   : > { %11955 = vst [vmem:[#allocation115_spill] sm:$0xff] %v8698_v12  ;;  %v5082_v12 = vld [vmem:[#allocation5 + $0x8] sm:$0xff]  }
 0x401   : > { %4964 = vmatprep.subr.bf16.mxu1 %v5082_v12  ;;  %4885 = vmatprep.subr.bf16.mxu0 %v5082_v12 }
 0x402   : > { %2426 = vadd.xlane.f32.xlu0 %v2425_v7  ;;  %v8702_v22 = vpop.xlane.xlu1 %1994  ;;  %4972 = vmatpush3.bf16.msra.mxu1 %v5082_v12  ;;  %v5217_v7 = vld [vmem:[%s5893_s10 + $0x18] sm:$0xff] }
 0x403   : > { %11956 = vst [vmem:[#allocation221_spill] sm:$0xff] %v8702_v22  ;;  %v8704_v31 = vpop.xlane.xlu0 %1991  ;;  %4886 = vmatpush3.bf16.msra.mxu0 %v5082_v12  ;;  %v5218_v22 = vld [vmem:[%s5893_s10 + $0x8] sm:$0xff]  ;;  %4965 = vmatprep.subr.bf16.mxu1 %v5083_v56 }
 0x404   : > { %11957 = vst [vmem:[#allocation116_spill] sm:$0xff] %v8704_v31  ;;  %v1481_v6 = vpack.c.bf16 %v5217_v7, %v5218_v22  ;;  %4887 = vmatprep.subr.bf16.mxu0 %v5083_v56  ;;  %v5084_v7 = vld [vmem:[#allocation5 + $0x18] sm:$0xff]  }
 0x406   : > { %v8706_v21 = vpop.xlane.xlu1 %2000  ;;  %4973 = vmatpush3.bf16.msra.mxu1 %v5083_v56 }
 0x407   : > { %11958 = vst [vmem:[#allocation222_spill] sm:$0xff] %v8706_v21  ;;  %v8708_v60 = vpop.xlane.xlu0 %1997  ;;  %4888 = vmatpush3.bf16.msra.mxu0 %v5083_v56  ;;  %4966 = vmatprep.subr.bf16.mxu1 %v5084_v7  ;;  %v5221_v56 = vld [vmem:[%s5893_s10 + $0x438] sm:$0xff] }
 0x408   : > { %11959 = vst [vmem:[#allocation117_spill] sm:$0xff] %v8708_v60  ;;  %v5220_v60 = vld [vmem:[%s5893_s10 + $0x28] sm:$0xff]  ;;  %4889 = vmatprep.subr.bf16.mxu0 %v5084_v7 }
 0x409   : > { %v1482_v21 = vpack.c.bf16 %v5219_v54, %v5220_v60  ;;  %v5085_v54 = vld [vmem:[#allocation5 + $0x20] sm:$0xff]  }
 0x40a   : > { %v8712_v31 = vpop.xlane.xlu1 %2006  ;;  %4974 = vmatpush3.bf16.msra.mxu1 %v5084_v7 }
 0x40b   : > { %11960 = vst [vmem:[#allocation223_spill] sm:$0xff] %v8712_v31  ;;  %v8714_v20 = vpop.xlane.xlu0 %2003  ;;  %4890 = vmatpush3.bf16.msra.mxu0 %v5084_v7  ;;  %4967 = vmatprep.subr.bf16.mxu1 %v5085_v54  ;;  %v5225_v7 = vld [vmem:[%s5893_s10 + $0x90] sm:$0xff] }
 0x40c   : > { %11961 = vst [vmem:[#allocation118_spill] sm:$0xff] %v8714_v20  ;;  %v5222_v20 = vld [vmem:[%s5893_s10 + $0x428] sm:$0xff]  ;;  %4891 = vmatprep.subr.bf16.mxu0 %v5085_v54 }
 0x40d   : > { %v1498_v31 = vpack.c.bf16 %v5221_v56, %v5222_v20  ;;  %v5226_v20 = vld [vmem:[%s5893_s10 + $0x80] sm:$0xff] }
 0x40e   : > { %3275 = vrot.lane.b32.xlu1 %v1481_v6, %s5648_s23  ;;  %v8719_v12 = vpop.xlane.xlu1 %2012  ;;  %4975 = vmatpush3.bf16.msra.mxu1 %v5085_v54  ;;  %v2154_v56 = vpack.c.bf16 %v5225_v7, %v5226_v20 }
 0x40f   : > { %11962 = vst [vmem:[#allocation224_spill] sm:$0xff] %v8719_v12  ;;  %v8721_v22 = vpop.xlane.xlu0 %2009  ;;  %v5224_v12 = vld [vmem:[%s5893_s10 + $0x408] sm:$0xff]  ;;  %4892 = vmatpush3.bf16.msra.mxu0 %v5085_v54  ;;  %v5230_v54 = vld [vmem:[%s5893_s10 + $0xa0] sm:$0xff] }
 0x410   : > { %11963 = vst [vmem:[#allocation119_spill] sm:$0xff] %v8721_v22  ;;  %v5223_v22 = vld [vmem:[%s5893_s10 + $0x418] sm:$0xff] }
 0x411   : > { %v1497_v33 = vpack.c.bf16 %v5223_v22, %v5224_v12  ;;  %v2170_v12 = vpack.c.bf16 %v5227_v46, %v5228_v63  ;;  %v5229_v22 = vld [vmem:[%s5893_s10 + $0xb0] sm:$0xff] }
 0x412   : > { %3277 = vrot.lane.b32.xlu1 %v1482_v21, %s5648_s23  ;;  %v8726_v60 = vpop.xlane.xlu1 %2018  ;;  %v2155_v7 = vpack.c.bf16 %v5229_v22, %v5230_v54  ;;  %v5235_v22 = vld [vmem:[%s5893_s10 + $0x458] sm:$0xff]  ;;  %v5236_v54 = vld [vmem:[%s5893_s10 + $0x448] sm:$0xff] }
 0x413   : > { %11964 = vst [vmem:[#allocation225_spill] sm:$0xff] %v8726_v60  ;;  %v8728_v6 = vpop.xlane.xlu0 %2015  ;;  %v5086_v60 = vld [vmem:[#allocation5 + $0x28] sm:$0xff]  }
 0x414   : > { %11965 = vst [vmem:[#allocation120_spill] sm:$0xff] %v8728_v6  ;;  %4968 = vmatprep.subr.bf16.mxu1 %v5086_v60  ;;  %4893 = vmatprep.subr.bf16.mxu0 %v5086_v60 }
 0x415   : > { %4976 = vmatpush3.bf16.msra.mxu1 %v5086_v60  ;;  %4894 = vmatpush3.bf16.msra.mxu0 %v5086_v60 }
 0x416   : > { %3309 = vrot.lane.b32.xlu1 %v1498_v31, %s5648_s23  ;;  %v8735_v21 = vpop.xlane.xlu1 %2024 }
 0x417   : > { %11966 = vst [vmem:[#allocation226_spill] sm:$0xff] %v8735_v21  ;;  %v8737_v6 = vpop.xlane.xlu0 %2021  ;;  %v5231_v21 = vld [vmem:[%s5893_s10 + $0x4b0] sm:$0xff] }
 0x418   : > { %11967 = vst [vmem:[#allocation121_spill] sm:$0xff] %v8737_v6  ;;  %3307 = vrot.lane.b32.xlu0 %v1497_v33, %s5648_s23  ;;  %v5087_v6 = vld [vmem:[#allocation5 + $0x30] sm:$0xff]   ;;  %v2171_v46 = vpack.c.bf16 %v5231_v21, %v5232_v59  ;;  %v2827_v33 = vpack.c.bf16 %v8222_v50, %v8225_v3  ;;  %v2843_v59 = vpack.c.bf16 %v8510_v11, %v8513_v35  ;;  %v5233_v35 = vld [vmem:[%s5893_s10 + $0x58] sm:$0xff]  ;;  %v5234_v21 = vld [vmem:[%s5893_s10 + $0x48] sm:$0xff] }
 0x419   : > { %4969 = vmatprep.subr.bf16.mxu1 %v5087_v6  ;;  %4895 = vmatprep.subr.bf16.mxu0 %v5087_v6  ;;  %v2828_v50 = vpack.c.bf16 %v8240_v62, %v8243_v49  ;;  %v2844_v11 = vpack.c.bf16 %v8526_v10, %v8529_v53  ;;  %v5237_v53 = vld [vmem:[%s5893_s10 + $0x78] sm:$0xff]  ;;  %v5238_v10 = vld [vmem:[%s5893_s10 + $0x68] sm:$0xff] }
 0x41a   : > { %3371 = vrot.lane.b32.xlu1 %v2154_v56, %s5649_s25  ;;  %v8745_v31 = vpop.xlane.xlu1 %2255  ;;  %4977 = vmatpush3.bf16.msra.mxu1 %v5087_v6  ;;  %v5088_v56 = vld [vmem:[#allocation5 + $0x38] sm:$0xff]  }
 0x41b   : > { %v8747_v20 = vpop.xlane.xlu0 %2252  ;;  %4896 = vmatpush3.bf16.msra.mxu0 %v5087_v6  ;;  %4970 = vmatprep.subr.bf16.mxu1 %v5088_v56 }
 0x41c   : > { %3403 = vrot.lane.b32.xlu0 %v2170_v12, %s5649_s25  ;;  %4897 = vmatprep.subr.bf16.mxu0 %v5088_v56  ;;  %v1483_v12 = vpack.c.bf16 %v5233_v35, %v5234_v21  ;;  %v5241_v21 = vld [vmem:[%s5893_s10 + $0xd0] sm:$0xff] }
 0x41e   : > { %3373 = vrot.lane.b32.xlu1 %v2155_v7, %s5649_s25  ;;  %v8755_v63 = vpop.xlane.xlu1 %2261  ;;  %4978 = vmatpush3.bf16.msra.mxu1 %v5088_v56  ;;  %v1499_v7 = vpack.c.bf16 %v5235_v22, %v5236_v54 }
 0x41f   : > { %11968 = vst [vmem:[#allocation227_spill] sm:$0xff] %v8755_v63  ;;  %v8757_v60 = vpop.xlane.xlu0 %2258  ;;  %4898 = vmatpush3.bf16.msra.mxu0 %v5088_v56  ;;  %v12168_v63 = vld [vmem:[#allocation322_spill] sm:$0xff] }
 0x420   : > { %11969 = vst [vmem:[#allocation122_spill] sm:$0xff] %v8757_v60  ;;  %3405 = vrot.lane.b32.xlu0 %v2171_v46, %s5649_s25  ;;  %v1484_v46 = vpack.c.bf16 %v5237_v53, %v5238_v10  ;;  %v5243_v53 = vld [vmem:[%s5893_s10 + $0x4d0] sm:$0xff]  ;;  %v5244_v10 = vld [vmem:[%s5893_s10 + $0x4c0] sm:$0xff] }
 0x421   : > { %v12166_v60 = vld [vmem:[#allocation321_spill] sm:$0xff] }
 0x422   : > { %3467 = vrot.lane.b32.xlu1 %v2827_v33, %s5650_s27  ;;  %v8765_v3 = vpop.xlane.xlu1 %2267 }
 0x423   : > { %11970 = vst [vmem:[#allocation228_spill] sm:$0xff] %v8765_v3  ;;  %v8767_v6 = vpop.xlane.xlu0 %2264  ;;  %v12165_v3 = vld [vmem:[#allocation193_spill] sm:$0xff] }
 0x424   : > { %11971 = vst [vmem:[#allocation123_spill] sm:$0xff] %v8767_v6  ;;  %3499 = vrot.lane.b32.xlu0 %v2843_v59, %s5650_s27  ;;  %v5239_v59 = vld [vmem:[%s5893_s10 + $0x478] sm:$0xff]  ;;  %v12162_v6 = vld [vmem:[#allocation192_spill] sm:$0xff] }
 0x426   : > { %3469 = vrot.lane.b32.xlu1 %v2828_v50, %s5650_s27  ;;  %v8775_v62 = vpop.xlane.xlu1 %2273  ;;  %v5240_v50 = vld [vmem:[%s5893_s10 + $0x468] sm:$0xff] }
 0x427   : > { %11972 = vst [vmem:[#allocation229_spill] sm:$0xff] %v8775_v62  ;;  %v8777_v49 = vpop.xlane.xlu0 %2270  ;;  %v1500_v35 = vpack.c.bf16 %v5239_v59, %v5240_v50  ;;  %v5246_v59 = vld [vmem:[%s5893_s10 + $0xe0] sm:$0xff] }
 0x428   : > { %11973 = vst [vmem:[#allocation124_spill] sm:$0xff] %v8777_v49  ;;  %3501 = vrot.lane.b32.xlu0 %v2844_v11, %s5650_s27  ;;  %v5242_v11 = vld [vmem:[%s5893_s10 + $0xc0] sm:$0xff] }
 0x429   : > { %v2156_v22 = vpack.c.bf16 %v5241_v21, %v5242_v11  ;;  %v5247_v21 = vld [vmem:[%s5893_s10 + $0x4f0] sm:$0xff]  ;;  %v12159_v62 = vld [vmem:[#allocation191_spill] sm:$0xff] }
 0x42a   : > { %3279 = vrot.lane.b32.xlu1 %v1483_v12, %s5648_s23  ;;  %v8785_v33 = vpop.xlane.xlu1 %2279 }
 0x42b   : > { %11974 = vst [vmem:[#allocation230_spill] sm:$0xff] %v8785_v33  ;;  %v8787_v56 = vpop.xlane.xlu0 %2276  ;;  %v5245_v33 = vld [vmem:[%s5893_s10 + $0xf0] sm:$0xff] }
 0x42c   : > { %11975 = vst [vmem:[#allocation125_spill] sm:$0xff] %v8787_v56  ;;  %3311 = vrot.lane.b32.xlu0 %v1499_v7, %s5648_s23  ;;  %v2172_v56 = vpack.c.bf16 %v5243_v53, %v5244_v10  ;;  %v2157_v50 = vpack.c.bf16 %v5245_v33, %v5246_v59  ;;  %v2829_v53 = vpack.c.bf16 %v8258_v52, %v8261_v23  ;;  %v5249_v59 = vld [vmem:[%s5893_s10 + $0x118] sm:$0xff] }
 0x42d   : > { %v2830_v10 = vpack.c.bf16 %v8276_v15, %v8279_v38 }
 0x42e   : > { %3281 = vrot.lane.b32.xlu1 %v1484_v46, %s5648_s23  ;;  %v8795_v54 = vpop.xlane.xlu1 %2285  ;;  %v5248_v46 = vld [vmem:[%s5893_s10 + $0x4e0] sm:$0xff] }
 0x42f   : > { %11976 = vst [vmem:[#allocation231_spill] sm:$0xff] %v8795_v54  ;;  %v8797_v12 = vpop.xlane.xlu0 %2282  ;;  %v2173_v11 = vpack.c.bf16 %v5247_v21, %v5248_v46  ;;  %v5252_v21 = vld [vmem:[%s5893_s10 + $0x508] sm:$0xff] }
 0x430   : > { %11977 = vst [vmem:[#allocation126_spill] sm:$0xff] %v8797_v12  ;;  %3313 = vrot.lane.b32.xlu0 %v1500_v35, %s5648_s23 }
 0x432   : > { %3375 = vrot.lane.b32.xlu1 %v2156_v22, %s5649_s25  ;;  %v8805_v7 = vpop.xlane.xlu1 %2291  ;;  %v2845_v22 = vpack.c.bf16 %v8540_v51, %v8543_v44  ;;  %v5250_v51 = vld [vmem:[%s5893_s10 + $0x108] sm:$0xff] }
 0x433   : > { %11978 = vst [vmem:[#allocation232_spill] sm:$0xff] %v8805_v7  ;;  %v8807_v49 = vpop.xlane.xlu0 %2288  ;;  %v1485_v44 = vpack.c.bf16 %v5249_v59, %v5250_v51  ;;  %v5256_v59 = vld [vmem:[%s5893_s10 + $0x528] sm:$0xff] }
 0x434   : > { %11979 = vst [vmem:[#allocation127_spill] sm:$0xff] %v8807_v49  ;;  %3407 = vrot.lane.b32.xlu0 %v2172_v56, %s5649_s25  ;;  %v2846_v56 = vpack.c.bf16 %v8554_v18, %v8557_v57  ;;  %v5253_v57 = vld [vmem:[%s5893_s10 + $0x138] sm:$0xff]  ;;  %v5254_v18 = vld [vmem:[%s5893_s10 + $0x128] sm:$0xff] }
 0x435   : > { %v12152_v49 = vld [vmem:[#allocation315_spill] sm:$0xff]  ;;  %v12154_v7 = vld [vmem:[#allocation316_spill] sm:$0xff] }
 0x436   : > { %3377 = vrot.lane.b32.xlu1 %v2157_v50, %s5649_s25  ;;  %v8815_v35 = vpop.xlane.xlu1 %2297  ;;  %v5251_v50 = vld [vmem:[%s5893_s10 + $0x518] sm:$0xff] }
 0x437   : > { %11980 = vst [vmem:[#allocation233_spill] sm:$0xff] %v8815_v35  ;;  %v8817_v33 = vpop.xlane.xlu0 %2294  ;;  %v1501_v46 = vpack.c.bf16 %v5251_v50, %v5252_v21  ;;  %v5257_v50 = vld [vmem:[%s5893_s10 + $0x190] sm:$0xff] }
 0x438   : > { %11981 = vst [vmem:[#allocation128_spill] sm:$0xff] %v8817_v33  ;;  %3409 = vrot.lane.b32.xlu0 %v2173_v11, %s5649_s25  ;;  %v1486_v11 = vpack.c.bf16 %v5253_v57, %v5254_v18  ;;  %v5259_v18 = vld [vmem:[%s5893_s10 + $0x590] sm:$0xff]  ;;  %v12147_v33 = vld [vmem:[#allocation183_spill] sm:$0xff] }
 0x439   : > { %v12150_v35 = vld [vmem:[#allocation314_spill] sm:$0xff] }
 0x43a   : > { %3471 = vrot.lane.b32.xlu1 %v2829_v53, %s5650_s27  ;;  %v8825_v52 = vpop.xlane.xlu1 %2303 }
 0x43b   : > { %11982 = vst [vmem:[#allocation234_spill] sm:$0xff] %v8825_v52  ;;  %v8827_v23 = vpop.xlane.xlu0 %2300  ;;  %v12145_v52 = vld [vmem:[#allocation182_spill] sm:$0xff] }
 0x43c   : > { %11983 = vst [vmem:[#allocation129_spill] sm:$0xff] %v8827_v23  ;;  %3503 = vrot.lane.b32.xlu0 %v2845_v22, %s5650_s27 }
 0x43e   : > { %3473 = vrot.lane.b32.xlu1 %v2830_v10, %s5650_s27  ;;  %v8835_v15 = vpop.xlane.xlu1 %2309  ;;  %v5255_v10 = vld [vmem:[%s5893_s10 + $0x538] sm:$0xff] }
 0x43f   : > { %11984 = vst [vmem:[#allocation235_spill] sm:$0xff] %v8835_v15  ;;  %v8837_v38 = vpop.xlane.xlu0 %2306  ;;  %v1502_v51 = vpack.c.bf16 %v5255_v10, %v5256_v59  ;;  %v5262_v10 = vld [vmem:[%s5893_s10 + $0x1a0] sm:$0xff] }
 0x440   : > { %11985 = vst [vmem:[#allocation130_spill] sm:$0xff] %v8837_v38  ;;  %3505 = vrot.lane.b32.xlu0 %v2846_v56, %s5650_s27  ;;  %v5258_v56 = vld [vmem:[%s5893_s10 + $0x180] sm:$0xff]  ;;  %v5261_v38 = vld [vmem:[%s5893_s10 + $0x1b0] sm:$0xff] }
 0x441   : > { %v2158_v21 = vpack.c.bf16 %v5257_v50, %v5258_v56  ;;  %v2159_v59 = vpack.c.bf16 %v5261_v38, %v5262_v10  ;;  %v5263_v50 = vld [vmem:[%s5893_s10 + $0x5b0] sm:$0xff]  ;;  %v5265_v10 = vld [vmem:[%s5893_s10 + $0x158] sm:$0xff] }
 0x442   : > { %3283 = vrot.lane.b32.xlu1 %v1485_v44, %s5648_s23  ;;  %v8845_v53 = vpop.xlane.xlu1 %2315 }
 0x443   : > { %11986 = vst [vmem:[#allocation236_spill] sm:$0xff] %v8845_v53  ;;  %v8847_v22 = vpop.xlane.xlu0 %2312  ;;  %v5260_v53 = vld [vmem:[%s5893_s10 + $0x580] sm:$0xff] }
 0x444   : > { %11987 = vst [vmem:[#allocation131_spill] sm:$0xff] %v8847_v22  ;;  %3315 = vrot.lane.b32.xlu0 %v1501_v46, %s5648_s23  ;;  %v2174_v22 = vpack.c.bf16 %v5259_v18, %v5260_v53  ;;  %v2831_v53 = vpack.c.bf16 %v8294_v0, %v8297_v1  ;;  %v2832_v18 = vpack.c.bf16 %v8312_v30, %v8315_v25 }
 0x446   : > { %3285 = vrot.lane.b32.xlu1 %v1486_v11, %s5648_s23  ;;  %v8855_v57 = vpop.xlane.xlu1 %2321  ;;  %v5264_v11 = vld [vmem:[%s5893_s10 + $0x5a0] sm:$0xff] }
 0x447   : > { %11988 = vst [vmem:[#allocation237_spill] sm:$0xff] %v8855_v57  ;;  %v8857_v44 = vpop.xlane.xlu0 %2318  ;;  %v2175_v56 = vpack.c.bf16 %v5263_v50, %v5264_v11  ;;  %v5268_v50 = vld [vmem:[%s5893_s10 + $0x548] sm:$0xff] }
 0x448   : > { %11989 = vst [vmem:[#allocation132_spill] sm:$0xff] %v8857_v44  ;;  %3317 = vrot.lane.b32.xlu0 %v1502_v51, %s5648_s23  ;;  %v12144_v57 = vld [vmem:[#allocation308_spill] sm:$0xff] }
 0x44a   : > { %3379 = vrot.lane.b32.xlu1 %v2158_v21, %s5649_s25  ;;  %v8865_v46 = vpop.xlane.xlu1 %2327  ;;  %v2847_v21 = vpack.c.bf16 %v8568_v55, %v8571_v8  ;;  %v5266_v8 = vld [vmem:[%s5893_s10 + $0x148] sm:$0xff] }
 0x44b   : > { %11990 = vst [vmem:[#allocation238_spill] sm:$0xff] %v8865_v46  ;;  %v8867_v15 = vpop.xlane.xlu0 %2324  ;;  %v1487_v55 = vpack.c.bf16 %v5265_v10, %v5266_v8  ;;  %v5272_v10 = vld [vmem:[%s5893_s10 + $0x568] sm:$0xff] }
 0x44c   : > { %11991 = vst [vmem:[#allocation133_spill] sm:$0xff] %v8867_v15  ;;  %3411 = vrot.lane.b32.xlu0 %v2174_v22, %s5649_s25  ;;  %v2848_v22 = vpack.c.bf16 %v8582_v4, %v8585_v5  ;;  %v5269_v5 = vld [vmem:[%s5893_s10 + $0x178] sm:$0xff]  ;;  %v5270_v4 = vld [vmem:[%s5893_s10 + $0x168] sm:$0xff] }
 0x44d   : > { %v12132_v15 = vld [vmem:[#allocation296_spill] sm:$0xff] }
 0x44e   : > { %3381 = vrot.lane.b32.xlu1 %v2159_v59, %s5649_s25  ;;  %v8875_v51 = vpop.xlane.xlu1 %2333  ;;  %v5267_v59 = vld [vmem:[%s5893_s10 + $0x558] sm:$0xff] }
 0x44f   : > { %11992 = vst [vmem:[#allocation239_spill] sm:$0xff] %v8875_v51  ;;  %v8877_v38 = vpop.xlane.xlu0 %2330  ;;  %v1503_v11 = vpack.c.bf16 %v5267_v59, %v5268_v50  ;;  %v5273_v59 = vld [vmem:[%s5893_s10 + $0x1d0] sm:$0xff]  ;;  %v12130_v51 = vld [vmem:[#allocation295_spill] sm:$0xff] }
 0x450   : > { %11993 = vst [vmem:[#allocation134_spill] sm:$0xff] %v8877_v38  ;;  %3413 = vrot.lane.b32.xlu0 %v2175_v56, %s5649_s25  ;;  %v1488_v56 = vpack.c.bf16 %v5269_v5, %v5270_v4  ;;  %v5275_v4 = vld [vmem:[%s5893_s10 + $0x5d0] sm:$0xff] }
 0x452   : > { %3475 = vrot.lane.b32.xlu1 %v2831_v53, %s5650_s27  ;;  %v8885_v0 = vpop.xlane.xlu1 %2339 }
 0x453   : > { %11994 = vst [vmem:[#allocation240_spill] sm:$0xff] %v8885_v0  ;;  %v8887_v1 = vpop.xlane.xlu0 %2336 }
 0x454   : > { %11995 = vst [vmem:[#allocation135_spill] sm:$0xff] %v8887_v1  ;;  %3507 = vrot.lane.b32.xlu0 %v2847_v21, %s5650_s27  ;;  %v5277_v1 = vld [vmem:[%s5893_s10 + $0x1f0] sm:$0xff] }
 0x456   : > { %3477 = vrot.lane.b32.xlu1 %v2832_v18, %s5650_s27  ;;  %v8895_v30 = vpop.xlane.xlu1 %2345  ;;  %v5271_v18 = vld [vmem:[%s5893_s10 + $0x578] sm:$0xff] }
 0x457   : > { %11996 = vst [vmem:[#allocation241_spill] sm:$0xff] %v8895_v30  ;;  %v8897_v25 = vpop.xlane.xlu0 %2342  ;;  %v1504_v8 = vpack.c.bf16 %v5271_v18, %v5272_v10  ;;  %v5278_v18 = vld [vmem:[%s5893_s10 + $0x1e0] sm:$0xff] }
 0x458   : > { %11997 = vst [vmem:[#allocation136_spill] sm:$0xff] %v8897_v25  ;;  %3509 = vrot.lane.b32.xlu0 %v2848_v22, %s5650_s27  ;;  %v5274_v22 = vld [vmem:[%s5893_s10 + $0x1c0] sm:$0xff]  ;;  %v2161_v10 = vpack.c.bf16 %v5277_v1, %v5278_v18  ;;  %v5281_v18 = vld [vmem:[%s5893_s10 + $0x218] sm:$0xff] }
 0x459   : > { %v2160_v50 = vpack.c.bf16 %v5273_v59, %v5274_v22  ;;  %v5276_v25 = vld [vmem:[%s5893_s10 + $0x5c0] sm:$0xff]  ;;  %v5279_v59 = vld [vmem:[%s5893_s10 + $0x5f0] sm:$0xff] }
 0x45a   : > { %3287 = vrot.lane.b32.xlu1 %v1487_v55, %s5648_s23  ;;  %v8905_v53 = vpop.xlane.xlu1 %2351  ;;  %v2176_v30 = vpack.c.bf16 %v5275_v4, %v5276_v25  ;;  %v2833_v25 = vpack.c.bf16 %v8330_v37, %v8333_v61  ;;  %v2834_v4 = vpack.c.bf16 %v8348_v16, %v8351_v32 }
 0x45b   : > { %11998 = vst [vmem:[#allocation242_spill] sm:$0xff] %v8905_v53  ;;  %v8907_v21 = vpop.xlane.xlu0 %2348  ;;  %v12137_v53 = vld [vmem:[#allocation175_spill] sm:$0xff] }
 0x45c   : > { %11999 = vst [vmem:[#allocation137_spill] sm:$0xff] %v8907_v21  ;;  %3319 = vrot.lane.b32.xlu0 %v1503_v11, %s5648_s23  ;;  %v12142_v21 = vld [vmem:[#allocation307_spill] sm:$0xff] }
 0x45e   : > { %3289 = vrot.lane.b32.xlu1 %v1488_v56, %s5648_s23  ;;  %v8915_v5 = vpop.xlane.xlu1 %2357  ;;  %v5280_v56 = vld [vmem:[%s5893_s10 + $0x5e0] sm:$0xff] }
 0x45f   : > { %12000 = vst [vmem:[#allocation243_spill] sm:$0xff] %v8915_v5  ;;  %v8917_v55 = vpop.xlane.xlu0 %2354  ;;  %v2177_v22 = vpack.c.bf16 %v5279_v59, %v5280_v56  ;;  %v5284_v59 = vld [vmem:[%s5893_s10 + $0x608] sm:$0xff] }
 0x460   : > { %12001 = vst [vmem:[#allocation138_spill] sm:$0xff] %v8917_v55  ;;  %3321 = vrot.lane.b32.xlu0 %v1504_v8, %s5648_s23  ;;  %v12139_v5 = vld [vmem:[#allocation176_spill] sm:$0xff]  ;;  %v12141_v55 = vld [vmem:[#allocation179_spill] sm:$0xff] }
 0x462   : > { %3383 = vrot.lane.b32.xlu1 %v2160_v50, %s5649_s25  ;;  %v8925_v11 = vpop.xlane.xlu1 %2363  ;;  %v2849_v50 = vpack.c.bf16 %v8596_v24, %v8599_v34  ;;  %v5282_v34 = vld [vmem:[%s5893_s10 + $0x208] sm:$0xff] }
 0x463   : > { %12002 = vst [vmem:[#allocation244_spill] sm:$0xff] %v8925_v11  ;;  %v8927_v0 = vpop.xlane.xlu0 %2360  ;;  %v1489_v24 = vpack.c.bf16 %v5281_v18, %v5282_v34  ;;  %v5288_v18 = vld [vmem:[%s5893_s10 + $0x628] sm:$0xff] }
 0x464   : > { %12003 = vst [vmem:[#allocation139_spill] sm:$0xff] %v8927_v0  ;;  %3415 = vrot.lane.b32.xlu0 %v2176_v30, %s5649_s25  ;;  %v2850_v30 = vpack.c.bf16 %v8610_v43, %v8613_v17  ;;  %v5285_v17 = vld [vmem:[%s5893_s10 + $0x238] sm:$0xff]  ;;  %v5286_v43 = vld [vmem:[%s5893_s10 + $0x228] sm:$0xff] }
 0x465   : > { %v12127_v11 = vld [vmem:[#allocation165_spill] sm:$0xff] }
 0x466   : > { %3385 = vrot.lane.b32.xlu1 %v2161_v10, %s5649_s25  ;;  %v8935_v8 = vpop.xlane.xlu1 %2369  ;;  %v5283_v10 = vld [vmem:[%s5893_s10 + $0x618] sm:$0xff] }
 0x467   : > { %12004 = vst [vmem:[#allocation245_spill] sm:$0xff] %v8935_v8  ;;  %v8937_v1 = vpop.xlane.xlu0 %2366  ;;  %v1505_v56 = vpack.c.bf16 %v5283_v10, %v5284_v59  ;;  %v5289_v10 = vld [vmem:[%s5893_s10 + $0x290] sm:$0xff] }
 0x468   : > { %12005 = vst [vmem:[#allocation140_spill] sm:$0xff] %v8937_v1  ;;  %3417 = vrot.lane.b32.xlu0 %v2177_v22, %s5649_s25  ;;  %v1490_v22 = vpack.c.bf16 %v5285_v17, %v5286_v43  ;;  %v5291_v43 = vld [vmem:[%s5893_s10 + $0x690] sm:$0xff]  ;;  %v12122_v1 = vld [vmem:[#allocation287_spill] sm:$0xff] }
 0x46a   : > { %3479 = vrot.lane.b32.xlu1 %v2833_v25, %s5650_s27  ;;  %v8945_v37 = vpop.xlane.xlu1 %2375 }
 0x46b   : > { %12006 = vst [vmem:[#allocation246_spill] sm:$0xff] %v8945_v37  ;;  %v8947_v61 = vpop.xlane.xlu0 %2372  ;;  %v12120_v37 = vld [vmem:[#allocation284_spill] sm:$0xff] }
 0x46c   : > { %12007 = vst [vmem:[#allocation141_spill] sm:$0xff] %v8947_v61  ;;  %3511 = vrot.lane.b32.xlu0 %v2849_v50, %s5650_s27  ;;  %v12119_v61 = vld [vmem:[#allocation161_spill] sm:$0xff] }
 0x46e   : > { %3481 = vrot.lane.b32.xlu1 %v2834_v4, %s5650_s27  ;;  %v8955_v16 = vpop.xlane.xlu1 %2381  ;;  %v5287_v4 = vld [vmem:[%s5893_s10 + $0x638] sm:$0xff] }
 0x46f   : > { %12008 = vst [vmem:[#allocation247_spill] sm:$0xff] %v8955_v16  ;;  %v8957_v32 = vpop.xlane.xlu0 %2378  ;;  %v1506_v34 = vpack.c.bf16 %v5287_v4, %v5288_v18  ;;  %v5294_v4 = vld [vmem:[%s5893_s10 + $0x2a0] sm:$0xff] }
 0x470   : > { %12009 = vst [vmem:[#allocation142_spill] sm:$0xff] %v8957_v32  ;;  %3513 = vrot.lane.b32.xlu0 %v2850_v30, %s5650_s27  ;;  %v5290_v30 = vld [vmem:[%s5893_s10 + $0x280] sm:$0xff]  ;;  %v5293_v32 = vld [vmem:[%s5893_s10 + $0x2b0] sm:$0xff] }
 0x471   : > { %v2162_v59 = vpack.c.bf16 %v5289_v10, %v5290_v30  ;;  %v2163_v18 = vpack.c.bf16 %v5293_v32, %v5294_v4  ;;  %v5295_v10 = vld [vmem:[%s5893_s10 + $0x6b0] sm:$0xff]  ;;  %v5297_v4 = vld [vmem:[%s5893_s10 + $0x258] sm:$0xff] }
 0x472   : > { %3291 = vrot.lane.b32.xlu1 %v1489_v24, %s5648_s23  ;;  %v8965_v25 = vpop.xlane.xlu1 %2387 }
 0x473   : > { %12010 = vst [vmem:[#allocation248_spill] sm:$0xff] %v8965_v25  ;;  %v8967_v50 = vpop.xlane.xlu0 %2384  ;;  %v5292_v25 = vld [vmem:[%s5893_s10 + $0x680] sm:$0xff] }
 0x474   : > { %12011 = vst [vmem:[#allocation143_spill] sm:$0xff] %v8967_v50  ;;  %3323 = vrot.lane.b32.xlu0 %v1505_v56, %s5648_s23  ;;  %v2178_v50 = vpack.c.bf16 %v5291_v43, %v5292_v25  ;;  %v2835_v25 = vpack.c.bf16 %v8366_v40, %v8369_v42  ;;  %v2836_v43 = vpack.c.bf16 %v8384_v48, %v8387_v41 }
 0x476   : > { %3293 = vrot.lane.b32.xlu1 %v1490_v22, %s5648_s23  ;;  %v8975_v17 = vpop.xlane.xlu1 %2393  ;;  %v5296_v22 = vld [vmem:[%s5893_s10 + $0x6a0] sm:$0xff] }
 0x477   : > { %12012 = vst [vmem:[#allocation249_spill] sm:$0xff] %v8975_v17  ;;  %v8977_v24 = vpop.xlane.xlu0 %2390  ;;  %v2179_v30 = vpack.c.bf16 %v5295_v10, %v5296_v22  ;;  %v5300_v10 = vld [vmem:[%s5893_s10 + $0x648] sm:$0xff] }
 0x478   : > { %12013 = vst [vmem:[#allocation144_spill] sm:$0xff] %v8977_v24  ;;  %3325 = vrot.lane.b32.xlu0 %v1506_v34, %s5648_s23 }
 0x47a   : > { %3387 = vrot.lane.b32.xlu1 %v2162_v59, %s5649_s25  ;;  %v8985_v56 = vpop.xlane.xlu1 %2399  ;;  %v2851_v59 = vpack.c.bf16 %v8624_v27, %v8627_v19  ;;  %v5298_v19 = vld [vmem:[%s5893_s10 + $0x248] sm:$0xff] }
 0x47b   : > { %12014 = vst [vmem:[#allocation251_spill] sm:$0xff] %v8985_v56  ;;  %v8987_v16 = vpop.xlane.xlu0 %2396  ;;  %v1491_v27 = vpack.c.bf16 %v5297_v4, %v5298_v19  ;;  %v5304_v4 = vld [vmem:[%s5893_s10 + $0x668] sm:$0xff] }
 0x47c   : > { %12015 = vst [vmem:[#allocation145_spill] sm:$0xff] %v8987_v16  ;;  %3419 = vrot.lane.b32.xlu0 %v2178_v50, %s5649_s25  ;;  %v2852_v50 = vpack.c.bf16 %v8638_v26, %v8641_v36  ;;  %v5301_v36 = vld [vmem:[%s5893_s10 + $0x278] sm:$0xff]  ;;  %v5302_v26 = vld [vmem:[%s5893_s10 + $0x268] sm:$0xff] }
 0x47e   : > { %3389 = vrot.lane.b32.xlu1 %v2163_v18, %s5649_s25  ;;  %v8995_v34 = vpop.xlane.xlu1 %2405  ;;  %v5299_v18 = vld [vmem:[%s5893_s10 + $0x658] sm:$0xff] }
 0x47f   : > { %12016 = vst [vmem:[#allocation252_spill] sm:$0xff] %v8995_v34  ;;  %v8997_v32 = vpop.xlane.xlu0 %2402  ;;  %v1507_v22 = vpack.c.bf16 %v5299_v18, %v5300_v10  ;;  %v5305_v18 = vld [vmem:[%s5893_s10 + $0x2d0] sm:$0xff]  ;;  %v12106_v34 = vld [vmem:[#allocation271_spill] sm:$0xff] }
 0x480   : > { %12017 = vst [vmem:[#allocation147_spill] sm:$0xff] %v8997_v32  ;;  %3421 = vrot.lane.b32.xlu0 %v2179_v30, %s5649_s25  ;;  %v1492_v30 = vpack.c.bf16 %v5301_v36, %v5302_v26  ;;  %v5307_v26 = vld [vmem:[%s5893_s10 + $0x6d0] sm:$0xff] }
 0x482   : > { %3483 = vrot.lane.b32.xlu1 %v2835_v25, %s5650_s27  ;;  %v9005_v40 = vpop.xlane.xlu1 %2411 }
 0x483   : > { %12018 = vst [vmem:[#allocation256_spill] sm:$0xff] %v9005_v40  ;;  %v9007_v42 = vpop.xlane.xlu0 %2408  ;;  %v5312_v40 = vld [vmem:[%s5893_s10 + $0x6e0] sm:$0xff] }
 0x484   : > { %12019 = vst [vmem:[#allocation324_spill] sm:$0xff] %v9007_v42  ;;  %3515 = vrot.lane.b32.xlu0 %v2851_v59, %s5650_s27  ;;  %v5311_v42 = vld [vmem:[%s5893_s10 + $0x6f0] sm:$0xff] }
 0x486   : > { %3485 = vrot.lane.b32.xlu1 %v2836_v43, %s5650_s27  ;;  %v9015_v48 = vpop.xlane.xlu1 %2417  ;;  %v5303_v43 = vld [vmem:[%s5893_s10 + $0x678] sm:$0xff] }
 0x487   : > { %12020 = vst [vmem:[#allocation325_spill] sm:$0xff] %v9015_v48  ;;  %v9017_v41 = vpop.xlane.xlu0 %2414  ;;  %v1508_v19 = vpack.c.bf16 %v5303_v43, %v5304_v4  ;;  %v5310_v48 = vld [vmem:[%s5893_s10 + $0x2e0] sm:$0xff] }
 0x488   : > { %12021 = vst [vmem:[#allocation326_spill] sm:$0xff] %v9017_v41  ;;  %3517 = vrot.lane.b32.xlu0 %v2852_v50, %s5650_s27  ;;  %v5306_v50 = vld [vmem:[%s5893_s10 + $0x2c0] sm:$0xff] }
 0x489   : > { %v2164_v10 = vpack.c.bf16 %v5305_v18, %v5306_v50  ;;  %v2181_v18 = vpack.c.bf16 %v5311_v42, %v5312_v40 }
 0x48a   : > { %3295 = vrot.lane.b32.xlu1 %v1491_v27, %s5648_s23  ;;  %v9025_v25 = vpop.xlane.xlu1 %2423 }
 0x48b   : > { %12022 = vst [vmem:[#allocation327_spill] sm:$0xff] %v9025_v25  ;;  %v9027_v59 = vpop.xlane.xlu0 %2420  ;;  %v5308_v25 = vld [vmem:[%s5893_s10 + $0x6c0] sm:$0xff] }
 0x48c   : > { %12023 = vst [vmem:[#allocation328_spill] sm:$0xff] %v9027_v59  ;;  %3327 = vrot.lane.b32.xlu0 %v1507_v22, %s5648_s23  ;;  %v2180_v41 = vpack.c.bf16 %v5307_v26, %v5308_v25  ;;  %v5309_v59 = vld [vmem:[%s5893_s10 + $0x2f0] sm:$0xff] }
 0x48d   : > { %v2165_v43 = vpack.c.bf16 %v5309_v59, %v5310_v48  ;;  %v2853_v48 = vpack.c.bf16 %v8652_v47, %v8655_v2  ;;  %v2838_v59 = vpack.c.bf16 %v8420_v29, %v8423_v9  ;;  %v5313_v2 = vld [vmem:[%s5893_s10 + $0x318] sm:$0xff]  ;;  %v5314_v29 = vld [vmem:[%s5893_s10 + $0x308] sm:$0xff] }
 0x48e   : > { %3297 = vrot.lane.b32.xlu1 %v1492_v30, %s5648_s23  ;;  %v3276_v36 = vpop.permute.xlu1 %3275  ;;  %v2837_v30 = vpack.c.bf16 %v8402_v45, %v8405_v39  ;;  %v2854_v45 = vpack.c.bf16 %v8666_v14, %v8669_v58  ;;  %v12025_v39 = vld [vmem:[#allocation48_spill] sm:$0xff]  ;;  %v1493_v9 = vpack.c.bf16 %v5313_v2, %v5314_v29  ;;  %v5315_v14 = vld [vmem:[%s5893_s10 + $0x718] sm:$0xff] }
 0x48f   : > { %v9035_v27 = vpop.xlane.xlu0 %2426  ;;  %v5317_v2 = vld [vmem:[%s5893_s10 + $0x338] sm:$0xff]  ;;  %v5318_v29 = vld [vmem:[%s5893_s10 + $0x328] sm:$0xff] }
 0x490   : > { %12024 = vst [vmem:[#allocation329_spill] sm:$0xff] %v9035_v27  ;;  %3329 = vrot.lane.b32.xlu0 %v1508_v19, %s5648_s23  ;;  %v1494_v27 = vpack.c.bf16 %v5317_v2, %v5318_v29  ;;  %v5324_v2 = vld [vmem:[%s5893_s10 + $0x780] sm:$0xff] }
 0x492   : > { %3391 = vrot.lane.b32.xlu1 %v2164_v10, %s5649_s25  ;;  %v3278_v22 = vpop.permute.xlu1 %3277 }
 0x493   : > { %v3308_v4 = vpop.permute.xlu0 %3307 }
 0x494   : > { %3423 = vrot.lane.b32.xlu0 %v2180_v41, %s5649_s25  ;;  %v12026_v41 = vld [vmem:[#allocation49_spill] sm:$0xff] }
 0x495   : > { %v12027_v50 = vpack.c.bf16 %v12025_v39, %v12026_v41 }
 0x496   : > { %3393 = vrot.lane.b32.xlu1 %v2165_v43, %s5649_s25  ;;  %v3310_v25 = vpop.permute.xlu1 %3309  ;;  %v5316_v43 = vld [vmem:[%s5893_s10 + $0x708] sm:$0xff] }
 0x497   : > { %v3404_v19 = vpop.permute.xlu0 %3403  ;;  %v3581_v10 = vsel %vm359_vm0, %v12027_v50, %v3308_v4  ;;  %v1509_v4 = vpack.c.bf16 %v5315_v14, %v5316_v43  ;;  %v12032_v50 = vld [vmem:[#allocation51_spill] sm:$0xff] }
 0x498   : > { %3425 = vrot.lane.b32.xlu0 %v2181_v18, %s5649_s25  ;;  %v3661_v47 = vsel %vm3627_vm1, %v3581_v10, %v3404_v19  ;;  %v12031_v19 = vld [vmem:[#allocation50_spill] sm:$0xff] }
 0x499   : > { %v5319_v43 = vld [vmem:[%s5893_s10 + $0x738] sm:$0xff] }
 0x49a   : > { %3487 = vrot.lane.b32.xlu1 %v2837_v30, %s5650_s27  ;;  %v3372_v40 = vpop.permute.xlu1 %3371  ;;  %v12028_v30 = vld [vmem:[#allocation19_spill] sm:$0xff] }
 0x49b   : > { %v3406_v42 = vpop.permute.xlu0 %3405 }
 0x49c   : > { %3519 = vrot.lane.b32.xlu0 %v2853_v48, %s5650_s27  ;;  %v12029_v48 = vld [vmem:[#allocation17_spill] sm:$0xff] }
 0x49d   : > { %v12030_v39 = vpack.c.bf16 %v12028_v30, %v12029_v48 }
 0x49e   : > { %3489 = vrot.lane.b32.xlu1 %v2838_v59, %s5650_s27  ;;  %v3374_v26 = vpop.permute.xlu1 %3373  ;;  %v12033_v59 = vpack.c.bf16 %v12031_v19, %v12032_v50 }
 0x49f   : > { %v3500_v58 = vpop.permute.xlu0 %3499  ;;  %v3533_v41 = vsel %vm359_vm0, %v12030_v39, %v3276_v36  ;;  %v5320_v36 = vld [vmem:[%s5893_s10 + $0x728] sm:$0xff]  ;;  %v5321_v39 = vld [vmem:[%s5893_s10 + $0x390] sm:$0xff] }
 0x4a0   : > { %3521 = vrot.lane.b32.xlu0 %v2854_v45, %s5650_s27  ;;  %v3742_v18 = vsel %vm3692_vm2, %v3661_v47, %v3500_v58  ;;  %v3584_v10 = vsel %vm359_vm0, %v12033_v59, %v3310_v25  ;;  %v3629_v45 = vsel %vm3627_vm1, %v3533_v41, %v3372_v40  ;;  %v12034_v40 = vld [vmem:[#allocation18_spill] sm:$0xff]  ;;  %v5322_v41 = vld [vmem:[%s5893_s10 + $0x380] sm:$0xff] }
 0x4a1   : > { %4931 = vmatprep.mubr.bf16.mxu1 %v3742_v18  ;;  %v3663_v47 = vsel %vm3627_vm1, %v3584_v10, %v3406_v42  ;;  %v1510_v18 = vpack.c.bf16 %v5319_v43, %v5320_v36  ;;  %v12035_v42 = vld [vmem:[#allocation16_spill] sm:$0xff]  ;;  %v2166_v19 = vpack.c.bf16 %v5321_v39, %v5322_v41  ;;  %v5323_v10 = vld [vmem:[%s5893_s10 + $0x790] sm:$0xff] }
 0x4a2   : > { %3299 = vrot.lane.b32.xlu1 %v1493_v9, %s5648_s23  ;;  %v3468_v58 = vpop.permute.xlu1 %3467  ;;  %v12036_v48 = vpack.c.bf16 %v12034_v40, %v12035_v42  ;;  %v2182_v29 = vpack.c.bf16 %v5323_v10, %v5324_v2  ;;  %v5328_v43 = vld [vmem:[%s5893_s10 + $0x7a0] sm:$0xff]  ;;  %v12038_v42 = vld [vmem:[#allocation66_spill] sm:$0xff]  ;;  %v12039_v39 = vld [vmem:[#allocation109_spill] sm:$0xff] }
 0x4a3   : > { %v3502_v14 = vpop.permute.xlu0 %3501  ;;  %v3694_v25 = vsel %vm3692_vm2, %v3629_v45, %v3468_v58  ;;  %v12037_v40 = vld [vmem:[#allocation184_spill] sm:$0xff]  ;;  %v12040_v41 = vld [vmem:[#allocation290_spill] sm:$0xff]  ;;  %v12043_v2 = vld [vmem:[#allocation53_spill] sm:$0xff] }
 0x4a4   : > { %3331 = vrot.lane.b32.xlu0 %v1509_v4, %s5648_s23  ;;  %v3745_v30 = vsel %vm3692_vm2, %v3663_v47, %v3502_v14  ;;  %4899 = vmatprep.mubr.bf16.mxu0 %v3694_v25  ;;  %v3536_v9 = vsel %vm359_vm0, %v12036_v48, %v3278_v22  ;;  %v5325_v22 = vld [vmem:[%s5893_s10 + $0x3b0] sm:$0xff]  ;;  %v5326_v47 = vld [vmem:[%s5893_s10 + $0x3a0] sm:$0xff]  ;;  %v2855_v48 = vpack.c.bf16 %v12038_v42, %v12037_v40  ;;  %v5332_v40 = vld [vmem:[%s5893_s10 + $0x748] sm:$0xff] }
 0x4a5   : > { %4932 = vmatmul.mubr.bf16.vlgmr.msra.gmra.mrb[0].mxu1 %v3745_v30  ;;  %v3631_v50 = vsel %vm3627_vm1, %v3536_v9, %v3374_v26  ;;  %v2167_v58 = vpack.c.bf16 %v5325_v22, %v5326_v47  ;;  %v9113_v9 = vld [vmem:[%s5893_s10 + $0x7b8] sm:$0xff]  ;;  %v12042_v10 = vld [vmem:[#allocation52_spill] sm:$0xff] }
 0x4a6   : > { %3301 = vrot.lane.b32.xlu1 %v1494_v27, %s5648_s23  ;;  %v3470_v4 = vpop.permute.xlu1 %3469  ;;  %v5327_v27 = vld [vmem:[%s5893_s10 + $0x7b0] sm:$0xff]  ;;  %v5329_v22 = vld [vmem:[%s5893_s10 + $0x358] sm:$0xff]  ;;  %v5330_v47 = vld [vmem:[%s5893_s10 + $0x348] sm:$0xff] }
 0x4a7   : > { %v3312_v59 = vpop.permute.xlu0 %3311  ;;  %v3697_v45 = vsel %vm3692_vm2, %v3631_v50, %v3470_v4  ;;  %v2183_v36 = vpack.c.bf16 %v5327_v27, %v5328_v43 }
 0x4a8   : > { %3333 = vrot.lane.b32.xlu0 %v1510_v18, %s5648_s23  ;;  %4900 = vmatmul.mubr.bf16.vlgmr.msra.gmra.mrb[0].mxu0 %v3697_v45  ;;  %v2839_v18 = vpack.c.bf16 %v8438_v13, %v8441_v28  ;;  %v12041_v28 = vld [vmem:[#allocation114_spill] sm:$0xff] }
 0x4a9   : > { %v2856_v4 = vpack.c.bf16 %v9113_v9, %v12041_v28 }
 0x4aa   : > { %3395 = vrot.lane.b32.xlu1 %v2166_v19, %s5649_s25  ;;  %v3280_v26 = vpop.permute.xlu1 %3279  ;;  %v2840_v19 = vpack.c.bf16 %v12040_v41, %v12039_v39  ;;  %v12046_v39 = vld [vmem:[#allocation21_spill] sm:$0xff] }
 0x4ab   : > { %v3314_v14 = vpop.permute.xlu0 %3313 }
 0x4ac   : > { %3427 = vrot.lane.b32.xlu0 %v2182_v29, %s5649_s25  ;;  %v12044_v29 = vpack.c.bf16 %v12042_v10, %v12043_v2  ;;  %v12049_v10 = vld [vmem:[#allocation55_spill] sm:$0xff] }
 0x4ae   : > { %3397 = vrot.lane.b32.xlu1 %v2167_v58, %s5649_s25  ;;  %v3282_v25 = vpop.permute.xlu1 %3281  ;;  %v3587_v45 = vsel %vm359_vm0, %v12044_v29, %v3312_v59  ;;  %v1495_v58 = vpack.c.bf16 %v5329_v22, %v5330_v47  ;;  %v5333_v29 = vld [vmem:[%s5893_s10 + $0x378] sm:$0xff] }
 0x4af   : > { %v3408_v30 = vpop.permute.xlu0 %3407 }
 0x4b0   : > { %3429 = vrot.lane.b32.xlu0 %v2183_v36, %s5649_s25  ;;  %v3665_v27 = vsel %vm3627_vm1, %v3587_v45, %v3408_v30  ;;  %v12048_v30 = vld [vmem:[#allocation54_spill] sm:$0xff]  ;;  %v5334_v45 = vld [vmem:[%s5893_s10 + $0x368] sm:$0xff] }
 0x4b1   : > { %v1496_v22 = vpack.c.bf16 %v5333_v29, %v5334_v45  ;;  %v5341_v45 = vld [vmem:[%s5893_s10 + $0x3f0] sm:$0xff] }
 0x4b2   : > { %3491 = vrot.lane.b32.xlu1 %v2839_v18, %s5650_s27  ;;  %v3376_v50 = vpop.permute.xlu1 %3375  ;;  %v5331_v18 = vld [vmem:[%s5893_s10 + $0x758] sm:$0xff] }
 0x4b3   : > { %v3410_v13 = vpop.permute.xlu0 %3409  ;;  %v1511_v42 = vpack.c.bf16 %v5331_v18, %v5332_v40  ;;  %v5335_v18 = vld [vmem:[%s5893_s10 + $0x778] sm:$0xff] }
 0x4b4   : > { %3523 = vrot.lane.b32.xlu0 %v2855_v48, %s5650_s27  ;;  %v12045_v48 = vld [vmem:[#allocation20_spill] sm:$0xff] }
 0x4b5   : > { %v12047_v41 = vpack.c.bf16 %v12045_v48, %v12046_v39  ;;  %v5337_v39 = vld [vmem:[%s5893_s10 + $0x3d0] sm:$0xff] }
 0x4b6   : > { %3493 = vrot.lane.b32.xlu1 %v2840_v19, %s5650_s27  ;;  %v3378_v43 = vpop.permute.xlu1 %3377  ;;  %v12050_v19 = vpack.c.bf16 %v12048_v30, %v12049_v10 }
 0x4b7   : > { %v3504_v36 = vpop.permute.xlu0 %3503  ;;  %v3539_v28 = vsel %vm359_vm0, %v12047_v41, %v3280_v26  ;;  %v5336_v26 = vld [vmem:[%s5893_s10 + $0x768] sm:$0xff]  ;;  %v5338_v41 = vld [vmem:[%s5893_s10 + $0x3c0] sm:$0xff] }
 0x4b8   : > { %3525 = vrot.lane.b32.xlu0 %v2856_v4, %s5650_s27  ;;  %v3748_v59 = vsel %vm3692_vm2, %v3665_v27, %v3504_v36  ;;  %v3590_v2 = vsel %vm359_vm0, %v12050_v19, %v3314_v14  ;;  %v3633_v4 = vsel %vm3627_vm1, %v3539_v28, %v3376_v50  ;;  %v1512_v40 = vpack.c.bf16 %v5335_v18, %v5336_v26  ;;  %v12051_v50 = vld [vmem:[#allocation22_spill] sm:$0xff]  ;;  %v9170_v26 = vld [vmem:[%s5893_s10 + $0x7c8] sm:$0xff] }
 0x4b9   : > { %4935 = vmatprep.mubr.bf16.mxu1 %v3748_v59  ;;  %v3667_v47 = vsel %vm3627_vm1, %v3590_v2, %v3410_v13  ;;  %v12052_v13 = vld [vmem:[#allocation23_spill] sm:$0xff]  ;;  %v2168_v28 = vpack.c.bf16 %v5337_v39, %v5338_v41  ;;  %v5339_v19 = vld [vmem:[%s5893_s10 + $0x7d0] sm:$0xff]  ;;  %v9182_v39 = vld [vmem:[%s5893_s10 + $0x7e8] sm:$0xff] }
 0x4ba   : > { %3303 = vrot.lane.b32.xlu1 %v1495_v58, %s5648_s23  ;;  %v3472_v27 = vpop.permute.xlu1 %3471  ;;  %v12053_v48 = vpack.c.bf16 %v12051_v50, %v12052_v13  ;;  %v5340_v2 = vld [vmem:[%s5893_s10 + $0x7c0] sm:$0xff]  ;;  %v9185_v41 = vld [vmem:[%s5893_s10 + $0x7f8] sm:$0xff] }
 0x4bb   : > { %v3506_v36 = vpop.permute.xlu0 %3505  ;;  %v3700_v14 = vsel %vm3692_vm2, %v3633_v4, %v3472_v27  ;;  %v2184_v29 = vpack.c.bf16 %v5339_v19, %v5340_v2  ;;  %v5342_v4 = vld [vmem:[%s5893_s10 + $0x3e0] sm:$0xff]  ;;  %v5343_v27 = vld [vmem:[%s5893_s10 + $0x7f0] sm:$0xff] }
 0x4bc   : > { %3335 = vrot.lane.b32.xlu0 %v1511_v42, %s5648_s23  ;;  %v3751_v59 = vsel %vm3692_vm2, %v3667_v47, %v3506_v36  ;;  %4903 = vmatprep.mubr.bf16.mxu0 %v3700_v14  ;;  %v3542_v58 = vsel %vm359_vm0, %v12053_v48, %v3282_v25  ;;  %v2169_v47 = vpack.c.bf16 %v5341_v45, %v5342_v4  ;;  %v5344_v36 = vld [vmem:[%s5893_s10 + $0x7e0] sm:$0xff]  ;;  %v12054_v14 = vld [vmem:[#allocation293_spill] sm:$0xff] }
 0x4bd   : > { %4936 = vmatmul.mubr.bf16.gmra.mrb[4].mxu1 %v3751_v59  ;;  %v3635_v30 = vsel %vm3627_vm1, %v3542_v58, %v3378_v43  ;;  %v2185_v18 = vpack.c.bf16 %v5343_v27, %v5344_v36  ;;  %v12055_v59 = vld [vmem:[#allocation217_spill] sm:$0xff]  ;;  %v5346_v45 = vld [vmem:[%s5893_s10 + $0x520] sm:$0xff] }
 0x4be   : > { %3305 = vrot.lane.b32.xlu1 %v1496_v22, %s5648_s23  ;;  %v3474_v42 = vpop.permute.xlu1 %3473  ;;  %v2841_v50 = vpack.c.bf16 %v12055_v59, %v12054_v14  ;;  %v12059_v27 = vld [vmem:[#allocation57_spill] sm:$0xff] }
 0x4bf   : > { %v3316_v10 = vpop.permute.xlu0 %3315  ;;  %v3703_v25 = vsel %vm3692_vm2, %v3635_v30, %v3474_v42  ;;  %v12057_v30 = vld [vmem:[#allocation166_spill] sm:$0xff] }
 0x4c0   : > { %3337 = vrot.lane.b32.xlu0 %v1512_v40, %s5648_s23  ;;  %4904 = vmatmul.mubr.bf16.gmra.mrb[4].mxu0 %v3703_v25  ;;  %v9173_v40 = vld [vmem:[%s5893_s10 + $0x7d8] sm:$0xff]  ;;  %v5345_v25 = vld [vmem:[%s5893_s10 + $0x530] sm:$0xff] }
 0x4c1   : > { %v2857_v58 = vpack.c.bf16 %v9173_v40, %v9170_v26  ;;  %v829_v4 = vpack.c.bf16 %v5345_v25, %v5346_v45 }
 0x4c2   : > { %3399 = vrot.lane.b32.xlu1 %v2168_v28, %s5649_s25  ;;  %v3284_v43 = vpop.permute.xlu1 %3283  ;;  %v12056_v28 = vld [vmem:[#allocation112_spill] sm:$0xff] }
 0x4c3   : > { %v3318_v22 = vpop.permute.xlu0 %3317  ;;  %v2842_v42 = vpack.c.bf16 %v12057_v30, %v12056_v28  ;;  %v12061_v28 = vld [vmem:[#allocation24_spill] sm:$0xff]  ;;  %v12062_v30 = vld [vmem:[#allocation25_spill] sm:$0xff] }
 0x4c4   : > { %3431 = vrot.lane.b32.xlu0 %v2184_v29, %s5649_s25  ;;  %v2858_v29 = vpack.c.bf16 %v9185_v41, %v9182_v39  ;;  %v12063_v32 = vpack.c.bf16 %v12061_v28, %v12062_v30  ;;  %v3596_v45 = vsel %vm359_vm0, %v829_v4, %v3318_v22  ;;  %v5347_v30 = vld [vmem:[%s5893_s10 + $0x550] sm:$0xff] }
 0x4c6   : > { %3401 = vrot.lane.b32.xlu1 %v2169_v47, %s5649_s25  ;;  %v3286_v13 = vpop.permute.xlu1 %3285  ;;  %v12058_v47 = vld [vmem:[#allocation56_spill] sm:$0xff]  ;;  %v3545_v25 = vsel %vm359_vm0, %v12063_v32, %v3284_v43 }
 0x4c7   : > { %v3412_v48 = vpop.permute.xlu0 %3411  ;;  %v12060_v36 = vpack.c.bf16 %v12058_v47, %v12059_v27 }
 0x4c8   : > { %3433 = vrot.lane.b32.xlu0 %v2185_v18, %s5649_s25 }
 0x4c9   : > { %v3593_v18 = vsel %vm359_vm0, %v12060_v36, %v3316_v10  ;;  %v12064_v36 = vld [vmem:[#allocation26_spill] sm:$0xff] }
 0x4ca   : > { %3495 = vrot.lane.b32.xlu1 %v2841_v50, %s5650_s27  ;;  %v3380_v19 = vpop.permute.xlu1 %3379  ;;  %v3669_v14 = vsel %vm3627_vm1, %v3593_v18, %v3412_v48  ;;  %v12065_v18 = vld [vmem:[#allocation27_spill] sm:$0xff] }
 0x4cb   : > { %v3414_v2 = vpop.permute.xlu0 %3413  ;;  %v3637_v10 = vsel %vm3627_vm1, %v3545_v25, %v3380_v19  ;;  %v5348_v25 = vld [vmem:[%s5893_s10 + $0x540] sm:$0xff] }
 0x4cc   : > { %3527 = vrot.lane.b32.xlu0 %v2857_v58, %s5650_s27  ;;  %v3671_v48 = vsel %vm3627_vm1, %v3596_v45, %v3414_v2  ;;  %v830_v45 = vpack.c.bf16 %v5347_v30, %v5348_v25 }
 0x4ce   : > { %3497 = vrot.lane.b32.xlu1 %v2842_v42, %s5650_s27  ;;  %v3382_v59 = vpop.permute.xlu1 %3381 }
 0x4cf   : > { %v3508_v50 = vpop.permute.xlu0 %3507 }
 0x4d0   : > { %3529 = vrot.lane.b32.xlu0 %v2858_v29, %s5650_s27  ;;  %v3754_v58 = vsel %vm3692_vm2, %v3669_v14, %v3508_v50  ;;  %v12066_v14 = vpack.c.bf16 %v12064_v36, %v12065_v18 }
 0x4d1   : > { %4939 = vmatprep.mubr.bf16.mxu1 %v3754_v58 }
 0x4d2   : > { %v3476_v47 = vpop.permute.xlu1 %3475  ;;  %v3548_v32 = vsel %vm359_vm0, %v12066_v14, %v3286_v13  ;;  %v12067_v14 = vld [vmem:[#allocation28_spill] sm:$0xff] }
 0x4d3   : > { %v3510_v42 = vpop.permute.xlu0 %3509  ;;  %v3706_v29 = vsel %vm3692_vm2, %v3637_v10, %v3476_v47  ;;  %v3639_v43 = vsel %vm3627_vm1, %v3548_v32, %v3382_v59  ;;  %v5349_v47 = vld [vmem:[%s5893_s10 + $0x570] sm:$0xff] }
 0x4d4   : > { %v3757_v27 = vsel %vm3692_vm2, %v3671_v48, %v3510_v42  ;;  %4907 = vmatprep.mubr.bf16.mxu0 %v3706_v29  ;;  %v5350_v42 = vld [vmem:[%s5893_s10 + $0x560] sm:$0xff]  ;;  %v12068_v32 = vld [vmem:[#allocation29_spill] sm:$0xff] }
 0x4d5   : > { %4940 = vmatmul.mubr.bf16.gmra.mrb[8].mxu1 %v3757_v27  ;;  %v831_v13 = vpack.c.bf16 %v5349_v47, %v5350_v42  ;;  %v2431_v42 = vsel %vm359_vm0, %v9170_v26, 0.0  ;;  %v2434_v26 = vsel %vm359_vm0, %v9173_v40, 0.0 }
 0x4d6   : > { %v3478_v22 = vpop.permute.xlu1 %3477 }
 0x4d7   : > { %v3320_v19 = vpop.permute.xlu0 %3319  ;;  %v3709_v2 = vsel %vm3692_vm2, %v3639_v43, %v3478_v22  ;;  %v12069_v43 = vpack.c.bf16 %v12067_v14, %v12068_v32  ;;  %v2437_v32 = vsel %vm359_vm0, %v9182_v39, 0.0 }
 0x4d8   : > { %4908 = vmatmul.mubr.bf16.gmra.mrb[8].mxu0 %v3709_v2  ;;  %v3599_v29 = vsel %vm359_vm0, %v830_v45, %v3320_v19 }
 0x4da   : > { %v3288_v4 = vpop.permute.xlu1 %3287 }
 0x4db   : > { %v3322_v50 = vpop.permute.xlu0 %3321  ;;  %v3551_v22 = vsel %vm359_vm0, %v12069_v43, %v3288_v4  ;;  %v5351_v43 = vld [vmem:[%s5893_s10 + $0x98] sm:$0xff] }
 0x4dc   : > { %v3602_v2 = vsel %vm359_vm0, %v831_v13, %v3322_v50 }
 0x4de   : > { %v3290_v58 = vpop.permute.xlu1 %3289 }
 0x4df   : > { %v3416_v28 = vpop.permute.xlu0 %3415 }
 0x4e0   : > { %v3673_v59 = vsel %vm3627_vm1, %v3599_v29, %v3416_v28  ;;  %v12070_v29 = vld [vmem:[#allocation30_spill] sm:$0xff] }
 0x4e2   : > { %v3384_v10 = vpop.permute.xlu1 %3383 }
 0x4e3   : > { %v3418_v48 = vpop.permute.xlu0 %3417  ;;  %v3641_v30 = vsel %vm3627_vm1, %v3551_v22, %v3384_v10  ;;  %v5352_v22 = vld [vmem:[%s5893_s10 + $0x88] sm:$0xff] }
 0x4e4   : > { %v3675_v25 = vsel %vm3627_vm1, %v3602_v2, %v3418_v48  ;;  %v2443_v2 = vmul.f32 %v5352_v22, %v5352_v22 }
 0x4e6   : > { %v3386_v27 = vpop.permute.xlu1 %3385 }
 0x4e7   : > { %v3512_v36 = vpop.permute.xlu0 %3511 }
 0x4e8   : > { %v3760_v18 = vsel %vm3692_vm2, %v3673_v59, %v3512_v36  ;;  %v12071_v59 = vld [vmem:[#allocation31_spill] sm:$0xff] }
 0x4e9   : > { %4943 = vmatprep.mubr.bf16.mxu1 %v3760_v18  ;;  %v12072_v4 = vpack.c.bf16 %v12070_v29, %v12071_v59  ;;  %v2428_v18 = vsel %vm359_vm0, %v9113_v9, 0.0  ;;  %v2444_v9 = vmul.f32 %v5351_v43, %v5351_v43 }
 0x4ea   : > { %v3480_v47 = vpop.permute.xlu1 %3479 }
 0x4eb   : > { %v3514_v19 = vpop.permute.xlu0 %3513  ;;  %v3712_v28 = vsel %vm3692_vm2, %v3641_v30, %v3480_v47  ;;  %v3554_v50 = vsel %vm359_vm0, %v12072_v4, %v3290_v58  ;;  %v2507_v47 = vsel %vm359_vm0, %v2443_v2, 0.0 }
 0x4ec   : > { %v3763_v45 = vsel %vm3692_vm2, %v3675_v25, %v3514_v19  ;;  %4911 = vmatprep.mubr.bf16.mxu0 %v3712_v28  ;;  %v3643_v10 = vsel %vm3627_vm1, %v3554_v50, %v3386_v27  ;;  %v2440_v27 = vsel %vm359_vm0, %v9185_v41, 0.0  ;;  %v2510_v25 = vsel %vm359_vm0, %v2444_v9, 0.0  ;;  %v5353_v41 = vld [vmem:[%s5893_s10 + $0xb8] sm:$0xff]  ;;  %v5354_v28 = vld [vmem:[%s5893_s10 + $0xa8] sm:$0xff] }
 0x4ed   : > { %4944 = vmatmul.mubr.bf16.gmra.mrb[12].mxu1 %v3763_v45  ;;  %v2446_v19 = vmul.f32 %v5353_v41, %v5353_v41  ;;  %v2445_v39 = vmul.f32 %v5354_v28, %v5354_v28  ;;  %v5355_v45 = vld [vmem:[%s5893_s10 + $0x610] sm:$0xff] }
 0x4ee   : > { %v3482_v48 = vpop.permute.xlu1 %3481 }
 0x4ef   : > { %2432 = vadd.xlane.f32.xlu0 %v2431_v42  ;;  %v3324_v13 = vpop.permute.xlu0 %3323  ;;  %v3715_v36 = vsel %vm3692_vm2, %v3643_v10, %v3482_v48  ;;  %v5356_v42 = vld [vmem:[%s5893_s10 + $0x600] sm:$0xff]  ;;  %v2516_v50 = vsel %vm359_vm0, %v2446_v19, 0.0  ;;  %v2513_v10 = vsel %vm359_vm0, %v2445_v39, 0.0  ;;  %v5357_v48 = vld [vmem:[%s5893_s10 + $0xd8] sm:$0xff] }
 0x4f0   : > { %4912 = vmatmul.mubr.bf16.gmra.mrb[12].mxu0 %v3715_v36  ;;  %v832_v29 = vpack.c.bf16 %v5355_v45, %v5356_v42  ;;  %v2448_v36 = vmul.f32 %v5357_v48, %v5357_v48  ;;  %v5362_v45 = vld [vmem:[%s5893_s10 + $0xe8] sm:$0xff] }
 0x4f1   : > { %v2449_v42 = vmul.f32 %v5362_v45, %v5362_v45 }
 0x4f2   : > { %2429 = vadd.xlane.f32.xlu1 %v2428_v18  ;;  %v3292_v14 = vpop.permute.xlu1 %3291  ;;  %v5358_v18 = vld [vmem:[%s5893_s10 + $0xc8] sm:$0xff]  ;;  %v3605_v9 = vsel %vm359_vm0, %v832_v29, %v3324_v13  ;;  %v2522_v28 = vsel %vm359_vm0, %v2448_v36, 0.0 }
 0x4f3   : > { %2435 = vadd.xlane.f32.xlu0 %v2434_v26  ;;  %v3326_v58 = vpop.permute.xlu0 %3325  ;;  %v2447_v26 = vmul.f32 %v5358_v18, %v5358_v18  ;;  %v12073_v13 = vld [vmem:[#allocation32_spill] sm:$0xff]  ;;  %v12074_v29 = vld [vmem:[#allocation33_spill] sm:$0xff] }
 0x4f5   : > { %v2519_v39 = vsel %vm359_vm0, %v2447_v26, 0.0 }
 0x4f6   : > { %2441 = vadd.xlane.f32.xlu1 %v2440_v27  ;;  %v3294_v40 = vpop.permute.xlu1 %3293  ;;  %v5359_v27 = vld [vmem:[%s5893_s10 + $0x630] sm:$0xff] }
 0x4f7   : > { %2438 = vadd.xlane.f32.xlu0 %v2437_v32  ;;  %v3420_v30 = vpop.permute.xlu0 %3419  ;;  %v5360_v32 = vld [vmem:[%s5893_s10 + $0x620] sm:$0xff] }
 0x4f8   : > { %v833_v43 = vpack.c.bf16 %v5359_v27, %v5360_v32  ;;  %v3677_v22 = vsel %vm3627_vm1, %v3605_v9, %v3420_v30  ;;  %v12075_v30 = vpack.c.bf16 %v12073_v13, %v12074_v29  ;;  %v5363_v32 = vld [vmem:[%s5893_s10 + $0x198] sm:$0xff] }
 0x4f9   : > { %v2452_v9 = vmul.f32 %v5363_v32, %v5363_v32  ;;  %v5365_v29 = vld [vmem:[%s5893_s10 + $0x1b8] sm:$0xff] }
 0x4fa   : > { %2511 = vadd.xlane.f32.xlu1 %v2510_v25  ;;  %v3388_v59 = vpop.permute.xlu1 %3387 }
 0x4fb   : > { %2508 = vadd.xlane.f32.xlu0 %v2507_v47  ;;  %v3422_v4 = vpop.permute.xlu0 %3421  ;;  %v5361_v47 = vld [vmem:[%s5893_s10 + $0xf8] sm:$0xff]  ;;  %v2534_v45 = vsel %vm359_vm0, %v2452_v9, 0.0 }
 0x4fc   : > { %v2450_v41 = vmul.f32 %v5361_v47, %v5361_v47 }
 0x4fe   : > { %2517 = vadd.xlane.f32.xlu1 %v2516_v50  ;;  %v3390_v2 = vpop.permute.xlu1 %3389  ;;  %v3557_v50 = vsel %vm359_vm0, %v12075_v30, %v3292_v14  ;;  %v2528_v26 = vsel %vm359_vm0, %v2450_v41, 0.0  ;;  %v2525_v14 = vsel %vm359_vm0, %v2449_v42, 0.0  ;;  %v2454_v30 = vmul.f32 %v5365_v29, %v5365_v29  ;;  %v5373_v29 = vld [vmem:[%s5893_s10 + $0x298] sm:$0xff] }
 0x4ff   : > { %2514 = vadd.xlane.f32.xlu0 %v2513_v10  ;;  %v3516_v25 = vpop.permute.xlu0 %3515  ;;  %v3608_v10 = vsel %vm359_vm0, %v833_v43, %v3326_v58  ;;  %v3645_v48 = vsel %vm3627_vm1, %v3557_v50, %v3388_v59  ;;  %v5364_v58 = vld [vmem:[%s5893_s10 + $0x188] sm:$0xff]  ;;  %v12077_v43 = vld [vmem:[#allocation35_spill] sm:$0xff] }
 0x500   : > { %v3766_v19 = vsel %vm3692_vm2, %v3677_v22, %v3516_v25  ;;  %v3679_v18 = vsel %vm3627_vm1, %v3608_v10, %v3422_v4  ;;  %v2451_v59 = vmul.f32 %v5364_v58, %v5364_v58  ;;  %v12076_v4 = vld [vmem:[#allocation34_spill] sm:$0xff]  ;;  %v5366_v50 = vld [vmem:[%s5893_s10 + $0x1a8] sm:$0xff] }
 0x501   : > { %4947 = vmatprep.mubr.bf16.mxu1 %v3766_v19  ;;  %v12078_v47 = vpack.c.bf16 %v12076_v4, %v12077_v43  ;;  %v2453_v10 = vmul.f32 %v5366_v50, %v5366_v50  ;;  %v5369_v58 = vld [vmem:[%s5893_s10 + $0x1f8] sm:$0xff]  ;;  %v5370_v4 = vld [vmem:[%s5893_s10 + $0x1e8] sm:$0xff] }
 0x502   : > { %2523 = vadd.xlane.f32.xlu1 %v2522_v28  ;;  %v3484_v27 = vpop.permute.xlu1 %3483  ;;  %v2531_v13 = vsel %vm359_vm0, %v2451_v59, 0.0  ;;  %v2458_v59 = vmul.f32 %v5369_v58, %v5369_v58  ;;  %v2457_v43 = vmul.f32 %v5370_v4, %v5370_v4  ;;  %v5374_v50 = vld [vmem:[%s5893_s10 + $0x288] sm:$0xff] }
 0x503   : > { %2520 = vadd.xlane.f32.xlu0 %v2519_v39  ;;  %v3518_v36 = vpop.permute.xlu0 %3517  ;;  %v3718_v22 = vsel %vm3692_vm2, %v3645_v48, %v3484_v27  ;;  %v3560_v19 = vsel %vm359_vm0, %v12078_v47, %v3294_v40  ;;  %v2540_v48 = vsel %vm359_vm0, %v2454_v30, 0.0  ;;  %v5367_v27 = vld [vmem:[%s5893_s10 + $0x1d8] sm:$0xff]  ;;  %v5371_v47 = vld [vmem:[%s5893_s10 + $0x650] sm:$0xff]  ;;  %v2460_v30 = vmul.f32 %v5373_v29, %v5373_v29 }
 0x504   : > { %v3769_v25 = vsel %vm3692_vm2, %v3679_v18, %v3518_v36  ;;  %4915 = vmatprep.mubr.bf16.mxu0 %v3718_v22  ;;  %v3647_v41 = vsel %vm3627_vm1, %v3560_v19, %v3390_v2  ;;  %v2537_v18 = vsel %vm359_vm0, %v2453_v10, 0.0  ;;  %v2456_v36 = vmul.f32 %v5367_v27, %v5367_v27  ;;  %v5372_v19 = vld [vmem:[%s5893_s10 + $0x640] sm:$0xff] }
 0x505   : > { %4948 = vmatmul.mubr.bf16.gmra.mrb[16].mxu1 %v3769_v25  ;;  %v2459_v10 = vmul.f32 %v5374_v50, %v5374_v50  ;;  %v2558_v4 = vsel %vm359_vm0, %v2460_v30, 0.0 }
 0x506   : > { %2529 = vadd.xlane.f32.xlu1 %v2528_v26  ;;  %v3486_v28 = vpop.permute.xlu1 %3485  ;;  %v5368_v26 = vld [vmem:[%s5893_s10 + $0x1c8] sm:$0xff]  ;;  %v2546_v25 = vsel %vm359_vm0, %v2456_v36, 0.0 }
 0x507   : > { %2526 = vadd.xlane.f32.xlu0 %v2525_v14  ;;  %v3328_v39 = vpop.permute.xlu0 %3327  ;;  %v3721_v42 = vsel %vm3692_vm2, %v3647_v41, %v3486_v28  ;;  %v2455_v32 = vmul.f32 %v5368_v26, %v5368_v26  ;;  %v834_v41 = vpack.c.bf16 %v5371_v47, %v5372_v19  ;;  %v5378_v47 = vld [vmem:[%s5893_s10 + $0x2a8] sm:$0xff] }
 0x508   : > { %4916 = vmatmul.mubr.bf16.gmra.mrb[16].mxu0 %v3721_v42  ;;  %v2552_v42 = vsel %vm359_vm0, %v2458_v59, 0.0  ;;  %v2461_v19 = vmul.f32 %v5378_v47, %v5378_v47 }
 0x509   : > { %v2543_v14 = vsel %vm359_vm0, %v2455_v32, 0.0  ;;  %v3611_v36 = vsel %vm359_vm0, %v834_v41, %v3328_v39  ;;  %v12079_v39 = vld [vmem:[#allocation36_spill] sm:$0xff]  ;;  %v12080_v41 = vld [vmem:[#allocation37_spill] sm:$0xff] }
 0x50a   : > { %2535 = vadd.xlane.f32.xlu1 %v2534_v45  ;;  %v3296_v40 = vpop.permute.xlu1 %3295 }
 0x50b   : > { %2532 = vadd.xlane.f32.xlu0 %v2531_v13  ;;  %v3330_v2 = vpop.permute.xlu0 %3329  ;;  %v2549_v13 = vsel %vm359_vm0, %v2457_v43, 0.0  ;;  %v2555_v43 = vsel %vm359_vm0, %v2459_v10, 0.0 }
 0x50e   : > { %2541 = vadd.xlane.f32.xlu1 %v2540_v48  ;;  %v3298_v9 = vpop.permute.xlu1 %3297  ;;  %v5375_v48 = vld [vmem:[%s5893_s10 + $0x670] sm:$0xff] }
 0x50f   : > { %2538 = vadd.xlane.f32.xlu0 %v2537_v18  ;;  %v3424_v22 = vpop.permute.xlu0 %3423  ;;  %v5376_v18 = vld [vmem:[%s5893_s10 + $0x660] sm:$0xff] }
 0x510   : > { %v835_v27 = vpack.c.bf16 %v5375_v48, %v5376_v18  ;;  %v3681_v26 = vsel %vm3627_vm1, %v3611_v36, %v3424_v22  ;;  %v12081_v22 = vpack.c.bf16 %v12079_v39, %v12080_v41  ;;  %v5379_v18 = vld [vmem:[%s5893_s10 + $0x2d8] sm:$0xff] }
 0x511   : > { %v2464_v36 = vmul.f32 %v5379_v18, %v5379_v18  ;;  %v5381_v41 = vld [vmem:[%s5893_s10 + $0x2f8] sm:$0xff] }
 0x512   : > { %2547 = vadd.xlane.f32.xlu1 %v2546_v25  ;;  %v3392_v28 = vpop.permute.xlu1 %3391 }
 0x513   : > { %2544 = vadd.xlane.f32.xlu0 %v2543_v14  ;;  %v3426_v45 = vpop.permute.xlu0 %3425  ;;  %v5377_v14 = vld [vmem:[%s5893_s10 + $0x2b8] sm:$0xff]  ;;  %v2570_v47 = vsel %vm359_vm0, %v2464_v36, 0.0 }
 0x514   : > { %v2462_v58 = vmul.f32 %v5377_v14, %v5377_v14 }
 0x516   : > { %2553 = vadd.xlane.f32.xlu1 %v2552_v42  ;;  %v3394_v32 = vpop.permute.xlu1 %3393  ;;  %v3563_v42 = vsel %vm359_vm0, %v12081_v22, %v3296_v40  ;;  %v2564_v10 = vsel %vm359_vm0, %v2462_v58, 0.0  ;;  %v2561_v40 = vsel %vm359_vm0, %v2461_v19, 0.0  ;;  %v2466_v22 = vmul.f32 %v5381_v41, %v5381_v41  ;;  %v5389_v41 = vld [vmem:[%s5893_s10 + $0x3d8] sm:$0xff] }
 0x517   : > { %2550 = vadd.xlane.f32.xlu0 %v2549_v13  ;;  %v3520_v25 = vpop.permute.xlu0 %3519  ;;  %v3614_v13 = vsel %vm359_vm0, %v835_v27, %v3330_v2  ;;  %v3649_v29 = vsel %vm3627_vm1, %v3563_v42, %v3392_v28  ;;  %v5380_v2 = vld [vmem:[%s5893_s10 + $0x2c8] sm:$0xff]  ;;  %v12083_v27 = vld [vmem:[#allocation39_spill] sm:$0xff] }
 0x518   : > { %v3772_v59 = vsel %vm3692_vm2, %v3681_v26, %v3520_v25  ;;  %v3683_v50 = vsel %vm3627_vm1, %v3614_v13, %v3426_v45  ;;  %v2463_v28 = vmul.f32 %v5380_v2, %v5380_v2  ;;  %v12082_v45 = vld [vmem:[#allocation38_spill] sm:$0xff]  ;;  %v5382_v42 = vld [vmem:[%s5893_s10 + $0x2e8] sm:$0xff] }
 0x519   : > { %4951 = vmatprep.mubr.bf16.mxu1 %v3772_v59  ;;  %v12084_v14 = vpack.c.bf16 %v12082_v45, %v12083_v27  ;;  %v2465_v13 = vmul.f32 %v5382_v42, %v5382_v42  ;;  %v5385_v2 = vld [vmem:[%s5893_s10 + $0x3b8] sm:$0xff]  ;;  %v5386_v45 = vld [vmem:[%s5893_s10 + $0x3a8] sm:$0xff] }
 0x51a   : > { %2559 = vadd.xlane.f32.xlu1 %v2558_v4  ;;  %v3488_v48 = vpop.permute.xlu1 %3487  ;;  %v2567_v39 = vsel %vm359_vm0, %v2463_v28, 0.0  ;;  %v2470_v28 = vmul.f32 %v5385_v2, %v5385_v2  ;;  %v2469_v27 = vmul.f32 %v5386_v45, %v5386_v45  ;;  %v5390_v42 = vld [vmem:[%s5893_s10 + $0x3c8] sm:$0xff] }
 0x51b   : > { %2556 = vadd.xlane.f32.xlu0 %v2555_v43  ;;  %v3522_v30 = vpop.permute.xlu0 %3521  ;;  %v3724_v26 = vsel %vm3692_vm2, %v3649_v29, %v3488_v48  ;;  %v3566_v59 = vsel %vm359_vm0, %v12084_v14, %v3298_v9  ;;  %v2576_v29 = vsel %vm359_vm0, %v2466_v22, 0.0  ;;  %v5383_v48 = vld [vmem:[%s5893_s10 + $0x398] sm:$0xff]  ;;  %v5387_v14 = vld [vmem:[%s5893_s10 + $0x710] sm:$0xff]  ;;  %v2472_v22 = vmul.f32 %v5389_v41, %v5389_v41 }
 0x51c   : > { %v3775_v25 = vsel %vm3692_vm2, %v3683_v50, %v3522_v30  ;;  %4919 = vmatprep.mubr.bf16.mxu0 %v3724_v26  ;;  %v3651_v58 = vsel %vm3627_vm1, %v3566_v59, %v3394_v32  ;;  %v2573_v50 = vsel %vm359_vm0, %v2465_v13, 0.0  ;;  %v2468_v30 = vmul.f32 %v5383_v48, %v5383_v48  ;;  %v5388_v59 = vld [vmem:[%s5893_s10 + $0x700] sm:$0xff] }
 0x51d   : > { %4952 = vmatmul.mubr.bf16.gmra.mrb[20].mxu1 %v3775_v25  ;;  %v2471_v13 = vmul.f32 %v5390_v42, %v5390_v42  ;;  %v2594_v45 = vsel %vm359_vm0, %v2472_v22, 0.0 }
 0x51e   : > { %2565 = vadd.xlane.f32.xlu1 %v2564_v10  ;;  %v3490_v4 = vpop.permute.xlu1 %3489  ;;  %v5384_v10 = vld [vmem:[%s5893_s10 + $0x388] sm:$0xff]  ;;  %v2582_v25 = vsel %vm359_vm0, %v2468_v30, 0.0 }
 0x51f   : > { %2562 = vadd.xlane.f32.xlu0 %v2561_v40  ;;  %v3332_v43 = vpop.permute.xlu0 %3331  ;;  %v3727_v19 = vsel %vm3692_vm2, %v3651_v58, %v3490_v4  ;;  %v2467_v18 = vmul.f32 %v5384_v10, %v5384_v10  ;;  %v836_v58 = vpack.c.bf16 %v5387_v14, %v5388_v59  ;;  %v5394_v14 = vld [vmem:[%s5893_s10 + $0x3e8] sm:$0xff] }
 0x520   : > { %4920 = vmatmul.mubr.bf16.gmra.mrb[20].mxu0 %v3727_v19  ;;  %v2588_v19 = vsel %vm359_vm0, %v2470_v28, 0.0  ;;  %v2473_v59 = vmul.f32 %v5394_v14, %v5394_v14  ;;  %v12089_v14 = vld [vmem:[#allocation255_spill] sm:$0xff] }
 0x521   : > { %v2579_v40 = vsel %vm359_vm0, %v2467_v18, 0.0  ;;  %v3617_v30 = vsel %vm359_vm0, %v836_v58, %v3332_v43  ;;  %v12085_v43 = vld [vmem:[#allocation40_spill] sm:$0xff]  ;;  %v12086_v58 = vld [vmem:[#allocation41_spill] sm:$0xff] }
 0x522   : > { %2571 = vadd.xlane.f32.xlu1 %v2570_v47  ;;  %v3300_v9 = vpop.permute.xlu1 %3299 }
 0x523   : > { %2568 = vadd.xlane.f32.xlu0 %v2567_v39  ;;  %v3334_v32 = vpop.permute.xlu0 %3333  ;;  %v2585_v39 = vsel %vm359_vm0, %v2469_v27, 0.0  ;;  %v2591_v27 = vsel %vm359_vm0, %v2471_v13, 0.0 }
 0x526   : > { %2577 = vadd.xlane.f32.xlu1 %v2576_v29  ;;  %v9344_v36 = vpop.permute.xlu1 %3301  ;;  %v5391_v29 = vld [vmem:[%s5893_s10 + $0x730] sm:$0xff] }
 0x527   : > { %2574 = vadd.xlane.f32.xlu0 %v2573_v50  ;;  %v3428_v26 = vpop.permute.xlu0 %3427  ;;  %v5392_v50 = vld [vmem:[%s5893_s10 + $0x720] sm:$0xff] }
 0x528   : > { %v837_v48 = vpack.c.bf16 %v5391_v29, %v5392_v50  ;;  %v3685_v10 = vsel %vm3627_vm1, %v3617_v30, %v3428_v26  ;;  %v12087_v26 = vpack.c.bf16 %v12085_v43, %v12086_v58  ;;  %v5395_v50 = vld [vmem:[%s5893_s10 + $0x498] sm:$0xff]  ;;  %v12090_v43 = vld [vmem:[#allocation148_spill] sm:$0xff] }
 0x529   : > { %v2476_v30 = vmul.f32 %v5395_v50, %v5395_v50  ;;  %v12091_v58 = vld [vmem:[#allocation259_spill] sm:$0xff] }
 0x52a   : > { %2583 = vadd.xlane.f32.xlu1 %v2582_v25  ;;  %v3396_v4 = vpop.permute.xlu1 %3395 }
 0x52b   : > { %2580 = vadd.xlane.f32.xlu0 %v2579_v40  ;;  %v3430_v47 = vpop.permute.xlu0 %3429  ;;  %v5393_v40 = vld [vmem:[%s5893_s10 + $0x3f8] sm:$0xff] }
 0x52c   : > { %v2474_v2 = vmul.f32 %v5393_v40, %v5393_v40  ;;  %v12101_v40 = vld [vmem:[#allocation152_spill] sm:$0xff] }
 0x52e   : > { %2589 = vadd.xlane.f32.xlu1 %v2588_v19  ;;  %v3398_v18 = vpop.permute.xlu1 %3397  ;;  %v3569_v19 = vsel %vm359_vm0, %v12087_v26, %v3300_v9  ;;  %v2600_v29 = vsel %vm359_vm0, %v2474_v2, 0.0  ;;  %v9390_v2 = vld [vmem:[%s5893_s10 + $0x760] sm:$0xff]  ;;  %v9400_v26 = vadd.f32 %v12091_v58, %v12090_v43 }
 0x52f   : > { %2586 = vadd.xlane.f32.xlu0 %v2585_v39  ;;  %v3524_v25 = vpop.permute.xlu0 %3523  ;;  %v3620_v39 = vsel %vm359_vm0, %v837_v48, %v3334_v32  ;;  %v3653_v41 = vsel %vm3627_vm1, %v3569_v19, %v3396_v4  ;;  %v2597_v32 = vsel %vm359_vm0, %v2473_v59, 0.0  ;;  %v5396_v48 = vld [vmem:[%s5893_s10 + $0x488] sm:$0xff] }
 0x530   : > { %v3778_v28 = vsel %vm3692_vm2, %v3685_v10, %v3524_v25  ;;  %v3687_v42 = vsel %vm3627_vm1, %v3620_v39, %v3430_v47  ;;  %v2475_v4 = vmul.f32 %v5396_v48, %v5396_v48  ;;  %v9379_v25 = vld [vmem:[%s5893_s10 + $0x750] sm:$0xff]  ;;  %v9382_v47 = vld [vmem:[%s5893_s10 + $0x740] sm:$0xff] }
 0x531   : > { %4955 = vmatprep.mubr.bf16.mxu1 %v3778_v28  ;;  %v9387_v28 = vld [vmem:[%s5893_s10 + $0x770] sm:$0xff]  ;;  %v12093_v39 = vld [vmem:[#allocation260_spill] sm:$0xff] }
 0x532   : > { %2595 = vadd.xlane.f32.xlu1 %v2594_v45  ;;  %v3492_v22 = vpop.permute.xlu1 %3491  ;;  %v12092_v19 = vld [vmem:[#allocation149_spill] sm:$0xff] }
 0x533   : > { %2592 = vadd.xlane.f32.xlu0 %v2591_v27  ;;  %v3526_v13 = vpop.permute.xlu0 %3525  ;;  %v3730_v9 = vsel %vm3692_vm2, %v3653_v41, %v3492_v22  ;;  %v12088_v27 = vld [vmem:[#allocation146_spill] sm:$0xff]  ;;  %v9404_v41 = vadd.f32 %v12093_v39, %v12092_v19  ;;  %v12095_v22 = vld [vmem:[#allocation43_spill] sm:$0xff]  ;;  %v2606_v39 = vsel %vm359_vm0, %v2476_v30, 0.0 }
 0x534   : > { %v3781_v10 = vsel %vm3692_vm2, %v3687_v42, %v3526_v13  ;;  %4923 = vmatprep.mubr.bf16.mxu0 %v3730_v9  ;;  %v9396_v59 = vadd.f32 %v12089_v14, %v12088_v27  ;;  %v12094_v42 = vld [vmem:[#allocation42_spill] sm:$0xff]  ;;  %v12099_v27 = vld [vmem:[#allocation151_spill] sm:$0xff]  ;;  %v12100_v14 = vld [vmem:[#allocation264_spill] sm:$0xff] }
 0x535   : > { %4956 = vmatmul.mubr.bf16.gmra.mrb[24].mxu1 %v3781_v10  ;;  %v12096_v13 = vpack.c.bf16 %v12094_v42, %v12095_v22  ;;  %v12097_v9 = vld [vmem:[#allocation150_spill] sm:$0xff]  ;;  %v12098_v10 = vld [vmem:[#allocation263_spill] sm:$0xff]  ;;  %v9417_v45 = vadd.f32 %v12100_v14, %v12099_v27 }
 0x536   : > { %v9413_v48 = vadd.f32 %v12098_v10, %v12097_v9  ;;  %2601 = vadd.xlane.f32.xlu1 %v2600_v29  ;;  %v3494_v58 = vpop.permute.xlu1 %3493  ;;  %v5401_v22 = vld [vmem:[%s5893_s10 + $0x4b8] sm:$0xff]  ;;  %v5402_v9 = vld [vmem:[%s5893_s10 + $0x4a8] sm:$0xff] }
 0x537   : > { %v3572_v50 = vsel %vm359_vm0, %v12096_v13, %v9344_v36  ;;  %2598 = vadd.xlane.f32.xlu0 %v2597_v32  ;;  %v9420_v19 = vpop.permute.xlu0 %3335  ;;  %v2603_v36 = vsel %vm359_vm0, %v2475_v4, 0.0  ;;  %v2478_v13 = vmul.f32 %v5401_v22, %v5401_v22  ;;  %v2477_v10 = vmul.f32 %v5402_v9, %v5402_v9  ;;  %v12102_v27 = vld [vmem:[#allocation267_spill] sm:$0xff]  ;;  %v12104_v29 = vld [vmem:[#allocation268_spill] sm:$0xff]  ;;  %v12105_v32 = vld [vmem:[#allocation154_spill] sm:$0xff] }
 0x538   : > { %v3655_v43 = vsel %vm3627_vm1, %v3572_v50, %v3398_v18  ;;  %v9429_v14 = vadd.f32 %v12102_v27, %v12101_v40  ;;  %v12103_v18 = vld [vmem:[#allocation153_spill] sm:$0xff]  ;;  %v9437_v16 = vadd.f32 %v12106_v34, %v12105_v32  ;;  %v12107_v30 = vld [vmem:[#allocation155_spill] sm:$0xff]  ;;  %v12112_v27 = vld [vmem:[#allocation276_spill] sm:$0xff] }
 0x539   : > { %v3733_v42 = vsel %vm3692_vm2, %v3655_v43, %v3494_v58  ;;  %v9433_v50 = vadd.f32 %v12104_v29, %v12103_v18  ;;  %v12108_v43 = vld [vmem:[#allocation272_spill] sm:$0xff]  ;;  %v12110_v22 = vld [vmem:[#allocation275_spill] sm:$0xff]  ;;  %v12111_v40 = vld [vmem:[#allocation157_spill] sm:$0xff] }
 0x53a   : > { %v9441_v4 = vadd.f32 %v12108_v43, %v12107_v30  ;;  %4924 = vmatmul.mubr.bf16.gmra.mrb[24].mxu0 %v3733_v42  ;;  %v12109_v58 = vld [vmem:[#allocation156_spill] sm:$0xff]  ;;  %v9449_v56 = vadd.f32 %v12112_v27, %v12111_v40  ;;  %v12113_v18 = vld [vmem:[#allocation158_spill] sm:$0xff]  ;;  %v12114_v29 = vld [vmem:[#allocation279_spill] sm:$0xff]  ;;  %2607 = vadd.xlane.f32.xlu1 %v2606_v39  ;;  %v9471_v27 = vpop.permute.xlu1 %3303 }
 0x53b   : > { %v9445_v9 = vadd.f32 %v12110_v22, %v12109_v58  ;;  %v9453_v24 = vadd.f32 %v12114_v29, %v12113_v18  ;;  %v12115_v34 = vld [vmem:[#allocation159_spill] sm:$0xff]  ;;  %v12116_v32 = vld [vmem:[#allocation280_spill] sm:$0xff]  ;;  %v9465_v58 = vadd.f32 %v12120_v37, %v12119_v61  ;;  %v12121_v22 = vld [vmem:[#allocation162_spill] sm:$0xff]  ;;  %2604 = vadd.xlane.f32.xlu0 %v2603_v36  ;;  %v9473_v18 = vpop.permute.xlu0 %3337  ;;  %v2612_v29 = vsel %vm359_vm0, %v2478_v13, 0.0 }
 0x53c   : > { %v9457_v17 = vadd.f32 %v12116_v32, %v12115_v34  ;;  %v12117_v30 = vld [vmem:[#allocation160_spill] sm:$0xff]  ;;  %v12118_v43 = vld [vmem:[#allocation283_spill] sm:$0xff]  ;;  %v9469_v40 = vadd.f32 %v12122_v1, %v12121_v22  ;;  %v2609_v34 = vsel %vm359_vm0, %v2477_v10, 0.0 }
 0x53d   : > { %v9461_v42 = vadd.f32 %v12118_v43, %v12117_v30  ;;  %v5403_v32 = vld [vmem:[%s5893_s10 + $0x4d8] sm:$0xff]  ;;  %v5404_v43 = vld [vmem:[%s5893_s10 + $0x4c8] sm:$0xff] }
 0x53e   : > { %v2480_v30 = vmul.f32 %v5403_v32, %v5403_v32  ;;  %v2479_v8 = vmul.f32 %v5404_v43, %v5404_v43  ;;  %v12123_v37 = vld [vmem:[#allocation163_spill] sm:$0xff]  ;;  %v12124_v61 = vld [vmem:[#allocation288_spill] sm:$0xff]  ;;  %2613 = vadd.xlane.f32.xlu1 %v2612_v29  ;;  %v12149_v29 = vld [vmem:[#allocation186_spill] sm:$0xff] }
 0x53f   : > { %v9481_v0 = vadd.f32 %v12124_v61, %v12123_v37  ;;  %v12125_v1 = vld [vmem:[#allocation164_spill] sm:$0xff]  ;;  %v12126_v22 = vld [vmem:[#allocation291_spill] sm:$0xff]  ;;  %2610 = vadd.xlane.f32.xlu0 %v2609_v34  ;;  %v9539_v34 = vadd.f32 %v12150_v35, %v12149_v29 }
 0x540   : > { %v9485_v39 = vadd.f32 %v12126_v22, %v12125_v1  ;;  %v12128_v36 = vld [vmem:[#allocation292_spill] sm:$0xff]  ;;  %v12129_v13 = vld [vmem:[#allocation167_spill] sm:$0xff] }
 0x541   : > { %v9489_v38 = vadd.f32 %v12128_v36, %v12127_v11  ;;  %v9493_v10 = vadd.f32 %v12130_v51, %v12129_v13  ;;  %v12131_v32 = vld [vmem:[#allocation168_spill] sm:$0xff]  ;;  %v12133_v37 = vld [vmem:[#allocation171_spill] sm:$0xff] }
 0x542   : > { %v9497_v43 = vadd.f32 %v12132_v15, %v12131_v32  ;;  %v12134_v61 = vld [vmem:[#allocation299_spill] sm:$0xff]  ;;  %v12135_v1 = vld [vmem:[#allocation172_spill] sm:$0xff]  ;;  %v9517_v15 = vadd.f32 %v12142_v21, %v12141_v55  ;;  %v12146_v21 = vld [vmem:[#allocation310_spill] sm:$0xff] }
 0x543   : > { %v9501_v46 = vadd.f32 %v12134_v61, %v12133_v37  ;;  %v12136_v22 = vld [vmem:[#allocation300_spill] sm:$0xff]  ;;  %v12138_v11 = vld [vmem:[#allocation303_spill] sm:$0xff]  ;;  %v9523_v61 = vpop.permute.xlu1 %3305  ;;  %v9531_v55 = vadd.f32 %v12146_v21, %v12145_v52  ;;  %v12155_v52 = vld [vmem:[#allocation189_spill] sm:$0xff] }
 0x544   : > { %v9505_v44 = vadd.f32 %v12136_v22, %v12135_v1  ;;  %v9509_v36 = vadd.f32 %v12138_v11, %v12137_v53  ;;  %v12140_v51 = vld [vmem:[#allocation304_spill] sm:$0xff]  ;;  %v3432_v1 = vpop.permute.xlu0 %3431  ;;  %v2618_v53 = vsel %vm359_vm0, %v2480_v30, 0.0  ;;  %v2615_v22 = vsel %vm359_vm0, %v2479_v8, 0.0  ;;  %v5405_v11 = vld [vmem:[%s5893_s10 + $0x4f8] sm:$0xff]  ;;  %v12156_v21 = vld [vmem:[#allocation317_spill] sm:$0xff] }
 0x545   : > { %v9513_v13 = vadd.f32 %v12140_v51, %v12139_v5  ;;  %v12143_v32 = vld [vmem:[#allocation180_spill] sm:$0xff]  ;;  %v2482_v5 = vmul.f32 %v5405_v11, %v5405_v11  ;;  %v12151_v30 = vld [vmem:[#allocation187_spill] sm:$0xff]  ;;  %v9551_v12 = vadd.f32 %v12156_v21, %v12155_v52  ;;  %2619 = vadd.xlane.f32.xlu1 %v2618_v53  ;;  %2616 = vadd.xlane.f32.xlu0 %v2615_v22  ;;  %v12173_v53 = vld [vmem:[#allocation169_spill] sm:$0xff] }
 0x546   : > { %v9521_v37 = vadd.f32 %v12144_v57, %v12143_v32  ;;  %v5406_v51 = vld [vmem:[%s5893_s10 + $0x4e8] sm:$0xff]  ;;  %v12148_v57 = vld [vmem:[#allocation311_spill] sm:$0xff]  ;;  %v9543_v8 = vadd.f32 %v12152_v49, %v12151_v30  ;;  %v9587_v22 = vadd.f32 %v12173_v53, %v9400_v26  ;;  %v12183_v26 = vpack.c.bf16 %v9379_v25, %v9382_v47 }
 0x547   : > { %v2481_v23 = vmul.f32 %v5406_v51, %v5406_v51  ;;  %v9535_v32 = vadd.f32 %v12148_v57, %v12147_v33  ;;  %v12153_v11 = vld [vmem:[#allocation188_spill] sm:$0xff]  ;;  %v12157_v33 = vld [vmem:[#allocation190_spill] sm:$0xff]  ;;  %v12160_v35 = vld [vmem:[#allocation319_spill] sm:$0xff]  ;;  %v3400_v21 = vpop.permute.xlu1 %3399 }
 0x548   : > { %v9547_v51 = vadd.f32 %v12154_v7, %v12153_v11  ;;  %v12158_v57 = vld [vmem:[#allocation318_spill] sm:$0xff]  ;;  %v9559_v29 = vadd.f32 %v12160_v35, %v12159_v62  ;;  %v12163_v49 = vld [vmem:[#allocation320_spill] sm:$0xff]  ;;  %v9567_v7 = vadd.f32 %v12166_v60, %v12165_v3  ;;  %v12170_v60 = vld [vmem:[#allocation323_spill] sm:$0xff]  ;;  %12174 = vst [vmem:[#allocation17_spill] sm:$0xff] %v9587_v22 }
 0x549   : > { %v9555_v54 = vadd.f32 %v12158_v57, %v12157_v33  ;;  %v9563_v30 = vadd.f32 %v12163_v49, %v12162_v6  ;;  %v12167_v11 = vld [vmem:[#allocation194_spill] sm:$0xff]  ;;  %v3434_v33 = vpop.permute.xlu0 %3433  ;;  %v2624_v57 = vsel %vm359_vm0, %v2482_v5, 0.0  ;;  %v2621_v62 = vsel %vm359_vm0, %v2481_v23, 0.0  ;;  %v5408_v6 = vld [vmem:[%s5893_s10 + $0x588] sm:$0xff]  ;;  %v12175_v5 = vld [vmem:[#allocation59_spill] sm:$0xff] }
 0x54a   : > { %12161 = vst [vmem:[#allocation48_spill] sm:$0xff] %v9559_v29  ;;  %v9571_v52 = vadd.f32 %v12168_v63, %v12167_v11  ;;  %v5407_v35 = vld [vmem:[%s5893_s10 + $0x598] sm:$0xff]  ;;  %v2483_v49 = vmul.f32 %v5408_v6, %v5408_v6  ;;  %v9591_v23 = vadd.f32 %v12175_v5, %v9404_v41  ;;  %v3623_v41 = vsel %vm359_vm0, %v12183_v26, %v9420_v19  ;;  %v12184_v53 = vld [vmem:[#allocation60_spill] sm:$0xff]  ;;  %v12186_v26 = vld [vmem:[#allocation173_spill] sm:$0xff] }
 0x54b   : > { %12164 = vst [vmem:[#allocation49_spill] sm:$0xff] %v9563_v30  ;;  %v2484_v29 = vmul.f32 %v5407_v35, %v5407_v35  ;;  %v12169_v30 = vld [vmem:[#allocation195_spill] sm:$0xff]  ;;  %v12171_v63 = vld [vmem:[#allocation298_spill] sm:$0xff]  ;;  %v9612_v5 = vadd.f32 %v12184_v53, %v9433_v50  ;;  %2625 = vadd.xlane.f32.xlu1 %v2624_v57  ;;  %2622 = vadd.xlane.f32.xlu0 %v2621_v62  ;;  %v5410_v47 = vld [vmem:[%s5893_s10 + $0x5a8] sm:$0xff] }
 0x54c   : > { %v9579_v3 = vadd.f32 %v12170_v60, %v12169_v30  ;;  %v9583_v11 = vadd.f32 %v12171_v63, %v9396_v59  ;;  %12176 = vst [vmem:[#allocation50_spill] sm:$0xff] %v9591_v23  ;;  %v12177_v35 = vld [vmem:[#allocation170_spill] sm:$0xff]  ;;  %v12179_v30 = vld [vmem:[#allocation301_spill] sm:$0xff]  ;;  %v2627_v25 = vsel %vm359_vm0, %v2483_v49, 0.0  ;;  %v2485_v19 = vmul.f32 %v5410_v47, %v5410_v47  ;;  %v12347_v23 = vld [vmem:[#allocation135_spill] sm:$0xff] }
 0x54d   : > { %v9595_v6 = vadd.f32 %v12177_v35, %v9413_v48  ;;  %v9599_v60 = vadd.f32 %v12179_v30, %v9417_v45  ;;  %v12181_v59 = vld [vmem:[#allocation302_spill] sm:$0xff]  ;;  %12185 = vst [vmem:[#allocation184_spill] sm:$0xff] %v9612_v5  ;;  %v3689_v48 = vsel %vm3627_vm1, %v3623_v41, %v3432_v1  ;;  %v3402_v35 = vpop.permute.xlu1 %3401  ;;  %v3528_v45 = vpop.permute.xlu0 %3527  ;;  %v9622_v50 = vadd.f32 %v12186_v26, %v9437_v16  ;;  %v12188_v1 = vld [vmem:[#allocation61_spill] sm:$0xff]  ;;  %v12352_v22 = vld [vmem:[#allocation136_spill] sm:$0xff] }
 0x54e   : > { %12172 = vst [vmem:[#allocation19_spill] sm:$0xff] %v9583_v11  ;;  %v9603_v63 = vadd.f32 %v12181_v59, %v9429_v14  ;;  %v5409_v30 = vld [vmem:[%s5893_s10 + $0x5b8] sm:$0xff]  ;;  %v3784_v14 = vsel %vm3692_vm2, %v3689_v48, %v3528_v45  ;;  %v2630_v59 = vsel %vm359_vm0, %v2484_v29, 0.0  ;;  %v9626_v57 = vadd.f32 %v12188_v1, %v9441_v4  ;;  %v12192_v53 = vld [vmem:[#allocation305_spill] sm:$0xff]  ;;  %v12198_v4 = vld [vmem:[#allocation44_spill] sm:$0xff] }
 0x54f   : > { %12178 = vst [vmem:[#allocation51_spill] sm:$0xff] %v9595_v6  ;;  %12180 = vst [vmem:[#allocation18_spill] sm:$0xff] %v9599_v60  ;;  %v2486_v60 = vmul.f32 %v5409_v30, %v5409_v30  ;;  %v12190_v62 = vld [vmem:[#allocation174_spill] sm:$0xff]  ;;  %v9634_v29 = vadd.f32 %v12192_v53, %v9449_v56  ;;  %4959 = vmatprep.mubr.bf16.mxu1 %v3784_v14  ;;  %v12199_v30 = vld [vmem:[#allocation45_spill] sm:$0xff]  ;;  %v12201_v56 = vpack.c.bf16 %v9387_v28, %v9390_v2 }
 0x550   : > { %12182 = vst [vmem:[#allocation16_spill] sm:$0xff] %v9603_v63  ;;  %12187 = vst [vmem:[#allocation66_spill] sm:$0xff] %v9622_v50  ;;  %v9630_v41 = vadd.f32 %v12190_v62, %v9445_v9  ;;  %v12194_v49 = vld [vmem:[#allocation306_spill] sm:$0xff]  ;;  %v12200_v47 = vpack.c.bf16 %v12198_v4, %v12199_v30  ;;  %2631 = vadd.xlane.f32.xlu1 %v2630_v59  ;;  %2628 = vadd.xlane.f32.xlu0 %v2627_v25  ;;  %v2633_v28 = vsel %vm359_vm0, %v2485_v19, 0.0  ;;  %v5412_v2 = vld [vmem:[%s5893_s10 + $0x5c8] sm:$0xff] }
 0x551   : > { %12189 = vst [vmem:[#allocation109_spill] sm:$0xff] %v9626_v57  ;;  %12193 = vst [vmem:[#allocation114_spill] sm:$0xff] %v9634_v29  ;;  %v9638_v48 = vadd.f32 %v12194_v49, %v9453_v24  ;;  %v12196_v16 = vld [vmem:[#allocation62_spill] sm:$0xff]  ;;  %v3626_v14 = vsel %vm359_vm0, %v12201_v56, %v9473_v18  ;;  %v3496_v1 = vpop.permute.xlu1 %3495  ;;  %v2636_v62 = vsel %vm359_vm0, %v2486_v60, 0.0  ;;  %v2487_v18 = vmul.f32 %v5412_v2, %v5412_v2  ;;  %v12208_v30 = vld [vmem:[#allocation309_spill] sm:$0xff] }
 0x552   : > { %12191 = vst [vmem:[#allocation290_spill] sm:$0xff] %v9630_v41  ;;  %v9642_v45 = vadd.f32 %v12196_v16, %v9457_v17  ;;  %v3575_v9 = vsel %vm359_vm0, %v12200_v47, %v9471_v27  ;;  %v3691_v26 = vsel %vm3627_vm1, %v3626_v14, %v3434_v33  ;;  %v3530_v17 = vpop.permute.xlu0 %3529  ;;  %v5411_v53 = vld [vmem:[%s5893_s10 + $0x5d8] sm:$0xff]  ;;  %v9676_v19 = vadd.f32 %v12208_v30, %v9481_v0  ;;  %v12210_v47 = vld [vmem:[#allocation64_spill] sm:$0xff]  ;;  %v12305_v41 = vld [vmem:[#allocation237_spill] sm:$0xff] }
 0x553   : > { %12195 = vst [vmem:[#allocation52_spill] sm:$0xff] %v9638_v48  ;;  %v3657_v24 = vsel %vm3627_vm1, %v3575_v9, %v3400_v21  ;;  %v2488_v49 = vmul.f32 %v5411_v53, %v5411_v53  ;;  %v3787_v16 = vsel %vm3692_vm2, %v3691_v26, %v3530_v17  ;;  %v12202_v21 = vld [vmem:[#allocation177_spill] sm:$0xff]  ;;  %v12204_v33 = vld [vmem:[#allocation63_spill] sm:$0xff]  ;;  %v12206_v60 = vld [vmem:[#allocation178_spill] sm:$0xff] }
 0x554   : > { %12197 = vst [vmem:[#allocation53_spill] sm:$0xff] %v9642_v45  ;;  %v3736_v27 = vsel %vm3692_vm2, %v3657_v24, %v3496_v1  ;;  %v9664_v4 = vadd.f32 %v12202_v21, %v9461_v42  ;;  %v9668_v59 = vadd.f32 %v12204_v33, %v9465_v58  ;;  %v9672_v25 = vadd.f32 %v12206_v60, %v9469_v40  ;;  %v12212_v9 = vld [vmem:[#allocation181_spill] sm:$0xff]  ;;  %v12214_v56 = vld [vmem:[#allocation46_spill] sm:$0xff]  ;;  %v12215_v40 = vld [vmem:[#allocation47_spill] sm:$0xff] }
 0x555   : > { %4927 = vmatprep.mubr.bf16.mxu0 %v3736_v27  ;;  %4960 = vmatmul.mubr.bf16.gmra.mrb[28].mxu1 %v3787_v16  ;;  %12209 = vst [vmem:[#allocation55_spill] sm:$0xff] %v9676_v19  ;;  %v9680_v42 = vadd.f32 %v12210_v47, %v9485_v39  ;;  %v9684_v58 = vadd.f32 %v12212_v9, %v9489_v38  ;;  %v12217_v26 = vld [vmem:[#allocation65_spill] sm:$0xff]  ;;  %v12219_v0 = vld [vmem:[#allocation219_spill] sm:$0xff]  ;;  %v3498_v53 = vpop.permute.xlu1 %3497  ;;  %v2642_v38 = vsel %vm359_vm0, %v2488_v49, 0.0  ;;  %v2639_v16 = vsel %vm359_vm0, %v2487_v18, 0.0  ;;  %v12221_v33 = vld [vmem:[#allocation312_spill] sm:$0xff] }
 0x556   : > { %12203 = vst [vmem:[#allocation20_spill] sm:$0xff] %v9664_v4  ;;  %12205 = vst [vmem:[#allocation21_spill] sm:$0xff] %v9668_v59  ;;  %v12216_v14 = vpack.c.bf16 %v12214_v56, %v12215_v40  ;;  %v9693_v1 = vadd.f32 %v12217_v26, %v9493_v10  ;;  %v9697_v17 = vadd.f32 %v12219_v0, %v9497_v43  ;;  %2637 = vadd.xlane.f32.xlu1 %v2636_v62  ;;  %v5414_v21 = vld [vmem:[%s5893_s10 + $0x5e8] sm:$0xff]  ;;  %v12304_v29 = vld [vmem:[#allocation250_spill] sm:$0xff] }
 0x557   : > { %12207 = vst [vmem:[#allocation54_spill] sm:$0xff] %v9672_v25  ;;  %12211 = vst [vmem:[#allocation22_spill] sm:$0xff] %v9680_v42  ;;  %2634 = vadd.xlane.f32.xlu0 %v2633_v28  ;;  %v2489_v10 = vmul.f32 %v5414_v21, %v5414_v21  ;;  %v9707_v60 = vadd.f32 %v12221_v33, %v9501_v46  ;;  %v12223_v43 = vld [vmem:[#allocation313_spill] sm:$0xff]  ;;  %v12229_v30 = vld [vmem:[#allocation220_spill] sm:$0xff] }
 0x558   : > { %12213 = vst [vmem:[#allocation23_spill] sm:$0xff] %v9684_v58  ;;  %v3578_v24 = vsel %vm359_vm0, %v12216_v14, %v9523_v61  ;;  %12218 = vst [vmem:[#allocation293_spill] sm:$0xff] %v9693_v1  ;;  %v5413_v61 = vld [vmem:[%s5893_s10 + $0x5f8] sm:$0xff]  ;;  %v12225_v62 = vld [vmem:[#allocation113_spill] sm:$0xff]  ;;  %v9723_v47 = vadd.f32 %v12229_v30, %v9517_v15 }
 0x559   : > { %12220 = vst [vmem:[#allocation217_spill] sm:$0xff] %v9697_v17  ;;  %v3659_v39 = vsel %vm3627_vm1, %v3578_v24, %v3402_v35  ;;  %v2490_v2 = vmul.f32 %v5413_v61, %v5413_v61  ;;  %12222 = vst [vmem:[#allocation112_spill] sm:$0xff] %v9707_v60  ;;  %v9711_v35 = vadd.f32 %v12223_v43, %v9505_v44  ;;  %v12227_v28 = vld [vmem:[#allocation185_spill] sm:$0xff]  ;;  %v12231_v46 = vld [vmem:[#allocation115_spill] sm:$0xff] }
 0x55a   : > { %v3739_v27 = vsel %vm3692_vm2, %v3659_v39, %v3498_v53  ;;  %v9715_v49 = vadd.f32 %v12225_v62, %v9509_v36  ;;  %v9719_v18 = vadd.f32 %v12227_v28, %v9513_v13  ;;  %12230 = vst [vmem:[#allocation24_spill] sm:$0xff] %v9723_v47  ;;  %v9727_v9 = vadd.f32 %v12231_v46, %v9521_v37  ;;  %v12233_v44 = vld [vmem:[#allocation70_spill] sm:$0xff]  ;;  %v12234_v40 = vld [vmem:[#allocation68_spill] sm:$0xff]  ;;  %v12235_v14 = vld [vmem:[#allocation221_spill] sm:$0xff] }
 0x55b   : > { %12224 = vst [vmem:[#allocation166_spill] sm:$0xff] %v9711_v35  ;;  %4928 = vmatmul.mubr.bf16.gmra.mrb[28].mxu0 %v3739_v27  ;;  %v2700_v56 = vadd.f32 %v8745_v31, %v12233_v44  ;;  %v2699_v36 = vadd.f32 %v8747_v20, %v12234_v40  ;;  %v9735_v24 = vadd.f32 %v12235_v14, %v9531_v55  ;;  %v12237_v13 = vld [vmem:[#allocation116_spill] sm:$0xff]  ;;  %v12239_v15 = vld [vmem:[#allocation222_spill] sm:$0xff]  ;;  %v2648_v37 = vsel %vm359_vm0, %v2490_v2, 0.0  ;;  %v12241_v55 = vld [vmem:[#allocation117_spill] sm:$0xff] }
 0x55c   : > { %12226 = vst [vmem:[#allocation56_spill] sm:$0xff] %v9715_v49  ;;  %12228 = vst [vmem:[#allocation57_spill] sm:$0xff] %v9719_v18  ;;  %v9739_v26 = vadd.f32 %v12237_v13, %v9535_v32  ;;  %v9743_v0 = vadd.f32 %v12239_v15, %v9539_v34  ;;  %2643 = vadd.xlane.f32.xlu1 %v2642_v38  ;;  %2640 = vadd.xlane.f32.xlu0 %v2639_v16  ;;  %v2645_v31 = vsel %vm359_vm0, %v2489_v10, 0.0  ;;  %v5415_v39 = vld [vmem:[%s5893_s10 + $0x698] sm:$0xff]  ;;  %v5416_v53 = vld [vmem:[%s5893_s10 + $0x688] sm:$0xff] }
 0x55d   : > { %12232 = vst [vmem:[#allocation25_spill] sm:$0xff] %v9727_v9  ;;  %12236 = vst [vmem:[#allocation26_spill] sm:$0xff] %v9735_v24  ;;  %v2492_v20 = vmul.f32 %v5415_v39, %v5415_v39  ;;  %v2491_v27 = vmul.f32 %v5416_v53, %v5416_v53  ;;  %v9751_v61 = vadd.f32 %v12241_v55, %v9543_v8  ;;  %v12243_v32 = vld [vmem:[#allocation223_spill] sm:$0xff]  ;;  %v12245_v34 = vld [vmem:[#allocation69_spill] sm:$0xff]  ;;  %v2860_v8 = vmul.f32 0.0078125, %v2700_v56 }
 0x55e   : > { %12238 = vst [vmem:[#allocation27_spill] sm:$0xff] %v9739_v26  ;;  %12240 = vst [vmem:[#allocation28_spill] sm:$0xff] %v9743_v0  ;;  %v9755_v21 = vadd.f32 %v12243_v32, %v9547_v51  ;;  %v12246_v38 = vld [vmem:[#allocation227_spill] sm:$0xff]  ;;  %v12248_v33 = vld [vmem:[#allocation122_spill] sm:$0xff]  ;;  %v2859_v46 = vmul.f32 0.0078125, %v2699_v36 }
 0x55f   : > { %12242 = vst [vmem:[#allocation29_spill] sm:$0xff] %v9751_v61  ;;  %v2702_v16 = vadd.f32 %v12246_v38, %v12245_v34  ;;  %v12247_v2 = vld [vmem:[#allocation67_spill] sm:$0xff]  ;;  %v12249_v43 = vld [vmem:[#allocation118_spill] sm:$0xff]  ;;  %v12251_v28 = vld [vmem:[#allocation224_spill] sm:$0xff] }
 0x560   : > { %12244 = vst [vmem:[#allocation30_spill] sm:$0xff] %v9755_v21  ;;  %v2701_v10 = vadd.f32 %v12248_v33, %v12247_v2  ;;  %v9763_v62 = vadd.f32 %v12249_v43, %v9551_v12  ;;  %v9767_v30 = vadd.f32 %v12251_v28, %v9555_v54  ;;  %v12253_v44 = vld [vmem:[#allocation48_spill] sm:$0xff]  ;;  %v12254_v51 = vld [vmem:[#allocation119_spill] sm:$0xff]  ;;  %v12256_v14 = vld [vmem:[#allocation49_spill] sm:$0xff]  ;;  %2649 = vadd.xlane.f32.xlu1 %v2648_v37  ;;  %v2654_v12 = vsel %vm359_vm0, %v2492_v20, 0.0 }
 0x561   : > { %v9771_v40 = vadd.f32 %v12254_v51, %v12253_v44  ;;  %v12257_v13 = vld [vmem:[#allocation225_spill] sm:$0xff]  ;;  %v12259_v39 = vld [vmem:[#allocation71_spill] sm:$0xff]  ;;  %v12260_v53 = vld [vmem:[#allocation228_spill] sm:$0xff]  ;;  %2646 = vadd.xlane.f32.xlu0 %v2645_v31  ;;  %v2651_v54 = vsel %vm359_vm0, %v2491_v27, 0.0  ;;  %v2862_v43 = vmul.f32 0.0078125, %v2702_v16 }
 0x562   : > { %12250 = vst [vmem:[#allocation31_spill] sm:$0xff] %v9763_v62  ;;  %12252 = vst [vmem:[#allocation32_spill] sm:$0xff] %v9767_v30  ;;  %v9775_v15 = vadd.f32 %v12257_v13, %v12256_v14  ;;  %v2704_v55 = vadd.f32 %v12260_v53, %v12259_v39  ;;  %v5417_v32 = vld [vmem:[%s5893_s10 + $0x6b8] sm:$0xff]  ;;  %v5418_v36 = vld [vmem:[%s5893_s10 + $0x6a8] sm:$0xff]  ;;  %v2861_v28 = vmul.f32 0.0078125, %v2701_v10  ;;  %v9799_v13 = vmul.f32 %v2860_v8, %v2860_v8 }
 0x563   : > { %12255 = vst [vmem:[#allocation33_spill] sm:$0xff] %v9771_v40  ;;  %v2494_v56 = vmul.f32 %v5417_v32, %v5417_v32  ;;  %v2493_v34 = vmul.f32 %v5418_v36, %v5418_v36  ;;  %v9783_v38 = vld [vmem:[#allocation7] ss:$0 sm:$0xff]  ;;  %v12261_v2 = vld [vmem:[#allocation120_spill] sm:$0xff]  ;;  %v12265_v20 = vld [vmem:[#allocation226_spill] sm:$0xff]  ;;  %v9801_v39 = vmul.f32 %v2859_v46, %v2859_v46 }
 0x564   : > { %12258 = vst [vmem:[#allocation34_spill] sm:$0xff] %v9775_v15  ;;  %v9787_v33 = vadd.f32 %v12261_v2, %v9567_v7  ;;  %v12263_v44 = vld [vmem:[#allocation72_spill] sm:$0xff]  ;;  %v12264_v37 = vld [vmem:[#allocation123_spill] sm:$0xff]  ;;  %v9793_v27 = vadd.f32 %v12265_v20, %v9571_v52  ;;  %v12267_v51 = vld [vmem:[#allocation121_spill] sm:$0xff]  ;;  %v2864_v7 = vmul.f32 0.0078125, %v2704_v55  ;;  %2655 = vadd.xlane.f32.xlu1 %v2654_v12  ;;  %v9808_v52 = vmul.f32 %v9783_v38, %v2859_v46 }
 0x565   : > { %v2703_v31 = vadd.f32 %v12264_v37, %v12263_v44  ;;  %v9797_v14 = vadd.f32 %v12267_v51, %v9579_v3  ;;  %v12269_v53 = vld [vmem:[#allocation73_spill] sm:$0xff]  ;;  %v12271_v32 = vld [vmem:[#allocation74_spill] sm:$0xff]  ;;  %v12272_v36 = vld [vmem:[#allocation124_spill] sm:$0xff]  ;;  %2652 = vadd.xlane.f32.xlu0 %v2651_v54  ;;  %v2660_v44 = vsel %vm359_vm0, %v2494_v56, 0.0  ;;  %v2657_v3 = vsel %vm359_vm0, %v2493_v34, 0.0 }
 0x566   : > { %12262 = vst [vmem:[#allocation35_spill] sm:$0xff] %v9787_v33  ;;  %12266 = vst [vmem:[#allocation36_spill] sm:$0xff] %v9793_v27  ;;  %v12270_v16 = vld [vmem:[#allocation229_spill] sm:$0xff]  ;;  %v2705_v2 = vadd.f32 %v12272_v36, %v12271_v32  ;;  %v5419_v37 = vld [vmem:[%s5893_s10 + $0x6d8] sm:$0xff]  ;;  %v9814_v55 = vmul.f32 %v2862_v43, %v2862_v43  ;;  %v9819_v12 = vmul.f32 %v9783_v38, %v2860_v8 }
 0x567   : > { %12268 = vst [vmem:[#allocation37_spill] sm:$0xff] %v9797_v14  ;;  %v2706_v10 = vadd.f32 %v12270_v16, %v12269_v53  ;;  %v2496_v20 = vmul.f32 %v5419_v37, %v5419_v37  ;;  %v5420_v51 = vld [vmem:[%s5893_s10 + $0x6c8] sm:$0xff]  ;;  %v9816_v53 = vmul.f32 %v2861_v28, %v2861_v28  ;;  %v2863_v16 = vmul.f32 0.0078125, %v2703_v31  ;;  %v12273_v46 = vld [vmem:[#allocation75_spill] sm:$0xff]  ;;  %v12274_v54 = vld [vmem:[#allocation230_spill] sm:$0xff] }
 0x568   : > { %v2495_v14 = vmul.f32 %v5420_v51, %v5420_v51  ;;  %v2708_v32 = vadd.f32 %v12274_v54, %v12273_v46  ;;  %v12275_v56 = vld [vmem:[#allocation76_spill] sm:$0xff]  ;;  %v12276_v36 = vld [vmem:[#allocation125_spill] sm:$0xff]  ;;  %v9826_v37 = vmul.f32 %v9783_v38, %v2861_v28  ;;  %v9829_v51 = vmul.f32 %v9783_v38, %v2862_v43  ;;  %v12278_v40 = vld [vmem:[#allocation231_spill] sm:$0xff]  ;;  %2661 = vadd.xlane.f32.xlu1 %v2660_v44 }
 0x569   : > { %v2707_v34 = vadd.f32 %v12276_v36, %v12275_v56  ;;  %v9831_v27 = vmul.f32 %v2864_v7, %v2864_v7  ;;  %v2866_v33 = vmul.f32 0.0078125, %v2706_v10  ;;  %v2865_v31 = vmul.f32 0.0078125, %v2705_v2  ;;  %v12277_v15 = vld [vmem:[#allocation77_spill] sm:$0xff]  ;;  %2658 = vadd.xlane.f32.xlu0 %v2657_v3  ;;  %v5421_v56 = vld [vmem:[%s5893_s10 + $0x6f8] sm:$0xff]  ;;  %v12282_v3 = vld [vmem:[#allocation232_spill] sm:$0xff] }
 0x56a   : > { %v2710_v8 = vadd.f32 %v12278_v40, %v12277_v15  ;;  %v2666_v46 = vsel %vm359_vm0, %v2496_v20, 0.0  ;;  %v2663_v54 = vsel %vm359_vm0, %v2495_v14, 0.0  ;;  %v2498_v36 = vmul.f32 %v5421_v56, %v5421_v56  ;;  %v5422_v28 = vld [vmem:[%s5893_s10 + $0x6e8] sm:$0xff]  ;;  %v12279_v43 = vld [vmem:[#allocation78_spill] sm:$0xff]  ;;  %v12281_v14 = vld [vmem:[#allocation79_spill] sm:$0xff] }
 0x56b   : > { %v2497_v30 = vmul.f32 %v5422_v28, %v5422_v28  ;;  %v9839_v62 = vmul.f32 %v2863_v16, %v2863_v16  ;;  %v12280_v21 = vld [vmem:[#allocation126_spill] sm:$0xff]  ;;  %v9844_v2 = vmul.f32 %v9783_v38, %v2863_v16  ;;  %v9847_v40 = vmul.f32 %v9783_v38, %v2864_v7  ;;  %v12283_v56 = vld [vmem:[#allocation80_spill] sm:$0xff]  ;;  %v12284_v28 = vld [vmem:[#allocation127_spill] sm:$0xff] }
 0x56c   : > { %v2709_v10 = vadd.f32 %v12280_v21, %v12279_v43  ;;  %v2868_v15 = vmul.f32 0.0078125, %v2708_v32  ;;  %v2867_v44 = vmul.f32 0.0078125, %v2707_v34  ;;  %v2712_v20 = vadd.f32 %v12282_v3, %v12281_v14  ;;  %v12285_v43 = vld [vmem:[#allocation81_spill] sm:$0xff]  ;;  %2667 = vadd.xlane.f32.xlu1 %v2666_v46  ;;  %v5423_v34 = vld [vmem:[%s5893_s10 + $0x798] sm:$0xff]  ;;  %v12301_v4 = vld [vmem:[#allocation236_spill] sm:$0xff] }
 0x56d   : > { %v2711_v61 = vadd.f32 %v12284_v28, %v12283_v56  ;;  %v9853_v0 = vmul.f32 %v2866_v33, %v2866_v33  ;;  %v9855_v26 = vmul.f32 %v2865_v31, %v2865_v31  ;;  %v2870_v21 = vmul.f32 0.0078125, %v2710_v8  ;;  %v12286_v16 = vld [vmem:[#allocation233_spill] sm:$0xff]  ;;  %2664 = vadd.xlane.f32.xlu0 %v2663_v54  ;;  %v12287_v56 = vld [vmem:[#allocation82_spill] sm:$0xff]  ;;  %v12288_v28 = vld [vmem:[#allocation128_spill] sm:$0xff] }
 0x56e   : > { %v2714_v24 = vadd.f32 %v12286_v16, %v12285_v43  ;;  %v2672_v7 = vsel %vm359_vm0, %v2498_v36, 0.0  ;;  %v2669_v32 = vsel %vm359_vm0, %v2497_v30, 0.0  ;;  %v2500_v9 = vmul.f32 %v5423_v34, %v5423_v34  ;;  %v5424_v14 = vld [vmem:[%s5893_s10 + $0x788] sm:$0xff]  ;;  %v5427_v1 = vld [vmem:[%s5893_s10 + $0x7d8] sm:$0xff] }
 0x56f   : > { %v2499_v3 = vmul.f32 %v5424_v14, %v5424_v14  ;;  %v2869_v47 = vmul.f32 0.0078125, %v2709_v10  ;;  %v2713_v18 = vadd.f32 %v12288_v28, %v12287_v56  ;;  %v9866_v8 = vmul.f32 %v9783_v38, %v2865_v31  ;;  %v5425_v56 = vld [vmem:[%s5893_s10 + $0x7b8] sm:$0xff]  ;;  %v5426_v49 = vld [vmem:[%s5893_s10 + $0x7a8] sm:$0xff] }
 0x570   : > { %v9869_v46 = vmul.f32 %v9783_v38, %v2866_v33  ;;  %v9871_v54 = vmul.f32 %v2868_v15, %v2868_v15  ;;  %v9873_v36 = vmul.f32 %v2867_v44, %v2867_v44  ;;  %v2872_v30 = vmul.f32 0.0078125, %v2712_v20  ;;  %2673 = vadd.xlane.f32.xlu1 %v2672_v7  ;;  %v12289_v7 = vld [vmem:[#allocation83_spill] sm:$0xff]  ;;  %v12292_v60 = vld [vmem:[#allocation129_spill] sm:$0xff]  ;;  %v12298_v25 = vld [vmem:[#allocation86_spill] sm:$0xff] }
 0x571   : > { %v2871_v43 = vmul.f32 0.0078125, %v2711_v61  ;;  %v9875_v16 = vmul.f32 %v2870_v21, %v2870_v21  ;;  %v2874_v10 = vmul.f32 0.0078125, %v2714_v24  ;;  %2670 = vadd.xlane.f32.xlu0 %v2669_v32  ;;  %v9878_v34 = vmul.f32 %v9783_v38, %v2867_v44  ;;  %v12290_v32 = vld [vmem:[#allocation234_spill] sm:$0xff]  ;;  %v12302_v45 = vld [vmem:[#allocation88_spill] sm:$0xff]  ;;  %v12306_v57 = vld [vmem:[#allocation257_spill] sm:$0xff] }
 0x572   : > { %v9881_v31 = vmul.f32 %v9783_v38, %v2868_v15  ;;  %v2678_v33 = vsel %vm359_vm0, %v2500_v9, 0.0  ;;  %v2675_v14 = vsel %vm359_vm0, %v2499_v3, 0.0  ;;  %v2502_v28 = vmul.f32 %v5425_v56, %v5425_v56  ;;  %v12291_v3 = vld [vmem:[#allocation84_spill] sm:$0xff]  ;;  %v12307_v50 = vld [vmem:[#allocation137_spill] sm:$0xff]  ;;  %v12346_v6 = vld [vmem:[#allocation91_spill] sm:$0xff] }
 0x573   : > { %v2501_v20 = vmul.f32 %v5426_v49, %v5426_v49  ;;  %v9887_v61 = vmul.f32 %v2869_v47, %v2869_v47  ;;  %v2873_v24 = vmul.f32 0.0078125, %v2713_v18  ;;  %v2716_v44 = vadd.f32 %v12290_v32, %v12289_v7 }
 0x574   : > { %v9892_v35 = vmul.f32 %v9783_v38, %v2869_v47  ;;  %v9894_v15 = vmul.f32 %v2872_v30, %v2872_v30  ;;  %v9896_v9 = vmul.f32 %v2871_v43, %v2871_v43  ;;  %v2715_v56 = vadd.f32 %v12292_v60, %v12291_v3  ;;  %2679 = vadd.xlane.f32.xlu1 %v2678_v33  ;;  %v5428_v60 = vld [vmem:[%s5893_s10 + $0x7c8] sm:$0xff] }
 0x575   : > { %v9901_v49 = vmul.f32 %v9783_v38, %v2870_v21  ;;  %v9903_v17 = vmul.f32 %v2874_v10, %v2874_v10  ;;  %2676 = vadd.xlane.f32.xlu0 %v2675_v14  ;;  %v9906_v18 = vmul.f32 %v9783_v38, %v2871_v43  ;;  %v9909_v47 = vmul.f32 %v9783_v38, %v2872_v30  ;;  %v12295_v33 = vld [vmem:[#allocation85_spill] sm:$0xff]  ;;  %v12296_v14 = vld [vmem:[#allocation235_spill] sm:$0xff] }
 0x576   : > { %v2684_v7 = vsel %vm359_vm0, %v2502_v28, 0.0  ;;  %v2681_v32 = vsel %vm359_vm0, %v2501_v20, 0.0  ;;  %v2504_v58 = vmul.f32 %v5427_v1, %v5427_v1  ;;  %v2503_v3 = vmul.f32 %v5428_v60, %v5428_v60  ;;  %v12299_v28 = vld [vmem:[#allocation130_spill] sm:$0xff]  ;;  %v12300_v20 = vld [vmem:[#allocation87_spill] sm:$0xff] }
 0x577   : > { %12293 = vst [vmem:[#allocation38_spill] sm:$0xff] %v9906_v18  ;;  %12294 = vst [vmem:[#allocation39_spill] sm:$0xff] %v9909_v47  ;;  %v9915_v21 = vmul.f32 %v2873_v24, %v2873_v24  ;;  %v2876_v42 = vmul.f32 0.0078125, %v2716_v44  ;;  %v2718_v43 = vadd.f32 %v12296_v14, %v12295_v33  ;;  %v9920_v19 = vmul.f32 %v9783_v38, %v2873_v24  ;;  %v12303_v60 = vld [vmem:[#allocation131_spill] sm:$0xff]  ;;  %v12308_v33 = vld [vmem:[#allocation93_spill] sm:$0xff] }
 0x578   : > { %v2875_v30 = vmul.f32 0.0078125, %v2715_v56  ;;  %v2717_v59 = vadd.f32 %v12299_v28, %v12298_v25  ;;  %v2720_v1 = vadd.f32 %v12301_v4, %v12300_v20  ;;  %v2719_v48 = vadd.f32 %v12303_v60, %v12302_v45  ;;  %v12309_v14 = vld [vmem:[#allocation138_spill] sm:$0xff]  ;;  %2685 = vadd.xlane.f32.xlu1 %v2684_v7  ;;  %v5430_v20 = vld [vmem:[%s5893_s10 + $0x7e8] sm:$0xff] }
 0x579   : > { %12297 = vst [vmem:[#allocation40_spill] sm:$0xff] %v9920_v19  ;;  %v2722_v44 = vadd.f32 %v12305_v41, %v12304_v29  ;;  %v2731_v47 = vadd.f32 %v12307_v50, %v12306_v57  ;;  %v2733_v24 = vadd.f32 %v12309_v14, %v12308_v33  ;;  %2682 = vadd.xlane.f32.xlu0 %v2681_v32  ;;  %v2690_v56 = vsel %vm359_vm0, %v2504_v58, 0.0  ;;  %v5429_v28 = vld [vmem:[%s5893_s10 + $0x7f8] sm:$0xff]  ;;  %v12317_v19 = vld [vmem:[#allocation132_spill] sm:$0xff] }
 0x57a   : > { %v2687_v25 = vsel %vm359_vm0, %v2503_v3, 0.0  ;;  %v2506_v4 = vmul.f32 %v5429_v28, %v5429_v28  ;;  %v2505_v18 = vmul.f32 %v5430_v20, %v5430_v20  ;;  %v9938_v45 = vmul.f32 %v2876_v42, %v2876_v42  ;;  %v12310_v41 = vld [vmem:[#allocation258_spill] sm:$0xff]  ;;  %v12311_v29 = vld [vmem:[#allocation243_spill] sm:$0xff]  ;;  %v12316_v20 = vld [vmem:[#allocation89_spill] sm:$0xff] }
 0x57b   : > { %v2878_v60 = vmul.f32 0.0078125, %v2718_v43  ;;  %v2734_v5 = vadd.f32 %v12311_v29, %v12310_v41  ;;  %v9943_v50 = vmul.f32 %v9783_v38, %v2874_v10  ;;  %v9945_v57 = vmul.f32 %v2875_v30, %v2875_v30  ;;  %v12313_v32 = vld [vmem:[#allocation199_spill] sm:$0xff]  ;;  %v12314_v58 = vld [vmem:[#allocation242_spill] sm:$0xff] }
 0x57c   : > { %v2877_v7 = vmul.f32 0.0078125, %v2717_v59  ;;  %v2732_v33 = vadd.f32 %v12314_v58, %v12313_v32  ;;  %v9950_v3 = vmul.f32 %v9783_v38, %v2875_v30  ;;  %v2880_v14 = vmul.f32 0.0078125, %v2720_v1  ;;  %2691 = vadd.xlane.f32.xlu1 %v2690_v56  ;;  %v12318_v30 = vld [vmem:[#allocation196_spill] sm:$0xff]  ;;  %v12319_v58 = vld [vmem:[#allocation238_spill] sm:$0xff] }
 0x57d   : > { %12312 = vst [vmem:[#allocation41_spill] sm:$0xff] %v9943_v50  ;;  %v2879_v28 = vmul.f32 0.0078125, %v2719_v48  ;;  %v2721_v43 = vadd.f32 %v12317_v19, %v12316_v20  ;;  %v9954_v63 = vmul.f32 0.0078125, %v2733_v24  ;;  %2688 = vadd.xlane.f32.xlu0 %v2687_v25  ;;  %v2882_v10 = vmul.f32 0.0078125, %v2722_v44 }
 0x57e   : > { %12315 = vst [vmem:[#allocation146_spill] sm:$0xff] %v9950_v3  ;;  %v9956_v41 = vmul.f32 0.0078125, %v2731_v47  ;;  %v2696_v59 = vsel %vm359_vm0, %v2506_v4, 0.0  ;;  %v2693_v29 = vsel %vm359_vm0, %v2505_v18, 0.0  ;;  %v9960_v32 = vmul.f32 %v2878_v60, %v2878_v60  ;;  %v12337_v3 = vld [vmem:[#allocation197_spill] sm:$0xff] }
 0x57f   : > { %v2724_v1 = vadd.f32 %v12319_v58, %v12318_v30  ;;  %v9964_v48 = vmul.f32 0.0078125, %v2734_v5  ;;  %v9967_v19 = vmul.f32 %v9783_v38, %v2876_v42  ;;  %v9969_v24 = vmul.f32 %v2877_v7, %v2877_v7  ;;  %v12344_v58 = vld [vmem:[#allocation254_spill] sm:$0xff] }
 0x580   : > { %v9971_v56 = vmul.f32 0.0078125, %v2732_v33  ;;  %v9974_v47 = vmul.f32 %v9783_v38, %v2877_v7  ;;  %v9977_v44 = vmul.f32 %v9783_v38, %v2878_v60  ;;  %v9979_v18 = vmul.f32 %v2880_v14, %v2880_v14  ;;  %2697 = vadd.xlane.f32.xlu1 %v2696_v59  ;;  %v9989_v33 = vpop.f32.mrb[0].mxu1  ;;  %v12333_v59 = vld [vmem:[#allocation90_spill] sm:$0xff] }
 0x581   : > { %12320 = vst [vmem:[#allocation255_spill] sm:$0xff] %v9967_v19  ;;  %12321 = vst [vmem:[#allocation148_spill] sm:$0xff] %v9969_v24  ;;  %v9981_v25 = vmul.f32 %v2879_v28, %v2879_v28  ;;  %v2881_v4 = vmul.f32 0.0078125, %v2721_v43  ;;  %2694 = vadd.xlane.f32.xlu0 %v2693_v29  ;;  %v9985_v5 = vmul.f32 %v9783_v38, %v9954_v63  ;;  %v10001_v43 = vmul.f32 0.0078125, %v2724_v1  ;;  %v12334_v29 = vld [vmem:[#allocation133_spill] sm:$0xff]  ;;  %v10007_v19 = vpop.f32.mrb[1].mxu1 }
 0x582   : > { %12322 = vst [vmem:[#allocation259_spill] sm:$0xff] %v9974_v47  ;;  %12323 = vst [vmem:[#allocation149_spill] sm:$0xff] %v9977_v44  ;;  %v9987_v42 = vmul.f32 %v2882_v10, %v2882_v10  ;;  %v9993_v7 = vmul.f32 %v9783_v38, %v9956_v41  ;;  %v9996_v60 = vmul.f32 %v9783_v38, %v2879_v28  ;;  %v12338_v28 = vld [vmem:[#allocation239_spill] sm:$0xff]  ;;  %v12339_v47 = vld [vmem:[#allocation253_spill] sm:$0xff]  ;;  %v10019_v50 = vpop.f32.mrb[2].mxu1 }
 0x583   : > { %12324 = vst [vmem:[#allocation260_spill] sm:$0xff] %v9979_v18  ;;  %12325 = vst [vmem:[#allocation42_spill] sm:$0xff] %v9981_v25  ;;  %v9999_v20 = vmul.f32 %v9783_v38, %v2880_v14  ;;  %v2723_v30 = vadd.f32 %v12334_v29, %v12333_v59  ;;  %v10011_v44 = vmul.f32 %v9783_v38, %v9964_v48  ;;  %v12340_v14 = vld [vmem:[#allocation134_spill] sm:$0xff]  ;;  %v12350_v1 = vld [vmem:[#allocation241_spill] sm:$0xff] }
 0x584   : > { %12326 = vst [vmem:[#allocation43_spill] sm:$0xff] %v9985_v5  ;;  %12327 = vst [vmem:[#allocation150_spill] sm:$0xff] %v9987_v42  ;;  %v10023_v59 = vmul.f32 %v9783_v38, %v9971_v56  ;;  %v10025_v29 = vmul.f32 %v2881_v4, %v2881_v4  ;;  %v12345_v5 = vld [vmem:[#allocation240_spill] sm:$0xff]  ;;  %v10041_v42 = vpop.f32.mrb[0].mxu0 }
 0x585   : > { %12328 = vst [vmem:[#allocation263_spill] sm:$0xff] %v9989_v33  ;;  %12329 = vst [vmem:[#allocation151_spill] sm:$0xff] %v9993_v7  ;;  %v2728_v33 = vadd.f32 %v12345_v5, %v12344_v58  ;;  %v2433_v5 = vpop.xlane.xlu0 %2432  ;;  %v10044_v58 = vmul.f32 %v9783_v38, %v2881_v4  ;;  %v12377_v18 = vld [vmem:[#allocation140_spill] sm:$0xff] }
 0x586   : > { %12330 = vst [vmem:[#allocation264_spill] sm:$0xff] %v9996_v60  ;;  %12331 = vst [vmem:[#allocation152_spill] sm:$0xff] %v9999_v20  ;;  %v2726_v60 = vadd.f32 %v12338_v28, %v12337_v3  ;;  %v2725_v20 = vadd.f32 %v12340_v14, %v12339_v47  ;;  %v2727_v3 = vadd.f32 %v12347_v23, %v12346_v6  ;;  %v10033_v28 = vpop.f32.mrb[3].mxu1  ;;  %v12349_v14 = vld [vmem:[#allocation198_spill] sm:$0xff]  ;;  %v10046_v23 = vmul.f32 0.0078125, %v2723_v30  ;;  %v12367_v30 = vld [vmem:[#allocation139_spill] sm:$0xff] }
 0x587   : > { %12332 = vst [vmem:[#allocation267_spill] sm:$0xff] %v10001_v43  ;;  %12335 = vst [vmem:[#allocation153_spill] sm:$0xff] %v10007_v19  ;;  %v2730_v7 = vadd.f32 %v12350_v1, %v12349_v14  ;;  %v12351_v19 = vld [vmem:[#allocation92_spill] sm:$0xff]  ;;  %v12355_v47 = vld [vmem:[#allocation102_spill] sm:$0xff]  ;;  %v10053_v1 = vpop.f32.mrb[1].mxu0  ;;  %v10068_v6 = vmul.f32 0.0078125, %v2728_v33 }
 0x588   : > { %12336 = vst [vmem:[#allocation268_spill] sm:$0xff] %v10011_v44  ;;  %12341 = vst [vmem:[#allocation154_spill] sm:$0xff] %v10019_v50  ;;  %v2729_v11 = vadd.f32 %v12352_v22, %v12351_v19  ;;  %v10051_v44 = vadd.f32 %v2433_v5, %v12355_v47  ;;  %v10056_v22 = vmul.f32 %v9783_v38, %v2882_v10  ;;  %v10062_v14 = vmul.f32 0.0078125, %v2726_v60  ;;  %v12362_v5 = vld [vmem:[#allocation200_spill] sm:$0xff]  ;;  %v12366_v50 = vld [vmem:[#allocation94_spill] sm:$0xff] }
 0x589   : > { %12342 = vst [vmem:[#allocation271_spill] sm:$0xff] %v10023_v59  ;;  %12343 = vst [vmem:[#allocation155_spill] sm:$0xff] %v10025_v29  ;;  %v10060_v19 = vmul.f32 %v10001_v43, %v10001_v43  ;;  %v2885_v4 = vmul.f32 0.0078125, %v2725_v20  ;;  %v10066_v29 = vpop.f32.mrb[2].mxu0  ;;  %v10070_v47 = vmul.f32 0.0078125, %v2727_v3  ;;  %v10078_v60 = vmul.f32 0.0078125, %v2730_v7  ;;  %v2430_v3 = vpop.xlane.xlu1 %2429 }
 0x58a   : > { %12348 = vst [vmem:[#allocation272_spill] sm:$0xff] %v10033_v28  ;;  %12353 = vst [vmem:[#allocation156_spill] sm:$0xff] %v10044_v58  ;;  %v12363_v58 = vld [vmem:[#allocation244_spill] sm:$0xff]  ;;  %v10076_v43 = vpop.f32.mrb[3].mxu0  ;;  %v10080_v20 = vmul.f32 0.0078125, %v2729_v11  ;;  %v2735_v59 = vadd.f32 %v12367_v30, %v12366_v50  ;;  %v2436_v28 = vpop.xlane.xlu0 %2435  ;;  %v10100_v50 = vmul.f32 %v10062_v14, %v10062_v14  ;;  %v12376_v33 = vld [vmem:[#allocation261_spill] sm:$0xff] }
 0x58b   : > { %12354 = vst [vmem:[#allocation275_spill] sm:$0xff] %v10046_v23  ;;  %12356 = vst [vmem:[#allocation157_spill] sm:$0xff] %v10051_v44  ;;  %v2736_v10 = vadd.f32 %v12363_v58, %v12362_v5  ;;  %v10088_v58 = vmul.f32 %v10046_v23, %v10046_v23  ;;  %v12368_v5 = vld [vmem:[#allocation201_spill] sm:$0xff]  ;;  %v12372_v11 = vld [vmem:[#allocation208_spill] sm:$0xff]  ;;  %v10102_v30 = vmul.f32 %v2885_v4, %v2885_v4 }
 0x58c   : > { %12357 = vst [vmem:[#allocation276_spill] sm:$0xff] %v10056_v22  ;;  %12358 = vst [vmem:[#allocation158_spill] sm:$0xff] %v10060_v19  ;;  %v12369_v22 = vld [vmem:[#allocation245_spill] sm:$0xff]  ;;  %v12370_v19 = vld [vmem:[#allocation274_spill] sm:$0xff]  ;;  %v10096_v25 = vadd.f32 %v2436_v28, %v12372_v11  ;;  %v2737_v24 = vadd.f32 %v12377_v18, %v12376_v33  ;;  %v10107_v23 = vmul.f32 %v9783_v38, %v2885_v4  ;;  %v2895_v4 = vmul.f32 0.0078125, %v2735_v59 }
 0x58d   : > { %12359 = vst [vmem:[#allocation279_spill] sm:$0xff] %v10062_v14  ;;  %12360 = vst [vmem:[#allocation159_spill] sm:$0xff] %v10068_v6  ;;  %v2738_v44 = vadd.f32 %v12369_v22, %v12368_v5  ;;  %v10093_v7 = vadd.f32 %v2430_v3, %v12370_v19  ;;  %v10111_v22 = vmul.f32 %v10068_v6, %v10068_v6  ;;  %v2896_v19 = vmul.f32 0.0078125, %v2736_v10  ;;  %v12381_v3 = vld [vmem:[#allocation262_spill] sm:$0xff]  ;;  %v12385_v33 = vld [vmem:[#allocation95_spill] sm:$0xff] }
 0x58e   : > { %12361 = vst [vmem:[#allocation280_spill] sm:$0xff] %v10070_v47  ;;  %12364 = vst [vmem:[#allocation160_spill] sm:$0xff] %v10078_v60  ;;  %v10115_v28 = vmul.f32 %v10070_v47, %v10070_v47  ;;  %v12382_v5 = vld [vmem:[#allocation246_spill] sm:$0xff]  ;;  %v10121_v14 = vmul.f32 %v10078_v60, %v10078_v60  ;;  %v10125_v18 = vmul.f32 %v10080_v20, %v10080_v20  ;;  %v12386_v6 = vld [vmem:[#allocation141_spill] sm:$0xff]  ;;  %v2897_v59 = vmul.f32 0.0078125, %v2737_v24 }
 0x58f   : > { %12365 = vst [vmem:[#allocation283_spill] sm:$0xff] %v10080_v20  ;;  %12371 = vst [vmem:[#allocation161_spill] sm:$0xff] %v10093_v7  ;;  %v2740_v11 = vadd.f32 %v12382_v5, %v12381_v3  ;;  %v2439_v7 = vpop.xlane.xlu0 %2438  ;;  %v10131_v10 = vmul.f32 %v9971_v56, %v9971_v56  ;;  %v2898_v47 = vmul.f32 0.0078125, %v2738_v44  ;;  %v12388_v3 = vld [vmem:[#allocation209_spill] sm:$0xff]  ;;  %v10141_v20 = vmul.f32 %v9956_v41, %v9956_v41 }
 0x590   : > { %12373 = vst [vmem:[#allocation284_spill] sm:$0xff] %v10096_v25  ;;  %12374 = vst [vmem:[#allocation162_spill] sm:$0xff] %v10100_v50  ;;  %v2442_v25 = vpop.xlane.xlu1 %2441  ;;  %v12390_v60 = vld [vmem:[#allocation277_spill] sm:$0xff]  ;;  %v10149_v56 = vmul.f32 %v9964_v48, %v9964_v48  ;;  %v10153_v44 = vmul.f32 %v9954_v63, %v9954_v63  ;;  %v10157_v41 = vmul.f32 %v2895_v4, %v2895_v4  ;;  %v12406_v63 = vld [vmem:[#allocation103_spill] sm:$0xff] }
 0x591   : > { %12375 = vst [vmem:[#allocation287_spill] sm:$0xff] %v10102_v30  ;;  %12378 = vst [vmem:[#allocation163_spill] sm:$0xff] %v10107_v23  ;;  %v2739_v23 = vadd.f32 %v12386_v6, %v12385_v33  ;;  %v10134_v5 = vadd.f32 %v2442_v25, %v12388_v3  ;;  %v12394_v6 = vld [vmem:[#allocation247_spill] sm:$0xff]  ;;  %v10155_v25 = vmul.f32 %v2896_v19, %v2896_v19  ;;  %v12402_v3 = vld [vmem:[#allocation248_spill] sm:$0xff] }
 0x592   : > { %12379 = vst [vmem:[#allocation288_spill] sm:$0xff] %v10111_v22  ;;  %12380 = vst [vmem:[#allocation164_spill] sm:$0xff] %v10115_v28  ;;  %v12395_v28 = vld [vmem:[#allocation96_spill] sm:$0xff]  ;;  %v12396_v22 = vld [vmem:[#allocation142_spill] sm:$0xff]  ;;  %v10164_v48 = vmul.f32 %v2898_v47, %v2898_v47 }
 0x593   : > { %12383 = vst [vmem:[#allocation291_spill] sm:$0xff] %v10121_v14  ;;  %12384 = vst [vmem:[#allocation165_spill] sm:$0xff] %v10125_v18  ;;  %v10137_v14 = vadd.f32 %v2439_v7, %v12390_v60  ;;  %v12393_v18 = vld [vmem:[#allocation202_spill] sm:$0xff]  ;;  %v2741_v30 = vadd.f32 %v12396_v22, %v12395_v28  ;;  %v2900_v60 = vmul.f32 0.0078125, %v2740_v11  ;;  %v2899_v24 = vmul.f32 0.0078125, %v2739_v23  ;;  %v12401_v7 = vld [vmem:[#allocation203_spill] sm:$0xff] }
 0x594   : > { %12387 = vst [vmem:[#allocation292_spill] sm:$0xff] %v10131_v10  ;;  %12389 = vst [vmem:[#allocation167_spill] sm:$0xff] %v10134_v5  ;;  %v2742_v33 = vadd.f32 %v12394_v6, %v12393_v18  ;;  %v2744_v18 = vadd.f32 %v12402_v3, %v12401_v7  ;;  %v2512_v6 = vpop.xlane.xlu1 %2511  ;;  %v10162_v22 = vmul.f32 %v9783_v38, %v2895_v4  ;;  %v12405_v28 = vld [vmem:[#allocation278_spill] sm:$0xff] }
 0x595   : > { %12391 = vst [vmem:[#allocation295_spill] sm:$0xff] %v10137_v14  ;;  %12392 = vst [vmem:[#allocation168_spill] sm:$0xff] %v10141_v20  ;;  %v2509_v14 = vpop.xlane.xlu0 %2508  ;;  %v2764_v5 = vadd.f32 %v2512_v6, %v12405_v28  ;;  %v10171_v11 = vmul.f32 %v2897_v59, %v2897_v59  ;;  %v10174_v7 = vmul.f32 %v9783_v38, %v2897_v59  ;;  %v12414_v28 = vld [vmem:[#allocation143_spill] sm:$0xff] }
 0x596   : > { %12397 = vst [vmem:[#allocation296_spill] sm:$0xff] %v10149_v56  ;;  %12398 = vst [vmem:[#allocation171_spill] sm:$0xff] %v10153_v44  ;;  %v2763_v44 = vadd.f32 %v2509_v14, %v12406_v63  ;;  %v2902_v23 = vmul.f32 0.0078125, %v2742_v33  ;;  %v10176_v3 = vmul.f32 %v2900_v60, %v2900_v60  ;;  %v10181_v6 = vmul.f32 %v2899_v24, %v2899_v24 }
 0x597   : > { %12399 = vst [vmem:[#allocation299_spill] sm:$0xff] %v10155_v25  ;;  %12400 = vst [vmem:[#allocation172_spill] sm:$0xff] %v10157_v41  ;;  %v10169_v25 = vmul.f32 %v9783_v38, %v2896_v19  ;;  %v2901_v41 = vmul.f32 0.0078125, %v2741_v30  ;;  %v2924_v4 = vmul.f32 0.0078125, %v2764_v5  ;;  %v10183_v14 = vmul.f32 0.0078125, %v2744_v18  ;;  %v12413_v19 = vld [vmem:[#allocation265_spill] sm:$0xff] }
 0x598   : > { %12403 = vst [vmem:[#allocation300_spill] sm:$0xff] %v10162_v22  ;;  %12404 = vst [vmem:[#allocation175_spill] sm:$0xff] %v10164_v48  ;;  %v2923_v56 = vmul.f32 0.0078125, %v2763_v44  ;;  %v10179_v48 = vmul.f32 %v9783_v38, %v2898_v47  ;;  %v2743_v63 = vadd.f32 %v12414_v28, %v12413_v19  ;;  %v10188_v30 = vmul.f32 %v9783_v38, %v2899_v24  ;;  %v12415_v44 = vld [vmem:[#allocation210_spill] sm:$0xff]  ;;  %v12416_v47 = vld [vmem:[#allocation104_spill] sm:$0xff] }
 0x599   : > { %12407 = vst [vmem:[#allocation303_spill] sm:$0xff] %v10169_v25  ;;  %12408 = vst [vmem:[#allocation176_spill] sm:$0xff] %v10171_v11  ;;  %v2518_v11 = vpop.xlane.xlu1 %2517  ;;  %v2515_v33 = vpop.xlane.xlu0 %2514  ;;  %v3052_v59 = vsub.f32 %v2924_v4, %v9799_v13  ;;  %v10194_v10 = vmul.f32 %v2902_v23, %v2902_v23  ;;  %v10196_v18 = vmul.f32 %v2901_v41, %v2901_v41  ;;  %v12421_v4 = vld [vmem:[#allocation249_spill] sm:$0xff]  ;;  %v12439_v22 = vld [vmem:[#allocation251_spill] sm:$0xff] }
 0x59a   : > { %12409 = vst [vmem:[#allocation304_spill] sm:$0xff] %v10174_v7  ;;  %12410 = vst [vmem:[#allocation179_spill] sm:$0xff] %v10176_v3  ;;  %v3051_v5 = vsub.f32 %v2923_v56, %v9801_v39  ;;  %v2766_v3 = vadd.f32 %v2518_v11, %v12415_v44  ;;  %v2765_v20 = vadd.f32 %v2515_v33, %v12416_v47  ;;  %v2903_v56 = vmul.f32 0.0078125, %v2743_v63  ;;  %v12420_v11 = vld [vmem:[#allocation266_spill] sm:$0xff]  ;;  %v10210_v47 = vpop.f32.mrb[4].mxu1  ;;  %v12441_v25 = vld [vmem:[#allocation145_spill] sm:$0xff] }
 0x59b   : > { %12411 = vst [vmem:[#allocation307_spill] sm:$0xff] %v10179_v48  ;;  %12412 = vst [vmem:[#allocation180_spill] sm:$0xff] %v10181_v6  ;;  %v10199_v6 = vmul.f32 %v9783_v38, %v2901_v41  ;;  %v10202_v19 = vmul.f32 %v9783_v38, %v2900_v60  ;;  %v3116_v24 = vadd.f32 1e-05, %v3052_v59  ;;  %v10206_v39 = vmul.f32 %v10183_v14, %v10183_v14 }
 0x59c   : > { %12417 = vst [vmem:[#allocation308_spill] sm:$0xff] %v10196_v18  ;;  %v3115_v28 = vadd.f32 1e-05, %v3051_v5  ;;  %v2926_v50 = vmul.f32 0.0078125, %v2766_v3  ;;  %v2925_v13 = vmul.f32 0.0078125, %v2765_v20  ;;  %v2746_v33 = vadd.f32 %v12421_v4, %v12420_v11  ;;  %12422 = vst [vmem:[#allocation183_spill] sm:$0xff] %v10210_v47 }
 0x59d   : > { %12418 = vst [vmem:[#allocation182_spill] sm:$0xff] %v10199_v6  ;;  %12419 = vst [vmem:[#allocation310_spill] sm:$0xff] %v10206_v39  ;;  %v2524_v44 = vpop.xlane.xlu1 %2523  ;;  %v10213_v41 = vmul.f32 %v9783_v38, %v2902_v23  ;;  %5089 = vrsqrt.f32 %v3116_v24  ;;  %v12423_v20 = vld [vmem:[#allocation211_spill] sm:$0xff]  ;;  %v2521_v5 = vpop.xlane.xlu0 %2520  ;;  %v12425_v11 = vld [vmem:[#allocation281_spill] sm:$0xff] }
 0x59e   : > { %v3054_v60 = vsub.f32 %v2926_v50, %v9814_v55  ;;  %v3053_v3 = vsub.f32 %v2925_v13, %v9816_v53  ;;  %v2768_v59 = vadd.f32 %v2524_v44, %v12423_v20  ;;  %v10218_v18 = vpop.f32.mrb[5].mxu1  ;;  %5091 = vrsqrt.f32 %v3115_v28  ;;  %v12429_v28 = vld [vmem:[#allocation97_spill] sm:$0xff]  ;;  %v12430_v20 = vld [vmem:[#allocation144_spill] sm:$0xff]  ;;  %v10237_v23 = vpop.f32.mrb[4].mxu0 }
 0x59f   : > { %12424 = vst [vmem:[#allocation311_spill] sm:$0xff] %v10218_v18  ;;  %v2767_v4 = vadd.f32 %v2521_v5, %v12425_v11  ;;  %v10225_v39 = vpop.f32.mrb[6].mxu1  ;;  %v10231_v44 = vmul.f32 %v2903_v56, %v2903_v56  ;;  %v2745_v63 = vadd.f32 %v12430_v20, %v12429_v28  ;;  %v12432_v28 = vld [vmem:[#allocation105_spill] sm:$0xff] }
 0x5a0   : > { %12426 = vst [vmem:[#allocation186_spill] sm:$0xff] %v10225_v39  ;;  %v3118_v24 = vadd.f32 1e-05, %v3054_v60  ;;  %v3117_v55 = vadd.f32 1e-05, %v3053_v3  ;;  %v2928_v50 = vmul.f32 0.0078125, %v2768_v59 }
 0x5a1   : > { %v10229_v13 = vpop.f32.mrb[7].mxu1  ;;  %12428 = vst [vmem:[#allocation187_spill] sm:$0xff] %v10231_v44  ;;  %v2927_v7 = vmul.f32 0.0078125, %v2767_v4  ;;  %v2530_v11 = vpop.xlane.xlu1 %2529  ;;  %v12431_v3 = vld [vmem:[#allocation282_spill] sm:$0xff]  ;;  %v2905_v5 = vmul.f32 0.0078125, %v2745_v63 }
 0x5a2   : > { %12427 = vst [vmem:[#allocation314_spill] sm:$0xff] %v10229_v13  ;;  %5093 = vrsqrt.f32 %v3118_v24  ;;  %v3056_v60 = vsub.f32 %v2928_v50, %v9831_v27  ;;  %v2770_v59 = vadd.f32 %v2530_v11, %v12431_v3  ;;  %v2527_v47 = vpop.xlane.xlu0 %2526  ;;  %v10243_v44 = vpop.f32.mrb[5].mxu0  ;;  %v2906_v24 = vmul.f32 0.0078125, %v2746_v33 }
 0x5a3   : > { %5095 = vrsqrt.f32 %v3117_v55  ;;  %v3055_v4 = vsub.f32 %v2927_v7, %v9839_v62  ;;  %v2769_v20 = vadd.f32 %v2527_v47, %v12432_v28  ;;  %v10249_v48 = vpop.f32.mrb[6].mxu0  ;;  %v10258_v47 = vmul.f32 %v9783_v38, %v2903_v56  ;;  %v12434_v28 = vld [vmem:[#allocation212_spill] sm:$0xff] }
 0x5a4   : > { %v3120_v27 = vadd.f32 1e-05, %v3056_v60  ;;  %v2930_v50 = vmul.f32 0.0078125, %v2770_v59  ;;  %v10253_v3 = vpop.f32.mrb[7].mxu0  ;;  %v10264_v11 = vmul.f32 %v9783_v38, %v10183_v14  ;;  %v10269_v56 = vmul.f32 %v2906_v24, %v2906_v24  ;;  %v12440_v14 = vld [vmem:[#allocation98_spill] sm:$0xff] }
 0x5a5   : > { %v3119_v53 = vadd.f32 1e-05, %v3055_v4  ;;  %v2929_v55 = vmul.f32 0.0078125, %v2769_v20  ;;  %v2536_v7 = vpop.xlane.xlu1 %2535  ;;  %12433 = vst [vmem:[#allocation315_spill] sm:$0xff] %v10258_v47  ;;  %v12436_v20 = vld [vmem:[#allocation106_spill] sm:$0xff]  ;;  %v2747_v63 = vadd.f32 %v12441_v25, %v12440_v14  ;;  %v10304_v14 = vmul.f32 %v9783_v38, %v2906_v24 }
 0x5a6   : > { %5097 = vrsqrt.f32 %v3120_v27  ;;  %v3058_v33 = vsub.f32 %v2930_v50, %v9853_v0  ;;  %v2772_v60 = vadd.f32 %v2536_v7, %v12434_v28  ;;  %v2533_v59 = vpop.xlane.xlu0 %2532  ;;  %12435 = vst [vmem:[#allocation188_spill] sm:$0xff] %v10264_v11  ;;  %12437 = vst [vmem:[#allocation316_spill] sm:$0xff] %v10269_v56  ;;  %v12438_v27 = vld [vmem:[#allocation204_spill] sm:$0xff]  ;;  %v10273_v50 = vld [vmem:[#allocation8] ss:$0 sm:$0xff]  ;;  %v12443_v56 = vsub.f32 %v10053_v1, %v9808_v52 }
 0x5a7   : > { %5099 = vrsqrt.f32 %v3119_v53  ;;  %v3057_v4 = vsub.f32 %v2929_v55, %v9855_v26  ;;  %v2771_v62 = vadd.f32 %v2533_v59, %v12436_v20  ;;  %v5090_v39 = vpop.eup %5089  ;;  %v2748_v0 = vadd.f32 %v12439_v22, %v12438_v27  ;;  %12448 = vst [vmem:[#allocation317_spill] sm:$0xff] %v10304_v14  ;;  %v12528_v14 = vld [vmem:[#allocation40_spill] sm:$0xff] }
 0x5a8   : > { %v3122_v7 = vadd.f32 1e-05, %v3058_v33  ;;  %v2932_v28 = vmul.f32 0.0078125, %v2772_v60  ;;  %v5092_v18 = vpop.eup %5091  ;;  %v12442_v53 = vsub.f32 %v10076_v43, %v9819_v12  ;;  %v12444_v60 = vld [vmem:[#allocation213_spill] sm:$0xff] }
 0x5a9   : > { %v3121_v55 = vadd.f32 1e-05, %v3057_v4  ;;  %v2931_v59 = vmul.f32 0.0078125, %v2771_v62  ;;  %v2542_v20 = vpop.xlane.xlu1 %2541  ;;  %v4277_v22 = vmul.f32 %v5092_v18, %v12443_v56  ;;  %v12445_v43 = vld [vmem:[#allocation285_spill] sm:$0xff]  ;;  %v10288_v4 = vmul.f32 %v2905_v5, %v2905_v5 }
 0x5aa   : > { %v4278_v26 = vmul.f32 %v5090_v39, %v12442_v53  ;;  %5101 = vrsqrt.f32 %v3122_v7  ;;  %v3060_v33 = vsub.f32 %v2932_v28, %v9871_v54  ;;  %v2774_v27 = vadd.f32 %v2542_v20, %v12444_v60  ;;  %v2539_v13 = vpop.xlane.xlu0 %2538 }
 0x5ab   : > { %5103 = vrsqrt.f32 %v3121_v55  ;;  %v3059_v12 = vsub.f32 %v2931_v59, %v9873_v36  ;;  %v2773_v39 = vadd.f32 %v2539_v13, %v12445_v43  ;;  %v4348_v52 = vadd.f32 %v10273_v50, %v4277_v22  ;;  %v12450_v59 = vld [vmem:[#allocation286_spill] sm:$0xff] }
 0x5ac   : > { %v4349_v25 = vadd.f32 %v10273_v50, %v4278_v26  ;;  %v5094_v62 = vpop.eup %5093  ;;  %v2934_v1 = vmul.f32 0.0078125, %v2774_v27  ;;  %v10292_v18 = vmul.f32 %v9783_v38, %v2905_v5  ;;  %v12447_v36 = vsub.f32 %v10066_v29, %v9829_v51 }
 0x5ad   : > { %v5096_v54 = vpop.eup %5095  ;;  %v3123_v56 = vadd.f32 1e-05, %v3059_v12  ;;  %v2933_v7 = vmul.f32 0.0078125, %v2773_v39  ;;  %v2548_v28 = vpop.xlane.xlu1 %2547  ;;  %v10306_v5 = vmul.f32 0.0078125, %v2748_v0  ;;  %4412 = vst.msk [vmem:[%s10296_s22] sm:$0xff] %vm3627_vm1, %v4348_v52  ;;  %v12449_v53 = vsub.f32 %v10041_v42, %v9826_v37  ;;  %v12451_v0 = vld [vmem:[#allocation107_spill] sm:$0xff] }
 0x5ae   : > { %12446 = vst [vmem:[#allocation189_spill] sm:$0xff] %v10292_v18  ;;  %4413 = vst.msk [vmem:[%s10296_s22 + $0x8] sm:$0xff] %vm3627_vm1, %v4349_v25  ;;  %v4280_v13 = vmul.f32 %v5094_v62, %v12447_v36  ;;  %v3062_v55 = vsub.f32 %v2934_v1, %v9875_v16  ;;  %v2776_v51 = vadd.f32 %v2548_v28, %v12450_v59  ;;  %v2545_v29 = vpop.xlane.xlu0 %2544  ;;  %v2907_v20 = vmul.f32 0.0078125, %v2747_v63 }
 0x5af   : > { %v4279_v26 = vmul.f32 %v5096_v54, %v12449_v53  ;;  %v3061_v24 = vsub.f32 %v2933_v7, %v9887_v61  ;;  %v2775_v60 = vadd.f32 %v2545_v29, %v12451_v0  ;;  %v3124_v12 = vadd.f32 1e-05, %v3060_v33  ;;  %v12454_v54 = vld [vmem:[#allocation214_spill] sm:$0xff] }
 0x5b0   : > { %v4351_v22 = vadd.f32 %v10273_v50, %v4280_v13  ;;  %v5098_v27 = vpop.eup %5097  ;;  %v3126_v43 = vadd.f32 1e-05, %v3062_v55  ;;  %v10319_v37 = vmul.f32 0.0078125, %v2776_v51  ;;  %v12452_v16 = vsub.f32 %v10253_v3, %v9847_v40  ;;  %v12482_v13 = vld [vmem:[#allocation297_spill] sm:$0xff] }
 0x5b1   : > { %v4350_v25 = vadd.f32 %v10273_v50, %v4279_v26  ;;  %v5100_v42 = vpop.eup %5099  ;;  %5105 = vrsqrt.f32 %v3123_v56  ;;  %v3125_v39 = vadd.f32 1e-05, %v3061_v24  ;;  %v10326_v62 = vmul.f32 0.0078125, %v2775_v60  ;;  %v2554_v61 = vpop.xlane.xlu1 %2553  ;;  %v12455_v56 = vld [vmem:[#allocation108_spill] sm:$0xff] }
 0x5b2   : > { %4415 = vst.msk [vmem:[%s10296_s22 + $0x18] sm:$0xff] %vm3627_vm1, %v4351_v22  ;;  %v4282_v63 = vmul.f32 %v5098_v27, %v12452_v16  ;;  %v12453_v33 = vsub.f32 %v10243_v44, %v9844_v2  ;;  %5107 = vrsqrt.f32 %v3126_v43  ;;  %v2778_v36 = vadd.f32 %v2554_v61, %v12454_v54  ;;  %v2551_v40 = vpop.xlane.xlu0 %2550  ;;  %v12456_v2 = vld [vmem:[#allocation205_spill] sm:$0xff]  ;;  %v12457_v44 = vld [vmem:[#allocation252_spill] sm:$0xff]  ;;  %v10358_v27 = vpop.f32.mrb[8].mxu1 }
 0x5b3   : > { %4414 = vst.msk [vmem:[%s10296_s22 + $0x10] sm:$0xff] %vm3627_vm1, %v4350_v25  ;;  %5109 = vrsqrt.f32 %v3125_v39  ;;  %v2777_v7 = vadd.f32 %v2551_v40, %v12455_v56  ;;  %v2750_v53 = vadd.f32 %v12457_v44, %v12456_v2  ;;  %v10347_v51 = vmul.f32 %v10306_v5, %v10306_v5  ;;  %v12459_v25 = vld [vmem:[#allocation269_spill] sm:$0xff]  ;;  %v10370_v61 = vpop.f32.mrb[9].mxu1  ;;  %v12464_v2 = vld [vmem:[#allocation270_spill] sm:$0xff]  ;;  %v12465_v44 = vld [vmem:[#allocation256_spill] sm:$0xff] }
 0x5b4   : > { %v4281_v52 = vmul.f32 %v5100_v42, %v12453_v33  ;;  %v4353_v3 = vadd.f32 %v10273_v50, %v4282_v63  ;;  %v5102_v28 = vpop.eup %5101  ;;  %5111 = vrsqrt.f32 %v3124_v12  ;;  %v10343_v55 = vmul.f32 0.0078125, %v2778_v36  ;;  %v12460_v12 = vld [vmem:[#allocation147_spill] sm:$0xff]  ;;  %v12463_v56 = vld [vmem:[#allocation289_spill] sm:$0xff] }
 0x5b5   : > { %v5104_v59 = vpop.eup %5103  ;;  %v10349_v29 = vmul.f32 %v2907_v20, %v2907_v20  ;;  %v12458_v22 = vsub.f32 %v10249_v48, %v9869_v46  ;;  %v10356_v0 = vmul.f32 0.0078125, %v2777_v7  ;;  %v2560_v60 = vpop.xlane.xlu1 %2559  ;;  %v2749_v43 = vadd.f32 %v12460_v12, %v12459_v25  ;;  %v12462_v48 = vld [vmem:[#allocation215_spill] sm:$0xff]  ;;  %v12467_v25 = vld [vmem:[#allocation324_spill] sm:$0xff] }
 0x5b6   : > { %v4352_v26 = vadd.f32 %v10273_v50, %v4281_v52  ;;  %4417 = vst.msk [vmem:[%s10296_s22 + $0x28] sm:$0xff] %vm3627_vm1, %v4353_v3  ;;  %v12461_v42 = vsub.f32 %v10237_v23, %v9866_v8  ;;  %v2780_v63 = vadd.f32 %v2560_v60, %v12462_v48  ;;  %v2557_v39 = vpop.xlane.xlu0 %2556  ;;  %v10377_v23 = vpop.f32.mrb[10].mxu1  ;;  %v10380_v54 = vmul.f32 %v9783_v38, %v2907_v20  ;;  %v12466_v60 = vld [vmem:[#allocation99_spill] sm:$0xff]  ;;  %v12468_v48 = vld [vmem:[#allocation216_spill] sm:$0xff] }
 0x5b7   : > { %v4284_v24 = vmul.f32 %v5102_v28, %v12458_v22  ;;  %v2910_v36 = vmul.f32 0.0078125, %v2750_v53  ;;  %v2779_v7 = vadd.f32 %v2557_v39, %v12463_v56  ;;  %v10386_v28 = vpop.f32.mrb[11].mxu1  ;;  %v2751_v12 = vadd.f32 %v12467_v25, %v12466_v60  ;;  %v12485_v52 = vld [vmem:[#allocation260_spill] sm:$0xff] }
 0x5b8   : > { %v4283_v16 = vmul.f32 %v5104_v59, %v12461_v42  ;;  %4416 = vst.msk [vmem:[%s10296_s22 + $0x20] sm:$0xff] %vm3627_vm1, %v4352_v26  ;;  %v10383_v3 = vmul.f32 0.0078125, %v2780_v63  ;;  %v2752_v26 = vadd.f32 %v12465_v44, %v12464_v2  ;;  %v12469_v44 = vld [vmem:[#allocation110_spill] sm:$0xff]  ;;  %v2909_v25 = vmul.f32 0.0078125, %v2749_v43 }
 0x5b9   : > { %v4355_v33 = vadd.f32 %v10273_v50, %v4284_v24  ;;  %v2566_v22 = vpop.xlane.xlu1 %2565  ;;  %v4909_v24 = vpop.f32.mrb[8].mxu0  ;;  %v2911_v42 = vmul.f32 0.0078125, %v2751_v12 }
 0x5ba   : > { %v4354_v40 = vadd.f32 %v10273_v50, %v4283_v16  ;;  %v10404_v16 = vmul.f32 0.0078125, %v2779_v7  ;;  %v2782_v63 = vadd.f32 %v2566_v22, %v12468_v48  ;;  %v2563_v39 = vpop.xlane.xlu0 %2562  ;;  %v4223_v2 = vsub.f32 %v4909_v24, %v9892_v35 }
 0x5bb   : > { %4419 = vst.msk [vmem:[%s10296_s22 + $0x38] sm:$0xff] %vm3627_vm1, %v4355_v33  ;;  %v3919_v33 = vpop.f32.mrb[9].mxu0  ;;  %v5106_v56 = vpop.eup %5105  ;;  %v2781_v8 = vadd.f32 %v2563_v39, %v12469_v44  ;;  %v10419_v24 = vmul.f32 %v2910_v36, %v2910_v36  ;;  %v2912_v43 = vmul.f32 0.0078125, %v2752_v26  ;;  %v10434_v12 = vmul.f32 %v9783_v38, %v2909_v25 }
 0x5bc   : > { %4418 = vst.msk [vmem:[%s10296_s22 + $0x30] sm:$0xff] %vm3627_vm1, %v4354_v40  ;;  %v4221_v20 = vsub.f32 %v3919_v33, %v9878_v34  ;;  %v4910_v59 = vpop.f32.mrb[10].mxu0  ;;  %v10412_v40 = vmul.f32 %v9783_v38, %v10306_v5  ;;  %v5108_v60 = vpop.eup %5107  ;;  %v10416_v22 = vmul.f32 0.0078125, %v2782_v63  ;;  %v10453_v63 = vmul.f32 %v2911_v42, %v2911_v42 }
 0x5bd   : > { %v4224_v48 = vsub.f32 %v4910_v59, %v9901_v49  ;;  %v3922_v53 = vpop.f32.mrb[11].mxu0  ;;  %v5110_v35 = vpop.eup %5109  ;;  %12470 = vst [vmem:[#allocation190_spill] sm:$0xff] %v10419_v24  ;;  %v10421_v39 = vmul.f32 0.0078125, %v2781_v8  ;;  %v12471_v49 = vld [vmem:[#allocation148_spill] sm:$0xff]  ;;  %v12517_v18 = vsub.f32 %v10404_v16, %v9945_v57  ;;  %v12524_v16 = vld [vmem:[#allocation157_spill] sm:$0xff] }
 0x5be   : > { %v4285_v34 = vmul.f32 %v5106_v56, %v4221_v20  ;;  %v4222_v33 = vsub.f32 %v3922_v53, %v9881_v31  ;;  %v2572_v5 = vpop.xlane.xlu1 %2571  ;;  %v5112_v44 = vpop.eup %5111  ;;  %v4287_v7 = vmul.f32 %v5110_v35, %v4223_v2  ;;  %v10429_v56 = vmul.f32 %v2909_v25, %v2909_v25  ;;  %v12473_v53 = vld [vmem:[#allocation294_spill] sm:$0xff]  ;;  %12479 = vst [vmem:[#allocation319_spill] sm:$0xff] %v10453_v63 }
 0x5bf   : > { %v2569_v1 = vpop.xlane.xlu0 %2568  ;;  %v4288_v46 = vmul.f32 %v5108_v60, %v4224_v48  ;;  %v2784_v26 = vadd.f32 %v2572_v5, %v12473_v53  ;;  %v12476_v5 = vld [vmem:[#allocation206_spill] sm:$0xff]  ;;  %v10471_v63 = vmul.f32 %v9783_v38, %v2911_v42 }
 0x5c0   : > { %v4356_v8 = vadd.f32 %v10273_v50, %v4285_v34  ;;  %v4286_v20 = vmul.f32 %v5112_v44, %v4222_v33  ;;  %12472 = vst [vmem:[#allocation318_spill] sm:$0xff] %v10429_v56  ;;  %v4358_v31 = vadd.f32 %v10273_v50, %v4287_v7  ;;  %v12474_v34 = vld [vmem:[#allocation111_spill] sm:$0xff]  ;;  %v10442_v33 = vmul.f32 %v9783_v38, %v2910_v36  ;;  %v12477_v44 = vld [vmem:[#allocation325_spill] sm:$0xff]  ;;  %v12492_v42 = vld [vmem:[#allocation150_spill] sm:$0xff] }
 0x5c1   : > { %v4359_v2 = vadd.f32 %v10273_v50, %v4288_v46  ;;  %v2783_v60 = vadd.f32 %v2569_v1, %v12474_v34  ;;  %v10444_v7 = vmul.f32 %v2912_v43, %v2912_v43  ;;  %v2754_v53 = vadd.f32 %v12477_v44, %v12476_v5  ;;  %v12481_v1 = vld [vmem:[#allocation326_spill] sm:$0xff]  ;;  %v12483_v44 = vld [vmem:[#allocation207_spill] sm:$0xff]  ;;  %12486 = vst [vmem:[#allocation192_spill] sm:$0xff] %v10471_v63  ;;  %v12500_v56 = vld [vmem:[#allocation329_spill] sm:$0xff] }
 0x5c2   : > { %4420 = vst.msk [vmem:[%s10296_s22 + $0x40] sm:$0xff] %vm3627_vm1, %v4356_v8  ;;  %v4357_v35 = vadd.f32 %v10273_v50, %v4286_v20  ;;  %v2578_v48 = vpop.xlane.xlu1 %2577  ;;  %4422 = vst.msk [vmem:[%s10296_s22 + $0x50] sm:$0xff] %vm3627_vm1, %v4358_v31  ;;  %v10450_v25 = vmul.f32 0.0078125, %v2784_v26  ;;  %v12478_v8 = vld [vmem:[#allocation218_spill] sm:$0xff]  ;;  %v12480_v20 = vld [vmem:[#allocation100_spill] sm:$0xff] }
 0x5c3   : > { %12475 = vst [vmem:[#allocation191_spill] sm:$0xff] %v10444_v7  ;;  %v2786_v59 = vadd.f32 %v2578_v48, %v12478_v8  ;;  %v2575_v46 = vpop.xlane.xlu0 %2574  ;;  %v2753_v34 = vadd.f32 %v12481_v1, %v12480_v20  ;;  %4423 = vst.msk [vmem:[%s10296_s22 + $0x58] sm:$0xff] %vm3627_vm1, %v4359_v2  ;;  %v10461_v36 = vmul.f32 0.0078125, %v2783_v60  ;;  %v12484_v31 = vld [vmem:[#allocation327_spill] sm:$0xff]  ;;  %v12487_v20 = vld [vmem:[#allocation273_spill] sm:$0xff]  ;;  %v4913_v57 = vpop.f32.mrb[12].mxu0 }
 0x5c4   : > { %4421 = vst.msk [vmem:[%s10296_s22 + $0x48] sm:$0xff] %vm3627_vm1, %v4357_v35  ;;  %v2785_v5 = vadd.f32 %v2575_v46, %v12482_v13  ;;  %v2756_v26 = vadd.f32 %v12484_v31, %v12483_v44  ;;  %v12488_v1 = vld [vmem:[#allocation328_spill] sm:$0xff]  ;;  %v12489_v35 = vsub.f32 %v10356_v0, %v9915_v21  ;;  %v12490_v7 = vld [vmem:[#allocation42_spill] sm:$0xff]  ;;  %v2914_v31 = vmul.f32 0.0078125, %v2754_v53  ;;  %v12493_v63 = vld [vmem:[#allocation19_spill] sm:$0xff] }
 0x5c5   : > { %v10468_v8 = vmul.f32 0.0078125, %v2786_v59  ;;  %v2755_v2 = vadd.f32 %v12488_v1, %v12487_v20  ;;  %v12491_v59 = vsub.f32 %v10326_v62, %v9896_v9  ;;  %v2913_v24 = vmul.f32 0.0078125, %v2753_v34  ;;  %v12496_v13 = vld [vmem:[#allocation58_spill] sm:$0xff] }
 0x5c6   : > { %v3129_v60 = vadd.f32 1e-05, %v12489_v35  ;;  %v10480_v46 = vmul.f32 0.0078125, %v2785_v5  ;;  %v2584_v44 = vpop.xlane.xlu1 %2583  ;;  %v12494_v21 = vsub.f32 %v10343_v55, %v9903_v17  ;;  %v12495_v35 = vld [vmem:[#allocation155_spill] sm:$0xff]  ;;  %v2916_v6 = vmul.f32 0.0078125, %v2756_v26  ;;  %v12502_v26 = vld [vmem:[#allocation158_spill] sm:$0xff] }
 0x5c7   : > { %v3127_v48 = vadd.f32 1e-05, %v12491_v59  ;;  %v2788_v20 = vadd.f32 %v2584_v44, %v12493_v63  ;;  %v2581_v1 = vpop.xlane.xlu0 %2580  ;;  %v12497_v9 = vsub.f32 %v10319_v37, %v9894_v15  ;;  %v10500_v63 = vmul.f32 %v9783_v38, %v2912_v43  ;;  %v12499_v44 = vld [vmem:[#allocation101_spill] sm:$0xff]  ;;  %v10530_v43 = vpop.f32.mrb[12].mxu1  ;;  %v10539_v15 = vld [vmem:[#allocation7] ss:$0 sm:$0xff] }
 0x5c8   : > { %v3130_v0 = vadd.f32 1e-05, %v12494_v21  ;;  %v2787_v53 = vadd.f32 %v2581_v1, %v12496_v13  ;;  %v2915_v34 = vmul.f32 0.0078125, %v2755_v2  ;;  %v2757_v17 = vadd.f32 %v12500_v56, %v12499_v44  ;;  %v12503_v37 = vld [vmem:[#allocation17_spill] sm:$0xff]  ;;  %v12505_v56 = vld [vmem:[#allocation50_spill] sm:$0xff]  ;;  %12508 = vst [vmem:[#allocation195_spill] sm:$0xff] %v10530_v43 }
 0x5c9   : > { %v3128_v62 = vadd.f32 1e-05, %v12497_v9  ;;  %v10497_v59 = vmul.f32 0.0078125, %v2788_v20  ;;  %12498 = vst [vmem:[#allocation320_spill] sm:$0xff] %v10500_v63  ;;  %5113 = vrsqrt.f32 %v3129_v60  ;;  %v10506_v5 = vmul.f32 %v2914_v31, %v2914_v31 }
 0x5ca   : > { %v10504_v55 = vmul.f32 0.0078125, %v2787_v53  ;;  %v2590_v21 = vpop.xlane.xlu1 %2589  ;;  %5115 = vrsqrt.f32 %v3127_v48  ;;  %v10511_v1 = vmul.f32 %v2913_v24, %v2913_v24  ;;  %v10519_v53 = vmul.f32 %v9783_v38, %v2913_v24 }
 0x5cb   : > { %12501 = vst [vmem:[#allocation193_spill] sm:$0xff] %v10506_v5  ;;  %v2790_v13 = vadd.f32 %v2590_v21, %v12503_v37  ;;  %v2587_v20 = vpop.xlane.xlu0 %2586  ;;  %5117 = vrsqrt.f32 %v3130_v0  ;;  %v10522_v48 = vmul.f32 %v9783_v38, %v2914_v31  ;;  %v10524_v9 = vmul.f32 %v2916_v6, %v2916_v6  ;;  %v10537_v31 = vpop.f32.mrb[13].mxu1  ;;  %v12530_v5 = vld [vmem:[#allocation184_spill] sm:$0xff] }
 0x5cc   : > { %12504 = vst [vmem:[#allocation321_spill] sm:$0xff] %v10511_v1  ;;  %v2789_v2 = vadd.f32 %v2587_v20, %v12505_v56  ;;  %5119 = vrsqrt.f32 %v3128_v62  ;;  %v10526_v44 = vmul.f32 %v2915_v34, %v2915_v34  ;;  %v2917_v21 = vmul.f32 0.0078125, %v2757_v17  ;;  %v12509_v20 = vld [vmem:[#allocation162_spill] sm:$0xff]  ;;  %12511 = vst [vmem:[#allocation323_spill] sm:$0xff] %v10537_v31  ;;  %v10552_v24 = vpop.f32.mrb[14].mxu1 }
 0x5cd   : > { %v10516_v60 = vmul.f32 0.0078125, %v2790_v13  ;;  %12506 = vst [vmem:[#allocation194_spill] sm:$0xff] %v10524_v9  ;;  %v12510_v13 = vld [vmem:[#allocation51_spill] sm:$0xff]  ;;  %v10542_v17 = vmul.f32 %v10539_v15, %v2915_v34  ;;  %v12515_v1 = vld [vmem:[#allocation18_spill] sm:$0xff]  ;;  %12516 = vst [vmem:[#allocation169_spill] sm:$0xff] %v10552_v24  ;;  %v3935_v24 = vpop.f32.mrb[13].mxu0 }
 0x5ce   : > { %12507 = vst [vmem:[#allocation322_spill] sm:$0xff] %v10526_v44  ;;  %v10528_v0 = vmul.f32 0.0078125, %v2789_v2  ;;  %v2596_v37 = vpop.xlane.xlu1 %2595  ;;  %v12513_v2 = vsub.f32 %v10383_v3, %v9938_v45  ;;  %v12514_v9 = vld [vmem:[#allocation287_spill] sm:$0xff]  ;;  %v3131_v43 = vadd.f32 1e-05, %v12517_v18  ;;  %v10561_v3 = vpop.f32.mrb[15].mxu1  ;;  %v10573_v18 = vmul.f32 %v10539_v15, %v2917_v21 }
 0x5cf   : > { %v2792_v56 = vadd.f32 %v2596_v37, %v12510_v13  ;;  %v2593_v38 = vpop.xlane.xlu0 %2592  ;;  %12512 = vst [vmem:[#allocation298_spill] sm:$0xff] %v10542_v17  ;;  %12519 = vst [vmem:[#allocation170_spill] sm:$0xff] %v10561_v3 }
 0x5d0   : > { %v3132_v44 = vadd.f32 1e-05, %v12513_v2  ;;  %v2791_v37 = vadd.f32 %v2593_v38, %v12515_v1  ;;  %v10564_v2 = vmul.f32 %v10539_v15, %v2916_v6  ;;  %v10566_v1 = vmul.f32 %v2917_v21, %v2917_v21  ;;  %12523 = vst [vmem:[#allocation173_spill] sm:$0xff] %v10573_v18  ;;  %v12527_v6 = vld [vmem:[#allocation16_spill] sm:$0xff]  ;;  %v12531_v18 = vld [vmem:[#allocation38_spill] sm:$0xff] }
 0x5d1   : > { %v10557_v34 = vmul.f32 0.0078125, %v2792_v56  ;;  %v10576_v56 = vmul.f32 0.0078125, %v12524_v16  ;;  %v4225_v11 = vsub.f32 %v3935_v24, %v12531_v18  ;;  %v4914_v16 = vpop.f32.mrb[14].mxu0 }
 0x5d2   : > { %12520 = vst [vmem:[#allocation301_spill] sm:$0xff] %v10564_v2  ;;  %12521 = vst [vmem:[#allocation302_spill] sm:$0xff] %v10566_v1  ;;  %v10568_v38 = vmul.f32 0.0078125, %v2791_v37  ;;  %v2602_v62 = vpop.xlane.xlu1 %2601  ;;  %v4227_v1 = vsub.f32 %v4913_v57, %v12528_v14  ;;  %5121 = vrsqrt.f32 %v3132_v44  ;;  %v3938_v14 = vpop.f32.mrb[15].mxu0  ;;  %v12534_v44 = vsub.f32 %v10416_v22, %v9960_v32 }
 0x5d3   : > { %12518 = vst [vmem:[#allocation59_spill] sm:$0xff] %v10557_v34  ;;  %12525 = vst [vmem:[#allocation61_spill] sm:$0xff] %v10576_v56  ;;  %v2794_v2 = vadd.f32 %v2602_v62, %v12527_v6  ;;  %v2599_v37 = vpop.xlane.xlu0 %2598  ;;  %v5114_v47 = vpop.eup %5113  ;;  %5123 = vrsqrt.f32 %v3131_v43  ;;  %v12533_v62 = vld [vmem:[#allocation41_spill] sm:$0xff]  ;;  %v12537_v43 = vsub.f32 %v10421_v39, %v12471_v49  ;;  %v12541_v49 = vsub.f32 %v10461_v36, %v12490_v7 }
 0x5d4   : > { %12522 = vst [vmem:[#allocation60_spill] sm:$0xff] %v10568_v38  ;;  %v2793_v21 = vadd.f32 %v2599_v37, %v12530_v5  ;;  %v5116_v3 = vpop.eup %5115  ;;  %v4291_v17 = vmul.f32 %v5114_v47, %v4227_v1  ;;  %v4228_v6 = vsub.f32 %v4914_v16, %v12533_v62  ;;  %v3134_v45 = vadd.f32 1e-05, %v12534_v44  ;;  %v12536_v37 = vld [vmem:[#allocation39_spill] sm:$0xff]  ;;  %v12578_v38 = vld [vmem:[#allocation153_spill] sm:$0xff] }
 0x5d5   : > { %v10586_v63 = vmul.f32 0.0078125, %v2794_v2  ;;  %v5118_v57 = vpop.eup %5117  ;;  %v4289_v5 = vmul.f32 %v5116_v3, %v4225_v11  ;;  %v4226_v24 = vsub.f32 %v3938_v14, %v12536_v37  ;;  %v3133_v47 = vadd.f32 1e-05, %v12537_v43  ;;  %v12543_v37 = vld [vmem:[#allocation109_spill] sm:$0xff]  ;;  %v12572_v1 = vld [vmem:[#allocation259_spill] sm:$0xff] }
 0x5d6   : > { %v10592_v31 = vmul.f32 0.0078125, %v2793_v21  ;;  %v2608_v18 = vpop.xlane.xlu1 %2607  ;;  %v5120_v34 = vpop.eup %5119  ;;  %v4362_v16 = vadd.f32 %v10273_v50, %v4291_v17  ;;  %v4292_v32 = vmul.f32 %v5118_v57, %v4228_v6  ;;  %v12539_v21 = vsub.f32 %v10450_v25, %v12485_v52  ;;  %v12542_v6 = vld [vmem:[#allocation66_spill] sm:$0xff]  ;;  %v12544_v25 = vld [vmem:[#allocation161_spill] sm:$0xff]  ;;  %v12577_v2 = vld [vmem:[#allocation23_spill] sm:$0xff] }
 0x5d7   : > { %12532 = vst [vmem:[#allocation174_spill] sm:$0xff] %v10586_v63  ;;  %v2605_v22 = vpop.xlane.xlu0 %2604  ;;  %v4360_v14 = vadd.f32 %v10273_v50, %v4289_v5  ;;  %v4290_v39 = vmul.f32 %v5120_v34, %v4226_v24  ;;  %v3135_v44 = vadd.f32 1e-05, %v12541_v49  ;;  %v2796_v57 = vadd.f32 %v2608_v18, %v12542_v6 }
 0x5d8   : > { %12535 = vst [vmem:[#allocation305_spill] sm:$0xff] %v10592_v31  ;;  %v3136_v11 = vadd.f32 1e-05, %v12539_v21  ;;  %4426 = vst.msk [vmem:[%s10296_s22 + $0x70] sm:$0xff] %vm3627_vm1, %v4362_v16  ;;  %v4363_v17 = vadd.f32 %v10273_v50, %v4292_v32  ;;  %v2795_v52 = vadd.f32 %v2605_v22, %v12543_v37  ;;  %v2918_v43 = vmul.f32 0.0078125, %v12544_v25  ;;  %v12546_v16 = vld [vmem:[#allocation290_spill] sm:$0xff] }
 0x5d9   : > { %5125 = vrsqrt.f32 %v3134_v45  ;;  %v12545_v5 = vsub.f32 %v10468_v8, %v12492_v42  ;;  %4424 = vst.msk [vmem:[%s10296_s22 + $0x60] sm:$0xff] %vm3627_vm1, %v4360_v14  ;;  %v4361_v7 = vadd.f32 %v10273_v50, %v4290_v39  ;;  %v2956_v24 = vmul.f32 0.0078125, %v2796_v57  ;;  %v12547_v21 = vld [vmem:[#allocation284_spill] sm:$0xff]  ;;  %v12550_v45 = vld [vmem:[#allocation114_spill] sm:$0xff] }
 0x5da   : > { %v2614_v36 = vpop.xlane.xlu1 %2613  ;;  %5127 = vrsqrt.f32 %v3133_v47  ;;  %4427 = vst.msk [vmem:[%s10296_s22 + $0x78] sm:$0xff] %vm3627_vm1, %v4363_v17  ;;  %v2955_v18 = vmul.f32 0.0078125, %v2795_v52  ;;  %v10626_v49 = vmul.f32 0.0078125, %v12547_v21  ;;  %v12549_v8 = vsub.f32 %v10480_v46, %v12495_v35  ;;  %v12551_v47 = vld [vmem:[#allocation292_spill] sm:$0xff] }
 0x5db   : > { %v3138_v34 = vadd.f32 1e-05, %v12545_v5  ;;  %v2798_v32 = vadd.f32 %v2614_v36, %v12546_v16  ;;  %v2611_v22 = vpop.xlane.xlu0 %2610  ;;  %5129 = vrsqrt.f32 %v3136_v11  ;;  %4425 = vst.msk [vmem:[%s10296_s22 + $0x68] sm:$0xff] %vm3627_vm1, %v4361_v7  ;;  %v3084_v39 = vsub.f32 %v2956_v24, %v12551_v47  ;;  %v12552_v17 = vld [vmem:[#allocation168_spill] sm:$0xff] }
 0x5dc   : > { %12548 = vst [vmem:[#allocation306_spill] sm:$0xff] %v10626_v49  ;;  %v3137_v42 = vadd.f32 1e-05, %v12549_v8  ;;  %v2797_v14 = vadd.f32 %v2611_v22, %v12550_v45  ;;  %5131 = vrsqrt.f32 %v3135_v44  ;;  %v3083_v6 = vsub.f32 %v2955_v18, %v12552_v17  ;;  %v10636_v37 = vpop.eup %5121  ;;  %v12553_v7 = vld [vmem:[#allocation296_spill] sm:$0xff]  ;;  %v12555_v22 = vld [vmem:[#allocation171_spill] sm:$0xff]  ;;  %v12556_v8 = vld [vmem:[#allocation53_spill] sm:$0xff] }
 0x5dd   : > { %v2958_v57 = vmul.f32 0.0078125, %v2798_v32  ;;  %v10640_v52 = vmul.f32 %v10576_v56, %v10576_v56  ;;  %v10642_v11 = vmul.f32 %v2918_v43, %v2918_v43  ;;  %5133 = vrsqrt.f32 %v3138_v34  ;;  %v10644_v25 = vpop.eup %5123  ;;  %v12554_v24 = vld [vmem:[#allocation52_spill] sm:$0xff] }
 0x5de   : > { %v2957_v46 = vmul.f32 0.0078125, %v2797_v14  ;;  %v2620_v35 = vpop.xlane.xlu1 %2619  ;;  %v3148_v5 = vadd.f32 1e-05, %v3084_v39  ;;  %v3147_v44 = vadd.f32 1e-05, %v3083_v6  ;;  %v10650_v32 = vmul.f32 %v10626_v49, %v10626_v49  ;;  %v12573_v49 = vld [vmem:[#allocation272_spill] sm:$0xff] }
 0x5df   : > { %v3086_v36 = vsub.f32 %v2958_v57, %v12553_v7  ;;  %v2800_v18 = vadd.f32 %v2620_v35, %v12554_v24  ;;  %v2617_v16 = vpop.xlane.xlu0 %2616  ;;  %5135 = vrsqrt.f32 %v3137_v42  ;;  %v12557_v45 = vsub.f32 %v10497_v59, %v12502_v26  ;;  %v12559_v42 = vld [vmem:[#allocation299_spill] sm:$0xff]  ;;  %v12560_v24 = vld [vmem:[#allocation20_spill] sm:$0xff] }
 0x5e0   : > { %v3085_v21 = vsub.f32 %v2957_v46, %v12555_v22  ;;  %v2799_v34 = vadd.f32 %v2617_v16, %v12556_v8  ;;  %5137 = vrsqrt.f32 %v3148_v5  ;;  %v12558_v17 = vsub.f32 %v10504_v55, %v10088_v58  ;;  %v12561_v5 = vld [vmem:[#allocation167_spill] sm:$0xff]  ;;  %v12562_v58 = vld [vmem:[#allocation172_spill] sm:$0xff] }
 0x5e1   : > { %v3140_v14 = vadd.f32 1e-05, %v12557_v45  ;;  %v3150_v47 = vadd.f32 1e-05, %v3086_v36  ;;  %v2960_v39 = vmul.f32 0.0078125, %v2800_v18  ;;  %5139 = vrsqrt.f32 %v3147_v44  ;;  %v12563_v44 = vld [vmem:[#allocation21_spill] sm:$0xff] }
 0x5e2   : > { %v3139_v6 = vadd.f32 1e-05, %v12558_v17  ;;  %v3149_v57 = vadd.f32 1e-05, %v3085_v21  ;;  %v2959_v35 = vmul.f32 0.0078125, %v2799_v34  ;;  %v2626_v7 = vpop.xlane.xlu1 %2625  ;;  %v10663_v59 = vmul.f32 %v10539_v15, %v2918_v43  ;;  %v12576_v56 = vld [vmem:[#allocation180_spill] sm:$0xff] }
 0x5e3   : > { %5141 = vrsqrt.f32 %v3150_v47  ;;  %v3088_v46 = vsub.f32 %v2960_v39, %v12559_v42  ;;  %v2802_v16 = vadd.f32 %v2626_v7, %v12560_v24  ;;  %v2623_v22 = vpop.xlane.xlu0 %2622  ;;  %v10665_v26 = vpop.eup %5125  ;;  %v10668_v36 = vmul.f32 0.0078125, %v12561_v5 }
 0x5e4   : > { %5143 = vrsqrt.f32 %v3149_v57  ;;  %v3087_v55 = vsub.f32 %v2959_v35, %v12562_v58  ;;  %v2801_v18 = vadd.f32 %v2623_v22, %v12563_v44  ;;  %v5128_v21 = vpop.eup %5127  ;;  %v12564_v8 = vsub.f32 %v10516_v60, %v12509_v20  ;;  %v10680_v42 = vpop.f32.mrb[16].mxu1  ;;  %v12567_v20 = vld [vmem:[#allocation54_spill] sm:$0xff]  ;;  %v12569_v58 = vld [vmem:[#allocation55_spill] sm:$0xff] }
 0x5e5   : > { %5145 = vrsqrt.f32 %v3140_v14  ;;  %v3152_v45 = vadd.f32 1e-05, %v3088_v46  ;;  %v2962_v47 = vmul.f32 0.0078125, %v2802_v16  ;;  %v10675_v43 = vpop.eup %5129  ;;  %v12565_v39 = vsub.f32 %v10528_v0, %v12514_v9  ;;  %v12566_v14 = vld [vmem:[#allocation175_spill] sm:$0xff]  ;;  %v10688_v22 = vpop.f32.mrb[17].mxu1  ;;  %v12568_v0 = vld [vmem:[#allocation176_spill] sm:$0xff] }
 0x5e6   : > { %v3142_v34 = vadd.f32 1e-05, %v12564_v8  ;;  %5147 = vrsqrt.f32 %v3139_v6  ;;  %v3151_v57 = vadd.f32 1e-05, %v3087_v55  ;;  %v2961_v7 = vmul.f32 0.0078125, %v2801_v18  ;;  %v2632_v35 = vpop.xlane.xlu1 %2631  ;;  %v10682_v24 = vpop.eup %5131 }
 0x5e7   : > { %v3141_v17 = vadd.f32 1e-05, %v12565_v39  ;;  %5149 = vrsqrt.f32 %v3152_v45  ;;  %v3090_v60 = vsub.f32 %v2962_v47, %v12566_v14  ;;  %v2804_v46 = vadd.f32 %v2632_v35, %v12567_v20  ;;  %v2629_v6 = vpop.xlane.xlu0 %2628  ;;  %v10690_v9 = vpop.eup %5133 }
 0x5e8   : > { %5151 = vrsqrt.f32 %v3151_v57  ;;  %v3089_v5 = vsub.f32 %v2961_v7, %v12568_v0  ;;  %v2803_v55 = vadd.f32 %v2629_v6, %v12569_v58  ;;  %v10696_v18 = vpop.f32.mrb[18].mxu1  ;;  %v4917_v6 = vpop.f32.mrb[16].mxu0 }
 0x5e9   : > { %5153 = vrsqrt.f32 %v3142_v34  ;;  %v3154_v8 = vadd.f32 1e-05, %v3090_v60  ;;  %v2964_v45 = vmul.f32 0.0078125, %v2804_v46  ;;  %v10700_v39 = vpop.f32.mrb[19].mxu1  ;;  %v10702_v35 = vpop.eup %5135  ;;  %v12570_v34 = vld [vmem:[#allocation179_spill] sm:$0xff]  ;;  %v12571_v46 = vld [vmem:[#allocation22_spill] sm:$0xff]  ;;  %v4231_v62 = vsub.f32 %v4917_v6, %v12572_v1 }
 0x5ea   : > { %5155 = vrsqrt.f32 %v3141_v17  ;;  %v3153_v57 = vadd.f32 1e-05, %v3089_v5  ;;  %v2963_v7 = vmul.f32 0.0078125, %v2803_v55  ;;  %v2638_v20 = vpop.xlane.xlu1 %2637  ;;  %v5138_v0 = vpop.eup %5137  ;;  %v12574_v17 = vld [vmem:[#allocation271_spill] sm:$0xff] }
 0x5eb   : > { %5157 = vrsqrt.f32 %v3154_v8  ;;  %v3092_v60 = vsub.f32 %v2964_v45, %v12570_v34  ;;  %v2806_v58 = vadd.f32 %v2638_v20, %v12571_v46  ;;  %v2635_v16 = vpop.xlane.xlu0 %2634  ;;  %v3951_v47 = vpop.f32.mrb[17].mxu0  ;;  %v12575_v5 = vsub.f32 %v12573_v49, %v12574_v17  ;;  %v12579_v45 = vld [vmem:[#allocation151_spill] sm:$0xff] }
 0x5ec   : > { %v5140_v44 = vpop.eup %5139  ;;  %5159 = vrsqrt.f32 %v3153_v57  ;;  %v3091_v14 = vsub.f32 %v2963_v7, %v12576_v56  ;;  %v2805_v63 = vadd.f32 %v2635_v16, %v12577_v2  ;;  %v4918_v13 = vpop.f32.mrb[18].mxu0  ;;  %v12580_v34 = vsub.f32 %v12578_v38, %v12579_v45  ;;  %v12582_v57 = vld [vmem:[#allocation268_spill] sm:$0xff] }
 0x5ed   : > { %v4310_v55 = vmul.f32 %v5138_v0, %v12575_v5  ;;  %v5142_v8 = vpop.eup %5141  ;;  %v3156_v46 = vadd.f32 1e-05, %v3092_v60  ;;  %v2966_v1 = vmul.f32 0.0078125, %v2806_v58  ;;  %v4295_v6 = vmul.f32 %v5128_v21, %v4231_v62  ;;  %v3954_v3 = vpop.f32.mrb[19].mxu0  ;;  %v12581_v0 = vld [vmem:[#allocation154_spill] sm:$0xff]  ;;  %v12585_v60 = vld [vmem:[#allocation43_spill] sm:$0xff] }
 0x5ee   : > { %v4309_v20 = vmul.f32 %v5140_v44, %v12580_v34  ;;  %v5144_v31 = vpop.eup %5143  ;;  %v12583_v17 = vsub.f32 %v12581_v0, %v12582_v57  ;;  %v3155_v7 = vadd.f32 1e-05, %v3091_v14  ;;  %v2965_v2 = vmul.f32 0.0078125, %v2805_v63  ;;  %v2644_v16 = vpop.xlane.xlu1 %2643  ;;  %v12584_v44 = vld [vmem:[#allocation263_spill] sm:$0xff]  ;;  %v12589_v0 = vld [vmem:[#allocation149_spill] sm:$0xff] }
 0x5ef   : > { %v4381_v49 = vadd.f32 %v10273_v50, %v4310_v55  ;;  %v10721_v5 = vpop.eup %5145  ;;  %v12586_v58 = vsub.f32 %v12584_v44, %v12585_v60  ;;  %5161 = vrsqrt.f32 %v3156_v46  ;;  %v3094_v21 = vsub.f32 %v2966_v1, %v10194_v10  ;;  %v2641_v55 = vpop.xlane.xlu0 %2640  ;;  %v12588_v46 = vld [vmem:[#allocation146_spill] sm:$0xff]  ;;  %v12593_v44 = vld [vmem:[#allocation255_spill] sm:$0xff] }
 0x5f0   : > { %v4312_v56 = vmul.f32 %v5142_v8, %v12583_v17  ;;  %v4380_v38 = vadd.f32 %v10273_v50, %v4309_v20  ;;  %v10728_v45 = vpop.eup %5147  ;;  %5163 = vrsqrt.f32 %v3155_v7  ;;  %v4366_v14 = vadd.f32 %v10273_v50, %v4295_v6  ;;  %v12587_v8 = vld [vmem:[#allocation308_spill] sm:$0xff] }
 0x5f1   : > { %v4311_v62 = vmul.f32 %v5144_v31, %v12586_v58  ;;  %4445 = vst.msk [vmem:[%s10296_s22 + $0x108] sm:$0xff] %vm3627_vm1, %v4381_v49  ;;  %v3093_v34 = vsub.f32 %v2965_v2, %v12587_v8  ;;  %v5150_v20 = vpop.eup %5149  ;;  %v3158_v10 = vadd.f32 1e-05, %v3094_v21  ;;  %v4229_v1 = vsub.f32 %v3951_v47, %v12588_v46  ;;  %v12590_v49 = vld [vmem:[#allocation314_spill] sm:$0xff]  ;;  %v12596_v47 = vld [vmem:[#allocation300_spill] sm:$0xff] }
 0x5f2   : > { %v4383_v63 = vadd.f32 %v10273_v50, %v4312_v56  ;;  %4444 = vst.msk [vmem:[%s10296_s22 + $0x100] sm:$0xff] %vm3627_vm1, %v4380_v38  ;;  %v4232_v57 = vsub.f32 %v4918_v13, %v12589_v0  ;;  %v5152_v17 = vpop.eup %5151  ;;  %v12591_v56 = vld [vmem:[#allocation303_spill] sm:$0xff]  ;;  %4430 = vst.msk [vmem:[%s10296_s22 + $0x90] sm:$0xff] %vm3627_vm1, %v4366_v14  ;;  %v4230_v60 = vsub.f32 %v3954_v3, %v12593_v44  ;;  %v12594_v38 = vld [vmem:[#allocation293_spill] sm:$0xff] }
 0x5f3   : > { %v4382_v31 = vadd.f32 %v10273_v50, %v4311_v62  ;;  %v12592_v7 = vsub.f32 %v12590_v49, %v12591_v56  ;;  %v3157_v2 = vadd.f32 1e-05, %v3093_v34  ;;  %v2808_v58 = vadd.f32 %v2644_v16, %v12594_v38  ;;  %v2650_v62 = vpop.xlane.xlu1 %2649  ;;  %v10749_v21 = vpop.eup %5153  ;;  %v12595_v13 = vld [vmem:[#allocation311_spill] sm:$0xff]  ;;  %v12599_v49 = vld [vmem:[#allocation186_spill] sm:$0xff] }
 0x5f4   : > { %4447 = vst.msk [vmem:[%s10296_s22 + $0x118] sm:$0xff] %vm3627_vm1, %v4383_v63  ;;  %v12597_v8 = vsub.f32 %v12595_v13, %v12596_v47  ;;  %5165 = vrsqrt.f32 %v3158_v10  ;;  %v4296_v14 = vmul.f32 %v10665_v26, %v4232_v57  ;;  %v2647_v34 = vpop.xlane.xlu0 %2646  ;;  %v10758_v46 = vpop.eup %5155  ;;  %v4294_v16 = vmul.f32 %v10636_v37, %v4230_v60  ;;  %v12598_v26 = vld [vmem:[#allocation217_spill] sm:$0xff]  ;;  %v12600_v56 = vld [vmem:[#allocation307_spill] sm:$0xff]  ;;  %v12603_v60 = vld [vmem:[#allocation112_spill] sm:$0xff] }
 0x5f5   : > { %v4314_v6 = vmul.f32 %v5150_v20, %v12592_v7  ;;  %4446 = vst.msk [vmem:[%s10296_s22 + $0x110] sm:$0xff] %vm3627_vm1, %v4382_v31  ;;  %v4293_v20 = vmul.f32 %v10644_v25, %v4229_v1  ;;  %5167 = vrsqrt.f32 %v3157_v2  ;;  %v2968_v31 = vmul.f32 0.0078125, %v2808_v58  ;;  %v5158_v0 = vpop.eup %5157  ;;  %v12602_v2 = vld [vmem:[#allocation310_spill] sm:$0xff]  ;;  %v12604_v13 = vld [vmem:[#allocation183_spill] sm:$0xff]  ;;  %v12605_v47 = vld [vmem:[#allocation304_spill] sm:$0xff] }
 0x5f6   : > { %v4313_v63 = vmul.f32 %v5152_v17, %v12597_v8  ;;  %v4367_v25 = vadd.f32 %v10273_v50, %v4296_v14  ;;  %v2807_v1 = vadd.f32 %v2641_v55, %v12598_v26  ;;  %v5160_v57 = vpop.eup %5159  ;;  %v12601_v7 = vsub.f32 %v12599_v49, %v12600_v56  ;;  %v12609_v26 = vld [vmem:[#allocation57_spill] sm:$0xff] }
 0x5f7   : > { %v4385_v3 = vadd.f32 %v10273_v50, %v4314_v6  ;;  %v4364_v10 = vadd.f32 %v10273_v50, %v4293_v20  ;;  %v4365_v6 = vadd.f32 %v10273_v50, %v4294_v16  ;;  %v3096_v44 = vsub.f32 %v2968_v31, %v12602_v2  ;;  %v2656_v58 = vpop.xlane.xlu1 %2655  ;;  %v12607_v20 = vld [vmem:[#allocation166_spill] sm:$0xff] }
 0x5f8   : > { %v4384_v17 = vadd.f32 %v10273_v50, %v4313_v63  ;;  %v4316_v37 = vmul.f32 %v5158_v0, %v12601_v7  ;;  %v2810_v38 = vadd.f32 %v2650_v62, %v12603_v60  ;;  %v12606_v55 = vsub.f32 %v12604_v13, %v12605_v47  ;;  %4431 = vst.msk [vmem:[%s10296_s22 + $0x98] sm:$0xff] %vm3627_vm1, %v4367_v25  ;;  %v2653_v31 = vpop.xlane.xlu0 %2652  ;;  %v12610_v25 = vld [vmem:[#allocation187_spill] sm:$0xff] }
 0x5f9   : > { %4449 = vst.msk [vmem:[%s10296_s22 + $0x128] sm:$0xff] %vm3627_vm1, %v4385_v3  ;;  %4428 = vst.msk [vmem:[%s10296_s22 + $0x80] sm:$0xff] %vm3627_vm1, %v4364_v10  ;;  %v2967_v63 = vmul.f32 0.0078125, %v2807_v1  ;;  %v2809_v14 = vadd.f32 %v2647_v34, %v12607_v20  ;;  %v12608_v3 = vld [vmem:[#allocation56_spill] sm:$0xff]  ;;  %v3160_v0 = vadd.f32 1e-05, %v3096_v44  ;;  %v5162_v49 = vpop.eup %5161 }
 0x5fa   : > { %4448 = vst.msk [vmem:[%s10296_s22 + $0x120] sm:$0xff] %vm3627_vm1, %v4384_v17  ;;  %v4315_v8 = vmul.f32 %v5160_v57, %v12606_v55  ;;  %v2812_v16 = vadd.f32 %v2656_v58, %v12608_v3  ;;  %v4387_v62 = vadd.f32 %v10273_v50, %v4316_v37  ;;  %4429 = vst.msk [vmem:[%s10296_s22 + $0x88] sm:$0xff] %vm3627_vm1, %v4365_v6  ;;  %v2970_v17 = vmul.f32 0.0078125, %v2810_v38  ;;  %v5164_v34 = vpop.eup %5163  ;;  %v12612_v6 = vld [vmem:[#allocation316_spill] sm:$0xff] }
 0x5fb   : > { %v2811_v57 = vadd.f32 %v2653_v31, %v12609_v26  ;;  %v3095_v56 = vsub.f32 %v2967_v63, %v12610_v25  ;;  %v2969_v1 = vmul.f32 0.0078125, %v2809_v14  ;;  %v12611_v37 = vsub.f32 %v10386_v28, %v10202_v19  ;;  %v2662_v38 = vpop.xlane.xlu1 %2661  ;;  %v12614_v14 = vld [vmem:[#allocation24_spill] sm:$0xff]  ;;  %v12618_v25 = vld [vmem:[#allocation25_spill] sm:$0xff] }
 0x5fc   : > { %v4386_v10 = vadd.f32 %v10273_v50, %v4315_v8  ;;  %v2972_v7 = vmul.f32 0.0078125, %v2812_v16  ;;  %4451 = vst.msk [vmem:[%s10296_s22 + $0x138] sm:$0xff] %vm3627_vm1, %v4387_v62  ;;  %5169 = vrsqrt.f32 %v3160_v0  ;;  %v3098_v44 = vsub.f32 %v2970_v17, %v12612_v6  ;;  %v2659_v63 = vpop.xlane.xlu0 %2658 }
 0x5fd   : > { %v4318_v2 = vmul.f32 %v5162_v49, %v12611_v37  ;;  %v2971_v60 = vmul.f32 0.0078125, %v2811_v57  ;;  %v12613_v58 = vsub.f32 %v10370_v61, %v10188_v30  ;;  %v3159_v47 = vadd.f32 1e-05, %v3095_v56  ;;  %v12616_v57 = vld [vmem:[#allocation182_spill] sm:$0xff] }
 0x5fe   : > { %4450 = vst.msk [vmem:[%s10296_s22 + $0x130] sm:$0xff] %vm3627_vm1, %v4386_v10  ;;  %v3097_v55 = vsub.f32 %v2969_v1, %v10288_v4  ;;  %v3100_v8 = vsub.f32 %v2972_v7, %v10347_v51  ;;  %v3162_v28 = vadd.f32 1e-05, %v3098_v44  ;;  %v2814_v3 = vadd.f32 %v2662_v38, %v12614_v14  ;;  %v5166_v16 = vpop.eup %5165  ;;  %v12619_v1 = vld [vmem:[#allocation26_spill] sm:$0xff] }
 0x5ff   : > { %v4317_v13 = vmul.f32 %v5164_v34, %v12613_v58  ;;  %v4389_v19 = vadd.f32 %v10273_v50, %v4318_v2  ;;  %v3099_v20 = vsub.f32 %v2971_v60, %v10349_v29  ;;  %5171 = vrsqrt.f32 %v3159_v47  ;;  %v5168_v62 = vpop.eup %5167  ;;  %v2668_v26 = vpop.xlane.xlu1 %2667  ;;  %v12620_v37 = vld [vmem:[#allocation190_spill] sm:$0xff]  ;;  %v12621_v47 = vld [vmem:[#allocation27_spill] sm:$0xff] }
 0x600   : > { %v3161_v30 = vadd.f32 1e-05, %v3097_v55  ;;  %v3164_v61 = vadd.f32 1e-05, %v3100_v8  ;;  %v12615_v4 = vsub.f32 %v10377_v23, %v10213_v41  ;;  %5173 = vrsqrt.f32 %v3162_v28  ;;  %v10813_v29 = vpop.f32.mrb[20].mxu1  ;;  %v2665_v41 = vpop.xlane.xlu0 %2664  ;;  %v12622_v8 = vld [vmem:[#allocation192_spill] sm:$0xff] }
 0x601   : > { %v4388_v31 = vadd.f32 %v10273_v50, %v4317_v13  ;;  %4453 = vst.msk [vmem:[%s10296_s22 + $0x148] sm:$0xff] %vm3627_vm1, %v4389_v19  ;;  %v3163_v0 = vadd.f32 1e-05, %v3099_v20  ;;  %v2974_v17 = vmul.f32 0.0078125, %v2814_v3  ;;  %v12617_v49 = vsub.f32 %v10358_v27, %v12616_v57  ;;  %v10822_v23 = vpop.f32.mrb[21].mxu1  ;;  %v4921_v20 = vpop.f32.mrb[20].mxu0 }
 0x602   : > { %v4320_v51 = vmul.f32 %v5166_v16, %v12615_v4  ;;  %5175 = vrsqrt.f32 %v3161_v30  ;;  %v2813_v56 = vadd.f32 %v2659_v63, %v12618_v25  ;;  %v2816_v7 = vadd.f32 %v2668_v26, %v12619_v1  ;;  %v10828_v27 = vpop.f32.mrb[22].mxu1  ;;  %v12624_v3 = vld [vmem:[#allocation191_spill] sm:$0xff]  ;;  %v12627_v26 = vld [vmem:[#allocation156_spill] sm:$0xff] }
 0x603   : > { %4452 = vst.msk [vmem:[%s10296_s22 + $0x140] sm:$0xff] %vm3627_vm1, %v4388_v31  ;;  %v4319_v10 = vmul.f32 %v5168_v62, %v12617_v49  ;;  %5177 = vrsqrt.f32 %v3164_v61  ;;  %v3102_v2 = vsub.f32 %v2974_v17, %v12620_v37  ;;  %v4267_v6 = vsub.f32 %v10813_v29, %v10519_v53  ;;  %v10831_v58 = vpop.f32.mrb[23].mxu1  ;;  %v2674_v28 = vpop.xlane.xlu1 %2673  ;;  %v12625_v31 = vld [vmem:[#allocation320_spill] sm:$0xff]  ;;  %v12628_v49 = vld [vmem:[#allocation29_spill] sm:$0xff] }
 0x604   : > { %v4391_v34 = vadd.f32 %v10273_v50, %v4320_v51  ;;  %5179 = vrsqrt.f32 %v3163_v0  ;;  %v2973_v60 = vmul.f32 0.0078125, %v2813_v56  ;;  %v2976_v38 = vmul.f32 0.0078125, %v2816_v7  ;;  %v12626_v61 = vld [vmem:[#allocation28_spill] sm:$0xff]  ;;  %v2671_v4 = vpop.xlane.xlu0 %2670  ;;  %v3967_v51 = vpop.f32.mrb[21].mxu0  ;;  %v12629_v56 = vld [vmem:[#allocation170_spill] sm:$0xff]  ;;  %v12665_v29 = vld [vmem:[#allocation301_spill] sm:$0xff] }
 0x605   : > { %v4390_v44 = vadd.f32 %v10273_v50, %v4319_v10  ;;  %v3166_v13 = vadd.f32 1e-05, %v3102_v2  ;;  %v2815_v55 = vadd.f32 %v2665_v41, %v12621_v47  ;;  %v4265_v63 = vsub.f32 %v10822_v23, %v12622_v8  ;;  %v12623_v50 = vld [vmem:[#allocation318_spill] sm:$0xff]  ;;  %v4922_v25 = vpop.f32.mrb[22].mxu0  ;;  %v12630_v1 = vld [vmem:[#allocation188_spill] sm:$0xff]  ;;  %v12662_v8 = vld [vmem:[#allocation37_spill] sm:$0xff] }
 0x606   : > { %4455 = vst.msk [vmem:[%s10296_s22 + $0x158] sm:$0xff] %vm3627_vm1, %v4391_v34  ;;  %v4268_v19 = vsub.f32 %v10828_v27, %v10522_v48  ;;  %v3101_v14 = vsub.f32 %v2973_v60, %v12623_v50  ;;  %v3104_v16 = vsub.f32 %v2976_v38, %v12624_v3  ;;  %v4266_v30 = vsub.f32 %v10831_v58, %v12625_v31  ;;  %v5170_v0 = vpop.eup %5169  ;;  %v12632_v60 = vld [vmem:[#allocation319_spill] sm:$0xff] }
 0x607   : > { %4454 = vst.msk [vmem:[%s10296_s22 + $0x150] sm:$0xff] %vm3627_vm1, %v4390_v44  ;;  %v2818_v62 = vadd.f32 %v2674_v28, %v12626_v61  ;;  %5181 = vrsqrt.f32 %v3166_v13  ;;  %v2975_v17 = vmul.f32 0.0078125, %v2815_v55  ;;  %v4235_v57 = vsub.f32 %v4921_v20, %v12627_v26  ;;  %v3970_v44 = vpop.f32.mrb[23].mxu0  ;;  %v12633_v13 = vld [vmem:[#allocation264_spill] sm:$0xff]  ;;  %v2680_v20 = vpop.xlane.xlu1 %2679  ;;  %v10855_v3 = vld [vmem:[#allocation8] ss:$0 sm:$0xff] }
 0x608   : > { %v2817_v10 = vadd.f32 %v2671_v4, %v12628_v49  ;;  %v12631_v7 = vsub.f32 %v12629_v56, %v12630_v1  ;;  %v3165_v34 = vadd.f32 1e-05, %v3101_v14  ;;  %v3168_v37 = vadd.f32 1e-05, %v3104_v16  ;;  %v12634_v4 = vld [vmem:[#allocation193_spill] sm:$0xff]  ;;  %v12635_v16 = vld [vmem:[#allocation276_spill] sm:$0xff] }
 0x609   : > { %v2978_v2 = vmul.f32 0.0078125, %v2818_v62  ;;  %v3103_v38 = vsub.f32 %v2975_v17, %v12632_v60  ;;  %v4299_v47 = vmul.f32 %v10702_v35, %v4235_v57  ;;  %v4233_v55 = vsub.f32 %v3967_v51, %v12633_v13  ;;  %v5172_v50 = vpop.eup %5171  ;;  %v12636_v26 = vld [vmem:[#allocation323_spill] sm:$0xff]  ;;  %v12639_v1 = vld [vmem:[#allocation169_spill] sm:$0xff] }
 0x60a   : > { %v4322_v41 = vmul.f32 %v5170_v0, %v12631_v7  ;;  %v2977_v28 = vmul.f32 0.0078125, %v2817_v10  ;;  %5183 = vrsqrt.f32 %v3165_v34  ;;  %v4236_v62 = vsub.f32 %v4922_v25, %v12635_v16  ;;  %v2677_v0 = vpop.xlane.xlu0 %2676  ;;  %v5174_v17 = vpop.eup %5173  ;;  %v12637_v35 = vld [vmem:[#allocation315_spill] sm:$0xff]  ;;  %v12640_v7 = vld [vmem:[#allocation317_spill] sm:$0xff] }
 0x60b   : > { %v3106_v14 = vsub.f32 %v2978_v2, %v12634_v4  ;;  %v12638_v57 = vsub.f32 %v12636_v26, %v12637_v35  ;;  %5185 = vrsqrt.f32 %v3168_v37  ;;  %v3167_v51 = vadd.f32 1e-05, %v3103_v38  ;;  %v12642_v25 = vld [vmem:[#allocation321_spill] sm:$0xff]  ;;  %v12643_v37 = vld [vmem:[#allocation195_spill] sm:$0xff] }
 0x60c   : > { %v4393_v61 = vadd.f32 %v10855_v3, %v4322_v41  ;;  %v4370_v10 = vadd.f32 %v10855_v3, %v4299_v47  ;;  %v5176_v56 = vpop.eup %5175  ;;  %v12641_v41 = vsub.f32 %v12639_v1, %v12640_v7  ;;  %v3105_v60 = vsub.f32 %v2977_v28, %v12642_v25  ;;  %v12644_v38 = vld [vmem:[#allocation189_spill] sm:$0xff]  ;;  %v12660_v31 = vld [vmem:[#allocation295_spill] sm:$0xff] }
 0x60d   : > { %v4321_v49 = vmul.f32 %v5172_v50, %v12638_v57  ;;  %v3170_v2 = vadd.f32 1e-05, %v3106_v14  ;;  %v4297_v13 = vmul.f32 %v10682_v24, %v4233_v55  ;;  %v5178_v4 = vpop.eup %5177  ;;  %v12645_v16 = vsub.f32 %v12643_v37, %v12644_v38  ;;  %v12652_v25 = vld [vmem:[#allocation33_spill] sm:$0xff]  ;;  %v12654_v37 = vld [vmem:[#allocation34_spill] sm:$0xff] }
 0x60e   : > { %4457 = vst.msk [vmem:[%s10296_s22 + $0x168] sm:$0xff] %vm3627_vm1, %v4393_v61  ;;  %v4324_v34 = vmul.f32 %v5174_v17, %v12641_v41  ;;  %5187 = vrsqrt.f32 %v3167_v51  ;;  %4434 = vst.msk [vmem:[%s10296_s22 + $0xb0] sm:$0xff] %vm3627_vm1, %v4370_v10  ;;  %v4300_v61 = vmul.f32 %v10690_v9, %v4236_v62  ;;  %v2686_v17 = vpop.xlane.xlu1 %2685  ;;  %v5180_v14 = vpop.eup %5179  ;;  %v12646_v24 = vsub.f32 %v10700_v39, %v10412_v40  ;;  %v12648_v51 = vld [vmem:[#allocation152_spill] sm:$0xff] }
 0x60f   : > { %v4392_v50 = vadd.f32 %v10855_v3, %v4321_v49  ;;  %v4323_v47 = vmul.f32 %v5176_v56, %v12645_v16  ;;  %5189 = vrsqrt.f32 %v3170_v2  ;;  %v3169_v55 = vadd.f32 1e-05, %v3105_v60  ;;  %v2683_v35 = vpop.xlane.xlu0 %2682  ;;  %v12649_v56 = vld [vmem:[#allocation30_spill] sm:$0xff] }
 0x610   : > { %v4395_v26 = vadd.f32 %v10855_v3, %v4324_v34  ;;  %v4326_v28 = vmul.f32 %v5178_v4, %v12646_v24  ;;  %v12647_v9 = vsub.f32 %v10688_v22, %v10380_v54  ;;  %v4368_v49 = vadd.f32 %v10855_v3, %v4297_v13  ;;  %v12650_v22 = vld [vmem:[#allocation31_spill] sm:$0xff]  ;;  %v12651_v34 = vld [vmem:[#allocation32_spill] sm:$0xff] }
 0x611   : > { %4456 = vst.msk [vmem:[%s10296_s22 + $0x160] sm:$0xff] %vm3627_vm1, %v4392_v50  ;;  %v4394_v57 = vadd.f32 %v10855_v3, %v4323_v47  ;;  %v4371_v40 = vadd.f32 %v10855_v3, %v4300_v61  ;;  %5191 = vrsqrt.f32 %v3169_v55  ;;  %v4234_v10 = vsub.f32 %v3970_v44, %v12648_v51  ;;  %v5182_v7 = vpop.eup %5181 }
 0x612   : > { %v4325_v62 = vmul.f32 %v5180_v14, %v12647_v9  ;;  %4459 = vst.msk [vmem:[%s10296_s22 + $0x178] sm:$0xff] %vm3627_vm1, %v4395_v26  ;;  %v4397_v39 = vadd.f32 %v10855_v3, %v4326_v28  ;;  %v2820_v1 = vadd.f32 %v2680_v20, %v12649_v56  ;;  %4432 = vst.msk [vmem:[%s10296_s22 + $0xa0] sm:$0xff] %vm3627_vm1, %v4368_v49  ;;  %v2692_v13 = vpop.xlane.xlu1 %2691  ;;  %v12658_v9 = vld [vmem:[#allocation322_spill] sm:$0xff] }
 0x613   : > { %4458 = vst.msk [vmem:[%s10296_s22 + $0x170] sm:$0xff] %vm3627_vm1, %v4394_v57  ;;  %4435 = vst.msk [vmem:[%s10296_s22 + $0xb8] sm:$0xff] %vm3627_vm1, %v4371_v40  ;;  %v2819_v41 = vadd.f32 %v2677_v0, %v12650_v22  ;;  %v2822_v2 = vadd.f32 %v2686_v17, %v12651_v34  ;;  %v2821_v60 = vadd.f32 %v2683_v35, %v12652_v25  ;;  %v2689_v16 = vpop.xlane.xlu0 %2688  ;;  %v12655_v17 = vld [vmem:[#allocation35_spill] sm:$0xff]  ;;  %v12659_v40 = vld [vmem:[#allocation302_spill] sm:$0xff] }
 0x614   : > { %v4396_v54 = vadd.f32 %v10855_v3, %v4325_v62  ;;  %4461 = vst.msk [vmem:[%s10296_s22 + $0x188] sm:$0xff] %vm3627_vm1, %v4397_v39  ;;  %v12653_v44 = vsub.f32 %v10696_v18, %v10442_v33  ;;  %v4298_v4 = vmul.f32 %v10675_v43, %v4234_v10  ;;  %v2980_v50 = vmul.f32 0.0078125, %v2820_v1  ;;  %v5184_v26 = vpop.eup %5183  ;;  %v12656_v18 = vld [vmem:[#allocation194_spill] sm:$0xff] }
 0x615   : > { %v2824_v38 = vadd.f32 %v2692_v13, %v12654_v37  ;;  %v2979_v0 = vmul.f32 0.0078125, %v2819_v41  ;;  %v2982_v47 = vmul.f32 0.0078125, %v2822_v2  ;;  %v2981_v61 = vmul.f32 0.0078125, %v2821_v60  ;;  %v5186_v55 = vpop.eup %5185  ;;  %v12661_v13 = vld [vmem:[#allocation36_spill] sm:$0xff] }
 0x616   : > { %v4328_v20 = vmul.f32 %v5182_v7, %v12653_v44  ;;  %4460 = vst.msk [vmem:[%s10296_s22 + $0x180] sm:$0xff] %vm3627_vm1, %v4396_v54  ;;  %v2823_v14 = vadd.f32 %v2689_v16, %v12655_v17  ;;  %v4369_v33 = vadd.f32 %v10855_v3, %v4298_v4  ;;  %v3108_v43 = vsub.f32 %v2980_v50, %v12656_v18  ;;  %v2698_v56 = vpop.xlane.xlu1 %2697  ;;  %v12663_v50 = vld [vmem:[#allocation173_spill] sm:$0xff] }
 0x617   : > { %v10918_v28 = vmul.f32 0.0078125, %v2824_v38  ;;  %v12657_v35 = vsub.f32 %v10680_v42, %v10434_v12  ;;  %v3107_v62 = vsub.f32 %v2979_v0, %v12658_v9  ;;  %v3110_v49 = vsub.f32 %v2982_v47, %v10642_v11  ;;  %v2695_v41 = vpop.xlane.xlu0 %2694 }
 0x618   : > { %v4399_v24 = vadd.f32 %v10855_v3, %v4328_v20  ;;  %v3109_v39 = vsub.f32 %v2981_v61, %v12659_v40  ;;  %v4330_v51 = vmul.f32 %v5186_v55, %v4266_v30  ;;  %4433 = vst.msk [vmem:[%s10296_s22 + $0xa8] sm:$0xff] %vm3627_vm1, %v4369_v33  ;;  %v3172_v10 = vadd.f32 1e-05, %v3108_v43  ;;  %v5188_v1 = vpop.eup %5187  ;;  %v4957_v20 = vpop.f32.mrb[24].mxu1  ;;  %v12664_v61 = vld [vmem:[#allocation298_spill] sm:$0xff]  ;;  %v12666_v33 = vld [vmem:[#allocation275_spill] sm:$0xff] }
 0x619   : > { %v4327_v57 = vmul.f32 %v5184_v26, %v12657_v35  ;;  %v3112_v12 = vsub.f32 %v10918_v28, %v10650_v32  ;;  %v10935_v42 = vmul.f32 0.0078125, %v2823_v14  ;;  %v3171_v7 = vadd.f32 1e-05, %v3107_v62  ;;  %v5190_v58 = vpop.eup %5189  ;;  %v4111_v27 = vpop.f32.mrb[25].mxu1  ;;  %v12667_v35 = vld [vmem:[#allocation163_spill] sm:$0xff]  ;;  %v12676_v32 = vld [vmem:[#allocation174_spill] sm:$0xff] }
 0x61a   : > { %4463 = vst.msk [vmem:[%s10296_s22 + $0x198] sm:$0xff] %vm3627_vm1, %v4399_v24  ;;  %v3174_v54 = vadd.f32 1e-05, %v3110_v49  ;;  %v3173_v22 = vadd.f32 1e-05, %v3109_v39  ;;  %v10939_v30 = vmul.f32 0.0078125, %v12660_v31  ;;  %v4329_v34 = vmul.f32 %v5188_v1, %v4265_v63 }
 0x61b   : > { %v4398_v11 = vadd.f32 %v10855_v3, %v4327_v57  ;;  %v4401_v2 = vadd.f32 %v10855_v3, %v4330_v51  ;;  %5193 = vrsqrt.f32 %v3172_v10  ;;  %v4332_v25 = vmul.f32 %v5190_v58, %v4268_v19  ;;  %v5192_v4 = vpop.eup %5191  ;;  %v4958_v38 = vpop.f32.mrb[26].mxu1  ;;  %v12668_v62 = vld [vmem:[#allocation279_spill] sm:$0xff] }
 0x61c   : > { %5195 = vrsqrt.f32 %v3171_v7  ;;  %v3111_v60 = vsub.f32 %v10935_v42, %v10640_v52  ;;  %v2826_v44 = vadd.f32 %v2698_v56, %v12661_v13  ;;  %v4400_v23 = vadd.f32 %v10855_v3, %v4329_v34  ;;  %v4114_v14 = vpop.f32.mrb[27].mxu1  ;;  %v4925_v24 = vpop.f32.mrb[24].mxu0  ;;  %v12669_v51 = vld [vmem:[#allocation267_spill] sm:$0xff] }
 0x61d   : > { %4462 = vst.msk [vmem:[%s10296_s22 + $0x190] sm:$0xff] %vm3627_vm1, %v4398_v11  ;;  %4465 = vst.msk [vmem:[%s10296_s22 + $0x1a8] sm:$0xff] %vm3627_vm1, %v4401_v2  ;;  %5197 = vrsqrt.f32 %v3174_v54  ;;  %v2825_v63 = vadd.f32 %v2695_v41, %v12662_v8  ;;  %v4271_v48 = vsub.f32 %v4957_v20, %v12663_v50  ;;  %v3050_v19 = vmul.f32 %v10668_v36, %v10668_v36  ;;  %v3983_v9 = vpop.f32.mrb[25].mxu0  ;;  %v12677_v28 = vld [vmem:[#allocation291_spill] sm:$0xff] }
 0x61e   : > { %v4403_v52 = vadd.f32 %v10855_v3, %v4332_v25  ;;  %v4331_v37 = vmul.f32 %v5192_v4, %v4267_v6  ;;  %5199 = vrsqrt.f32 %v3173_v22  ;;  %v3049_v16 = vmul.f32 %v10939_v30, %v10939_v30  ;;  %4464 = vst.msk [vmem:[%s10296_s22 + $0x1a0] sm:$0xff] %vm3627_vm1, %v4400_v23  ;;  %v4926_v39 = vpop.f32.mrb[26].mxu0 }
 0x61f   : > { %v2986_v0 = vmul.f32 0.0078125, %v2826_v44  ;;  %v2985_v47 = vmul.f32 0.0078125, %v2825_v63  ;;  %v4269_v17 = vsub.f32 %v4111_v27, %v12664_v61  ;;  %v4272_v53 = vsub.f32 %v4958_v38, %v10663_v59  ;;  %v3986_v56 = vpop.f32.mrb[27].mxu0  ;;  %v12674_v38 = vld [vmem:[#allocation164_spill] sm:$0xff]  ;;  %v12679_v61 = vld [vmem:[#allocation59_spill] sm:$0xff] }
 0x620   : > { %4467 = vst.msk [vmem:[%s10296_s22 + $0x1b8] sm:$0xff] %vm3627_vm1, %v4403_v52  ;;  %v4402_v26 = vadd.f32 %v10855_v3, %v4331_v37  ;;  %v4270_v6 = vsub.f32 %v4114_v14, %v12665_v29  ;;  %v4173_v18 = vmul.f32 %v10539_v15, %v12666_v33  ;;  %v4239_v57 = vsub.f32 %v4925_v24, %v12667_v35  ;;  %v12673_v37 = vld [vmem:[#allocation60_spill] sm:$0xff] }
 0x621   : > { %v3114_v43 = vsub.f32 %v2986_v0, %v3050_v19  ;;  %v3113_v55 = vsub.f32 %v2985_v47, %v3049_v16  ;;  %v4176_v49 = vmul.f32 %v10539_v15, %v12668_v62  ;;  %v4174_v59 = vmul.f32 %v10539_v15, %v12669_v51 }
 0x622   : > { %4466 = vst.msk [vmem:[%s10296_s22 + $0x1b0] sm:$0xff] %vm3627_vm1, %v4402_v26  ;;  %v4237_v40 = vsub.f32 %v3983_v9, %v4173_v18  ;;  %v4303_v10 = vmul.f32 %v10758_v46, %v4239_v57  ;;  %v3176_v50 = vadd.f32 1e-05, %v3112_v12  ;;  %v12675_v16 = vsub.f32 %v12673_v37, %v12674_v38  ;;  %v12683_v9 = vld [vmem:[#allocation306_spill] sm:$0xff] }
 0x623   : > { %v4240_v42 = vsub.f32 %v4926_v39, %v4176_v49  ;;  %v4238_v11 = vsub.f32 %v3986_v56, %v4174_v59  ;;  %v3177_v13 = vadd.f32 1e-05, %v3113_v55  ;;  %v3178_v8 = vadd.f32 1e-05, %v3114_v43 }
 0x624   : > { %v4301_v1 = vmul.f32 %v10728_v45, %v4237_v40  ;;  %v4374_v54 = vadd.f32 %v10855_v3, %v4303_v10  ;;  %v3143_v0 = vadd.f32 1e-05, %v12675_v16  ;;  %v12678_v12 = vsub.f32 %v12676_v32, %v12677_v28 }
 0x625   : > { %v5194_v7 = vpop.eup %5193  ;;  %v4304_v22 = vmul.f32 %v10749_v21, %v4240_v42  ;;  %v4302_v34 = vmul.f32 %v10721_v5, %v4238_v11  ;;  %v3175_v5 = vadd.f32 1e-05, %v3111_v60  ;;  %v12670_v60 = vld [vmem:[#allocation305_spill] sm:$0xff]  ;;  %5201 = vrsqrt.f32 %v3177_v13  ;;  %v5433_v11 = vld [vmem:[#allocation7] ss:$0 sm:$0xff] }
 0x626   : > { %v5196_v41 = vpop.eup %5195  ;;  %v4334_v58 = vmul.f32 %v5194_v7, %v4270_v6  ;;  %v4372_v31 = vadd.f32 %v10855_v3, %v4301_v1  ;;  %4438 = vst.msk [vmem:[%s10296_s22 + $0xd0] sm:$0xff] %vm3627_vm1, %v4374_v54  ;;  %v3146_v47 = vadd.f32 1e-05, %v12678_v12  ;;  %v12682_v6 = vld [vmem:[#allocation61_spill] sm:$0xff]  ;;  %v4212_v43 = vmul.f32 %v10539_v15, %v10668_v36  ;;  %v12685_v36 = vld [vmem:[#allocation280_spill] sm:$0xff] }
 0x627   : > { %v5198_v2 = vpop.eup %5197  ;;  %v4333_v46 = vmul.f32 %v5196_v41, %v4269_v17  ;;  %v4375_v45 = vadd.f32 %v10855_v3, %v4304_v22  ;;  %v4373_v20 = vadd.f32 %v10855_v3, %v4302_v34  ;;  %5203 = vrsqrt.f32 %v3175_v5  ;;  %v12680_v17 = vld [vmem:[#allocation288_spill] sm:$0xff] }
 0x628   : > { %v5200_v25 = vpop.eup %5199  ;;  %v4336_v44 = vmul.f32 %v5198_v2, %v4272_v53  ;;  %v4405_v21 = vadd.f32 %v10855_v3, %v4334_v58  ;;  %4436 = vst.msk [vmem:[%s10296_s22 + $0xc0] sm:$0xff] %vm3627_vm1, %v4372_v31  ;;  %5205 = vrsqrt.f32 %v3178_v8  ;;  %v12681_v14 = vsub.f32 %v12679_v61, %v12680_v17  ;;  %v4961_v29 = vpop.f32.mrb[28].mxu1  ;;  %v12686_v34 = vld [vmem:[#allocation160_spill] sm:$0xff] }
 0x629   : > { %v4335_v4 = vmul.f32 %v5200_v25, %v4271_v48  ;;  %v4404_v23 = vadd.f32 %v10855_v3, %v4333_v46  ;;  %4439 = vst.msk [vmem:[%s10296_s22 + $0xd8] sm:$0xff] %vm3627_vm1, %v4375_v45  ;;  %4437 = vst.msk [vmem:[%s10296_s22 + $0xc8] sm:$0xff] %vm3627_vm1, %v4373_v20  ;;  %v12671_v48 = vld [vmem:[#allocation165_spill] sm:$0xff]  ;;  %5207 = vrsqrt.f32 %v3176_v50  ;;  %v4211_v53 = vmul.f32 %v10539_v15, %v10939_v30  ;;  %v4127_v18 = vpop.f32.mrb[29].mxu1  ;;  %v12684_v30 = vld [vmem:[#allocation283_spill] sm:$0xff] }
 0x62a   : > { %v4407_v63 = vadd.f32 %v10855_v3, %v4336_v44  ;;  %4469 = vst.msk [vmem:[%s10296_s22 + $0x1c8] sm:$0xff] %vm3627_vm1, %v4405_v21  ;;  %v12672_v19 = vsub.f32 %v12670_v60, %v12671_v48  ;;  %v3144_v26 = vadd.f32 1e-05, %v12681_v14  ;;  %v4209_v24 = vmul.f32 %v10539_v15, %v12682_v6  ;;  %v4962_v57 = vpop.f32.mrb[30].mxu1  ;;  %v12687_v44 = vld [vmem:[#allocation159_spill] sm:$0xff] }
 0x62b   : > { %v4406_v27 = vadd.f32 %v10855_v3, %v4335_v4  ;;  %4468 = vst.msk [vmem:[%s10296_s22 + $0x1c0] sm:$0xff] %vm3627_vm1, %v4404_v23  ;;  %v4275_v33 = vsub.f32 %v4961_v29, %v4211_v53  ;;  %v4210_v62 = vmul.f32 %v10539_v15, %v12683_v9  ;;  %v4276_v39 = vsub.f32 %v4962_v57, %v4212_v43  ;;  %v4130_v51 = vpop.f32.mrb[31].mxu1 }
 0x62c   : > { %v3145_v52 = vadd.f32 1e-05, %v12672_v19  ;;  %4471 = vst.msk [vmem:[%s10296_s22 + $0x1d8] sm:$0xff] %vm3627_vm1, %v4407_v63  ;;  %v4273_v35 = vsub.f32 %v4127_v18, %v4209_v24  ;;  %v4179_v59 = vmul.f32 %v10539_v15, %v12684_v30  ;;  %v4177_v7 = vmul.f32 %v5433_v11, %v12685_v36 }
 0x62d   : > { %4470 = vst.msk [vmem:[%s10296_s22 + $0x1d0] sm:$0xff] %vm3627_vm1, %v4406_v27  ;;  %v4274_v56 = vsub.f32 %v4130_v51, %v4210_v62  ;;  %v4180_v2 = vmul.f32 %v5433_v11, %v12686_v34  ;;  %v4178_v21 = vmul.f32 %v5433_v11, %v12687_v44 }
 0x62e   : > { %5209 = vrsqrt.f32 %v3145_v52  ;;  %v4929_v1 = vpop.f32.mrb[28].mxu0 }
 0x62f   : > { %5211 = vrsqrt.f32 %v3143_v0  ;;  %v5202_v55 = vpop.eup %5201  ;;  %v4243_v58 = vsub.f32 %v4929_v1, %v4179_v59  ;;  %v3999_v31 = vpop.f32.mrb[29].mxu0 }
 0x630   : > { %5213 = vrsqrt.f32 %v3146_v47  ;;  %v4339_v40 = vmul.f32 %v5202_v55, %v4275_v33  ;;  %v4241_v25 = vsub.f32 %v3999_v31, %v4177_v7  ;;  %v4930_v13 = vpop.f32.mrb[30].mxu0 }
 0x631   : > { %5215 = vrsqrt.f32 %v3144_v26  ;;  %v5204_v49 = vpop.eup %5203  ;;  %v4244_v23 = vsub.f32 %v4930_v13, %v4180_v2  ;;  %v4002_v8 = vpop.f32.mrb[31].mxu0 }
 0x632   : > { %v5206_v10 = vpop.eup %5205  ;;  %v4337_v42 = vmul.f32 %v5204_v49, %v4273_v35  ;;  %v4410_v22 = vadd.f32 %v10855_v3, %v4339_v40  ;;  %v4242_v60 = vsub.f32 %v4002_v8, %v4178_v21 }
 0x633   : > { %v5208_v54 = vpop.eup %5207  ;;  %v4340_v41 = vmul.f32 %v5206_v10, %v4276_v39 }
 0x634   : > { %v4408_v15 = vadd.f32 %v10855_v3, %v4337_v42  ;;  %v4338_v45 = vmul.f32 %v5208_v54, %v4274_v56  ;;  %4474 = vst.msk [vmem:[%s10296_s22 + $0x1f0] sm:$0xff] %vm3627_vm1, %v4410_v22 }
 0x635   : > { %v4411_v5 = vadd.f32 %v10855_v3, %v4340_v41 }
 0x636   : > { %4472 = vst.msk [vmem:[%s10296_s22 + $0x1e0] sm:$0xff] %vm3627_vm1, %v4408_v15  ;;  %v4409_v50 = vadd.f32 %v10855_v3, %v4338_v45 }
 0x637   : > { %4475 = vst.msk [vmem:[%s10296_s22 + $0x1f8] sm:$0xff] %vm3627_vm1, %v4411_v5 }
 0x638   : > { %v5210_v46 = vpop.eup %5209  ;;  %4473 = vst.msk [vmem:[%s10296_s22 + $0x1e8] sm:$0xff] %vm3627_vm1, %v4409_v50 }
 0x639   : > { %v5212_v20 = vpop.eup %5211  ;;  %v4307_v4 = vmul.f32 %v5210_v46, %v4243_v58 }
 0x63a   : > { %v5214_v63 = vpop.eup %5213  ;;  %v4305_v27 = vmul.f32 %v5212_v20, %v4241_v25 }
 0x63b   : > { %v5216_v48 = vpop.eup %5215  ;;  %v4378_v19 = vadd.f32 %v10855_v3, %v4307_v4  ;;  %v4308_v52 = vmul.f32 %v5214_v63, %v4244_v23 }
 0x63c   : > { %v4376_v37 = vadd.f32 %v10855_v3, %v4305_v27  ;;  %v4306_v38 = vmul.f32 %v5216_v48, %v4242_v60 }
 0x63d   : > { %4442 = vst.msk [vmem:[%s10296_s22 + $0xf0] sm:$0xff] %vm3627_vm1, %v4378_v19  ;;  %v4379_v16 = vadd.f32 %v10855_v3, %v4308_v52 }
 0x63e   : > { %4440 = vst.msk [vmem:[%s10296_s22 + $0xe0] sm:$0xff] %vm3627_vm1, %v4376_v37  ;;  %v4377_v0 = vadd.f32 %v10855_v3, %v4306_v38 }
 0x63f   : > { %4443 = vst.msk [vmem:[%s10296_s22 + $0xf8] sm:$0xff] %vm3627_vm1, %v4379_v16 }
 0x640   : > { %4441 = vst.msk [vmem:[%s10296_s22 + $0xe8] sm:$0xff] %vm3627_vm1, %v4377_v0 }
 0x641   : > { %5561 = shalt.err (!%p5558_p0)
}
 0x642   : > { %s5562_s8 = scalar_lea.hbm %s11061_s12, 8192  ;;  %s5566_s25 = scalar_lea.hbm %s11123_s4, 16384 }
 0x643   : > { %p5563_p4 = scmp.ne.s32.totalorder %s11061_s12, %s5562_s8  ;;  %p5567_p12 = scmp.lt.u32.totalorder %s11061_s12, %s11123_s4 }
 0x644   : > { %p5568_p1 = scmp.lt.u32.totalorder %s5566_s25, %s5562_s8  ;;  %p5570_p13 = scmp.lt.u32.totalorder %s5562_s8, %s11061_s12 }
 0x645   : > { %p5564_p2 = pnand %p5563_p4, %p5831_p10 }
 0x646   : > { %p5569_p11 = por %p5568_p1, %p5567_p12 }
 0x647   : > { %p5565_p8 = pneg %p5564_p2 }
 0x648   : > { %p5571_p6 = por %p5570_p13, %p5569_p11 }
 0x64a   : > { %p5572_p3 = pnand %p5571_p6, %p5565_p8 }
 0x64c   : > { %5575 = shalt.err (!%p5572_p3)
}
 0x64d   : > { %s5652_s22 = smov 128   ;;  %s5653_s28 = smov 8  }
 0x64e   : > { %4993 = dma.vmem_to_hbm [thread:$0]  (%p5831_p10), %s11063_s6, 8192, %s11061_s12, %s4477_s13, %s5652_s22, %s5652_s22, %s5653_s28  }
 0x64f PF: > { %s12688_s18 = sld [smem:[#allocation15_spill]]  ;;  %s4509_s7 = sand.u32 1, %s5618_s15  }
 0x650   : > { %p12690_p7 = scmp.ge.s32.totalorder %s5638_s20, 2  ;;  %s4510_s21 = scalar_lea.sflag [#allocation4], %s4509_s7 }
 0x655   : > { %p12689_p5 = scmp.ne.s32.totalorder %s12688_s18, 0 }
 0x657   : > { %p5010_p9 = pnand %p12690_p7, %p12689_p5 }
 0x659   : > { %5613 = dma.done.wait (!%p5010_p9), %s4510_s21, 8192  }
 0x65a   : > { %5615 = vsyncadd (!%p5010_p9), %s4510_s21, 4294959104  ;;  %s22_s20 = sadd.s32 1, %s5638_s20   ;;  %s12691_s15 = smov %s5622_s16 }
 0x65b   : > { %p19_p0 = scmp.ge.s32.totalorder %s22_s20, 4   ;;  %s12692_s16 = smov %s5626_s17 }
 0x65c   : > { %s12693_s17 = smov %s5843_s11  ;;  %s12694_s18 = smov %s5634_s19 }
 0x65d   : > { %s12695_s19 = smov %s12697_s26  ;;  %21 = sbr.rel (!%p19_p0) target bundleno = 8 (0x8), region = 96 }
 0x664   :  { %4515 = vsyncpa [#allocation3], 1 }
 0x665   :  { %4517 = vsyncpa [#allocation3 + $0x1], 1 }
 0x666   :  { %4518 = vsyncpa [#allocation6], 1 }
 0x667   :  { %4519 = vsyncpa [#allocation9], 1 }
 0x668   :  { %4520 = vsyncpa [#allocation4], 1 }
 0x669   :  { %4522 = vsyncpa [#allocation4 + $0x1], 1 }

</bundles_post_ra>
